<compile_context>
chip_gen: v7x
topology: tpu7x:2x2x1
jax: 0.10.0
libtpu: 0.0.40
codegen_flags: <defaults>
</compile_context>

<pallas_src>
import functools

import numpy as np
import jax
import jax.numpy as jnp
from jax.experimental import pallas as pl
from jax.experimental.pallas import tpu as pltpu


def _eup_supports_bf16():
    """bf16 transcendentals are profitable (and supported) on v6e / v7x only."""
    try:
        kind = jax.devices()[0].device_kind.lower()
    except Exception:
        return False
    return any(tag in kind for tag in ("v6", "v7", "7x"))


# ----------------------------------------------------------------------------
# Pallas kernel: two-pass (flash-style) supervised-contrastive reduction.
# ----------------------------------------------------------------------------
def _contrastive_kernel(a_ref, ct_ref, lab_r_ref, lab_c_ref, m_ref,
                        loss_ref, cnt_ref,
                        neg_sc, psum_sc, pcnt_sc,
                        *, temperature, base_temperature, bf16_eup):
    phase = pl.program_id(1)
    j = pl.program_id(2)
    nj = pl.num_programs(2)

    inv_t = jnp.float32(1.0 / temperature)
    LOG_FLOOR = jnp.float32(1e-30)

    a = a_ref[...]                      # (TM, Dp) bf16 anchor tile (unscaled)
    ct = ct_ref[...]                    # (Dp, TN) bf16 contrast tile, 1/T pre-folded
    # bf16 x bf16 -> f32 accumulate on the MXU; logits already divided by T.
    dots = jnp.dot(a, ct, preferred_element_type=jnp.float32)       # (TM, TN)

    lab_r = lab_r_ref[...]              # (TM, 1) int32, -1 == invalid/ignored
    lab_c = lab_c_ref[...]              # (1, TN) int32, -1 == invalid/ignored
    m = m_ref[...]                      # (TM, 1) f32 per-anchor logit upper bound

    valid_col = lab_c >= 0              # (1, TN) bool
    same = lab_r == lab_c               # (TM, TN) bool

    x = dots - m                        # <= ~0 by construction (no overflow)
    if bf16_eup:
        # Packed bf16 EUP path (v6e / v7x): ~2x transcendental throughput.
        e = jnp.exp(x.astype(jnp.bfloat16)).astype(jnp.float32)
    else:
        e = jnp.exp(x)

    @pl.when(phase == 0)
    def _pass_a():
        @pl.when(j == 0)
        def _init():
            neg_sc[...] = jnp.zeros(neg_sc.shape, jnp.float32)
            psum_sc[...] = jnp.zeros(psum_sc.shape, jnp.float32)
            pcnt_sc[...] = jnp.zeros(pcnt_sc.shape, jnp.float32)

        neg_col = jnp.logical_and(valid_col, jnp.logical_not(same))
        neg_sc[...] += jnp.sum(jnp.where(neg_col, e, 0.0), axis=1, keepdims=True)

    @pl.when(phase == 1)
    def _pass_b():
        neg = neg_sc[...]               # final per-anchor negative-exp sum
        denom = jnp.maximum(e + neg, LOG_FLOOR)
        if bf16_eup:
            logd = jnp.log(denom.astype(jnp.bfloat16)).astype(jnp.float32)
        else:
            logd = jnp.log(denom)
        lp = x - logd                   # log-prob (logits part kept in f32)
        pos_col = jnp.logical_and(valid_col, same)      # still includes the diagonal
        psum_sc[...] += jnp.sum(jnp.where(pos_col, lp, 0.0), axis=1, keepdims=True)
        pcnt_sc[...] += jnp.sum(jnp.where(pos_col, 1.0, 0.0), axis=1, keepdims=True)

        @pl.when(j == nj - 1)
        def _finalize():
            anchor_valid = lab_r >= 0
            # Remove the diagonal (self) term analytically (no per-tile iota
            # masks); the few-ULP mismatch vs. the MXU diagonal is negligible.
            a32 = a.astype(jnp.float32)
            self_dot = jnp.sum(a32 * a32, axis=1, keepdims=True) * inv_t
            xs = self_dot - m
            lp_s = xs - jnp.log(jnp.maximum(jnp.exp(xs) + neg, LOG_FLOOR))
            pos_sum = psum_sc[...] - jnp.where(anchor_valid, lp_s, 0.0)
            pos_cnt = pcnt_sc[...] - jnp.where(anchor_valid, 1.0, 0.0)

            has_pos = pos_cnt > 0.5
            contributes = jnp.logical_and(anchor_valid, has_pos)
            mean_lpp = pos_sum / jnp.where(has_pos, pos_cnt, 1.0)
            scale = jnp.float32(-(temperature / base_temperature))
            per_anchor = jnp.where(contributes, scale * mean_lpp, 0.0)   # (TM, 1)

            # Reduce to per-anchor-tile scalars: avoids lane-sparse vector
            # stores and narrow output writeback DMA.
            loss_ref[...] = jnp.sum(per_anchor, keepdims=True)[None]                     # (1,1,1)
            cnt_ref[...] = jnp.sum(jnp.where(contributes, 1.0, 0.0), keepdims=True)[None]


def contrastive_loss_pallas(feats, labels, valid, *, temperature,
                            base_temperature, tile_m=512, tile_n=256):
    """feats (P, D) float, labels (P,) int (valid labels must be >= 0),
    valid (P,) {0,1}."""
    p, d = feats.shape
    d_pad = ((d + 127) // 128) * 128            # lane-aligned feature dim

    # Big anchor tile amortizes the 2*gm contrast re-streams (HBM demand per
    # step is independent of TM), but keep >= 2 anchor tiles when possible so
    # the "parallel" axis can be split across both v7x TensorCores.
    tm = tile_m
    while tm > 128 and (p + tm - 1) // tm < 2:
        tm //= 2
    tn = tile_n
    blk = max(tm, tn)                           # tn, tm are 128*2^k -> one divides the other
    p_pad = ((p + blk - 1) // blk) * blk

    inv_t = jnp.float32(1.0 / temperature)
    feats32 = feats.astype(jnp.float32)
    # Merge validity into the labels (-1 sentinel) -> no separate valid streams.
    labels32 = jnp.where(valid > 0.5, labels.astype(jnp.int32), -1)

    # Per-anchor logit upper bound replacing the in-kernel running row max:
    # dots_ij / T <= ||f_i|| * max_k ||f_k|| / T (== 1/T for L2-normalized
    # features, which is the case for this loss).  The loss is invariant to m.
    norms = jnp.sqrt(jnp.sum(feats32 * feats32, axis=1, keepdims=True))    # (P, 1)
    m_row = norms * jnp.max(norms) * inv_t

    pad = p_pad - p
    feats_pad = jnp.pad(feats32, ((0, pad), (0, d_pad - d)))
    labels_pad = jnp.pad(labels32, (0, pad), constant_values=-1)
    m_pad = jnp.pad(m_row, ((0, pad), (0, 0)))

    a_bf = feats_pad.astype(jnp.bfloat16)                   # (Pp, Dp) anchors (unscaled)
    ct_bf = (feats_pad * inv_t).astype(jnp.bfloat16).T      # (Dp, Pp) contrast, 1/T folded

    gm = p_pad // tm
    gn = p_pad // tn

    lab_r = labels_pad.reshape(p_pad, 1)
    lab_c = labels_pad.reshape(1, p_pad)

    def run(use_bf16_eup):
        kernel = functools.partial(_contrastive_kernel,
                                   temperature=float(temperature),
                                   base_temperature=float(base_temperature),
                                   bf16_eup=use_bf16_eup)
        return pl.pallas_call(
            kernel,
            out_shape=(jax.ShapeDtypeStruct((gm, 1, 1), jnp.float32),
                       jax.ShapeDtypeStruct((gm, 1, 1), jnp.float32)),
            grid_spec=pltpu.PrefetchScalarGridSpec(
                num_scalar_prefetch=0,
                grid=(gm, 2, gn),                                   # (anchor, phase, col)
                in_specs=[
                    pl.BlockSpec((tm, d_pad), lambda i, ph, j: (i, 0)),   # anchor feats
                    pl.BlockSpec((d_pad, tn), lambda i, ph, j: (0, j)),   # contrast feats^T / T
                    pl.BlockSpec((tm, 1), lambda i, ph, j: (i, 0)),       # anchor labels
                    pl.BlockSpec((1, tn), lambda i, ph, j: (0, j)),       # contrast labels
                    pl.BlockSpec((tm, 1), lambda i, ph, j: (i, 0)),       # per-anchor max bound
                ],
                out_specs=[
                    pl.BlockSpec((1, 1, 1), lambda i, ph, j: (i, 0, 0)),
                    pl.BlockSpec((1, 1, 1), lambda i, ph, j: (i, 0, 0)),
                ],
                scratch_shapes=[
                    pltpu.VMEM((tm, 1), jnp.float32),   # negative-exp sum
                    pltpu.VMEM((tm, 1), jnp.float32),   # positive log-prob sum
                    pltpu.VMEM((tm, 1), jnp.float32),   # positive count
                ],
            ),
            compiler_params=pltpu.CompilerParams(
                dimension_semantics=("parallel", "arbitrary", "arbitrary"),
                vmem_limit_bytes=32 * 1024 * 1024,
            ),
        )(a_bf, ct_bf, lab_r, lab_c, m_pad)

    bf16_eup = _eup_supports_bf16()
    try:
        loss_parts, cnt_parts = run(bf16_eup)
    except Exception:
        if not bf16_eup:
            raise
        # bf16 transcendental lowering unavailable -> f32 EUP path (v5e-style).
        loss_parts, cnt_parts = run(False)

    total_loss = jnp.sum(loss_parts)
    total_cnt = jnp.sum(cnt_parts)
    return total_loss / jnp.maximum(total_cnt, 1.0)


# ----------------------------------------------------------------------------
# Glue (plain JAX): resizing, pseudo-mask generation, counts.
# ----------------------------------------------------------------------------
def nearest_resize(x, h_out, w_out):
    """F.interpolate(..., mode='nearest') for NCHW."""
    _, _, h_in, w_in = x.shape
    ri = jnp.floor(jnp.arange(h_out) * (h_in / h_out)).astype(jnp.int32)
    ci = jnp.floor(jnp.arange(w_out) * (w_in / w_out)).astype(jnp.int32)
    return x[:, :, ri][:, :, :, ci]


def generate_foreground_background_mask(cams, ignore_index, sample_ratio, key):
    # TODO(synk): original helper is not provided in losses.py; deterministic
    # stand-in (per-image min-max normalize, fg>=0.7, bg<=0.3, bernoulli keep).
    cmin = cams.min(axis=(1, 2), keepdims=True)
    cmax = cams.max(axis=(1, 2), keepdims=True)
    norm = (cams - cmin) / (cmax - cmin + 1e-8)
    sel = jnp.where(norm >= 0.7, 1,
                    jnp.where(norm <= 0.3, 0, ignore_index)).astype(jnp.int32)
    keep = jax.random.bernoulli(key, sample_ratio, sel.shape)
    return jnp.where(keep, sel, ignore_index).astype(jnp.int32)


def sample_foreground_background_mask(masks, ignore_index, ratio, key):
    # TODO(synk): original helper is not provided in losses.py; deterministic
    # bernoulli subsample stand-in.
    keep = jax.random.bernoulli(key, ratio, masks.shape)
    return jnp.where(keep, masks, ignore_index).astype(masks.dtype)


def pixel_contrast_loss_forward(embeddings, cams, masks, use_pseudo_mask, *,
                                temperature, base_temperature, ignore_index,
                                labeled_sample_ratio, sample_ratio):
    b, c, h, w = embeddings.shape

    masks_r = nearest_resize(masks.astype(jnp.float32), h, w)[:, 0].astype(jnp.int32)

    # TODO(synk): general bicubic align_corners=True resize of cams not
    # implemented; cams are required at (h, w) already (identity-resize case).
    assert cams.shape[2:] == (h, w)
    cams_r = cams[:, 0]

    emb = jnp.transpose(embeddings, (0, 2, 3, 1))   # NHWC

    selected = generate_foreground_background_mask(
        cams_r, ignore_index, sample_ratio, jax.random.PRNGKey(0))
    if 0 < labeled_sample_ratio < 1:
        masks_r = sample_foreground_background_mask(
            masks_r, ignore_index, labeled_sample_ratio, jax.random.PRNGKey(1))
    selected = jnp.where(use_pseudo_mask[:, None, None], selected, masks_r)

    feats = emb.reshape(-1, c)
    sel_flat = selected.reshape(-1)
    valid = (sel_flat != ignore_index).astype(jnp.float32)

    loss = contrastive_loss_pallas(feats, sel_flat, valid,
                                   temperature=temperature,
                                   base_temperature=base_temperature)

    num_fg = jnp.sum(selected == 1)
    num_bg = jnp.sum(selected == 0)
    num_fg_corrects = jnp.sum((selected == 1) & (masks_r == 1))
    num_bg_corrects = jnp.sum((selected == 0) & (masks_r == 0))
    return loss, [num_fg_corrects, num_bg_corrects], [num_fg, num_bg]


# ----------------------------------------------------------------------------
# Numpy reference (gathered version with the same zero-positive guard).
# ----------------------------------------------------------------------------
def _reference_contrastive(f_anchor, f_contrast, labels, valid,
                           temperature, base_temperature):
    """Gathered reference; `f_contrast` already carries the 1/temperature scale."""
    vmask = np.asarray(valid, dtype=bool)
    fa = np.asarray(f_anchor, dtype=np.float64)[vmask]
    fc = np.asarray(f_contrast, dtype=np.float64)[vmask]
    l = np.asarray(labels)[vmask]
    dot = fa @ fc.T                                 # logits (already / T)
    m = dot.max(axis=1, keepdims=True)
    logits = dot - m
    eq = (l[:, None] == l[None, :]).astype(np.float64)
    n = fa.shape[0]
    not_diag = 1.0 - np.eye(n)
    pos = eq * not_diag
    neg = 1.0 - eq
    expl = np.exp(logits)
    neg_sum = (expl * neg).sum(1, keepdims=True)
    log_prob = logits - np.log(np.maximum(expl + neg_sum, 1e-30))
    pos_cnt = pos.sum(1)
    has_pos = pos_cnt > 0.5
    mean_lpp = (pos * log_prob).sum(1) / np.maximum(pos_cnt, 1.0)
    per = np.where(has_pos, -(temperature / base_temperature) * mean_lpp, 0.0)
    cnt = has_pos.sum()
    return float(per.sum() / max(int(cnt), 1))


if __name__ == "__main__":
    B, C, H, W = 2, 16, 16, 16
    temperature, base_temperature = 0.1, 0.07
    ignore_index = 255
    labeled_sample_ratio = 1.0   # == 1 -> labeled subsampling branch skipped
    sample_ratio = 0.5

    key = jax.random.PRNGKey(0)
    k1, k2, k3 = jax.random.split(key, 3)
    embeddings = jax.random.normal(k1, (B, C, H, W), dtype=jnp.float32)   # NCHW
    # L2-normalize along channels so logits/temperature stay in a sane range
    # (unnormalized random embeddings with temperature=0.1 overflow exp in any
    #  implementation, including the PyTorch reference).
    embeddings = embeddings / (jnp.linalg.norm(embeddings, axis=1, keepdims=True) + 1e-8)
    cams = jax.random.uniform(k2, (B, 1, H, W), dtype=jnp.float32)
    masks = jax.random.bernoulli(k3, 0.5, (B, 1, H, W)).astype(jnp.int32)
    use_pseudo_mask = jnp.array([True, False])

    loss, corrects, counts = pixel_contrast_loss_forward(
        embeddings, cams, masks, use_pseudo_mask,
        temperature=temperature, base_temperature=base_temperature,
        ignore_index=ignore_index, labeled_sample_ratio=labeled_sample_ratio,
        sample_ratio=sample_ratio)
    jax.block_until_ready(loss)
    jax.block_until_ready(corrects)
    jax.block_until_ready(counts)

    # Cross-check against the gathered numpy reference, using the same
    # bf16-rounded operands the kernel consumes (anchor tile unscaled, contrast
    # operand pre-scaled by 1/temperature before the bf16 cast).
    emb_flat = jnp.transpose(embeddings, (0, 2, 3, 1)).reshape(-1, C)
    feats_a = np.asarray(emb_flat.astype(jnp.bfloat16).astype(jnp.float32))
    feats_c = np.asarray((emb_flat * (1.0 / temperature))
                         .astype(jnp.bfloat16).astype(jnp.float32))
    selected = generate_foreground_background_mask(
        cams[:, 0], ignore_index, sample_ratio, jax.random.PRNGKey(0))
    selected = jnp.where(use_pseudo_mask[:, None, None], selected, masks[:, 0])
    sel_flat = np.asarray(selected.reshape(-1))
    ref_loss = _reference_contrastive(
        feats_a, feats_c, sel_flat.astype(np.int64),
        sel_flat != ignore_index, temperature, base_temperature)

    # bf16 exp/log on the EUP (v6e/v7x) perturbs the loss at the ~1e-2 level;
    # the f32 transcendental path (v5e and older) stays at 2e-3.
    tol = 2e-2 if _eup_supports_bf16() else 2e-3
    np.testing.assert_allclose(float(loss), ref_loss, rtol=tol, atol=tol)

    print("KERNEL_OK")
</pallas_src>

<mosaic_0001>
module attributes {stable_mosaic.version = 11 : i64} {
  func.func @_contrastive_kernel(%arg0: i32, %arg1: i32, %arg2: i32, %arg3: memref<256x128xbf16, #tpu.memory_space<vmem>>, %arg4: memref<128x256xbf16, #tpu.memory_space<vmem>>, %arg5: memref<256x1xi32, #tpu.memory_space<vmem>>, %arg6: memref<1x256xi32, #tpu.memory_space<vmem>>, %arg7: memref<256x1xf32, #tpu.memory_space<vmem>>, %arg8: memref<1x1x1xf32, #tpu.memory_space<vmem>>, %arg9: memref<1x1x1xf32, #tpu.memory_space<vmem>>, %arg10: memref<256x1xf32, #tpu.memory_space<vmem>>, %arg11: memref<256x1xf32, #tpu.memory_space<vmem>>, %arg12: memref<256x1xf32, #tpu.memory_space<vmem>>) attributes {dimension_semantics = [#tpu.dimension_semantics<parallel>, #tpu.dimension_semantics<arbitrary>, #tpu.dimension_semantics<arbitrary>], iteration_bounds = array<i64: 2, 2, 2>, scalar_prefetch = 0 : i64, scratch_operands = 3 : i64, tpu.core_type = #tpu.core_type<tc>, window_params = [{transform_indices = @transform_0, window_bounds = array<i64: 256, 128>}, {transform_indices = @transform_1, window_bounds = array<i64: 128, 256>}, {transform_indices = @transform_2, window_bounds = array<i64: 256, 1>}, {transform_indices = @transform_3, window_bounds = array<i64: 1, 256>}, {transform_indices = @transform_4, window_bounds = array<i64: 256, 1>}, {transform_indices = @transform_5, window_bounds = array<i64: 1, 1, 1>}, {transform_indices = @transform_6, window_bounds = array<i64: 1, 1, 1>}]} {
    %c0 = arith.constant 0 : index
    %c0_0 = arith.constant 0 : index
    %0 = vector.load %arg3[%c0, %c0_0] : memref<256x128xbf16, #tpu.memory_space<vmem>>, vector<256x128xbf16>
    %c0_1 = arith.constant 0 : index
    %c0_2 = arith.constant 0 : index
    %1 = vector.load %arg4[%c0_1, %c0_2] : memref<128x256xbf16, #tpu.memory_space<vmem>>, vector<128x256xbf16>
    %cst = arith.constant dense<0.000000e+00> : vector<256x256xf32>
    %2 = tpu.matmul %0, %1, %cst {dimension_numbers = #tpu.dot_dimension_numbers<[1], [0], [0], [1], [0, 0, 1, 1], [], []>} : vector<256x128xbf16>, vector<128x256xbf16>, vector<256x256xf32> -> vector<256x256xf32>
    %c0_3 = arith.constant 0 : index
    %c0_4 = arith.constant 0 : index
    %3 = vector.load %arg5[%c0_3, %c0_4] : memref<256x1xi32, #tpu.memory_space<vmem>>, vector<256x1xi32>
    %c0_5 = arith.constant 0 : index
    %c0_6 = arith.constant 0 : index
    %4 = vector.load %arg6[%c0_5, %c0_6] : memref<1x256xi32, #tpu.memory_space<vmem>>, vector<1x256xi32>
    %c0_7 = arith.constant 0 : index
    %c0_8 = arith.constant 0 : index
    %5 = vector.load %arg7[%c0_7, %c0_8] : memref<256x1xf32, #tpu.memory_space<vmem>>, vector<256x1xf32>
    %c0_i32 = arith.constant 0 : i32
    %6 = vector.broadcast %c0_i32 : i32 to vector<1x256xi32>
    %7 = arith.cmpi sge, %4, %6 : vector<1x256xi32>
    %8 = vector.broadcast %3 : vector<256x1xi32> to vector<256x256xi32>
    %9 = vector.broadcast %4 : vector<1x256xi32> to vector<256x256xi32>
    %10 = arith.cmpi eq, %8, %9 : vector<256x256xi32>
    %11 = vector.broadcast %5 : vector<256x1xf32> to vector<256x256xf32>
    %12 = arith.subf %2, %11 : vector<256x256xf32>
    %13 = math.exp %12 : vector<256x256xf32>
    %c0_i32_9 = arith.constant 0 : i32
    %14 = arith.cmpi eq, %arg1, %c0_i32_9 : i32
    %15 = arith.extui %14 : i1 to i32
    %c0_i32_10 = arith.constant 0 : i32
    %16 = arith.cmpi ne, %15, %c0_i32_10 : i32
    scf.if %16 {
      %c0_i32_14 = arith.constant 0 : i32
      %20 = arith.cmpi eq, %arg2, %c0_i32_14 : i32
      %21 = arith.extui %20 : i1 to i32
      %c0_i32_15 = arith.constant 0 : i32
      %22 = arith.cmpi ne, %21, %c0_i32_15 : i32
      scf.if %22 {
        %cst_23 = arith.constant 0.000000e+00 : f32
        %33 = vector.broadcast %cst_23 : f32 to vector<256x1xf32>
        %c0_24 = arith.constant 0 : index
        %c0_25 = arith.constant 0 : index
        %34 = vector.load %arg10[%c0_24, %c0_25] : memref<256x1xf32, #tpu.memory_space<vmem>>, vector<256x1xf32>
        tpu.vector_store %arg10[%c0_24, %c0_25], %33 {strides = array<i32>} : memref<256x1xf32, #tpu.memory_space<vmem>>, vector<256x1xf32>,
        %cst_26 = arith.constant 0.000000e+00 : f32
        %35 = vector.broadcast %cst_26 : f32 to vector<256x1xf32>
        %c0_27 = arith.constant 0 : index
        %c0_28 = arith.constant 0 : index
        %36 = vector.load %arg11[%c0_27, %c0_28] : memref<256x1xf32, #tpu.memory_space<vmem>>, vector<256x1xf32>
        tpu.vector_store %arg11[%c0_27, %c0_28], %35 {strides = array<i32>} : memref<256x1xf32, #tpu.memory_space<vmem>>, vector<256x1xf32>,
        %cst_29 = arith.constant 0.000000e+00 : f32
        %37 = vector.broadcast %cst_29 : f32 to vector<256x1xf32>
        %c0_30 = arith.constant 0 : index
        %c0_31 = arith.constant 0 : index
        %38 = vector.load %arg12[%c0_30, %c0_31] : memref<256x1xf32, #tpu.memory_space<vmem>>, vector<256x1xf32>
        tpu.vector_store %arg12[%c0_30, %c0_31], %37 {strides = array<i32>} : memref<256x1xf32, #tpu.memory_space<vmem>>, vector<256x1xf32>,
      } else {
      }
      %cst_16 = arith.constant dense<true> : vector<256x256xi1>
      %23 = arith.xori %10, %cst_16 : vector<256x256xi1>
      %24 = vector.broadcast %7 : vector<1x256xi1> to vector<256x256xi1>
      %25 = arith.andi %24, %23 : vector<256x256xi1>
      %c0_17 = arith.constant 0 : index
      %c0_18 = arith.constant 0 : index
      %26 = vector.load %arg10[%c0_17, %c0_18] : memref<256x1xf32, #tpu.memory_space<vmem>>, vector<256x1xf32>
      %cst_19 = arith.constant 0.000000e+00 : f32
      %27 = vector.broadcast %cst_19 : f32 to vector<256x256xf32>
      %28 = arith.select %25, %13, %27 : vector<256x256xi1>, vector<256x256xf32>
      %cst_20 = arith.constant dense<0.000000e+00> : vector<256xf32>
      %29 = vector.multi_reduction <add>, %28, %cst_20 [1] : vector<256x256xf32> to vector<256xf32>
      %30 = vector.shape_cast %29 : vector<256xf32> to vector<256x1xf32>
      %31 = arith.addf %26, %30 : vector<256x1xf32>
      %c0_21 = arith.constant 0 : index
      %c0_22 = arith.constant 0 : index
      %32 = vector.load %arg10[%c0_21, %c0_22] : memref<256x1xf32, #tpu.memory_space<vmem>>, vector<256x1xf32>
      tpu.vector_store %arg10[%c0_21, %c0_22], %31 {strides = array<i32>} : memref<256x1xf32, #tpu.memory_space<vmem>>, vector<256x1xf32>,
    } else {
    }
    %c1_i32 = arith.constant 1 : i32
    %17 = arith.cmpi eq, %arg1, %c1_i32 : i32
    %18 = arith.extui %17 : i1 to i32
    %cst_11 = arith.constant 1.000000e-30 : f32
    %cst_12 = arith.constant 1.000000e+01 : f32
    %c0_i32_13 = arith.constant 0 : i32
    %19 = arith.cmpi ne, %18, %c0_i32_13 : i32
    scf.if %19 {
      %c0_14 = arith.constant 0 : index
      %c0_15 = arith.constant 0 : index
      %20 = vector.load %arg10[%c0_14, %c0_15] : memref<256x1xf32, #tpu.memory_space<vmem>>, vector<256x1xf32>
      %21 = vector.broadcast %20 : vector<256x1xf32> to vector<256x256xf32>
      %22 = arith.addf %13, %21 : vector<256x256xf32>
      %23 = vector.broadcast %cst_11 : f32 to vector<256x256xf32>
      %24 = arith.maximumf %22, %23 : vector<256x256xf32>
      %25 = math.log %24 : vector<256x256xf32>
      %26 = arith.subf %12, %25 : vector<256x256xf32>
      %27 = vector.broadcast %7 : vector<1x256xi1> to vector<256x256xi1>
      %28 = arith.andi %27, %10 : vector<256x256xi1>
      %c0_16 = arith.constant 0 : index
      %c0_17 = arith.constant 0 : index
      %29 = vector.load %arg11[%c0_16, %c0_17] : memref<256x1xf32, #tpu.memory_space<vmem>>, vector<256x1xf32>
      %cst_18 = arith.constant 0.000000e+00 : f32
      %30 = vector.broadcast %cst_18 : f32 to vector<256x256xf32>
      %31 = arith.select %28, %26, %30 : vector<256x256xi1>, vector<256x256xf32>
      %cst_19 = arith.constant dense<0.000000e+00> : vector<256xf32>
      %32 = vector.multi_reduction <add>, %31, %cst_19 [1] : vector<256x256xf32> to vector<256xf32>
      %33 = vector.shape_cast %32 : vector<256xf32> to vector<256x1xf32>
      %34 = arith.addf %29, %33 : vector<256x1xf32>
      %c0_20 = arith.constant 0 : index
      %c0_21 = arith.constant 0 : index
      %35 = vector.load %arg11[%c0_20, %c0_21] : memref<256x1xf32, #tpu.memory_space<vmem>>, vector<256x1xf32>
      tpu.vector_store %arg11[%c0_20, %c0_21], %34 {strides = array<i32>} : memref<256x1xf32, #tpu.memory_space<vmem>>, vector<256x1xf32>,
      %c0_22 = arith.constant 0 : index
      %c0_23 = arith.constant 0 : index
      %36 = vector.load %arg12[%c0_22, %c0_23] : memref<256x1xf32, #tpu.memory_space<vmem>>, vector<256x1xf32>
      %cst_24 = arith.constant 1.000000e+00 : f32
      %cst_25 = arith.constant 0.000000e+00 : f32
      %37 = vector.broadcast %cst_24 : f32 to vector<256x256xf32>
      %38 = vector.broadcast %cst_25 : f32 to vector<256x256xf32>
      %39 = arith.select %28, %37, %38 : vector<256x256xi1>, vector<256x256xf32>
      %cst_26 = arith.constant dense<0.000000e+00> : vector<256xf32>
      %40 = vector.multi_reduction <add>, %39, %cst_26 [1] : vector<256x256xf32> to vector<256xf32>
      %41 = vector.shape_cast %40 : vector<256xf32> to vector<256x1xf32>
      %42 = arith.addf %36, %41 : vector<256x1xf32>
      %c0_27 = arith.constant 0 : index
      %c0_28 = arith.constant 0 : index
      %43 = vector.load %arg12[%c0_27, %c0_28] : memref<256x1xf32, #tpu.memory_space<vmem>>, vector<256x1xf32>
      tpu.vector_store %arg12[%c0_27, %c0_28], %42 {strides = array<i32>} : memref<256x1xf32, #tpu.memory_space<vmem>>, vector<256x1xf32>,
      %c1_i32_29 = arith.constant 1 : i32
      %44 = arith.cmpi eq, %arg2, %c1_i32_29 : i32
      %45 = arith.extui %44 : i1 to i32
      %c0_i32_30 = arith.constant 0 : i32
      %46 = arith.cmpi ne, %45, %c0_i32_30 : i32
      scf.if %46 {
        %c0_i32_31 = arith.constant 0 : i32
        %47 = vector.broadcast %c0_i32_31 : i32 to vector<256x1xi32>
        %48 = arith.cmpi sge, %3, %47 : vector<256x1xi32>
        %49 = arith.extf %0 : vector<256x128xbf16> to vector<256x128xf32>
        %50 = arith.mulf %49, %49 : vector<256x128xf32>
        %cst_32 = arith.constant dense<0.000000e+00> : vector<256xf32>
        %51 = vector.multi_reduction <add>, %50, %cst_32 [1] : vector<256x128xf32> to vector<256xf32>
        %52 = vector.shape_cast %51 : vector<256xf32> to vector<256x1xf32>
        %53 = vector.broadcast %cst_12 : f32 to vector<256x1xf32>
        %54 = arith.mulf %52, %53 : vector<256x1xf32>
        %55 = arith.subf %54, %5 : vector<256x1xf32>
        %56 = math.exp %55 : vector<256x1xf32>
        %57 = arith.addf %56, %20 : vector<256x1xf32>
        %58 = vector.broadcast %cst_11 : f32 to vector<256x1xf32>
        %59 = arith.maximumf %57, %58 : vector<256x1xf32>
        %60 = math.log %59 : vector<256x1xf32>
        %61 = arith.subf %55, %60 : vector<256x1xf32>
        %c0_33 = arith.constant 0 : index
        %c0_34 = arith.constant 0 : index
        %62 = vector.load %arg11[%c0_33, %c0_34] : memref<256x1xf32, #tpu.memory_space<vmem>>, vector<256x1xf32>
        %cst_35 = arith.constant 0.000000e+00 : f32
        %63 = vector.broadcast %cst_35 : f32 to vector<256x1xf32>
        %64 = arith.select %48, %61, %63 : vector<256x1xi1>, vector<256x1xf32>
        %65 = arith.subf %62, %64 : vector<256x1xf32>
        %c0_36 = arith.constant 0 : index
        %c0_37 = arith.constant 0 : index
        %66 = vector.load %arg12[%c0_36, %c0_37] : memref<256x1xf32, #tpu.memory_space<vmem>>, vector<256x1xf32>
        %cst_38 = arith.constant 1.000000e+00 : f32
        %cst_39 = arith.constant 0.000000e+00 : f32
        %67 = vector.broadcast %cst_38 : f32 to vector<256x1xf32>
        %68 = vector.broadcast %cst_39 : f32 to vector<256x1xf32>
        %69 = arith.select %48, %67, %68 : vector<256x1xi1>, vector<256x1xf32>
        %70 = arith.subf %66, %69 : vector<256x1xf32>
        %cst_40 = arith.constant 5.000000e-01 : f32
        %71 = vector.broadcast %cst_40 : f32 to vector<256x1xf32>
        %72 = arith.cmpf ogt, %70, %71 : vector<256x1xf32>
        %73 = arith.andi %48, %72 : vector<256x1xi1>
        %cst_41 = arith.constant 1.000000e+00 : f32
        %74 = vector.broadcast %cst_41 : f32 to vector<256x1xf32>
        %75 = arith.select %72, %70, %74 : vector<256x1xi1>, vector<256x1xf32>
        %76 = arith.divf %65, %75 : vector<256x1xf32>
        %cst_42 = arith.constant -1.42857146 : f32
        %77 = vector.broadcast %cst_42 : f32 to vector<256x1xf32>
        %78 = arith.mulf %77, %76 : vector<256x1xf32>
        %cst_43 = arith.constant 0.000000e+00 : f32
        %79 = vector.broadcast %cst_43 : f32 to vector<256x1xf32>
        %80 = arith.select %73, %78, %79 : vector<256x1xi1>, vector<256x1xf32>
        %81 = vector.shape_cast %80 : vector<256x1xf32> to vector<1x256x1xf32>
        %cst_44 = arith.constant dense<0.000000e+00> : vector<1xf32>
        %82 = vector.multi_reduction <add>, %81, %cst_44 [1, 2] : vector<1x256x1xf32> to vector<1xf32>
        %83 = vector.shape_cast %82 : vector<1xf32> to vector<1x1x1xf32>
        %84 = vector.extract %83[0, 0, 0] : f32 from vector<1x1x1xf32>
        %85 = vector.broadcast %84 : f32 to vector<1x1xf32>
        %86 = vector.shape_cast %85 : vector<1x1xf32> to vector<1x1x1xf32>
        %c0_45 = arith.constant 0 : index
        %c0_46 = arith.constant 0 : index
        %c0_47 = arith.constant 0 : index
        %87 = vector.load %arg8[%c0_45, %c0_46, %c0_47] : memref<1x1x1xf32, #tpu.memory_space<vmem>>, vector<1x1x1xf32>
        tpu.vector_store %arg8[%c0_45, %c0_46, %c0_47], %86 {strides = array<i32>} : memref<1x1x1xf32, #tpu.memory_space<vmem>>, vector<1x1x1xf32>,
        %cst_48 = arith.constant 1.000000e+00 : f32
        %cst_49 = arith.constant 0.000000e+00 : f32
        %88 = vector.broadcast %cst_48 : f32 to vector<256x1xf32>
        %89 = vector.broadcast %cst_49 : f32 to vector<256x1xf32>
        %90 = arith.select %73, %88, %89 : vector<256x1xi1>, vector<256x1xf32>
        %91 = vector.shape_cast %90 : vector<256x1xf32> to vector<1x256x1xf32>
        %cst_50 = arith.constant dense<0.000000e+00> : vector<1xf32>
        %92 = vector.multi_reduction <add>, %91, %cst_50 [1, 2] : vector<1x256x1xf32> to vector<1xf32>
        %93 = vector.shape_cast %92 : vector<1xf32> to vector<1x1x1xf32>
        %94 = vector.extract %93[0, 0, 0] : f32 from vector<1x1x1xf32>
        %95 = vector.broadcast %94 : f32 to vector<1x1xf32>
        %96 = vector.shape_cast %95 : vector<1x1xf32> to vector<1x1x1xf32>
        %c0_51 = arith.constant 0 : index
        %c0_52 = arith.constant 0 : index
        %c0_53 = arith.constant 0 : index
        %97 = vector.load %arg9[%c0_51, %c0_52, %c0_53] : memref<1x1x1xf32, #tpu.memory_space<vmem>>, vector<1x1x1xf32>
        tpu.vector_store %arg9[%c0_51, %c0_52, %c0_53], %96 {strides = array<i32>} : memref<1x1x1xf32, #tpu.memory_space<vmem>>, vector<1x1x1xf32>,
      } else {
      }
    } else {
    }
    return
  }
  func.func @transform_0(%arg0: i32, %arg1: i32, %arg2: i32) -> (i32, i32) {
    %c0_i32 = arith.constant 0 : i32
    %c0_i32_0 = arith.constant 0 : i32
    return %arg0, %c0_i32 : i32, i32
  }
  func.func @transform_1(%arg0: i32, %arg1: i32, %arg2: i32) -> (i32, i32) {
    %c0_i32 = arith.constant 0 : i32
    %c0_i32_0 = arith.constant 0 : i32
    return %c0_i32, %arg2 : i32, i32
  }
  func.func @transform_2(%arg0: i32, %arg1: i32, %arg2: i32) -> (i32, i32) {
    %c0_i32 = arith.constant 0 : i32
    %c0_i32_0 = arith.constant 0 : i32
    return %arg0, %c0_i32 : i32, i32
  }
  func.func @transform_3(%arg0: i32, %arg1: i32, %arg2: i32) -> (i32, i32) {
    %c0_i32 = arith.constant 0 : i32
    %c0_i32_0 = arith.constant 0 : i32
    return %c0_i32, %arg2 : i32, i32
  }
  func.func @transform_4(%arg0: i32, %arg1: i32, %arg2: i32) -> (i32, i32) {
    %c0_i32 = arith.constant 0 : i32
    %c0_i32_0 = arith.constant 0 : i32
    return %arg0, %c0_i32 : i32, i32
  }
  func.func @transform_5(%arg0: i32, %arg1: i32, %arg2: i32) -> (i32, i32, i32) {
    %c0_i32 = arith.constant 0 : i32
    %c0_i32_0 = arith.constant 0 : i32
    %c0_i32_1 = arith.constant 0 : i32
    return %arg0, %c0_i32, %c0_i32_0 : i32, i32, i32
  }
  func.func @transform_6(%arg0: i32, %arg1: i32, %arg2: i32) -> (i32, i32, i32) {
    %c0_i32 = arith.constant 0 : i32
    %c0_i32_0 = arith.constant 0 : i32
    %c0_i32_1 = arith.constant 0 : i32
    return %arg0, %c0_i32, %c0_i32_0 : i32, i32, i32
  }
}

</mosaic_0001>

<bundles_post_ra>
// kernel: tpu_custom_call.1
= control target key start
LH: loop header
LB: loop body
LE: loop exit
PB: predicated region body
PF: predicated region fallthrough
CT: control target
= control target key end

     0   :  { %s5031_s21 = smov 0   ;;  %s5033_s22 = smov 0   ;;  %s9406_s0 = inlined_call_operand.vmem [shape: bf16[512,128], index: 0, kind: input, shape index: {}]   ;;  %s9407_s1 = inlined_call_operand.vmem [shape: bf16[128,512], index: 1, kind: input, shape index: {}]   ;;  %s9408_s2 = inlined_call_operand.vmem [shape: s32[512,1], index: 2, kind: input, shape index: {}]   ;;  %s9409_s3 = inlined_call_operand.vmem [shape: s32[1,512], index: 3, kind: input, shape index: {}]   ;;  %s9410_s4 = inlined_call_operand.vmem [shape: f32[512,1], index: 4, kind: input, shape index: {}]   ;;  %s9411_s5 = inlined_call_operand.vmem [shape: f32[2,1,1], index: 5, kind: output, shape index: {0}]   ;;  %s9412_s6 = inlined_call_operand.vmem [shape: f32[2,1,1], index: 6, kind: output, shape index: {1}]  }
   0x1   :  { %s5035_s23 = smov 0   ;;  %s5037_s24 = smov 0  }
   0x2   :  { %s5039_s25 = smov 0   ;;  %s5041_s26 = smov 0  }
   0x3   :  { %s5043_s27 = smov 0   ;;  %s5045_s28 = smov 0  }
   0x4   :  { %s5047_s29 = smov 0  }
   0x5 LB: > { %s29_s30 = sadd.s32 1, %s4975_s26  ;;  %s32_s7 = sadd.s32 1, %s4979_s27  ;;  %s4987_s29 = sphi %s5047_s29, %s17_s29   ;;  %s4983_s28 = sphi %s5045_s28, %s11031_s28   ;;  %s4979_s27 = sphi %s5043_s27, %s11030_s27   ;;  %s4975_s26 = sphi %s5041_s26, %s11029_s26   ;;  %s4971_s25 = sphi %s5039_s25, %s11028_s25   ;;  %s4967_s24 = sphi %s5037_s24, %s11027_s24   ;;  %s4963_s23 = sphi %s5035_s23, %s11026_s23   ;;  %s4959_s22 = sphi %s5033_s22, %s11025_s22   ;;  %s4955_s21 = sphi %s5031_s21, %s11024_s21  }
   0x6   : > { %p30_p0 = scmp.ge.s32.totalorder %s29_s30, 2  ;;  %s36_s8 = sadd.s32 1, %s4983_s28 }
   0x7   : > { %p76_p1 = scmp.ne.s32.totalorder %s4959_s22, %s4955_s21  ;;  %p77_p2 = scmp.eq.s32.totalorder %s4987_s29, 0 }
   0x8   : > { %s11033_s30 = smov (%p30_p0, %s29_s30), 0  ;;  %s11035_s7 = smov (!%p30_p0, %s32_s7), %s4979_s27 }
   0x9   : > { %s66_s9 = ssub.s32 %s4975_s26, %s11033_s30  ;;  %p34_p3 = scmp.ge.s32.totalorder %s11035_s7, 2 }
   0xa   : > { %p67_p4 = scmp.eq.s32.totalorder %s66_s9, 0  ;;  %s69_s10 = sadd.s32 1, %s4959_s22 }
   0xb   : > { %p78_p5 = por %p77_p2, %p76_p1  ;;  %s11037_s7 = smov (%p34_p3, %s11035_s7), 0 }
   0xc   : > { %s11039_s8 = smov (!%p34_p3, %s36_s8), %s4983_s28  ;;  %p4258_p7 = scmp.ge.s32.totalorder %s4987_s29, 8 }
   0xd   : > { %s5092_s11 = scalar_select %p67_p4, %s4959_s22, %s69_s10  }
   0xe   : > { %p38_p6 = scmp.ge.s32.totalorder %s11039_s8, 2  ;;  %232 = sbr.rel (%p4258_p7) target bundleno = 33 (0x21), region = 16 }
  0x10   : > { %s11041_s8 = smov (%p38_p6, %s11039_s8), 0 }
  0x15   : > { %244 = sbr.rel (!%p78_p5) target bundleno = 33 (0x21), region = 24  ;;  %s246_s12 = sand.u32 (%p78_p5), 1, %s4959_s22  }
  0x16   : > { %s4309_s13 = sshll.u32 (%p78_p5), %s4975_s26, 3  ;;  %s4259_s14 = sshll.u32 (%p78_p5), %s246_s12, 7 }
  0x17   : > { %s5102_s17 = scalar_lea.vmem (%p78_p5), %s9407_s1, %s4309_s13  ;;  %s248_s18 = scalar_lea.vmem (%p78_p5), [#allocation5], %s4259_s14 }
  0x18   : > { %v309_v0 = vld [vmem:[%s5102_s17] sm:$0xff] (%p78_p5)  ;;  %v311_v1 = vld [vmem:[%s5102_s17 + $0x10] sm:$0xff] (%p78_p5) }
  0x19   : > { %v313_v2 = vld [vmem:[%s5102_s17 + $0x20] sm:$0xff] (%p78_p5)  ;;  %310 = vst [vmem:[%s248_s18] sm:$0xff] (%p78_p5), %v309_v0  ;;  %312 = vst [vmem:[%s248_s18 + $0x8] sm:$0xff] (%p78_p5), %v311_v1  ;;  %v315_v3 = vld [vmem:[%s5102_s17 + $0x30] sm:$0xff] (%p78_p5) }
  0x1a   : > { %314 = vst [vmem:[%s248_s18 + $0x10] sm:$0xff] (%p78_p5), %v313_v2  ;;  %v317_v4 = vld [vmem:[%s5102_s17 + $0x40] sm:$0xff] (%p78_p5)  ;;  %v319_v5 = vld [vmem:[%s5102_s17 + $0x50] sm:$0xff] (%p78_p5)  ;;  %316 = vst [vmem:[%s248_s18 + $0x18] sm:$0xff] (%p78_p5), %v315_v3 }
  0x1b   : > { %318 = vst [vmem:[%s248_s18 + $0x20] sm:$0xff] (%p78_p5), %v317_v4  ;;  %320 = vst [vmem:[%s248_s18 + $0x28] sm:$0xff] (%p78_p5), %v319_v5  ;;  %v321_v6 = vld [vmem:[%s5102_s17 + $0x60] sm:$0xff] (%p78_p5)  ;;  %v323_v7 = vld [vmem:[%s5102_s17 + $0x70] sm:$0xff] (%p78_p5) }
  0x1c   : > { %v325_v8 = vld [vmem:[%s5102_s17 + $0x80] sm:$0xff]  ;;  %322 = vst [vmem:[%s248_s18 + $0x30] sm:$0xff] %v321_v6  ;;  %324 = vst [vmem:[%s248_s18 + $0x38] sm:$0xff] %v323_v7  ;;  %v327_v9 = vld [vmem:[%s5102_s17 + $0x90] sm:$0xff] }
  0x1d   : > { %326 = vst [vmem:[%s248_s18 + $0x40] sm:$0xff] %v325_v8  ;;  %v329_v10 = vld [vmem:[%s5102_s17 + $0xa0] sm:$0xff]  ;;  %v331_v11 = vld [vmem:[%s5102_s17 + $0xb0] sm:$0xff]  ;;  %328 = vst [vmem:[%s248_s18 + $0x48] sm:$0xff] %v327_v9 }
  0x1e   : > { %330 = vst [vmem:[%s248_s18 + $0x50] sm:$0xff] %v329_v10  ;;  %332 = vst [vmem:[%s248_s18 + $0x58] sm:$0xff] %v331_v11  ;;  %v333_v12 = vld [vmem:[%s5102_s17 + $0xc0] sm:$0xff]  ;;  %v335_v13 = vld [vmem:[%s5102_s17 + $0xd0] sm:$0xff] }
  0x1f   : > { %v337_v14 = vld [vmem:[%s5102_s17 + $0xe0] sm:$0xff]  ;;  %334 = vst [vmem:[%s248_s18 + $0x60] sm:$0xff] %v333_v12  ;;  %336 = vst [vmem:[%s248_s18 + $0x68] sm:$0xff] %v335_v13  ;;  %v339_v15 = vld [vmem:[%s5102_s17 + $0xf0] sm:$0xff] }
  0x20   : > { %338 = vst [vmem:[%s248_s18 + $0x70] sm:$0xff] %v337_v14  ;;  %340 = vst [vmem:[%s248_s18 + $0x78] sm:$0xff] %v339_v15 }
  0x21 PF: > { %p4262_p8 = scmp.ge.s32.totalorder %s4987_s29, 1  ;;  %p371_p9 = scmp.lt.s32.totalorder %s4987_s29, 9 }
  0x23   : > { %p372_p10 = pnand %p4262_p8, %p371_p9 }
  0x25   : > { %375 = sbr.rel (%p372_p10) target bundleno = 1729 (0x6c1), region = 74 }
  0x2c   : > { %s378_s19 = sand.u32 1, %s4955_s21   ;;  %p451_p11 = scmp.lt.s32.totalorder %s4971_s25, 1  ;;  %v4989_v16 = vmov 0  }
  0x2d   : > { %s4263_s20 = sshll.u32 %s378_s19, 7  ;;  %4410 = vset.pattern.permute.xlu1 %v4989_v16  ;;  %4409 = vset.pattern.permute.xlu0 %v4989_v16  ;;  %s4264_s9 = sshll.u32 %s4971_s25, 5 }
  0x2e   : > { %p428_p12 = scmp.lt.s32.totalorder %s4264_s9, 63  ;;  %714 = vmatprep.mubr.bf16.mxu0 %v4989_v16  ;;  %794 = vmatprep.mubr.bf16.mxu1 %v4989_v16  ;;  %s11043_s25 = smov (!%p451_p11, %s4971_s25), 1 }
  0x2f   : > { %s5132_s10 = scalar_lea.vmem [#allocation5], %s4263_s20  ;;  %s453_s13 = scalar_lea.vmem %s9411_s5, %s11043_s25 }
  0x30   : > { %v4411_v17 = vld [vmem:[%s5132_s10 + $0x4] ss:$8 sps:$4 sm:$0xff]   ;;  %v4413_v18 = vld [vmem:[%s5132_s10] ss:$8 sps:$4 sm:$0xff]   ;;  %s11045_s9 = smov (!%p428_p12, %s4264_s9), 63  ;;  %s456_s16 = scalar_lea.vmem %s9412_s6, %s11043_s25 }
  0x31   : > { %682 = vmatprep.subr.bf16.mxu0 %v4411_v17  ;;  %4310 = vmatprep.subr.bf16.mxu1 %v4411_v17  ;;  %v4414_v19 = vld [vmem:[%s5132_s10 + $0x14] ss:$8 sps:$4 sm:$0xff]   ;;  %s4267_s17 = sshll.u32 %s11045_s9, 3  ;;  %v4416_v20 = vld [vmem:[%s5132_s10 + $0x10] ss:$8 sps:$4 sm:$0xff]   ;;  %s4265_s21 = sshll.u32 %s11045_s9, 2 }
  0x32   : > { %683 = vmatpush1.bf16.msra.mxu0 %v4413_v18  ;;  %4318 = vmatpush1.bf16.msra.mxu1 %v4413_v18  ;;  %s5154_s20 = scalar_lea.vmem %s9408_s2, %s4267_s17  ;;  %v4417_v21 = vld [vmem:[%s5132_s10 + $0x24] ss:$8 sps:$4 sm:$0xff]   ;;  %v4419_v26 = vld [vmem:[%s5132_s10 + $0x20] ss:$8 sps:$4 sm:$0xff]   ;;  %v4420_v27 = vld [vmem:[%s5132_s10 + $0x34] ss:$8 sps:$4 sm:$0xff]   ;;  %s5217_s15 = scalar_lea.vmem %s9406_s0, %s4265_s21 }
  0x33   : > { %684 = vmatprep.subr.bf16.mxu0 %v4414_v19  ;;  %4311 = vmatprep.subr.bf16.mxu1 %v4414_v19  ;;  %v5158_v22 = vld [vmem:[%s5154_s20 + $0x10] sm:$0xff]  ;;  %v5161_v23 = vld [vmem:[%s5154_s20] sm:$0xff]  ;;  %v5166_v24 = vld [vmem:[%s5154_s20 + $0x18] sm:$0xff]  ;;  %s5351_s19 = scalar_lea.vmem %s9410_s4, %s4267_s17  ;;  %s4268_s9 = sshll.u32 %s4963_s23, 1 }
  0x34   : > { %9871 = vst [vmem:[#allocation6_spill] sm:$0xff] %v5158_v22  ;;  %9872 = vst [vmem:[#allocation7_spill] sm:$0xff] %v5161_v23  ;;  %948 = vperm.xlu1 %4410, %v5158_v22   ;;  %942 = vperm.xlu0 %4409, %v5161_v23   ;;  %v5169_v25 = vld [vmem:[%s5154_s20 + $0x8] sm:$0xff]  ;;  %v5179_v29 = vld [vmem:[%s5154_s20 + $0x20] sm:$0xff]  ;;  %p441_p13 = scmp.lt.s32.totalorder %s4268_s9, 3  ;;  %p4303_p0 = scmp.ne.s32.totalorder %s4967_s24, 0 }
  0x35   : > { %9873 = vst [vmem:[#allocation8_spill] sm:$0xff] %v5166_v24  ;;  %9874 = vst [vmem:[#allocation9_spill] sm:$0xff] %v5169_v25  ;;  %v5176_v28 = vld [vmem:[%s5154_s20 + $0x28] sm:$0xff]  ;;  %v4422_v30 = vld [vmem:[%s5132_s10 + $0x30] ss:$8 sps:$4 sm:$0xff]   ;;  %p4304_p1 = scmp.ne.s32.totalorder (!%p4303_p0), %s4963_s23, 0 }
  0x36   : > { %685 = vmatpush1.bf16.msra.mxu0 %v4416_v20  ;;  %4319 = vmatpush1.bf16.msra.mxu1 %v4416_v20  ;;  %9875 = vst [vmem:[#allocation10_spill] sm:$0xff] %v5176_v28  ;;  %9876 = vst [vmem:[#allocation11_spill] sm:$0xff] %v5179_v29  ;;  %v4423_v31 = vld [vmem:[%s5132_s10 + $0x44] ss:$8 sps:$4 sm:$0xff]   ;;  %v5186_v32 = vld [vmem:[%s5154_s20 + $0x38] sm:$0xff]  ;;  %s11047_s9 = smov (!%p441_p13, %s4268_s9), 3 }
  0x37   : > { %686 = vmatprep.subr.bf16.mxu0 %v4417_v21  ;;  %4312 = vmatprep.subr.bf16.mxu1 %v4417_v21  ;;  %9877 = vst [vmem:[#allocation12_spill] sm:$0xff] %v5186_v32  ;;  %v5189_v33 = vld [vmem:[%s5154_s20 + $0x30] sm:$0xff]  ;;  %v4425_v34 = vld [vmem:[%s5132_s10 + $0x40] ss:$8 sps:$4 sm:$0xff]   ;;  %v4429_v39 = vld [vmem:[%s5132_s10 + $0x64] ss:$8 sps:$4 sm:$0xff]   ;;  %s443_s21 = scalar_lea.vmem %s9409_s3, %s11047_s9 }
  0x38   : > { %951 = vperm.xlu1 %4410, %v5166_v24   ;;  %945 = vperm.xlu0 %4409, %v5169_v25   ;;  %9878 = vst [vmem:[#allocation13_spill] sm:$0xff] %v5189_v33  ;;  %v4426_v35 = vld [vmem:[%s5132_s10 + $0x54] ss:$8 sps:$4 sm:$0xff]   ;;  %v5196_v36 = vld [vmem:[%s5154_s20 + $0x48] sm:$0xff]  ;;  %v5199_v37 = vld [vmem:[%s5154_s20 + $0x40] sm:$0xff] }
  0x39   : > { %9879 = vst [vmem:[#allocation14_spill] sm:$0xff] %v5196_v36  ;;  %9880 = vst [vmem:[#allocation15_spill] sm:$0xff] %v5199_v37  ;;  %v4428_v38 = vld [vmem:[%s5132_s10 + $0x50] ss:$8 sps:$4 sm:$0xff]   ;;  %v4431_v42 = vld [vmem:[%s5132_s10 + $0x60] ss:$8 sps:$4 sm:$0xff]  }
  0x3a   : > { %687 = vmatpush1.bf16.msra.mxu0 %v4419_v26  ;;  %4320 = vmatpush1.bf16.msra.mxu1 %v4419_v26  ;;  %v5207_v40 = vld [vmem:[%s5154_s20 + $0x58] sm:$0xff]  ;;  %v5210_v41 = vld [vmem:[%s5154_s20 + $0x50] sm:$0xff]  ;;  %v5222_v44 = vld [vmem:[%s5154_s20 + $0x68] sm:$0xff] }
  0x3b   : > { %688 = vmatprep.subr.bf16.mxu0 %v4420_v27  ;;  %4313 = vmatprep.subr.bf16.mxu1 %v4420_v27  ;;  %9881 = vst [vmem:[#allocation16_spill] sm:$0xff] %v5207_v40  ;;  %9882 = vst [vmem:[#allocation17_spill] sm:$0xff] %v5210_v41  ;;  %v4432_v43 = vld [vmem:[%s5132_s10 + $0x74] ss:$8 sps:$4 sm:$0xff]   ;;  %v5225_v45 = vld [vmem:[%s5154_s20 + $0x60] sm:$0xff] }
  0x3c   : > { %957 = vperm.xlu1 %4410, %v5176_v28   ;;  %954 = vperm.xlu0 %4409, %v5179_v29   ;;  %9883 = vst [vmem:[#allocation18_spill] sm:$0xff] %v5222_v44  ;;  %9884 = vst [vmem:[#allocation19_spill] sm:$0xff] %v5225_v45  ;;  %v4434_v46 = vld [vmem:[%s5132_s10 + $0x70] ss:$8 sps:$4 sm:$0xff]   ;;  %v5229_v47 = vld [vmem:[%s5217_s15] sm:$0xff]  }
  0x3d   : > { %9885 = vst [vmem:[#allocation20_spill] sm:$0xff] %v5229_v47  ;;  %v5232_v48 = vld [vmem:[%s5217_s15 + $0x40] sm:$0xff]   ;;  %v5237_v49 = vld [vmem:[%s5154_s20 + $0x78] sm:$0xff]  ;;  %v5240_v50 = vld [vmem:[%s5154_s20 + $0x70] sm:$0xff] }
  0x3e   : > { %689 = vmatpush1.bf16.msra.mxu0 %v4422_v30  ;;  %4321 = vmatpush1.bf16.msra.mxu1 %v4422_v30  ;;  %9886 = vst [vmem:[#allocation21_spill] sm:$0xff] %v5232_v48  ;;  %9887 = vst [vmem:[#allocation22_spill] sm:$0xff] %v5237_v49  ;;  %v5247_v51 = vld [vmem:[%s5154_s20 + $0x88] sm:$0xff]  ;;  %v5250_v52 = vld [vmem:[%s5154_s20 + $0x80] sm:$0xff] }
  0x3f   : > { %690 = vmatprep.subr.bf16.mxu0 %v4423_v31  ;;  %4314 = vmatprep.subr.bf16.mxu1 %v4423_v31  ;;  %9888 = vst [vmem:[#allocation23_spill] sm:$0xff] %v5240_v50  ;;  %9889 = vst [vmem:[#allocation24_spill] sm:$0xff] %v5247_v51  ;;  %v5255_v53 = vld [vmem:[%s5217_s15 + $0x8] sm:$0xff]   ;;  %v5263_v55 = vld [vmem:[%s5154_s20 + $0x98] sm:$0xff] }
  0x40   : > { %963 = vperm.xlu1 %4410, %v5186_v32   ;;  %960 = vperm.xlu0 %4409, %v5189_v33   ;;  %9890 = vst [vmem:[#allocation25_spill] sm:$0xff] %v5250_v52  ;;  %9891 = vst [vmem:[#allocation26_spill] sm:$0xff] %v5255_v53  ;;  %v5258_v54 = vld [vmem:[%s5217_s15 + $0x48] sm:$0xff]   ;;  %v5266_v56 = vld [vmem:[%s5154_s20 + $0x90] sm:$0xff] }
  0x41   : > { %9892 = vst [vmem:[#allocation27_spill] sm:$0xff] %v5258_v54  ;;  %9893 = vst [vmem:[#allocation28_spill] sm:$0xff] %v5263_v55  ;;  %v5273_v57 = vld [vmem:[%s5154_s20 + $0xa8] sm:$0xff]  ;;  %v5276_v58 = vld [vmem:[%s5154_s20 + $0xa0] sm:$0xff] }
  0x42   : > { %691 = vmatpush1.bf16.msra.mxu0 %v4425_v34  ;;  %4322 = vmatpush1.bf16.msra.mxu1 %v4425_v34  ;;  %9894 = vst [vmem:[#allocation29_spill] sm:$0xff] %v5266_v56  ;;  %9895 = vst [vmem:[#allocation30_spill] sm:$0xff] %v5273_v57  ;;  %v5281_v59 = vld [vmem:[%s5217_s15 + $0x10] sm:$0xff]   ;;  %v5289_v61 = vld [vmem:[%s5154_s20 + $0xb8] sm:$0xff] }
  0x43   : > { %692 = vmatprep.subr.bf16.mxu0 %v4426_v35  ;;  %4315 = vmatprep.subr.bf16.mxu1 %v4426_v35  ;;  %9896 = vst [vmem:[#allocation31_spill] sm:$0xff] %v5276_v58  ;;  %9897 = vst [vmem:[#allocation32_spill] sm:$0xff] %v5281_v59  ;;  %v5284_v60 = vld [vmem:[%s5217_s15 + $0x50] sm:$0xff]   ;;  %v5299_v63 = vld [vmem:[%s5154_s20 + $0xc8] sm:$0xff] }
  0x44   : > { %969 = vperm.xlu1 %4410, %v5196_v36   ;;  %966 = vperm.xlu0 %4409, %v5199_v37   ;;  %9898 = vst [vmem:[#allocation33_spill] sm:$0xff] %v5284_v60  ;;  %9899 = vst [vmem:[#allocation34_spill] sm:$0xff] %v5289_v61  ;;  %v5292_v62 = vld [vmem:[%s5154_s20 + $0xb0] sm:$0xff]  ;;  %v5302_v0 = vld [vmem:[%s5154_s20 + $0xc0] sm:$0xff] }
  0x45   : > { %9900 = vst [vmem:[#allocation35_spill] sm:$0xff] %v5292_v62  ;;  %9901 = vst [vmem:[#allocation36_spill] sm:$0xff] %v5299_v63  ;;  %v5307_v1 = vld [vmem:[%s5217_s15 + $0x18] sm:$0xff]   ;;  %v5318_v4 = vld [vmem:[%s5154_s20 + $0xd0] sm:$0xff] }
  0x46   : > { %693 = vmatpush1.bf16.msra.mxu0 %v4428_v38  ;;  %4323 = vmatpush1.bf16.msra.mxu1 %v4428_v38  ;;  %9902 = vst [vmem:[#allocation37_spill] sm:$0xff] %v5302_v0  ;;  %9903 = vst [vmem:[#allocation38_spill] sm:$0xff] %v5307_v1  ;;  %v5310_v2 = vld [vmem:[%s5217_s15 + $0x58] sm:$0xff]   ;;  %v5325_v5 = vld [vmem:[%s5154_s20 + $0xe8] sm:$0xff] }
  0x47   : > { %694 = vmatprep.subr.bf16.mxu0 %v4429_v39  ;;  %4316 = vmatprep.subr.bf16.mxu1 %v4429_v39  ;;  %9904 = vst [vmem:[#allocation39_spill] sm:$0xff] %v5310_v2  ;;  %v5315_v3 = vld [vmem:[%s5154_s20 + $0xd8] sm:$0xff]  ;;  %9906 = vst [vmem:[#allocation41_spill] sm:$0xff] %v5318_v4  ;;  %v5328_v6 = vld [vmem:[%s5154_s20 + $0xe0] sm:$0xff] }
  0x48   : > { %975 = vperm.xlu1 %4410, %v5207_v40   ;;  %972 = vperm.xlu0 %4409, %v5210_v41   ;;  %9905 = vst [vmem:[#allocation40_spill] sm:$0xff] %v5315_v3  ;;  %9907 = vst [vmem:[#allocation42_spill] sm:$0xff] %v5325_v5  ;;  %v5333_v7 = vld [vmem:[%s5217_s15 + $0x20] sm:$0xff]   ;;  %v5341_v9 = vld [vmem:[%s5154_s20 + $0xf8] sm:$0xff] }
  0x49   : > { %9908 = vst [vmem:[#allocation43_spill] sm:$0xff] %v5328_v6  ;;  %9909 = vst [vmem:[#allocation44_spill] sm:$0xff] %v5333_v7  ;;  %v5336_v8 = vld [vmem:[%s5217_s15 + $0x60] sm:$0xff]   ;;  %v5344_v10 = vld [vmem:[%s5154_s20 + $0xf0] sm:$0xff] }
  0x4a   : > { %695 = vmatpush1.bf16.msra.mxu0 %v4431_v42  ;;  %4324 = vmatpush1.bf16.msra.mxu1 %v4431_v42  ;;  %9910 = vst [vmem:[#allocation45_spill] sm:$0xff] %v5336_v8  ;;  %9911 = vst [vmem:[#allocation46_spill] sm:$0xff] %v5341_v9  ;;  %v5358_v11 = vld [vmem:[%s5351_s19 + $0x8] sm:$0xff]  ;;  %v5361_v12 = vld [vmem:[%s5351_s19] sm:$0xff] }
  0x4b   : > { %696 = vmatprep.subr.bf16.mxu0 %v4432_v43  ;;  %4317 = vmatprep.subr.bf16.mxu1 %v4432_v43  ;;  %9912 = vst [vmem:[#allocation47_spill] sm:$0xff] %v5344_v10  ;;  %9913 = vst [vmem:[#allocation48_spill] sm:$0xff] %v5358_v11  ;;  %v5366_v13 = vld [vmem:[%s5217_s15 + $0x28] sm:$0xff]   ;;  %v5374_v15 = vld [vmem:[%s5351_s19 + $0x18] sm:$0xff] }
  0x4c   : > { %981 = vperm.xlu1 %4410, %v5222_v44   ;;  %978 = vperm.xlu0 %4409, %v5225_v45   ;;  %9914 = vst [vmem:[#allocation49_spill] sm:$0xff] %v5361_v12  ;;  %9915 = vst [vmem:[#allocation50_spill] sm:$0xff] %v5366_v13  ;;  %v5369_v14 = vld [vmem:[%s5217_s15 + $0x68] sm:$0xff]   ;;  %v5377_v17 = vld [vmem:[%s5351_s19 + $0x10] sm:$0xff] }
  0x4d   : > { %9916 = vst [vmem:[#allocation51_spill] sm:$0xff] %v5369_v14  ;;  %9917 = vst [vmem:[#allocation52_spill] sm:$0xff] %v5374_v15  ;;  %v5384_v18 = vld [vmem:[%s5351_s19 + $0x28] sm:$0xff]  ;;  %v5387_v19 = vld [vmem:[%s5351_s19 + $0x20] sm:$0xff] }
  0x4e   : > { %697 = vmatpush1.bf16.msra.mxu0 %v4434_v46  ;;  %4325 = vmatpush1.bf16.msra.mxu1 %v4434_v46  ;;  %9918 = vst [vmem:[#allocation53_spill] sm:$0xff] %v5377_v17  ;;  %9919 = vst [vmem:[#allocation54_spill] sm:$0xff] %v5384_v18  ;;  %v5392_v20 = vld [vmem:[%s5217_s15 + $0x30] sm:$0xff]   ;;  %v5400_v26 = vld [vmem:[%s5351_s19 + $0x38] sm:$0xff] }
  0x4f   : > { %9920 = vst [vmem:[#allocation55_spill] sm:$0xff] %v5387_v19  ;;  %9921 = vst [vmem:[#allocation56_spill] sm:$0xff] %v5392_v20  ;;  %v5395_v21 = vld [vmem:[%s5217_s15 + $0x70] sm:$0xff]   ;;  %v5410_v30 = vld [vmem:[%s5351_s19 + $0x48] sm:$0xff] }
  0x50   : > { %987 = vperm.xlu1 %4410, %v5237_v49   ;;  %984 = vperm.xlu0 %4409, %v5240_v50   ;;  %9922 = vst [vmem:[#allocation57_spill] sm:$0xff] %v5395_v21  ;;  %9923 = vst [vmem:[#allocation58_spill] sm:$0xff] %v5400_v26  ;;  %v5403_v27 = vld [vmem:[%s5351_s19 + $0x30] sm:$0xff]  ;;  %v5413_v31 = vld [vmem:[%s5351_s19 + $0x40] sm:$0xff] }
  0x51   : > { %715 = vmatmul.mubr.bf16.vlgmr.msra.gmra.mrb[0].mxu0 %v5229_v47  ;;  %795 = vmatmul.mubr.bf16.vlgmr.msra.gmra.mrb[0].mxu1 %v5232_v48  ;;  %9924 = vst [vmem:[#allocation59_spill] sm:$0xff] %v5403_v27  ;;  %9925 = vst [vmem:[#allocation60_spill] sm:$0xff] %v5410_v30  ;;  %v5418_v34 = vld [vmem:[%s5217_s15 + $0x38] sm:$0xff]   ;;  %v5429_v39 = vld [vmem:[%s5351_s19 + $0x50] sm:$0xff] }
  0x52   : > { %724 = vmatprep.mubr.bf16.mxu0 %v4989_v16  ;;  %804 = vmatprep.mubr.bf16.mxu1 %v4989_v16  ;;  %9926 = vst [vmem:[#allocation61_spill] sm:$0xff] %v5413_v31  ;;  %9927 = vst [vmem:[#allocation62_spill] sm:$0xff] %v5418_v34  ;;  %v5421_v35 = vld [vmem:[%s5217_s15 + $0x78] sm:$0xff]   ;;  %v5439_v42 = vld [vmem:[%s5351_s19 + $0x60] sm:$0xff] }
  0x53   : > { %9928 = vst [vmem:[#allocation63_spill] sm:$0xff] %v5421_v35  ;;  %v5426_v38 = vld [vmem:[%s5351_s19 + $0x58] sm:$0xff]  ;;  %9930 = vst [vmem:[#allocation65_spill] sm:$0xff] %v5429_v39  ;;  %v5447_v46 = vld [vmem:[%s5351_s19 + $0x70] sm:$0xff] }
  0x54   : > { %993 = vperm.xlu1 %4410, %v5247_v51   ;;  %990 = vperm.xlu0 %4409, %v5250_v52   ;;  %9929 = vst [vmem:[#allocation64_spill] sm:$0xff] %v5426_v38  ;;  %9932 = vst [vmem:[#allocation67_spill] sm:$0xff] %v5439_v42  ;;  %v5444_v43 = vld [vmem:[%s5351_s19 + $0x78] sm:$0xff] }
  0x55   : > { %9933 = vst [vmem:[#allocation68_spill] sm:$0xff] %v5444_v43  ;;  %9934 = vst [vmem:[#allocation69_spill] sm:$0xff] %v5447_v46 }
  0x58   : > { %999 = vperm.xlu1 %4410, %v5263_v55   ;;  %996 = vperm.xlu0 %4409, %v5266_v56  }
  0x59   : > { %725 = vmatmul.mubr.bf16.gmra.mrb[4].mxu0 %v5255_v53  ;;  %805 = vmatmul.mubr.bf16.gmra.mrb[4].mxu1 %v5258_v54 }
  0x5a   : > { %734 = vmatprep.mubr.bf16.mxu0 %v4989_v16  ;;  %814 = vmatprep.mubr.bf16.mxu1 %v4989_v16 }
  0x5c   : > { %1005 = vperm.xlu1 %4410, %v5273_v57   ;;  %1002 = vperm.xlu0 %4409, %v5276_v58  }
  0x60   : > { %1011 = vperm.xlu1 %4410, %v5289_v61   ;;  %1008 = vperm.xlu0 %4409, %v5292_v62  }
  0x61   : > { %735 = vmatmul.mubr.bf16.gmra.mrb[8].mxu0 %v5281_v59  ;;  %815 = vmatmul.mubr.bf16.gmra.mrb[8].mxu1 %v5284_v60 }
  0x62   : > { %744 = vmatprep.mubr.bf16.mxu0 %v4989_v16  ;;  %824 = vmatprep.mubr.bf16.mxu1 %v4989_v16 }
  0x64   : > { %1017 = vperm.xlu1 %4410, %v5299_v63   ;;  %1014 = vperm.xlu0 %4409, %v5302_v0  }
  0x68   : > { %1023 = vperm.xlu1 %4410, %v5315_v3   ;;  %1020 = vperm.xlu0 %4409, %v5318_v4  }
  0x69   : > { %745 = vmatmul.mubr.bf16.gmra.mrb[12].mxu0 %v5307_v1  ;;  %825 = vmatmul.mubr.bf16.gmra.mrb[12].mxu1 %v5310_v2 }
  0x6a   : > { %754 = vmatprep.mubr.bf16.mxu0 %v4989_v16  ;;  %834 = vmatprep.mubr.bf16.mxu1 %v4989_v16 }
  0x6c   : > { %1029 = vperm.xlu1 %4410, %v5325_v5   ;;  %1026 = vperm.xlu0 %4409, %v5328_v6  }
  0x70   : > { %1035 = vperm.xlu1 %4410, %v5341_v9   ;;  %1032 = vperm.xlu0 %4409, %v5344_v10   ;;  %v5452_v10 = vld [vmem:[%s5351_s19 + $0x88] sm:$0xff]  ;;  %v5455_v9 = vld [vmem:[%s5351_s19 + $0x80] sm:$0xff] }
  0x71   : > { %755 = vmatmul.mubr.bf16.gmra.mrb[16].mxu0 %v5333_v7  ;;  %835 = vmatmul.mubr.bf16.gmra.mrb[16].mxu1 %v5336_v8  ;;  %9935 = vst [vmem:[#allocation70_spill] sm:$0xff] %v5452_v10  ;;  %9936 = vst [vmem:[#allocation71_spill] sm:$0xff] %v5455_v9 }
  0x72   : > { %764 = vmatprep.mubr.bf16.mxu0 %v4989_v16  ;;  %844 = vmatprep.mubr.bf16.mxu1 %v4989_v16 }
  0x74   : > { %1116 = vperm.xlu1 %4410, %v5358_v11   ;;  %1111 = vperm.xlu0 %4409, %v5361_v12  }
  0x78   : > { %1126 = vperm.xlu1 %4410, %v5374_v15   ;;  %1121 = vperm.xlu0 %4409, %v5377_v17  }
  0x79   : > { %765 = vmatmul.mubr.bf16.gmra.mrb[20].mxu0 %v5366_v13  ;;  %845 = vmatmul.mubr.bf16.gmra.mrb[20].mxu1 %v5369_v14 }
  0x7a   : > { %774 = vmatprep.mubr.bf16.mxu0 %v4989_v16  ;;  %854 = vmatprep.mubr.bf16.mxu1 %v4989_v16 }
  0x7c   : > { %1136 = vperm.xlu1 %4410, %v5384_v18   ;;  %1131 = vperm.xlu0 %4409, %v5387_v19  }
  0x80   : > { %1146 = vperm.xlu1 %4410, %v5400_v26   ;;  %1141 = vperm.xlu0 %4409, %v5403_v27  }
  0x81   : > { %775 = vmatmul.mubr.bf16.gmra.mrb[24].mxu0 %v5392_v20  ;;  %855 = vmatmul.mubr.bf16.gmra.mrb[24].mxu1 %v5395_v21 }
  0x82   : > { %784 = vmatprep.mubr.bf16.mxu0 %v4989_v16  ;;  %864 = vmatprep.mubr.bf16.mxu1 %v4989_v16  ;;  %v5436_v16 = vld [vmem:[%s5351_s19 + $0x68] sm:$0xff] }
  0x83   : > { %9931 = vst [vmem:[#allocation66_spill] sm:$0xff] %v5436_v16 }
  0x84   : > { %1156 = vperm.xlu1 %4410, %v5410_v30   ;;  %1151 = vperm.xlu0 %4409, %v5413_v31  }
  0x88   : > { %1166 = vperm.xlu1 %4410, %v5426_v38   ;;  %1161 = vperm.xlu0 %4409, %v5429_v39   ;;  %v5496_v39 = vld [vmem:[%s5351_s19 + $0xd0] sm:$0xff]  ;;  %v5504_v38 = vld [vmem:[%s5351_s19 + $0xe0] sm:$0xff] }
  0x89   : > { %785 = vmatmul.mubr.bf16.gmra.mrb[28].mxu0 %v5418_v34  ;;  %865 = vmatmul.mubr.bf16.gmra.mrb[28].mxu1 %v5421_v35  ;;  %9946 = vst [vmem:[#allocation81_spill] sm:$0xff] %v5496_v39  ;;  %9948 = vst [vmem:[#allocation83_spill] sm:$0xff] %v5504_v38 }
  0x8c   : > { %1176 = vperm.xlu1 %4410, %v5436_v16   ;;  %1171 = vperm.xlu0 %4409, %v5439_v42   ;;  %v5460_v42 = vld [vmem:[%s5351_s19 + $0x98] sm:$0xff]  ;;  %v5463_v16 = vld [vmem:[%s5351_s19 + $0x90] sm:$0xff] }
  0x8d   : > { %9937 = vst [vmem:[#allocation72_spill] sm:$0xff] %v5460_v42  ;;  %9938 = vst [vmem:[#allocation73_spill] sm:$0xff] %v5463_v16 }
  0x90   : > { %1186 = vperm.xlu1 %4410, %v5444_v43   ;;  %1181 = vperm.xlu0 %4409, %v5447_v46   ;;  %v5468_v46 = vld [vmem:[%s5351_s19 + $0xa8] sm:$0xff]  ;;  %v5471_v43 = vld [vmem:[%s5351_s19 + $0xa0] sm:$0xff] }
  0x91   : > { %9939 = vst [vmem:[#allocation74_spill] sm:$0xff] %v5468_v46  ;;  %9940 = vst [vmem:[#allocation75_spill] sm:$0xff] %v5471_v43 }
  0x94   : > { %1196 = vperm.xlu1 %4410, %v5452_v10   ;;  %1191 = vperm.xlu0 %4409, %v5455_v9   ;;  %v5476_v10 = vld [vmem:[%s5351_s19 + $0xb8] sm:$0xff]  ;;  %v5479_v9 = vld [vmem:[%s5351_s19 + $0xb0] sm:$0xff] }
  0x95   : > { %9941 = vst [vmem:[#allocation76_spill] sm:$0xff] %v5476_v10  ;;  %9942 = vst [vmem:[#allocation77_spill] sm:$0xff] %v5479_v9 }
  0x98   : > { %1206 = vperm.xlu1 %4410, %v5460_v42   ;;  %1201 = vperm.xlu0 %4409, %v5463_v16   ;;  %v5485_v16 = vld [vmem:[%s5351_s19 + $0xc8] sm:$0xff]  ;;  %v5488_v42 = vld [vmem:[%s5351_s19 + $0xc0] sm:$0xff] }
  0x99   : > { %9943 = vst [vmem:[#allocation78_spill] sm:$0xff] %v5485_v16  ;;  %9944 = vst [vmem:[#allocation79_spill] sm:$0xff] %v5488_v42 }
  0x9c   : > { %1216 = vperm.xlu1 %4410, %v5468_v46   ;;  %1211 = vperm.xlu0 %4409, %v5471_v43   ;;  %v1037_v43 = vlaneseq  ;;  %v5493_v46 = vld [vmem:[%s5351_s19 + $0xd8] sm:$0xff] }
  0x9d   : > { %9945 = vst [vmem:[#allocation80_spill] sm:$0xff] %v5493_v46 }
  0xa0   : > { %1226 = vperm.xlu1 %4410, %v5476_v10   ;;  %1221 = vperm.xlu0 %4409, %v5479_v9   ;;  %v1038_v9 = vshrl.u32 %v1037_v43, 7  ;;  %v5501_v10 = vld [vmem:[%s5351_s19 + $0xe8] sm:$0xff]  ;;  %v5521_v43 = vld [vmem:[%s443_s21] sm:$0x3] }
  0xa1   : > { %9947 = vst [vmem:[#allocation82_spill] sm:$0xff] %v5501_v10  ;;  %vm9655_vm15 = vcmp.ge.s32.totalorder %v5521_v43, 0 }
  0xa4   : > { %1236 = vperm.xlu1 %4410, %v5485_v16   ;;  %1231 = vperm.xlu0 %4409, %v5488_v42   ;;  %v5511_v42 = vsub.s32 0, %v1038_v9  ;;  %v5513_v16 = vsub.s32 1, %v1038_v9 }
  0xa6   : > { %v5527_v6 = vrot.slane %v5521_v43, %v5511_v42 }
  0xa8   : > { %1246 = vperm.xlu1 %4410, %v5493_v46   ;;  %1241 = vperm.xlu0 %4409, %v5496_v39   ;;  %v5516_v46 = vld [vmem:[%s5351_s19 + $0xf8] sm:$0xff]  ;;  %v5519_v39 = vld [vmem:[%s5351_s19 + $0xf0] sm:$0xff] }
  0xa9   : > { %9949 = vst [vmem:[#allocation84_spill] sm:$0xff] %v5516_v46  ;;  %9950 = vst [vmem:[#allocation85_spill] sm:$0xff] %v5519_v39 }
  0xac   : > { %1256 = vperm.xlu1 %4410, %v5501_v10   ;;  %1251 = vperm.xlu0 %4409, %v5504_v38   ;;  %v5531_v38 = vrot.slane %v5521_v43, %v5513_v16 }
  0xb0   : > { %1266 = vperm.xlu1 %4410, %v5516_v46   ;;  %1261 = vperm.xlu0 %4409, %v5519_v39  }
  0xb3   : > { %v5533_v9 = vpop.permute.xlu1 %948  ;;  %v5535_v10 = vpop.permute.xlu0 %942 }
  0xb4   : > { %9951 = vst [vmem:[#allocation86_spill] sm:$0xff] %v5533_v9  ;;  %9952 = vst [vmem:[#allocation87_spill] sm:$0xff] %v5535_v10  ;;  %vm9653_vm0 = vcmp.eq.s32.totalorder %v5533_v9, %v5527_v6  ;;  %vm9654_vm1 = vcmp.eq.s32.totalorder %v5533_v9, %v5531_v38  ;;  %vm9656_vm2 = vcmp.eq.s32.totalorder %v5535_v10, %v5527_v6 }
  0xb5   : > { %vm1046_vm3 = vcmp.eq.s32.totalorder %v5535_v10, %v5531_v38 }
  0xb7   : > { %v5545_v39 = vpop.permute.xlu1 %951  ;;  %v5547_v46 = vpop.permute.xlu0 %945 }
  0xb8   : > { %vm1051_vm4 = vcmp.eq.s32.totalorder %v5545_v39, %v5527_v6  ;;  %vm1052_vm5 = vcmp.eq.s32.totalorder %v5545_v39, %v5531_v38  ;;  %vm1047_vm6 = vcmp.eq.s32.totalorder %v5547_v46, %v5527_v6  ;;  %vm1048_vm7 = vcmp.eq.s32.totalorder %v5547_v46, %v5531_v38 }
  0xbb   : > { %v5557_v5 = vpop.permute.xlu1 %957  ;;  %v5559_v31 = vpop.permute.xlu0 %954 }
  0xbf   : > { %v5569_v30 = vpop.permute.xlu1 %963  ;;  %v5571_v27 = vpop.permute.xlu0 %960 }
  0xc3   : > { %v5581_v26 = vpop.permute.xlu1 %969  ;;  %v5583_v19 = vpop.permute.xlu0 %966 }
  0xc7   : > { %v5593_v18 = vpop.permute.xlu1 %975  ;;  %v5595_v4 = vpop.permute.xlu0 %972 }
  0xc8   : > { %9953 = vst [vmem:[#allocation88_spill] sm:$0xff] %v5595_v4 }
  0xcb   : > { %v5605_v11 = vpop.permute.xlu1 %981  ;;  %v5607_v15 = vpop.permute.xlu0 %978 }
  0xcc   : > { %9954 = vst [vmem:[#allocation89_spill] sm:$0xff] %v5605_v11  ;;  %9955 = vst [vmem:[#allocation90_spill] sm:$0xff] %v5607_v15 }
  0xcf   : > { %v5617_v3 = vpop.permute.xlu1 %987  ;;  %v5619_v12 = vpop.permute.xlu0 %984 }
  0xd0   : > { %9956 = vst [vmem:[#allocation91_spill] sm:$0xff] %v5617_v3  ;;  %9957 = vst [vmem:[#allocation92_spill] sm:$0xff] %v5619_v12 }
  0xd3   : > { %v5629_v17 = vpop.permute.xlu1 %993  ;;  %v5631_v0 = vpop.permute.xlu0 %990 }
  0xd4   : > { %9958 = vst [vmem:[#allocation93_spill] sm:$0xff] %v5629_v17  ;;  %9959 = vst [vmem:[#allocation94_spill] sm:$0xff] %v5631_v0 }
  0xd7   : > { %v5641_v63 = vpop.permute.xlu1 %999  ;;  %v5643_v62 = vpop.permute.xlu0 %996 }
  0xd8   : > { %9960 = vst [vmem:[#allocation95_spill] sm:$0xff] %v5641_v63  ;;  %9961 = vst [vmem:[#allocation96_spill] sm:$0xff] %v5643_v62 }
  0xdb   : > { %v5653_v61 = vpop.permute.xlu1 %1005  ;;  %v5655_v58 = vpop.permute.xlu0 %1002 }
  0xdc   : > { %9962 = vst [vmem:[#allocation97_spill] sm:$0xff] %v5653_v61  ;;  %9963 = vst [vmem:[#allocation98_spill] sm:$0xff] %v5655_v58 }
  0xdf   : > { %v5665_v57 = vpop.permute.xlu1 %1011  ;;  %v5667_v55 = vpop.permute.xlu0 %1008 }
  0xe0   : > { %9964 = vst [vmem:[#allocation99_spill] sm:$0xff] %v5665_v57  ;;  %9965 = vst [vmem:[#allocation100_spill] sm:$0xff] %v5667_v55 }
  0xe3   : > { %v5677_v56 = vpop.permute.xlu1 %1017  ;;  %v5679_v51 = vpop.permute.xlu0 %1014 }
  0xe4   : > { %9966 = vst [vmem:[#allocation101_spill] sm:$0xff] %v5677_v56  ;;  %9967 = vst [vmem:[#allocation102_spill] sm:$0xff] %v5679_v51 }
  0xe7   : > { %v5689_v52 = vpop.permute.xlu1 %1023  ;;  %v5691_v49 = vpop.permute.xlu0 %1020 }
  0xe8   : > { %9968 = vst [vmem:[#allocation103_spill] sm:$0xff] %v5689_v52  ;;  %9969 = vst [vmem:[#allocation104_spill] sm:$0xff] %v5691_v49 }
  0xeb   : > { %v5702_v50 = vpop.permute.xlu1 %1029  ;;  %v5704_v44 = vpop.permute.xlu0 %1026 }
  0xec   : > { %9970 = vst [vmem:[#allocation105_spill] sm:$0xff] %v5702_v50  ;;  %9971 = vst [vmem:[#allocation106_spill] sm:$0xff] %v5704_v44 }
  0xef   : > { %v5714_v45 = vpop.permute.xlu1 %1035  ;;  %v5716_v40 = vpop.permute.xlu0 %1032 }
  0xf0   : > { %9972 = vst [vmem:[#allocation107_spill] sm:$0xff] %v5714_v45  ;;  %9973 = vst [vmem:[#allocation108_spill] sm:$0xff] %v5716_v40 }
  0xf3   : > { %v1117_v41 = vpop.permute.xlu1 %1116  ;;  %v1112_v36 = vpop.permute.xlu0 %1111 }
  0xf7   : > { %v5726_v37 = vpop.permute.xlu1 %1126  ;;  %v1122_v32 = vpop.permute.xlu0 %1121 }
  0xfb   : > { %v5728_v33 = vpop.permute.xlu1 %1136  ;;  %v5730_v28 = vpop.permute.xlu0 %1131 }
  0xff   : > { %v5732_v29 = vpop.permute.xlu1 %1146  ;;  %v5734_v24 = vpop.permute.xlu0 %1141 }
 0x103   : > { %v5736_v22 = vpop.permute.xlu1 %1156  ;;  %v5738_v35 = vpop.permute.xlu0 %1151 }
 0x107   : > { %v5740_v25 = vpop.permute.xlu1 %1166  ;;  %v5742_v23 = vpop.permute.xlu0 %1161 }
 0x10b   : > { %v5744_v21 = vpop.permute.xlu1 %1176  ;;  %v5746_v14 = vpop.permute.xlu0 %1171 }
 0x10f   : > { %v5748_v8 = vpop.permute.xlu1 %1186  ;;  %v5750_v2 = vpop.permute.xlu0 %1181 }
 0x113   : > { %v1197_v60 = vpop.permute.xlu1 %1196  ;;  %v1192_v54 = vpop.permute.xlu0 %1191 }
 0x124   : > { %v716_v48 = vpop.f32.mrb[0].mxu0  ;;  %v796_v34 = vpop.f32.mrb[0].mxu1 }
 0x125   : > { %v5752_v20 = vsub.f32 %v716_v48, %v1112_v36  ;;  %v5754_v13 = vsub.f32 %v796_v34, %v1192_v54  ;;  %v718_v7 = vpop.f32.mrb[1].mxu0  ;;  %v798_v1 = vpop.f32.mrb[1].mxu1 }
 0x126   : > { %v5756_v59 = vsub.f32 %v718_v7, %v1112_v36  ;;  %v5758_v47 = vsub.f32 %v798_v1, %v1192_v54  ;;  %v720_v53 = vpop.f32.mrb[2].mxu0  ;;  %v800_v40 = vpop.f32.mrb[2].mxu1 }
 0x127   : > { %9974 = vst [vmem:[#allocation109_spill] sm:$0xff] %v5752_v20  ;;  %9975 = vst [vmem:[#allocation110_spill] sm:$0xff] %v5754_v13  ;;  %v1333_v45 = vmul.f32 1.442695, %v5752_v20  ;;  %v1397_v44 = vmul.f32 1.442695, %v5754_v13  ;;  %v5762_v50 = vsub.f32 %v720_v53, %v1117_v41  ;;  %v5764_v49 = vsub.f32 %v800_v40, %v1197_v60  ;;  %v1207_v53 = vpop.permute.xlu1 %1206  ;;  %v1202_v13 = vpop.permute.xlu0 %1201 }
 0x128   : > { %9976 = vst [vmem:[#allocation111_spill] sm:$0xff] %v5756_v59  ;;  %9977 = vst [vmem:[#allocation112_spill] sm:$0xff] %v5758_v47  ;;  %v1335_v48 = vmul.f32 1.442695, %v5756_v59  ;;  %v1399_v34 = vmul.f32 1.442695, %v5758_v47 }
 0x129   : > { %9978 = vst [vmem:[#allocation113_spill] sm:$0xff] %v5762_v50  ;;  %9979 = vst [vmem:[#allocation114_spill] sm:$0xff] %v5764_v49  ;;  %v722_v52 = vpop.f32.mrb[3].mxu0  ;;  %v802_v51 = vpop.f32.mrb[3].mxu1  ;;  %4467 = vpow2.f32 %v1333_v45  ;;  %v1337_v36 = vmul.f32 1.442695, %v5762_v50 }
 0x12a   : > { %v5769_v54 = vsub.f32 %v722_v52, %v1117_v41  ;;  %4469 = vpow2.f32 %v1397_v44  ;;  %v1401_v1 = vmul.f32 1.442695, %v5764_v49  ;;  %v5772_v7 = vsub.f32 %v802_v51, %v1197_v60 }
 0x12b   : > { %4471 = vpow2.f32 %v1335_v48 }
 0x12c   : > { %9980 = vst [vmem:[#allocation115_spill] sm:$0xff] %v5769_v54  ;;  %9981 = vst [vmem:[#allocation116_spill] sm:$0xff] %v5772_v7  ;;  %v1339_v40 = vmul.f32 1.442695, %v5769_v54  ;;  %4473 = vpow2.f32 %v1399_v34  ;;  %v1403_v47 = vmul.f32 1.442695, %v5772_v7  ;;  %v1212_v54 = vpop.permute.xlu0 %1211 }
 0x12d   : > { %v726_v59 = vpop.f32.mrb[4].mxu0  ;;  %v806_v20 = vpop.f32.mrb[4].mxu1  ;;  %4475 = vpow2.f32 %v1337_v36 }
 0x12e   : > { %v5776_v45 = vsub.f32 %v726_v59, %v1122_v32  ;;  %v5778_v41 = vsub.f32 %v806_v20, %v1202_v13  ;;  %v728_v44 = vpop.f32.mrb[5].mxu0  ;;  %v808_v52 = vpop.f32.mrb[5].mxu1  ;;  %4477 = vpow2.f32 %v1401_v1 }
 0x12f   : > { %v5780_v51 = vsub.f32 %v728_v44, %v1122_v32  ;;  %v5782_v60 = vsub.f32 %v808_v52, %v1202_v13  ;;  %v730_v48 = vpop.f32.mrb[6].mxu0  ;;  %v810_v49 = vpop.f32.mrb[6].mxu1  ;;  %4479 = vpow2.f32 %v1339_v40 }
 0x130   : > { %9982 = vst [vmem:[#allocation117_spill] sm:$0xff] %v5776_v45  ;;  %9983 = vst [vmem:[#allocation118_spill] sm:$0xff] %v5778_v41  ;;  %v1341_v34 = vmul.f32 1.442695, %v5776_v45  ;;  %v1405_v7 = vmul.f32 1.442695, %v5778_v41  ;;  %v5787_v36 = vsub.f32 %v730_v48, %v5726_v37  ;;  %4481 = vpow2.f32 %v1403_v47  ;;  %v1217_v41 = vpop.permute.xlu1 %1216 }
 0x131   : > { %9984 = vst [vmem:[#allocation119_spill] sm:$0xff] %v5780_v51  ;;  %9985 = vst [vmem:[#allocation120_spill] sm:$0xff] %v5782_v60  ;;  %v1343_v59 = vmul.f32 1.442695, %v5780_v51  ;;  %v1407_v20 = vmul.f32 1.442695, %v5782_v60  ;;  %v5791_v1 = vsub.f32 %v810_v49, %v1207_v53 }
 0x132   : > { %9986 = vst [vmem:[#allocation121_spill] sm:$0xff] %v5787_v36  ;;  %v732_v32 = vpop.f32.mrb[7].mxu0  ;;  %v812_v13 = vpop.f32.mrb[7].mxu1  ;;  %4483 = vpow2.f32 %v1341_v34  ;;  %v1345_v44 = vmul.f32 1.442695, %v5787_v36 }
 0x133   : > { %9987 = vst [vmem:[#allocation122_spill] sm:$0xff] %v5791_v1  ;;  %v5795_v40 = vsub.f32 %v732_v32, %v5726_v37  ;;  %v5797_v52 = vsub.f32 %v812_v13, %v1207_v53  ;;  %4485 = vpow2.f32 %v1405_v7  ;;  %v1409_v48 = vmul.f32 1.442695, %v5791_v1  ;;  %v5800_v47 = vpop.eup %4467 }
 0x134   : > { %4487 = vpow2.f32 %v1343_v59  ;;  %v5803_v60 = vpop.eup %4469  ;;  %v736_v36 = vpop.f32.mrb[8].mxu0 }
 0x135   : > { %9988 = vst [vmem:[#allocation123_spill] sm:$0xff] %v5795_v40  ;;  %9989 = vst [vmem:[#allocation124_spill] sm:$0xff] %v5797_v52  ;;  %v1347_v49 = vmul.f32 1.442695, %v5795_v40  ;;  %4489 = vpow2.f32 %v1407_v20  ;;  %v1411_v34 = vmul.f32 1.442695, %v5797_v52  ;;  %v5806_v32 = vpop.eup %4471  ;;  %v5809_v7 = vsub.f32 %v736_v36, %v5730_v28 }
 0x136   : > { %9990 = vst [vmem:[#allocation125_spill] sm:$0xff] %v5803_v60  ;;  %v816_v37 = vpop.f32.mrb[8].mxu1  ;;  %4491 = vpow2.f32 %v1345_v44  ;;  %v738_v13 = vpop.f32.mrb[9].mxu0 }
 0x137   : > { %9991 = vst [vmem:[#allocation126_spill] sm:$0xff] %v5809_v7  ;;  %v5811_v53 = vsub.f32 %v816_v37, %v1212_v54  ;;  %v818_v1 = vpop.f32.mrb[9].mxu1  ;;  %v5813_v59 = vpop.eup %4473  ;;  %4493 = vpow2.f32 %v1409_v48  ;;  %v5816_v40 = vsub.f32 %v738_v13, %v5730_v28  ;;  %v1349_v36 = vmul.f32 1.442695, %v5809_v7 }
 0x138   : > { %9993 = vst [vmem:[#allocation128_spill] sm:$0xff] %v5813_v59  ;;  %v5818_v20 = vsub.f32 %v818_v1, %v1212_v54  ;;  %v740_v52 = vpop.f32.mrb[10].mxu0  ;;  %v820_v50 = vpop.f32.mrb[10].mxu1  ;;  %4495 = vpow2.f32 %v1347_v49 }
 0x139   : > { %9992 = vst [vmem:[#allocation127_spill] sm:$0xff] %v5811_v53  ;;  %9994 = vst [vmem:[#allocation129_spill] sm:$0xff] %v5816_v40  ;;  %v5820_v51 = vpop.eup %4475  ;;  %v1413_v44 = vmul.f32 1.442695, %v5811_v53  ;;  %v5825_v37 = vsub.f32 %v740_v52, %v5728_v33  ;;  %v742_v45 = vpop.f32.mrb[11].mxu0  ;;  %4497 = vpow2.f32 %v1411_v34  ;;  %v5831_v1 = vsub.f32 %v820_v50, %v1217_v41 }
 0x13a   : > { %9995 = vst [vmem:[#allocation130_spill] sm:$0xff] %v5818_v20  ;;  %v822_v56 = vpop.f32.mrb[11].mxu1  ;;  %v5827_v48 = vpop.eup %4477  ;;  %v1351_v28 = vmul.f32 1.442695, %v5816_v40  ;;  %v1415_v54 = vmul.f32 1.442695, %v5818_v20  ;;  %4499 = vpow2.f32 %v1349_v36  ;;  %v5837_v53 = vsub.f32 %v742_v45, %v5728_v33 }
 0x13b   : > { %9996 = vst [vmem:[#allocation131_spill] sm:$0xff] %v5825_v37  ;;  %9997 = vst [vmem:[#allocation132_spill] sm:$0xff] %v5827_v48  ;;  %v5833_v13 = vpop.eup %4479  ;;  %v1353_v49 = vmul.f32 1.442695, %v5825_v37  ;;  %v5839_v52 = vsub.f32 %v822_v56, %v1217_v41  ;;  %4501 = vpow2.f32 %v1413_v44  ;;  %v1417_v34 = vmul.f32 1.442695, %v5831_v1  ;;  %v1227_v20 = vpop.permute.xlu1 %1226 }
 0x13c   : > { %9998 = vst [vmem:[#allocation133_spill] sm:$0xff] %v5831_v1  ;;  %9999 = vst [vmem:[#allocation134_spill] sm:$0xff] %v5837_v53  ;;  %v5841_v7 = vpop.eup %4481  ;;  %v1222_v50 = vpop.permute.xlu0 %1221  ;;  %4503 = vpow2.f32 %v1351_v28  ;;  %v1355_v55 = vmul.f32 1.442695, %v5837_v53 }
 0x13d   : > { %10000 = vst [vmem:[#allocation135_spill] sm:$0xff] %v5839_v52  ;;  %10001 = vst [vmem:[#allocation136_spill] sm:$0xff] %v5841_v7  ;;  %v5844_v40 = vpop.eup %4483  ;;  %4505 = vpow2.f32 %v1415_v54  ;;  %v1419_v33 = vmul.f32 1.442695, %v5839_v52  ;;  %v746_v45 = vpop.f32.mrb[12].mxu0 }
 0x13e   : > { %10002 = vst [vmem:[#allocation137_spill] sm:$0xff] %v5844_v40  ;;  %v5847_v36 = vpop.eup %4485  ;;  %v826_v56 = vpop.f32.mrb[12].mxu1  ;;  %4507 = vpow2.f32 %v1353_v49  ;;  %v5853_v44 = vsub.f32 %v746_v45, %v5734_v24 }
 0x13f   : > { %10003 = vst [vmem:[#allocation138_spill] sm:$0xff] %v5847_v36  ;;  %v5850_v41 = vpop.eup %4487  ;;  %v5855_v1 = vsub.f32 %v826_v56, %v1222_v50  ;;  %v748_v37 = vpop.f32.mrb[13].mxu0  ;;  %4509 = vpow2.f32 %v1417_v34 }
 0x140   : > { %10004 = vst [vmem:[#allocation139_spill] sm:$0xff] %v5853_v44  ;;  %v828_v57 = vpop.f32.mrb[13].mxu1  ;;  %v5857_v28 = vpop.eup %4489  ;;  %v5860_v53 = vsub.f32 %v748_v37, %v5734_v24  ;;  %4511 = vpow2.f32 %v1355_v55  ;;  %v1357_v49 = vmul.f32 1.442695, %v5853_v44 }
 0x141   : > { %10005 = vst [vmem:[#allocation140_spill] sm:$0xff] %v5855_v1  ;;  %10006 = vst [vmem:[#allocation141_spill] sm:$0xff] %v5857_v28  ;;  %v5862_v54 = vsub.f32 %v828_v57, %v1222_v50  ;;  %v750_v52 = vpop.f32.mrb[14].mxu0  ;;  %v830_v58 = vpop.f32.mrb[14].mxu1  ;;  %v1421_v45 = vmul.f32 1.442695, %v5855_v1  ;;  %4513 = vpow2.f32 %v1419_v33 }
 0x142   : > { %10007 = vst [vmem:[#allocation142_spill] sm:$0xff] %v5860_v53  ;;  %v5864_v61 = vpop.eup %4491  ;;  %v5869_v56 = vsub.f32 %v750_v52, %v5732_v29  ;;  %v752_v36 = vpop.f32.mrb[15].mxu0  ;;  %v1359_v24 = vmul.f32 1.442695, %v5860_v53  ;;  %v5875_v37 = vsub.f32 %v830_v58, %v1227_v20  ;;  %4515 = vpow2.f32 %v1357_v49 }
 0x143   : > { %10008 = vst [vmem:[#allocation143_spill] sm:$0xff] %v5862_v54  ;;  %v832_v28 = vpop.f32.mrb[15].mxu1  ;;  %v5871_v34 = vpop.eup %4493  ;;  %v1423_v57 = vmul.f32 1.442695, %v5862_v54  ;;  %v5881_v1 = vsub.f32 %v752_v36, %v5732_v29  ;;  %4517 = vpow2.f32 %v1421_v45 }
 0x144   : > { %10009 = vst [vmem:[#allocation144_spill] sm:$0xff] %v5869_v56  ;;  %10010 = vst [vmem:[#allocation145_spill] sm:$0xff] %v5871_v34  ;;  %v5877_v50 = vpop.eup %4495  ;;  %v1361_v55 = vmul.f32 1.442695, %v5869_v56  ;;  %v5883_v52 = vsub.f32 %v832_v28, %v1227_v20  ;;  %v1425_v33 = vmul.f32 1.442695, %v5875_v37  ;;  %v1237_v54 = vpop.permute.xlu1 %1236  ;;  %4519 = vpow2.f32 %v1359_v24 }
 0x145   : > { %10011 = vst [vmem:[#allocation146_spill] sm:$0xff] %v5875_v37  ;;  %10012 = vst [vmem:[#allocation147_spill] sm:$0xff] %v5881_v1  ;;  %v5885_v44 = vpop.eup %4497  ;;  %v1232_v58 = vpop.permute.xlu0 %1231  ;;  %v1363_v62 = vmul.f32 1.442695, %v5881_v1  ;;  %4521 = vpow2.f32 %v1423_v57 }
 0x146   : > { %10013 = vst [vmem:[#allocation148_spill] sm:$0xff] %v5883_v52  ;;  %10014 = vst [vmem:[#allocation149_spill] sm:$0xff] %v5885_v44  ;;  %v5888_v53 = vpop.eup %4499  ;;  %v1427_v29 = vmul.f32 1.442695, %v5883_v52  ;;  %v756_v36 = vpop.f32.mrb[16].mxu0  ;;  %4523 = vpow2.f32 %v1361_v55 }
 0x147   : > { %v5891_v49 = vpop.eup %4501  ;;  %v836_v20 = vpop.f32.mrb[16].mxu1  ;;  %v5897_v45 = vsub.f32 %v756_v36, %v5738_v35  ;;  %4525 = vpow2.f32 %v1425_v33 }
 0x148   : > { %10015 = vst [vmem:[#allocation150_spill] sm:$0xff] %v5891_v49  ;;  %v5894_v28 = vpop.eup %4503  ;;  %v5899_v37 = vsub.f32 %v836_v20, %v1232_v58  ;;  %v758_v56 = vpop.f32.mrb[17].mxu0  ;;  %4527 = vpow2.f32 %v1363_v62 }
 0x149   : > { %10016 = vst [vmem:[#allocation151_spill] sm:$0xff] %v5897_v45  ;;  %v838_v44 = vpop.f32.mrb[17].mxu1  ;;  %v5901_v24 = vpop.eup %4505  ;;  %v5904_v1 = vsub.f32 %v758_v56, %v5738_v35  ;;  %v1365_v55 = vmul.f32 1.442695, %v5897_v45  ;;  %4529 = vpow2.f32 %v1427_v29 }
 0x14a   : > { %10017 = vst [vmem:[#allocation152_spill] sm:$0xff] %v5899_v37  ;;  %10018 = vst [vmem:[#allocation153_spill] sm:$0xff] %v5901_v24  ;;  %v5906_v57 = vsub.f32 %v838_v44, %v1232_v58  ;;  %v760_v52 = vpop.f32.mrb[18].mxu0  ;;  %v840_v49 = vpop.f32.mrb[18].mxu1  ;;  %v1429_v36 = vmul.f32 1.442695, %v5899_v37 }
 0x14b   : > { %10019 = vst [vmem:[#allocation154_spill] sm:$0xff] %v5904_v1  ;;  %v5908_v34 = vpop.eup %4507  ;;  %v5913_v20 = vsub.f32 %v760_v52, %v5736_v22  ;;  %v762_v63 = vpop.f32.mrb[19].mxu0  ;;  %v1367_v35 = vmul.f32 1.442695, %v5904_v1  ;;  %v5919_v56 = vsub.f32 %v840_v49, %v1237_v54  ;;  %4531 = vpow2.f32 %v1365_v55 }
 0x14c   : > { %10020 = vst [vmem:[#allocation155_spill] sm:$0xff] %v5906_v57  ;;  %v842_v24 = vpop.f32.mrb[19].mxu1  ;;  %v5915_v33 = vpop.eup %4509  ;;  %v1431_v44 = vmul.f32 1.442695, %v5906_v57  ;;  %v5925_v37 = vsub.f32 %v762_v63, %v5736_v22  ;;  %4533 = vpow2.f32 %v1429_v36 }
 0x14d   : > { %10021 = vst [vmem:[#allocation156_spill] sm:$0xff] %v5913_v20  ;;  %10022 = vst [vmem:[#allocation157_spill] sm:$0xff] %v5915_v33  ;;  %v5921_v58 = vpop.eup %4511  ;;  %v1369_v62 = vmul.f32 1.442695, %v5913_v20  ;;  %v5927_v52 = vsub.f32 %v842_v24, %v1237_v54  ;;  %v1433_v29 = vmul.f32 1.442695, %v5919_v56  ;;  %v1247_v57 = vpop.permute.xlu1 %1246  ;;  %4535 = vpow2.f32 %v1367_v35 }
 0x14e   : > { %10023 = vst [vmem:[#allocation158_spill] sm:$0xff] %v5919_v56  ;;  %10024 = vst [vmem:[#allocation159_spill] sm:$0xff] %v5925_v37  ;;  %v5929_v45 = vpop.eup %4513  ;;  %v1242_v49 = vpop.permute.xlu0 %1241  ;;  %v1371_v33 = vmul.f32 1.442695, %v5925_v37  ;;  %4537 = vpow2.f32 %v1431_v44 }
 0x14f   : > { %10025 = vst [vmem:[#allocation160_spill] sm:$0xff] %v5927_v52  ;;  %10026 = vst [vmem:[#allocation161_spill] sm:$0xff] %v5929_v45  ;;  %v5932_v1 = vpop.eup %4515  ;;  %v1435_v22 = vmul.f32 1.442695, %v5927_v52  ;;  %v766_v63 = vpop.f32.mrb[20].mxu0  ;;  %4539 = vpow2.f32 %v1369_v62 }
 0x150   : > { %v5935_v55 = vpop.eup %4517  ;;  %v846_v54 = vpop.f32.mrb[20].mxu1  ;;  %v5941_v36 = vsub.f32 %v766_v63, %v5742_v23  ;;  %4541 = vpow2.f32 %v1433_v29 }
 0x151   : > { %10027 = vst [vmem:[#allocation162_spill] sm:$0xff] %v5935_v55  ;;  %v5938_v24 = vpop.eup %4519  ;;  %v5943_v56 = vsub.f32 %v846_v54, %v1242_v49  ;;  %v768_v20 = vpop.f32.mrb[21].mxu0  ;;  %4543 = vpow2.f32 %v1371_v33 }
 0x152   : > { %10028 = vst [vmem:[#allocation163_spill] sm:$0xff] %v5941_v36  ;;  %v848_v45 = vpop.f32.mrb[21].mxu1  ;;  %v5945_v35 = vpop.eup %4521  ;;  %v5948_v37 = vsub.f32 %v768_v20, %v5742_v23  ;;  %v1373_v62 = vmul.f32 1.442695, %v5941_v36  ;;  %4545 = vpow2.f32 %v1435_v22 }
 0x153   : > { %10029 = vst [vmem:[#allocation164_spill] sm:$0xff] %v5943_v56  ;;  %10030 = vst [vmem:[#allocation165_spill] sm:$0xff] %v5945_v35  ;;  %v5950_v44 = vsub.f32 %v848_v45, %v1242_v49  ;;  %v770_v52 = vpop.f32.mrb[22].mxu0  ;;  %v850_v55 = vpop.f32.mrb[22].mxu1  ;;  %v1437_v63 = vmul.f32 1.442695, %v5943_v56 }
 0x154   : > { %10031 = vst [vmem:[#allocation166_spill] sm:$0xff] %v5948_v37  ;;  %v5952_v59 = vpop.eup %4523  ;;  %v5957_v54 = vsub.f32 %v770_v52, %v5740_v25  ;;  %v772_v60 = vpop.f32.mrb[23].mxu0  ;;  %v1375_v23 = vmul.f32 1.442695, %v5948_v37  ;;  %v5963_v20 = vsub.f32 %v850_v55, %v1247_v57  ;;  %4547 = vpow2.f32 %v1373_v62 }
 0x155   : > { %10032 = vst [vmem:[#allocation167_spill] sm:$0xff] %v5950_v44  ;;  %v852_v35 = vpop.f32.mrb[23].mxu1  ;;  %v5959_v29 = vpop.eup %4525  ;;  %v1439_v45 = vmul.f32 1.442695, %v5950_v44  ;;  %v5969_v56 = vsub.f32 %v772_v60, %v5740_v25  ;;  %4549 = vpow2.f32 %v1437_v63 }
 0x156   : > { %10033 = vst [vmem:[#allocation168_spill] sm:$0xff] %v5957_v54  ;;  %10034 = vst [vmem:[#allocation169_spill] sm:$0xff] %v5959_v29  ;;  %v5965_v49 = vpop.eup %4527  ;;  %v1377_v33 = vmul.f32 1.442695, %v5957_v54  ;;  %v5971_v52 = vsub.f32 %v852_v35, %v1247_v57  ;;  %v1441_v22 = vmul.f32 1.442695, %v5963_v20  ;;  %v1257_v44 = vpop.permute.xlu1 %1256  ;;  %4551 = vpow2.f32 %v1375_v23 }
 0x157   : > { %10035 = vst [vmem:[#allocation170_spill] sm:$0xff] %v5963_v20  ;;  %10036 = vst [vmem:[#allocation171_spill] sm:$0xff] %v5969_v56  ;;  %v5973_v36 = vpop.eup %4529  ;;  %v1252_v55 = vpop.permute.xlu0 %1251  ;;  %v1379_v29 = vmul.f32 1.442695, %v5969_v56  ;;  %4553 = vpow2.f32 %v1439_v45 }
 0x158   : > { %10037 = vst [vmem:[#allocation172_spill] sm:$0xff] %v5971_v52  ;;  %10038 = vst [vmem:[#allocation173_spill] sm:$0xff] %v5973_v36  ;;  %v5976_v37 = vpop.eup %4531  ;;  %v1443_v25 = vmul.f32 1.442695, %v5971_v52  ;;  %v776_v60 = vpop.f32.mrb[24].mxu0  ;;  %4555 = vpow2.f32 %v1377_v33 }
 0x159   : > { %v5979_v62 = vpop.eup %4533  ;;  %v856_v57 = vpop.f32.mrb[24].mxu1  ;;  %v5985_v63 = vsub.f32 %v776_v60, %v5746_v14  ;;  %4557 = vpow2.f32 %v1441_v22 }
 0x15a   : > { %10039 = vst [vmem:[#allocation174_spill] sm:$0xff] %v5979_v62  ;;  %v5982_v35 = vpop.eup %4535  ;;  %v5987_v20 = vsub.f32 %v856_v57, %v1252_v55  ;;  %v778_v54 = vpop.f32.mrb[25].mxu0  ;;  %4559 = vpow2.f32 %v1379_v29 }
 0x15b   : > { %10040 = vst [vmem:[#allocation175_spill] sm:$0xff] %v5985_v63  ;;  %v858_v36 = vpop.f32.mrb[25].mxu1  ;;  %v5989_v23 = vpop.eup %4537  ;;  %v5992_v56 = vsub.f32 %v778_v54, %v5746_v14  ;;  %v1381_v33 = vmul.f32 1.442695, %v5985_v63  ;;  %4561 = vpow2.f32 %v1443_v25 }
 0x15c   : > { %10041 = vst [vmem:[#allocation176_spill] sm:$0xff] %v5987_v20  ;;  %10042 = vst [vmem:[#allocation177_spill] sm:$0xff] %v5989_v23  ;;  %v5994_v45 = vsub.f32 %v858_v36, %v1252_v55  ;;  %v780_v52 = vpop.f32.mrb[26].mxu0  ;;  %v860_v62 = vpop.f32.mrb[26].mxu1  ;;  %v1445_v60 = vmul.f32 1.442695, %v5987_v20 }
 0x15d   : > { %10043 = vst [vmem:[#allocation178_spill] sm:$0xff] %v5992_v56  ;;  %v5996_v0 = vpop.eup %4539  ;;  %v6001_v57 = vsub.f32 %v780_v52, %v5744_v21  ;;  %v782_v7 = vpop.f32.mrb[27].mxu0  ;;  %v1383_v14 = vmul.f32 1.442695, %v5992_v56  ;;  %v6007_v54 = vsub.f32 %v860_v62, %v1257_v44  ;;  %4563 = vpow2.f32 %v1381_v33 }
 0x15e   : > { %10044 = vst [vmem:[#allocation179_spill] sm:$0xff] %v5994_v45  ;;  %v862_v23 = vpop.f32.mrb[27].mxu1  ;;  %v6003_v22 = vpop.eup %4541  ;;  %v1447_v36 = vmul.f32 1.442695, %v5994_v45  ;;  %v6013_v20 = vsub.f32 %v782_v7, %v5744_v21  ;;  %4565 = vpow2.f32 %v1445_v60 }
 0x15f   : > { %10045 = vst [vmem:[#allocation180_spill] sm:$0xff] %v6001_v57  ;;  %10046 = vst [vmem:[#allocation181_spill] sm:$0xff] %v6003_v22  ;;  %v6009_v55 = vpop.eup %4543  ;;  %v1385_v29 = vmul.f32 1.442695, %v6001_v57  ;;  %v6015_v52 = vsub.f32 %v862_v23, %v1257_v44  ;;  %v1449_v25 = vmul.f32 1.442695, %v6007_v54  ;;  %v1267_v45 = vpop.permute.xlu1 %1266  ;;  %4567 = vpow2.f32 %v1383_v14 }
 0x160   : > { %10047 = vst [vmem:[#allocation182_spill] sm:$0xff] %v6007_v54  ;;  %10048 = vst [vmem:[#allocation183_spill] sm:$0xff] %v6013_v20  ;;  %v6017_v63 = vpop.eup %4545  ;;  %v1262_v62 = vpop.permute.xlu0 %1261  ;;  %v1387_v22 = vmul.f32 1.442695, %v6013_v20  ;;  %4569 = vpow2.f32 %v1447_v36 }
 0x161   : > { %10049 = vst [vmem:[#allocation184_spill] sm:$0xff] %v6015_v52  ;;  %10050 = vst [vmem:[#allocation185_spill] sm:$0xff] %v6017_v63  ;;  %v6020_v56 = vpop.eup %4547  ;;  %v1451_v21 = vmul.f32 1.442695, %v6015_v52  ;;  %v786_v7 = vpop.f32.mrb[28].mxu0  ;;  %4571 = vpow2.f32 %v1385_v29 }
 0x162   : > { %v6023_v33 = vpop.eup %4549  ;;  %v866_v44 = vpop.f32.mrb[28].mxu1  ;;  %v6029_v60 = vsub.f32 %v786_v7, %v5750_v2  ;;  %4573 = vpow2.f32 %v1449_v25 }
 0x163   : > { %10051 = vst [vmem:[#allocation186_spill] sm:$0xff] %v6023_v33  ;;  %v6026_v23 = vpop.eup %4551  ;;  %v6031_v54 = vsub.f32 %v866_v44, %v1262_v62  ;;  %v788_v57 = vpop.f32.mrb[29].mxu0  ;;  %4575 = vpow2.f32 %v1387_v22 }
 0x164   : > { %10052 = vst [vmem:[#allocation187_spill] sm:$0xff] %v6029_v60  ;;  %v868_v63 = vpop.f32.mrb[29].mxu1  ;;  %v6033_v14 = vpop.eup %4553  ;;  %v6036_v20 = vsub.f32 %v788_v57, %v5750_v2  ;;  %v1389_v29 = vmul.f32 1.442695, %v6029_v60  ;;  %4577 = vpow2.f32 %v1451_v21 }
 0x165   : > { %10053 = vst [vmem:[#allocation188_spill] sm:$0xff] %v6031_v54  ;;  %10054 = vst [vmem:[#allocation189_spill] sm:$0xff] %v6033_v14  ;;  %v6038_v36 = vsub.f32 %v868_v63, %v1262_v62  ;;  %v790_v52 = vpop.f32.mrb[30].mxu0  ;;  %v870_v33 = vpop.f32.mrb[30].mxu1  ;;  %v1453_v7 = vmul.f32 1.442695, %v6031_v54 }
 0x166   : > { %10055 = vst [vmem:[#allocation190_spill] sm:$0xff] %v6036_v20  ;;  %v6040_v48 = vpop.eup %4555  ;;  %v6045_v44 = vsub.f32 %v790_v52, %v5748_v8  ;;  %v792_v17 = vpop.f32.mrb[31].mxu0  ;;  %v1391_v2 = vmul.f32 1.442695, %v6036_v20  ;;  %v6051_v57 = vsub.f32 %v870_v33, %v1267_v45  ;;  %4579 = vpow2.f32 %v1389_v29 }
 0x167   : > { %10056 = vst [vmem:[#allocation191_spill] sm:$0xff] %v6038_v36  ;;  %v872_v14 = vpop.f32.mrb[31].mxu1  ;;  %v6047_v25 = vpop.eup %4557  ;;  %v1455_v63 = vmul.f32 1.442695, %v6038_v36  ;;  %v6057_v54 = vsub.f32 %v792_v17, %v5748_v8  ;;  %4581 = vpow2.f32 %v1453_v7 }
 0x168   : > { %10057 = vst [vmem:[#allocation192_spill] sm:$0xff] %v6045_v44  ;;  %10058 = vst [vmem:[#allocation193_spill] sm:$0xff] %v6047_v25  ;;  %v6053_v62 = vpop.eup %4559  ;;  %v1393_v22 = vmul.f32 1.442695, %v6045_v44  ;;  %v6059_v52 = vsub.f32 %v872_v14, %v1267_v45  ;;  %v1457_v21 = vmul.f32 1.442695, %v6051_v57  ;;  %4583 = vpow2.f32 %v1391_v2 }
 0x169   : > { %10059 = vst [vmem:[#allocation194_spill] sm:$0xff] %v6051_v57  ;;  %10060 = vst [vmem:[#allocation195_spill] sm:$0xff] %v6057_v54  ;;  %v6061_v60 = vpop.eup %4561  ;;  %v1395_v33 = vmul.f32 1.442695, %v6057_v54  ;;  %4585 = vpow2.f32 %v1455_v63 }
 0x16a   : > { %10061 = vst [vmem:[#allocation196_spill] sm:$0xff] %v6059_v52  ;;  %10062 = vst [vmem:[#allocation197_spill] sm:$0xff] %v6061_v60  ;;  %v6064_v20 = vpop.eup %4563  ;;  %v1459_v29 = vmul.f32 1.442695, %v6059_v52  ;;  %4587 = vpow2.f32 %v1393_v22 }
 0x16b   : > { %v6067_v36 = vpop.eup %4565  ;;  %4589 = vpow2.f32 %v1457_v21 }
 0x16c   : > { %10063 = vst [vmem:[#allocation198_spill] sm:$0xff] %v6067_v36  ;;  %v6070_v44 = vpop.eup %4567  ;;  %4591 = vpow2.f32 %v1395_v33 }
 0x16d   : > { %v6072_v8 = vpop.eup %4569  ;;  %4593 = vpow2.f32 %v1459_v29 }
 0x16e   : > { %10064 = vst [vmem:[#allocation199_spill] sm:$0xff] %v6072_v8  ;;  %v6074_v17 = vpop.eup %4571 }
 0x16f   : > { %v6076_v45 = vpop.eup %4573 }
 0x170   : > { %10065 = vst [vmem:[#allocation200_spill] sm:$0xff] %v6076_v45  ;;  %v6078_v14 = vpop.eup %4575 }
 0x171   : > { %v6080_v7 = vpop.eup %4577 }
 0x172   : > { %10066 = vst [vmem:[#allocation201_spill] sm:$0xff] %v6080_v7  ;;  %v6082_v2 = vpop.eup %4579 }
 0x173   : > { %v6084_v63 = vpop.eup %4581 }
 0x174   : > { %10067 = vst [vmem:[#allocation202_spill] sm:$0xff] %v6084_v63  ;;  %v6086_v52 = vpop.eup %4583  ;;  %1464 = sbr.rel (%p4303_p0) target bundleno = 705 (0x2c1), region = 82 }
 0x175   : > { %v6088_v22 = vpop.eup %4585 }
 0x176   : > { %10068 = vst [vmem:[#allocation203_spill] sm:$0xff] %v6088_v22  ;;  %v6090_v57 = vpop.eup %4587 }
 0x177   : > { %v6092_v21 = vpop.eup %4589 }
 0x178   : > { %10069 = vst [vmem:[#allocation204_spill] sm:$0xff] %v6092_v21  ;;  %v6094_v33 = vpop.eup %4591 }
 0x179   : > { %v6096_v54 = vpop.eup %4593 }
 0x17a   : > { %10070 = vst [vmem:[#allocation205_spill] sm:$0xff] %v6096_v54 }
 0x17b   : > { %1468 = sbr.rel (%p4304_p1) target bundleno = 428 (0x1ac), region = 86  ;;  %vm1469_vm10 = vcmask (!%p4304_p1), 7168   ;;  %v4990_v29 = vmov (!%p4304_p1), 0.0  }
 0x17c   : > { %1470 = vst.msk [vmem:[#allocation2] sm:$0xff] (!%p4304_p1), %vm1469_vm10, %v4990_v29  ;;  %1471 = vst.msk [vmem:[#allocation2 + $0x8] sm:$0xff] (!%p4304_p1), %vm1469_vm10, %v4990_v29 }
 0x17d   : > { %1472 = vst.msk [vmem:[#allocation2 + $0x10] sm:$0xff] (!%p4304_p1), %vm1469_vm10, %v4990_v29  ;;  %1473 = vst.msk [vmem:[#allocation2 + $0x18] sm:$0xff] (!%p4304_p1), %vm1469_vm10, %v4990_v29 }
 0x17e   : > { %1474 = vst.msk [vmem:[#allocation2 + $0x20] sm:$0xff] (!%p4304_p1), %vm1469_vm10, %v4990_v29  ;;  %1475 = vst.msk [vmem:[#allocation2 + $0x28] sm:$0xff] (!%p4304_p1), %vm1469_vm10, %v4990_v29 }
 0x17f   : > { %1476 = vst.msk [vmem:[#allocation2 + $0x30] sm:$0xff] (!%p4304_p1), %vm1469_vm10, %v4990_v29  ;;  %1477 = vst.msk [vmem:[#allocation2 + $0x38] sm:$0xff] (!%p4304_p1), %vm1469_vm10, %v4990_v29 }
 0x180   : > { %1478 = vst.msk [vmem:[#allocation2 + $0x40] sm:$0xff] (!%p4304_p1), %vm1469_vm10, %v4990_v29  ;;  %1479 = vst.msk [vmem:[#allocation2 + $0x48] sm:$0xff] (!%p4304_p1), %vm1469_vm10, %v4990_v29 }
 0x181   : > { %1480 = vst.msk [vmem:[#allocation2 + $0x50] sm:$0xff] (!%p4304_p1), %vm1469_vm10, %v4990_v29  ;;  %1481 = vst.msk [vmem:[#allocation2 + $0x58] sm:$0xff] (!%p4304_p1), %vm1469_vm10, %v4990_v29 }
 0x182   : > { %1482 = vst.msk [vmem:[#allocation2 + $0x60] sm:$0xff] %vm1469_vm10, %v4990_v29  ;;  %1483 = vst.msk [vmem:[#allocation2 + $0x68] sm:$0xff] %vm1469_vm10, %v4990_v29 }
 0x183   : > { %1484 = vst.msk [vmem:[#allocation2 + $0x70] sm:$0xff] %vm1469_vm10, %v4990_v29  ;;  %1485 = vst.msk [vmem:[#allocation2 + $0x78] sm:$0xff] %vm1469_vm10, %v4990_v29 }
 0x184   : > { %1486 = vst.msk [vmem:[#allocation2 + $0x80] sm:$0xff] %vm1469_vm10, %v4990_v29  ;;  %1487 = vst.msk [vmem:[#allocation2 + $0x88] sm:$0xff] %vm1469_vm10, %v4990_v29 }
 0x185   : > { %1488 = vst.msk [vmem:[#allocation2 + $0x90] sm:$0xff] %vm1469_vm10, %v4990_v29  ;;  %1489 = vst.msk [vmem:[#allocation2 + $0x98] sm:$0xff] %vm1469_vm10, %v4990_v29 }
 0x186   : > { %1490 = vst.msk [vmem:[#allocation2 + $0xa0] sm:$0xff] %vm1469_vm10, %v4990_v29  ;;  %1491 = vst.msk [vmem:[#allocation2 + $0xa8] sm:$0xff] %vm1469_vm10, %v4990_v29 }
 0x187   : > { %1492 = vst.msk [vmem:[#allocation2 + $0xb0] sm:$0xff] %vm1469_vm10, %v4990_v29  ;;  %1493 = vst.msk [vmem:[#allocation2 + $0xb8] sm:$0xff] %vm1469_vm10, %v4990_v29 }
 0x188   : > { %1494 = vst.msk [vmem:[#allocation2 + $0xc0] sm:$0xff] %vm1469_vm10, %v4990_v29  ;;  %1495 = vst.msk [vmem:[#allocation2 + $0xc8] sm:$0xff] %vm1469_vm10, %v4990_v29 }
 0x189   : > { %1496 = vst.msk [vmem:[#allocation2 + $0xd0] sm:$0xff] %vm1469_vm10, %v4990_v29  ;;  %1497 = vst.msk [vmem:[#allocation2 + $0xd8] sm:$0xff] %vm1469_vm10, %v4990_v29 }
 0x18a   : > { %1498 = vst.msk [vmem:[#allocation2 + $0xe0] sm:$0xff] %vm1469_vm10, %v4990_v29  ;;  %1499 = vst.msk [vmem:[#allocation2 + $0xe8] sm:$0xff] %vm1469_vm10, %v4990_v29 }
 0x18b   : > { %1500 = vst.msk [vmem:[#allocation2 + $0xf0] sm:$0xff] %vm1469_vm10, %v4990_v29  ;;  %1501 = vst.msk [vmem:[#allocation2 + $0xf8] sm:$0xff] %vm1469_vm10, %v4990_v29 }
 0x18c   : > { %1502 = vst.msk [vmem:[#allocation3] sm:$0xff] %vm1469_vm10, %v4990_v29  ;;  %1503 = vst.msk [vmem:[#allocation3 + $0x8] sm:$0xff] %vm1469_vm10, %v4990_v29 }
 0x18d   : > { %1504 = vst.msk [vmem:[#allocation3 + $0x10] sm:$0xff] %vm1469_vm10, %v4990_v29  ;;  %1505 = vst.msk [vmem:[#allocation3 + $0x18] sm:$0xff] %vm1469_vm10, %v4990_v29 }
 0x18e   : > { %1506 = vst.msk [vmem:[#allocation3 + $0x20] sm:$0xff] %vm1469_vm10, %v4990_v29  ;;  %1507 = vst.msk [vmem:[#allocation3 + $0x28] sm:$0xff] %vm1469_vm10, %v4990_v29 }
 0x18f   : > { %1508 = vst.msk [vmem:[#allocation3 + $0x30] sm:$0xff] %vm1469_vm10, %v4990_v29  ;;  %1509 = vst.msk [vmem:[#allocation3 + $0x38] sm:$0xff] %vm1469_vm10, %v4990_v29 }
 0x190   : > { %1510 = vst.msk [vmem:[#allocation3 + $0x40] sm:$0xff] %vm1469_vm10, %v4990_v29  ;;  %1511 = vst.msk [vmem:[#allocation3 + $0x48] sm:$0xff] %vm1469_vm10, %v4990_v29 }
 0x191   : > { %1512 = vst.msk [vmem:[#allocation3 + $0x50] sm:$0xff] %vm1469_vm10, %v4990_v29  ;;  %1513 = vst.msk [vmem:[#allocation3 + $0x58] sm:$0xff] %vm1469_vm10, %v4990_v29 }
 0x192   : > { %1514 = vst.msk [vmem:[#allocation3 + $0x60] sm:$0xff] %vm1469_vm10, %v4990_v29  ;;  %1515 = vst.msk [vmem:[#allocation3 + $0x68] sm:$0xff] %vm1469_vm10, %v4990_v29 }
 0x193   : > { %1516 = vst.msk [vmem:[#allocation3 + $0x70] sm:$0xff] %vm1469_vm10, %v4990_v29  ;;  %1517 = vst.msk [vmem:[#allocation3 + $0x78] sm:$0xff] %vm1469_vm10, %v4990_v29 }
 0x194   : > { %1518 = vst.msk [vmem:[#allocation3 + $0x80] sm:$0xff] %vm1469_vm10, %v4990_v29  ;;  %1519 = vst.msk [vmem:[#allocation3 + $0x88] sm:$0xff] %vm1469_vm10, %v4990_v29 }
 0x195   : > { %1520 = vst.msk [vmem:[#allocation3 + $0x90] sm:$0xff] %vm1469_vm10, %v4990_v29  ;;  %1521 = vst.msk [vmem:[#allocation3 + $0x98] sm:$0xff] %vm1469_vm10, %v4990_v29 }
 0x196   : > { %1522 = vst.msk [vmem:[#allocation3 + $0xa0] sm:$0xff] %vm1469_vm10, %v4990_v29  ;;  %1523 = vst.msk [vmem:[#allocation3 + $0xa8] sm:$0xff] %vm1469_vm10, %v4990_v29 }
 0x197   : > { %1524 = vst.msk [vmem:[#allocation3 + $0xb0] sm:$0xff] %vm1469_vm10, %v4990_v29  ;;  %1525 = vst.msk [vmem:[#allocation3 + $0xb8] sm:$0xff] %vm1469_vm10, %v4990_v29 }
 0x198   : > { %1526 = vst.msk [vmem:[#allocation3 + $0xc0] sm:$0xff] %vm1469_vm10, %v4990_v29  ;;  %1527 = vst.msk [vmem:[#allocation3 + $0xc8] sm:$0xff] %vm1469_vm10, %v4990_v29 }
 0x199   : > { %1528 = vst.msk [vmem:[#allocation3 + $0xd0] sm:$0xff] %vm1469_vm10, %v4990_v29  ;;  %1529 = vst.msk [vmem:[#allocation3 + $0xd8] sm:$0xff] %vm1469_vm10, %v4990_v29 }
 0x19a   : > { %1530 = vst.msk [vmem:[#allocation3 + $0xe0] sm:$0xff] %vm1469_vm10, %v4990_v29  ;;  %1531 = vst.msk [vmem:[#allocation3 + $0xe8] sm:$0xff] %vm1469_vm10, %v4990_v29 }
 0x19b   : > { %1532 = vst.msk [vmem:[#allocation3 + $0xf0] sm:$0xff] %vm1469_vm10, %v4990_v29  ;;  %1533 = vst.msk [vmem:[#allocation3 + $0xf8] sm:$0xff] %vm1469_vm10, %v4990_v29 }
 0x19c   : > { %1534 = vst.msk [vmem:[#allocation4] sm:$0xff] %vm1469_vm10, %v4990_v29  ;;  %1535 = vst.msk [vmem:[#allocation4 + $0x8] sm:$0xff] %vm1469_vm10, %v4990_v29 }
 0x19d   : > { %1536 = vst.msk [vmem:[#allocation4 + $0x10] sm:$0xff] %vm1469_vm10, %v4990_v29  ;;  %1537 = vst.msk [vmem:[#allocation4 + $0x18] sm:$0xff] %vm1469_vm10, %v4990_v29 }
 0x19e   : > { %1538 = vst.msk [vmem:[#allocation4 + $0x20] sm:$0xff] %vm1469_vm10, %v4990_v29  ;;  %1539 = vst.msk [vmem:[#allocation4 + $0x28] sm:$0xff] %vm1469_vm10, %v4990_v29 }
 0x19f   : > { %1540 = vst.msk [vmem:[#allocation4 + $0x30] sm:$0xff] %vm1469_vm10, %v4990_v29  ;;  %1541 = vst.msk [vmem:[#allocation4 + $0x38] sm:$0xff] %vm1469_vm10, %v4990_v29 }
 0x1a0   : > { %1542 = vst.msk [vmem:[#allocation4 + $0x40] sm:$0xff] %vm1469_vm10, %v4990_v29  ;;  %1543 = vst.msk [vmem:[#allocation4 + $0x48] sm:$0xff] %vm1469_vm10, %v4990_v29 }
 0x1a1   : > { %1544 = vst.msk [vmem:[#allocation4 + $0x50] sm:$0xff] %vm1469_vm10, %v4990_v29  ;;  %1545 = vst.msk [vmem:[#allocation4 + $0x58] sm:$0xff] %vm1469_vm10, %v4990_v29 }
 0x1a2   : > { %1546 = vst.msk [vmem:[#allocation4 + $0x60] sm:$0xff] %vm1469_vm10, %v4990_v29  ;;  %1547 = vst.msk [vmem:[#allocation4 + $0x68] sm:$0xff] %vm1469_vm10, %v4990_v29 }
 0x1a3   : > { %1548 = vst.msk [vmem:[#allocation4 + $0x70] sm:$0xff] %vm1469_vm10, %v4990_v29  ;;  %1549 = vst.msk [vmem:[#allocation4 + $0x78] sm:$0xff] %vm1469_vm10, %v4990_v29 }
 0x1a4   : > { %1550 = vst.msk [vmem:[#allocation4 + $0x80] sm:$0xff] %vm1469_vm10, %v4990_v29  ;;  %1551 = vst.msk [vmem:[#allocation4 + $0x88] sm:$0xff] %vm1469_vm10, %v4990_v29 }
 0x1a5   : > { %1552 = vst.msk [vmem:[#allocation4 + $0x90] sm:$0xff] %vm1469_vm10, %v4990_v29  ;;  %1553 = vst.msk [vmem:[#allocation4 + $0x98] sm:$0xff] %vm1469_vm10, %v4990_v29 }
 0x1a6   : > { %1554 = vst.msk [vmem:[#allocation4 + $0xa0] sm:$0xff] %vm1469_vm10, %v4990_v29  ;;  %1555 = vst.msk [vmem:[#allocation4 + $0xa8] sm:$0xff] %vm1469_vm10, %v4990_v29 }
 0x1a7   : > { %1556 = vst.msk [vmem:[#allocation4 + $0xb0] sm:$0xff] %vm1469_vm10, %v4990_v29  ;;  %1557 = vst.msk [vmem:[#allocation4 + $0xb8] sm:$0xff] %vm1469_vm10, %v4990_v29 }
 0x1a8   : > { %1558 = vst.msk [vmem:[#allocation4 + $0xc0] sm:$0xff] %vm1469_vm10, %v4990_v29  ;;  %1559 = vst.msk [vmem:[#allocation4 + $0xc8] sm:$0xff] %vm1469_vm10, %v4990_v29 }
 0x1a9   : > { %1560 = vst.msk [vmem:[#allocation4 + $0xd0] sm:$0xff] %vm1469_vm10, %v4990_v29  ;;  %1561 = vst.msk [vmem:[#allocation4 + $0xd8] sm:$0xff] %vm1469_vm10, %v4990_v29 }
 0x1aa   : > { %1562 = vst.msk [vmem:[#allocation4 + $0xe0] sm:$0xff] %vm1469_vm10, %v4990_v29  ;;  %1563 = vst.msk [vmem:[#allocation4 + $0xe8] sm:$0xff] %vm1469_vm10, %v4990_v29 }
 0x1ab   : > { %1564 = vst.msk [vmem:[#allocation4 + $0xf0] sm:$0xff] %vm1469_vm10, %v4990_v29  ;;  %1565 = vst.msk [vmem:[#allocation4 + $0xf8] sm:$0xff] %vm1469_vm10, %v4990_v29 }
 0x1ac PF: > { %vm4991_vm14 = vmmov 1   ;;  %v4992_v22 = vmov 0  }
 0x1ad   : > { %vm1570_vm9 = vmxor %vm9653_vm0, %vm4991_vm14  ;;  %v1630_v63 = vsel %vm9655_vm15, 1, %v4992_v22 }
 0x1ae   : > { %vm1571_vm12 = vmxor %vm9654_vm1, %vm4991_vm14  ;;  %v1634_v54 = vrot.slane %v1630_v63, %v5511_v42  ;;  %v1638_v29 = vrot.slane %v1630_v63, %v5513_v16 }
 0x1af   : > { %vm1566_vm10 = vmxor %vm9656_vm2, %vm4991_vm14 }
 0x1b0   : > { %vm6308_vm13 = vcmp.eq.s32.totalorder %v1634_v54, 1  ;;  %vm6312_vm0 = vcmp.eq.s32.totalorder %v1638_v29, 1  ;;  %vm1567_vm1 = vmxor %vm1046_vm3, %vm4991_vm14 }
 0x1b1   : > { %vm1645_vm15 = vmand %vm6308_vm13, %vm1570_vm9 }
 0x1b2   : > { %vm1646_vm11 = vmand %vm6312_vm0, %vm1571_vm12  ;;  %v1741_v54 = vsel %vm1645_vm15, %v5844_v40, 0.0 }
 0x1b3   : > { %v1742_v63 = vsel %vm1646_vm11, %v5850_v41, 0.0  ;;  %vm1641_vm2 = vmand %vm6308_vm13, %vm1566_vm10 }
 0x1b4   : > { %v1807_v29 = vadd.f32 %v1742_v63, %v1741_v54  ;;  %vm1642_vm8 = vmand %vm6312_vm0, %vm1567_vm1  ;;  %v1737_v9 = vsel %vm1641_vm2, %v5800_v47, 0.0 }
 0x1b5   : > { %v1738_v10 = vsel %vm1642_vm8, %v5806_v32, 0.0  ;;  %vm1572_vm9 = vmxor %vm1051_vm4, %vm4991_vm14 }
 0x1b6   : > { %1808 = vadd.xlane.f32.xlu1 %v1807_v29  ;;  %v1801_v40 = vadd.f32 %v1738_v10, %v1737_v9  ;;  %vm1573_vm11 = vmxor %vm1052_vm5, %vm4991_vm14 }
 0x1b7   : > { %vm1647_vm12 = vmand %vm6308_vm13, %vm1572_vm9  ;;  %vm10075_vm9 = vcmp.eq.s32.totalorder %v5557_v5, %v5527_v6 }
 0x1b8   : > { %1802 = vadd.xlane.f32.xlu0 %v1801_v40  ;;  %vm1648_vm1 = vmand %vm6312_vm0, %vm1573_vm11  ;;  %v1743_v54 = vsel %vm1647_vm12, %v5864_v61, 0.0  ;;  %vm10076_vm12 = vcmp.eq.s32.totalorder %v5557_v5, %v5531_v38 }
 0x1b9   : > { %v1744_v63 = vsel %vm1648_vm1, %v5877_v50, 0.0  ;;  %vm1568_vm2 = vmxor %vm1047_vm6, %vm4991_vm14 }
 0x1ba   : > { %v1810_v10 = vadd.f32 %v1744_v63, %v1743_v54  ;;  %vm1569_vm8 = vmxor %vm1048_vm7, %vm4991_vm14 }
 0x1bb   : > { %vm1643_vm15 = vmand %vm6308_vm13, %vm1568_vm2 }
 0x1bc   : > { %1811 = vadd.xlane.f32.xlu1 %v1810_v10  ;;  %vm1644_vm10 = vmand %vm6312_vm0, %vm1569_vm8  ;;  %v1739_v9 = vsel %vm1643_vm15, %v5820_v51, 0.0  ;;  %vm10077_vm15 = vcmp.eq.s32.totalorder %v5559_v31, %v5527_v6 }
 0x1bd   : > { %v1740_v40 = vsel %vm1644_vm10, %v5833_v13, 0.0  ;;  %vm1576_vm11 = vmxor %vm10075_vm9, %vm4991_vm14  ;;  %vm10078_vm9 = vcmp.eq.s32.totalorder %v5559_v31, %v5531_v38 }
 0x1be   : > { %v1804_v29 = vadd.f32 %v1740_v40, %v1739_v9  ;;  %vm1577_vm1 = vmxor %vm10076_vm12, %vm4991_vm14 }
 0x1bf   : > { %vm1651_vm2 = vmand %vm6308_vm13, %vm1576_vm11 }
 0x1c0   : > { %1805 = vadd.xlane.f32.xlu0 %v1804_v29  ;;  %vm1652_vm8 = vmand %vm6312_vm0, %vm1577_vm1  ;;  %v1747_v54 = vsel %vm1651_vm2, %v5908_v34, 0.0  ;;  %vm10079_vm2 = vcmp.eq.s32.totalorder %v5569_v30, %v5527_v6 }
 0x1c1   : > { %v1748_v63 = vsel %vm1652_vm8, %v5921_v58, 0.0  ;;  %vm1574_vm10 = vmxor %vm10077_vm15, %vm4991_vm14  ;;  %vm10080_vm15 = vcmp.eq.s32.totalorder %v5569_v30, %v5531_v38 }
 0x1c2   : > { %v1816_v10 = vadd.f32 %v1748_v63, %v1747_v54  ;;  %vm1575_vm12 = vmxor %vm10078_vm9, %vm4991_vm14 }
 0x1c3   : > { %vm1649_vm11 = vmand %vm6308_vm13, %vm1574_vm10 }
 0x1c4   : > { %1817 = vadd.xlane.f32.xlu1 %v1816_v10  ;;  %vm1650_vm1 = vmand %vm6312_vm0, %vm1575_vm12  ;;  %v1745_v9 = vsel %vm1649_vm11, %v5888_v53, 0.0  ;;  %vm10081_vm11 = vcmp.eq.s32.totalorder %v5571_v27, %v5527_v6 }
 0x1c5   : > { %v1746_v40 = vsel %vm1650_vm1, %v5894_v28, 0.0  ;;  %vm1580_vm8 = vmxor %vm10079_vm2, %vm4991_vm14  ;;  %vm10082_vm2 = vcmp.eq.s32.totalorder %v5571_v27, %v5531_v38 }
 0x1c6   : > { %v1813_v29 = vadd.f32 %v1746_v40, %v1745_v9  ;;  %vm1581_vm9 = vmxor %vm10080_vm15, %vm4991_vm14 }
 0x1c7   : > { %vm1655_vm10 = vmand %vm6308_vm13, %vm1580_vm8 }
 0x1c8   : > { %1814 = vadd.xlane.f32.xlu0 %v1813_v29  ;;  %vm1656_vm12 = vmand %vm6312_vm0, %vm1581_vm9  ;;  %v1751_v54 = vsel %vm1655_vm10, %v5952_v59, 0.0  ;;  %vm10083_vm10 = vcmp.eq.s32.totalorder %v5581_v26, %v5527_v6 }
 0x1c9   : > { %v1752_v63 = vsel %vm1656_vm12, %v5965_v49, 0.0  ;;  %vm1578_vm1 = vmxor %vm10081_vm11, %vm4991_vm14  ;;  %vm10084_vm11 = vcmp.eq.s32.totalorder %v5581_v26, %v5531_v38 }
 0x1ca   : > { %v1822_v10 = vadd.f32 %v1752_v63, %v1751_v54  ;;  %vm1579_vm15 = vmxor %vm10082_vm2, %vm4991_vm14 }
 0x1cb   : > { %vm1653_vm8 = vmand %vm6308_vm13, %vm1578_vm1 }
 0x1cc   : > { %1823 = vadd.xlane.f32.xlu1 %v1822_v10  ;;  %vm1654_vm9 = vmand %vm6312_vm0, %vm1579_vm15  ;;  %v1749_v9 = vsel %vm1653_vm8, %v5932_v1, 0.0  ;;  %vm10085_vm8 = vcmp.eq.s32.totalorder %v5583_v19, %v5527_v6 }
 0x1cd   : > { %v1750_v40 = vsel %vm1654_vm9, %v5938_v24, 0.0  ;;  %vm1584_vm12 = vmxor %vm10083_vm10, %vm4991_vm14  ;;  %vm10086_vm10 = vcmp.eq.s32.totalorder %v5583_v19, %v5531_v38 }
 0x1ce   : > { %v1819_v29 = vadd.f32 %v1750_v40, %v1749_v9  ;;  %vm1585_vm2 = vmxor %vm10084_vm11, %vm4991_vm14 }
 0x1cf   : > { %vm1659_vm1 = vmand %vm6308_vm13, %vm1584_vm12 }
 0x1d0   : > { %1820 = vadd.xlane.f32.xlu0 %v1819_v29  ;;  %vm1660_vm15 = vmand %vm6312_vm0, %vm1585_vm2  ;;  %v1755_v54 = vsel %vm1659_vm1, %v5996_v0, 0.0  ;;  %vm10087_vm1 = vcmp.eq.s32.totalorder %v5593_v18, %v5527_v6 }
 0x1d1   : > { %v1756_v63 = vsel %vm1660_vm15, %v6009_v55, 0.0  ;;  %vm1582_vm9 = vmxor %vm10085_vm8, %vm4991_vm14  ;;  %vm10088_vm8 = vcmp.eq.s32.totalorder %v5593_v18, %v5531_v38 }
 0x1d2   : > { %v1828_v10 = vadd.f32 %v1756_v63, %v1755_v54  ;;  %vm1583_vm11 = vmxor %vm10086_vm10, %vm4991_vm14 }
 0x1d3   : > { %vm1657_vm12 = vmand %vm6308_vm13, %vm1582_vm9 }
 0x1d4   : > { %1829 = vadd.xlane.f32.xlu1 %v1828_v10  ;;  %vm1658_vm2 = vmand %vm6312_vm0, %vm1583_vm11  ;;  %v1753_v9 = vsel %vm1657_vm12, %v5976_v37, 0.0  ;;  %vm10089_vm12 = vcmp.eq.s32.totalorder %v5595_v4, %v5527_v6 }
 0x1d5   : > { %v1754_v40 = vsel %vm1658_vm2, %v5982_v35, 0.0  ;;  %vm1588_vm15 = vmxor %vm10087_vm1, %vm4991_vm14  ;;  %vm10090_vm1 = vcmp.eq.s32.totalorder %v5595_v4, %v5531_v38 }
 0x1d6   : > { %v1825_v29 = vadd.f32 %v1754_v40, %v1753_v9  ;;  %vm1589_vm10 = vmxor %vm10088_vm8, %vm4991_vm14 }
 0x1d7   : > { %vm1663_vm9 = vmand %vm6308_vm13, %vm1588_vm15 }
 0x1d8   : > { %1826 = vadd.xlane.f32.xlu0 %v1825_v29  ;;  %vm1664_vm11 = vmand %vm6312_vm0, %vm1589_vm10  ;;  %v1759_v54 = vsel %vm1663_vm9, %v6040_v48, 0.0  ;;  %vm10091_vm9 = vcmp.eq.s32.totalorder %v5605_v11, %v5527_v6 }
 0x1d9   : > { %v1760_v63 = vsel %vm1664_vm11, %v6053_v62, 0.0  ;;  %vm1586_vm2 = vmxor %vm10089_vm12, %vm4991_vm14  ;;  %vm10092_vm12 = vcmp.eq.s32.totalorder %v5605_v11, %v5531_v38  ;;  %v10104_v11 = vld [vmem:[#allocation94_spill] sm:$0xff] }
 0x1da   : > { %v1834_v10 = vadd.f32 %v1760_v63, %v1759_v54  ;;  %vm1587_vm8 = vmxor %vm10090_vm1, %vm4991_vm14 }
 0x1db   : > { %vm1661_vm15 = vmand %vm6308_vm13, %vm1586_vm2 }
 0x1dc   : > { %1835 = vadd.xlane.f32.xlu1 %v1834_v10  ;;  %vm1662_vm10 = vmand %vm6312_vm0, %vm1587_vm8  ;;  %v1757_v9 = vsel %vm1661_vm15, %v6020_v56, 0.0  ;;  %vm10093_vm15 = vcmp.eq.s32.totalorder %v5607_v15, %v5527_v6 }
 0x1dd   : > { %v1758_v40 = vsel %vm1662_vm10, %v6026_v23, 0.0  ;;  %vm1592_vm11 = vmxor %vm10091_vm9, %vm4991_vm14  ;;  %vm10094_vm9 = vcmp.eq.s32.totalorder %v5607_v15, %v5531_v38 }
 0x1de   : > { %v1831_v29 = vadd.f32 %v1758_v40, %v1757_v9  ;;  %vm1593_vm1 = vmxor %vm10092_vm12, %vm4991_vm14 }
 0x1df   : > { %vm1667_vm2 = vmand %vm6308_vm13, %vm1592_vm11 }
 0x1e0   : > { %1832 = vadd.xlane.f32.xlu0 %v1831_v29  ;;  %vm1668_vm8 = vmand %vm6312_vm0, %vm1593_vm1  ;;  %v1763_v54 = vsel %vm1667_vm2, %v6074_v17, 0.0  ;;  %vm10095_vm2 = vcmp.eq.s32.totalorder %v5617_v3, %v5527_v6 }
 0x1e1   : > { %v1764_v63 = vsel %vm1668_vm8, %v6078_v14, 0.0  ;;  %vm1590_vm10 = vmxor %vm10093_vm15, %vm4991_vm14  ;;  %vm10096_vm15 = vcmp.eq.s32.totalorder %v5617_v3, %v5531_v38  ;;  %v10103_v3 = vld [vmem:[#allocation136_spill] sm:$0xff] }
 0x1e2   : > { %v1840_v10 = vadd.f32 %v1764_v63, %v1763_v54  ;;  %vm1591_vm12 = vmxor %vm10094_vm9, %vm4991_vm14 }
 0x1e3   : > { %vm1665_vm11 = vmand %vm6308_vm13, %vm1590_vm10 }
 0x1e4   : > { %1841 = vadd.xlane.f32.xlu1 %v1840_v10  ;;  %vm1666_vm1 = vmand %vm6312_vm0, %vm1591_vm12  ;;  %v1761_v9 = vsel %vm1665_vm11, %v6064_v20, 0.0  ;;  %vm10097_vm11 = vcmp.eq.s32.totalorder %v5619_v12, %v5527_v6 }
 0x1e5   : > { %v1762_v40 = vsel %vm1666_vm1, %v6070_v44, 0.0  ;;  %vm1596_vm8 = vmxor %vm10095_vm2, %vm4991_vm14  ;;  %vm10098_vm2 = vcmp.eq.s32.totalorder %v5619_v12, %v5531_v38 }
 0x1e6   : > { %v1837_v29 = vadd.f32 %v1762_v40, %v1761_v9  ;;  %vm1597_vm9 = vmxor %vm10096_vm15, %vm4991_vm14 }
 0x1e7   : > { %vm1671_vm10 = vmand %vm6308_vm13, %vm1596_vm8 }
 0x1e8   : > { %1838 = vadd.xlane.f32.xlu0 %v1837_v29  ;;  %vm1672_vm12 = vmand %vm6312_vm0, %vm1597_vm9  ;;  %v1767_v54 = vsel %vm1671_vm10, %v6090_v57, 0.0  ;;  %v10099_v29 = vld [vmem:[#allocation93_spill] sm:$0xff] }
 0x1e9   : > { %v1768_v63 = vsel %vm1672_vm12, %v6094_v33, 0.0  ;;  %vm1594_vm1 = vmxor %vm10097_vm11, %vm4991_vm14  ;;  %vm10100_vm10 = vcmp.eq.s32.totalorder %v10099_v29, %v5527_v6  ;;  %vm10101_vm11 = vcmp.eq.s32.totalorder %v10099_v29, %v5531_v38  ;;  %v10108_v29 = vld [vmem:[#allocation128_spill] sm:$0xff] }
 0x1ea   : > { %v1846_v10 = vadd.f32 %v1768_v63, %v1767_v54  ;;  %vm1595_vm15 = vmxor %vm10098_vm2, %vm4991_vm14  ;;  %v10102_v63 = vld [vmem:[#allocation132_spill] sm:$0xff] }
 0x1eb   : > { %vm1669_vm8 = vmand %vm6308_vm13, %vm1594_vm1 }
 0x1ec   : > { %1847 = vadd.xlane.f32.xlu1 %v1846_v10  ;;  %vm1670_vm9 = vmand %vm6312_vm0, %vm1595_vm15  ;;  %v1765_v9 = vsel %vm1669_vm8, %v6082_v2, 0.0  ;;  %vm10105_vm8 = vcmp.eq.s32.totalorder %v10104_v11, %v5527_v6 }
 0x1ed   : > { %v1766_v40 = vsel %vm1670_vm9, %v6086_v52, 0.0  ;;  %vm1600_vm12 = vmxor %vm10100_vm10, %vm4991_vm14  ;;  %vm10106_vm10 = vcmp.eq.s32.totalorder %v10104_v11, %v5531_v38  ;;  %v10112_v11 = vld [vmem:[#allocation145_spill] sm:$0xff] }
 0x1ee   : > { %v1843_v54 = vadd.f32 %v1766_v40, %v1765_v9  ;;  %vm1601_vm2 = vmxor %vm10101_vm11, %vm4991_vm14  ;;  %v10107_v40 = vld [vmem:[#allocation125_spill] sm:$0xff] }
 0x1ef   : > { %vm1675_vm1 = vmand %vm6308_vm13, %vm1600_vm12 }
 0x1f0   : > { %1844 = vadd.xlane.f32.xlu0 %v1843_v54  ;;  %vm1676_vm15 = vmand %vm6312_vm0, %vm1601_vm2  ;;  %v1771_v10 = vsel %vm1675_vm1, %v10102_v63, 0.0  ;;  %v10109_v63 = vld [vmem:[#allocation95_spill] sm:$0xff] }
 0x1f1   : > { %v1772_v12 = vsel %vm1676_vm15, %v10103_v3, 0.0  ;;  %vm1598_vm9 = vmxor %vm10105_vm8, %vm4991_vm14  ;;  %vm10110_vm1 = vcmp.eq.s32.totalorder %v10109_v63, %v5527_v6  ;;  %vm10111_vm8 = vcmp.eq.s32.totalorder %v10109_v63, %v5531_v38 }
 0x1f2   : > { %v1852_v9 = vadd.f32 %v1772_v12, %v1771_v10  ;;  %vm1599_vm11 = vmxor %vm10106_vm10, %vm4991_vm14 }
 0x1f3   : > { %vm1673_vm12 = vmand %vm6308_vm13, %vm1598_vm9 }
 0x1f4   : > { %1853 = vadd.xlane.f32.xlu1 %v1852_v9  ;;  %vm1674_vm2 = vmand %vm6312_vm0, %vm1599_vm11  ;;  %v1769_v3 = vsel %vm1673_vm12, %v10107_v40, 0.0  ;;  %v10113_v9 = vld [vmem:[#allocation149_spill] sm:$0xff] }
 0x1f5   : > { %v1770_v54 = vsel %vm1674_vm2, %v10108_v29, 0.0  ;;  %vm1604_vm15 = vmxor %vm10110_vm1, %vm4991_vm14  ;;  %v10114_v29 = vld [vmem:[#allocation96_spill] sm:$0xff] }
 0x1f6   : > { %v1849_v12 = vadd.f32 %v1770_v54, %v1769_v3  ;;  %vm1605_vm10 = vmxor %vm10111_vm8, %vm4991_vm14  ;;  %vm10115_vm12 = vcmp.eq.s32.totalorder %v10114_v29, %v5527_v6  ;;  %vm10116_vm1 = vcmp.eq.s32.totalorder %v10114_v29, %v5531_v38  ;;  %v10117_v54 = vld [vmem:[#allocation138_spill] sm:$0xff] }
 0x1f7   : > { %vm1679_vm9 = vmand %vm6308_vm13, %vm1604_vm15 }
 0x1f8   : > { %1850 = vadd.xlane.f32.xlu0 %v1849_v12  ;;  %vm1680_vm11 = vmand %vm6312_vm0, %vm1605_vm10  ;;  %v1775_v10 = vsel %vm1679_vm9, %v10112_v11, 0.0  ;;  %v10118_v12 = vld [vmem:[#allocation141_spill] sm:$0xff] }
 0x1f9   : > { %v1776_v40 = vsel %vm1680_vm11, %v10113_v9, 0.0  ;;  %vm1602_vm2 = vmxor %vm10115_vm12, %vm4991_vm14  ;;  %v10119_v9 = vld [vmem:[#allocation97_spill] sm:$0xff] }
 0x1fa   : > { %v1858_v3 = vadd.f32 %v1776_v40, %v1775_v10  ;;  %vm1603_vm8 = vmxor %vm10116_vm1, %vm4991_vm14  ;;  %vm10120_vm9 = vcmp.eq.s32.totalorder %v10119_v9, %v5527_v6  ;;  %vm10121_vm12 = vcmp.eq.s32.totalorder %v10119_v9, %v5531_v38  ;;  %v10122_v40 = vld [vmem:[#allocation157_spill] sm:$0xff] }
 0x1fb   : > { %vm1677_vm15 = vmand %vm6308_vm13, %vm1602_vm2 }
 0x1fc   : > { %1859 = vadd.xlane.f32.xlu1 %v1858_v3  ;;  %vm1678_vm10 = vmand %vm6312_vm0, %vm1603_vm8  ;;  %v1773_v63 = vsel %vm1677_vm15, %v10117_v54, 0.0  ;;  %v10123_v3 = vld [vmem:[#allocation161_spill] sm:$0xff] }
 0x1fd   : > { %v1774_v11 = vsel %vm1678_vm10, %v10118_v12, 0.0  ;;  %vm1608_vm11 = vmxor %vm10120_vm9, %vm4991_vm14  ;;  %v10124_v12 = vld [vmem:[#allocation98_spill] sm:$0xff] }
 0x1fe   : > { %v1855_v10 = vadd.f32 %v1774_v11, %v1773_v63  ;;  %vm1609_vm1 = vmxor %vm10121_vm12, %vm4991_vm14  ;;  %vm10125_vm15 = vcmp.eq.s32.totalorder %v10124_v12, %v5527_v6  ;;  %vm10126_vm9 = vcmp.eq.s32.totalorder %v10124_v12, %v5531_v38  ;;  %v10127_v11 = vld [vmem:[#allocation150_spill] sm:$0xff] }
 0x1ff   : > { %vm1683_vm2 = vmand %vm6308_vm13, %vm1608_vm11 }
 0x200   : > { %1856 = vadd.xlane.f32.xlu0 %v1855_v10  ;;  %vm1684_vm8 = vmand %vm6312_vm0, %vm1609_vm1  ;;  %v1779_v29 = vsel %vm1683_vm2, %v10122_v40, 0.0  ;;  %v10128_v10 = vld [vmem:[#allocation153_spill] sm:$0xff] }
 0x201   : > { %v1780_v54 = vsel %vm1684_vm8, %v10123_v3, 0.0  ;;  %vm1606_vm10 = vmxor %vm10125_vm15, %vm4991_vm14  ;;  %v10129_v3 = vld [vmem:[#allocation99_spill] sm:$0xff] }
 0x202   : > { %v1864_v63 = vadd.f32 %v1780_v54, %v1779_v29  ;;  %vm1607_vm12 = vmxor %vm10126_vm9, %vm4991_vm14  ;;  %vm10130_vm2 = vcmp.eq.s32.totalorder %v10129_v3, %v5527_v6  ;;  %vm10131_vm15 = vcmp.eq.s32.totalorder %v10129_v3, %v5531_v38  ;;  %v10132_v54 = vld [vmem:[#allocation169_spill] sm:$0xff] }
 0x203   : > { %vm1681_vm11 = vmand %vm6308_vm13, %vm1606_vm10 }
 0x204   : > { %1865 = vadd.xlane.f32.xlu1 %v1864_v63  ;;  %vm1682_vm1 = vmand %vm6312_vm0, %vm1607_vm12  ;;  %v1777_v9 = vsel %vm1681_vm11, %v10127_v11, 0.0  ;;  %v10133_v63 = vld [vmem:[#allocation173_spill] sm:$0xff] }
 0x205   : > { %v1778_v40 = vsel %vm1682_vm1, %v10128_v10, 0.0  ;;  %vm1612_vm8 = vmxor %vm10130_vm2, %vm4991_vm14  ;;  %v10134_v10 = vld [vmem:[#allocation100_spill] sm:$0xff] }
 0x206   : > { %v1861_v29 = vadd.f32 %v1778_v40, %v1777_v9  ;;  %vm1613_vm9 = vmxor %vm10131_vm15, %vm4991_vm14  ;;  %vm10135_vm11 = vcmp.eq.s32.totalorder %v10134_v10, %v5527_v6  ;;  %vm10136_vm2 = vcmp.eq.s32.totalorder %v10134_v10, %v5531_v38  ;;  %v10137_v40 = vld [vmem:[#allocation162_spill] sm:$0xff] }
 0x207   : > { %vm1687_vm10 = vmand %vm6308_vm13, %vm1612_vm8 }
 0x208   : > { %1862 = vadd.xlane.f32.xlu0 %v1861_v29  ;;  %vm1688_vm12 = vmand %vm6312_vm0, %vm1613_vm9  ;;  %v1783_v12 = vsel %vm1687_vm10, %v10132_v54, 0.0  ;;  %v10138_v29 = vld [vmem:[#allocation165_spill] sm:$0xff] }
 0x209   : > { %v1784_v11 = vsel %vm1688_vm12, %v10133_v63, 0.0  ;;  %vm1610_vm1 = vmxor %vm10135_vm11, %vm4991_vm14  ;;  %v10139_v63 = vld [vmem:[#allocation101_spill] sm:$0xff] }
 0x20a   : > { %v1870_v9 = vadd.f32 %v1784_v11, %v1783_v12  ;;  %vm1611_vm15 = vmxor %vm10136_vm2, %vm4991_vm14  ;;  %vm10140_vm10 = vcmp.eq.s32.totalorder %v10139_v63, %v5527_v6  ;;  %vm10141_vm11 = vcmp.eq.s32.totalorder %v10139_v63, %v5531_v38  ;;  %v10142_v11 = vld [vmem:[#allocation181_spill] sm:$0xff] }
 0x20b   : > { %vm1685_vm8 = vmand %vm6308_vm13, %vm1610_vm1 }
 0x20c   : > { %1871 = vadd.xlane.f32.xlu1 %v1870_v9  ;;  %vm1686_vm9 = vmand %vm6312_vm0, %vm1611_vm15  ;;  %v1781_v3 = vsel %vm1685_vm8, %v10137_v40, 0.0  ;;  %v10143_v9 = vld [vmem:[#allocation185_spill] sm:$0xff] }
 0x20d   : > { %v1782_v54 = vsel %vm1686_vm9, %v10138_v29, 0.0  ;;  %vm1616_vm12 = vmxor %vm10140_vm10, %vm4991_vm14  ;;  %v10144_v29 = vld [vmem:[#allocation102_spill] sm:$0xff] }
 0x20e   : > { %v1867_v12 = vadd.f32 %v1782_v54, %v1781_v3  ;;  %vm1617_vm2 = vmxor %vm10141_vm11, %vm4991_vm14  ;;  %vm10145_vm8 = vcmp.eq.s32.totalorder %v10144_v29, %v5527_v6  ;;  %vm10146_vm10 = vcmp.eq.s32.totalorder %v10144_v29, %v5531_v38  ;;  %v10147_v54 = vld [vmem:[#allocation174_spill] sm:$0xff] }
 0x20f   : > { %vm1691_vm1 = vmand %vm6308_vm13, %vm1616_vm12 }
 0x210   : > { %1868 = vadd.xlane.f32.xlu0 %v1867_v12  ;;  %vm1692_vm15 = vmand %vm6312_vm0, %vm1617_vm2  ;;  %v1787_v10 = vsel %vm1691_vm1, %v10142_v11, 0.0  ;;  %v10148_v12 = vld [vmem:[#allocation177_spill] sm:$0xff] }
 0x211   : > { %v1788_v40 = vsel %vm1692_vm15, %v10143_v9, 0.0  ;;  %vm1614_vm9 = vmxor %vm10145_vm8, %vm4991_vm14  ;;  %v10149_v9 = vld [vmem:[#allocation103_spill] sm:$0xff] }
 0x212   : > { %v1876_v3 = vadd.f32 %v1788_v40, %v1787_v10  ;;  %vm1615_vm11 = vmxor %vm10146_vm10, %vm4991_vm14  ;;  %vm10150_vm1 = vcmp.eq.s32.totalorder %v10149_v9, %v5527_v6  ;;  %vm10151_vm8 = vcmp.eq.s32.totalorder %v10149_v9, %v5531_v38 }
 0x213   : > { %vm1689_vm12 = vmand %vm6308_vm13, %vm1614_vm9 }
 0x214   : > { %1877 = vadd.xlane.f32.xlu1 %v1876_v3  ;;  %vm1690_vm2 = vmand %vm6312_vm0, %vm1615_vm11  ;;  %v1785_v63 = vsel %vm1689_vm12, %v10147_v54, 0.0  ;;  %v10152_v3 = vld [vmem:[#allocation104_spill] sm:$0xff] }
 0x215   : > { %v1786_v11 = vsel %vm1690_vm2, %v10148_v12, 0.0  ;;  %vm1620_vm15 = vmxor %vm10150_vm1, %vm4991_vm14  ;;  %vm10153_vm12 = vcmp.eq.s32.totalorder %v10152_v3, %v5527_v6  ;;  %vm10154_vm1 = vcmp.eq.s32.totalorder %v10152_v3, %v5531_v38 }
 0x216   : > { %v1873_v10 = vadd.f32 %v1786_v11, %v1785_v63  ;;  %vm1621_vm10 = vmxor %vm10151_vm8, %vm4991_vm14  ;;  %v10155_v63 = vld [vmem:[#allocation186_spill] sm:$0xff]  ;;  %v10156_v11 = vld [vmem:[#allocation189_spill] sm:$0xff] }
 0x217   : > { %vm1695_vm9 = vmand %vm6308_vm13, %vm1620_vm15 }
 0x218   : > { %1874 = vadd.xlane.f32.xlu0 %v1873_v10  ;;  %vm1696_vm11 = vmand %vm6312_vm0, %vm1621_vm10  ;;  %v1791_v40 = vsel %vm1695_vm9, %v6047_v25, 0.0  ;;  %v10157_v10 = vld [vmem:[#allocation105_spill] sm:$0xff] }
 0x219   : > { %v1792_v29 = vsel %vm1696_vm11, %v6061_v60, 0.0  ;;  %vm1618_vm2 = vmxor %vm10153_vm12, %vm4991_vm14  ;;  %vm10158_vm9 = vcmp.eq.s32.totalorder %v10157_v10, %v5527_v6  ;;  %vm10159_vm12 = vcmp.eq.s32.totalorder %v10157_v10, %v5531_v38 }
 0x21a   : > { %v1882_v54 = vadd.f32 %v1792_v29, %v1791_v40  ;;  %vm1619_vm8 = vmxor %vm10154_vm1, %vm4991_vm14 }
 0x21b   : > { %vm1693_vm15 = vmand %vm6308_vm13, %vm1618_vm2 }
 0x21c   : > { %1883 = vadd.xlane.f32.xlu1 %v1882_v54  ;;  %vm1694_vm10 = vmand %vm6312_vm0, %vm1619_vm8  ;;  %v1789_v12 = vsel %vm1693_vm15, %v10155_v63, 0.0  ;;  %v10160_v54 = vld [vmem:[#allocation106_spill] sm:$0xff] }
 0x21d   : > { %v1790_v9 = vsel %vm1694_vm10, %v10156_v11, 0.0  ;;  %vm1624_vm11 = vmxor %vm10158_vm9, %vm4991_vm14  ;;  %vm10161_vm15 = vcmp.eq.s32.totalorder %v10160_v54, %v5527_v6  ;;  %vm10162_vm9 = vcmp.eq.s32.totalorder %v10160_v54, %v5531_v38 }
 0x21e   : > { %v1879_v40 = vadd.f32 %v1790_v9, %v1789_v12  ;;  %vm1625_vm1 = vmxor %vm10159_vm12, %vm4991_vm14  ;;  %v10163_v9 = vld [vmem:[#allocation107_spill] sm:$0xff] }
 0x21f   : > { %vm1699_vm2 = vmand %vm6308_vm13, %vm1624_vm11 }
 0x220   : > { %1880 = vadd.xlane.f32.xlu0 %v1879_v40  ;;  %vm1700_vm8 = vmand %vm6312_vm0, %vm1625_vm1  ;;  %v1795_v29 = vsel %vm1699_vm2, %v6076_v45, 0.0  ;;  %vm10164_vm2 = vcmp.eq.s32.totalorder %v10163_v9, %v5527_v6  ;;  %v10166_v40 = vld [vmem:[#allocation204_spill] sm:$0xff]  ;;  %v1706_v45 = vld [vmem:[#allocation2 + $0x8] sm:$0xff] }
 0x221   : > { %v1796_v3 = vsel %vm1700_vm8, %v6080_v7, 0.0  ;;  %vm1622_vm10 = vmxor %vm10161_vm15, %vm4991_vm14  ;;  %vm10165_vm15 = vcmp.eq.s32.totalorder %v10163_v9, %v5531_v38  ;;  %v1708_v7 = vld [vmem:[#allocation2 + $0x18] sm:$0xff] }
 0x222   : > { %v1888_v63 = vadd.f32 %v1796_v3, %v1795_v29  ;;  %vm1623_vm12 = vmxor %vm10162_vm9, %vm4991_vm14  ;;  %v10167_v3 = vld [vmem:[#allocation205_spill] sm:$0xff] }
 0x223   : > { %vm1697_vm11 = vmand %vm6308_vm13, %vm1622_vm10 }
 0x224   : > { %1889 = vadd.xlane.f32.xlu1 %v1888_v63  ;;  %vm1698_vm1 = vmand %vm6312_vm0, %vm1623_vm12  ;;  %v1793_v12 = vsel %vm1697_vm11, %v6067_v36, 0.0  ;;  %v10168_v63 = vld [vmem:[#allocation108_spill] sm:$0xff] }
 0x225   : > { %v1794_v11 = vsel %vm1698_vm1, %v6072_v8, 0.0  ;;  %vm1628_vm8 = vmxor %vm10164_vm2, %vm4991_vm14  ;;  %vm10169_vm11 = vcmp.eq.s32.totalorder %v10168_v63, %v5527_v6  ;;  %vm10170_vm2 = vcmp.eq.s32.totalorder %v10168_v63, %v5531_v38  ;;  %v1707_v8 = vld [vmem:[#allocation2 + $0x10] sm:$0xff] }
 0x226   : > { %v1885_v10 = vadd.f32 %v1794_v11, %v1793_v12  ;;  %vm1629_vm9 = vmxor %vm10165_vm15, %vm4991_vm14  ;;  %v10171_v11 = vld [vmem:[#allocation202_spill] sm:$0xff] }
 0x227   : > { %vm1703_vm10 = vmand %vm6308_vm13, %vm1628_vm8 }
 0x228   : > { %1886 = vadd.xlane.f32.xlu0 %v1885_v10  ;;  %vm1704_vm12 = vmand %vm6312_vm0, %vm1629_vm9  ;;  %v1799_v29 = vsel %vm1703_vm10, %v10166_v40, 0.0  ;;  %v10172_v10 = vld [vmem:[#allocation203_spill] sm:$0xff]  ;;  %vm1929_vm10 = vcmask 7168  }
 0x229   : > { %v1800_v54 = vsel %vm1704_vm12, %v10167_v3, 0.0  ;;  %vm1626_vm1 = vmxor %vm10169_vm11, %vm4991_vm14 }
 0x22a   : > { %v1894_v12 = vadd.f32 %v1800_v54, %v1799_v29  ;;  %vm1627_vm15 = vmxor %vm10170_vm2, %vm4991_vm14  ;;  %v1705_v54 = vld [vmem:[#allocation2] sm:$0xff] }
 0x22b   : > { %vm1701_vm8 = vmand %vm6308_vm13, %vm1626_vm1 }
 0x22c   : > { %1895 = vadd.xlane.f32.xlu1 %v1894_v12  ;;  %vm1702_vm9 = vmand %vm6312_vm0, %vm1627_vm15  ;;  %v1797_v9 = vsel %vm1701_vm8, %v10171_v11, 0.0 }
 0x22d   : > { %v1798_v40 = vsel %vm1702_vm9, %v10172_v10, 0.0  ;;  %v1710_v10 = vld [vmem:[#allocation2 + $0x28] sm:$0xff] }
 0x22e   : > { %v1891_v3 = vadd.f32 %v1798_v40, %v1797_v9 }
 0x230   : > { %1892 = vadd.xlane.f32.xlu0 %v1891_v3 }
 0x243   : > { %v1809_v29 = vpop.xlane.xlu1 %1808 }
 0x244   : > { %v1899_v36 = vadd.f32 %v1809_v29, %v1707_v8  ;;  %v1709_v8 = vld [vmem:[#allocation2 + $0x20] sm:$0xff] }
 0x245   : > { %v1803_v63 = vpop.xlane.xlu0 %1802 }
 0x246   : > { %1932 = vst.msk [vmem:[#allocation2 + $0x10] sm:$0xff] %vm1929_vm10, %v1899_v36  ;;  %v1897_v21 = vadd.f32 %v1803_v63, %v1705_v54  ;;  %v1712_v54 = vld [vmem:[#allocation2 + $0x38] sm:$0xff] }
 0x248   : > { %1930 = vst.msk [vmem:[#allocation2] sm:$0xff] %vm1929_vm10, %v1897_v21  ;;  %v1711_v21 = vld [vmem:[#allocation2 + $0x30] sm:$0xff] }
 0x249   : > { %v1812_v22 = vpop.xlane.xlu1 %1811 }
 0x24a   : > { %v1900_v12 = vadd.f32 %v1812_v22, %v1708_v7 }
 0x24c   : > { %1933 = vst.msk [vmem:[#allocation2 + $0x18] sm:$0xff] %vm1929_vm10, %v1900_v12  ;;  %v1714_v12 = vld [vmem:[#allocation2 + $0x48] sm:$0xff] }
 0x24d   : > { %v1806_v11 = vpop.xlane.xlu0 %1805 }
 0x24e   : > { %v1898_v9 = vadd.f32 %v1806_v11, %v1706_v45 }
 0x250   : > { %1931 = vst.msk [vmem:[#allocation2 + $0x8] sm:$0xff] %vm1929_vm10, %v1898_v9 }
 0x251   : > { %v1818_v40 = vpop.xlane.xlu1 %1817 }
 0x252   : > { %v1902_v3 = vadd.f32 %v1818_v40, %v1710_v10  ;;  %v1713_v10 = vld [vmem:[#allocation2 + $0x40] sm:$0xff] }
 0x254   : > { %1935 = vst.msk [vmem:[#allocation2 + $0x28] sm:$0xff] %vm1929_vm10, %v1902_v3 }
 0x255   : > { %v1815_v36 = vpop.xlane.xlu0 %1814 }
 0x256   : > { %v1901_v29 = vadd.f32 %v1815_v36, %v1709_v8  ;;  %v1716_v8 = vld [vmem:[#allocation2 + $0x58] sm:$0xff] }
 0x258   : > { %1934 = vst.msk [vmem:[#allocation2 + $0x20] sm:$0xff] %vm1929_vm10, %v1901_v29 }
 0x259   : > { %v1824_v63 = vpop.xlane.xlu1 %1823 }
 0x25a   : > { %v1904_v7 = vadd.f32 %v1824_v63, %v1712_v54  ;;  %v1715_v54 = vld [vmem:[#allocation2 + $0x50] sm:$0xff] }
 0x25c   : > { %1937 = vst.msk [vmem:[#allocation2 + $0x38] sm:$0xff] %vm1929_vm10, %v1904_v7 }
 0x25d   : > { %v1821_v22 = vpop.xlane.xlu0 %1820 }
 0x25e   : > { %v1903_v45 = vadd.f32 %v1821_v22, %v1711_v21  ;;  %v1718_v21 = vld [vmem:[#allocation2 + $0x68] sm:$0xff] }
 0x260   : > { %1936 = vst.msk [vmem:[#allocation2 + $0x30] sm:$0xff] %vm1929_vm10, %v1903_v45 }
 0x261   : > { %v1830_v11 = vpop.xlane.xlu1 %1829 }
 0x262   : > { %v1906_v9 = vadd.f32 %v1830_v11, %v1714_v12  ;;  %v1717_v12 = vld [vmem:[#allocation2 + $0x60] sm:$0xff] }
 0x264   : > { %1939 = vst.msk [vmem:[#allocation2 + $0x48] sm:$0xff] %vm1929_vm10, %v1906_v9 }
 0x265   : > { %v1827_v40 = vpop.xlane.xlu0 %1826 }
 0x266   : > { %v1905_v3 = vadd.f32 %v1827_v40, %v1713_v10  ;;  %v1720_v10 = vld [vmem:[#allocation2 + $0x78] sm:$0xff] }
 0x268   : > { %1938 = vst.msk [vmem:[#allocation2 + $0x40] sm:$0xff] %vm1929_vm10, %v1905_v3 }
 0x269   : > { %v1836_v36 = vpop.xlane.xlu1 %1835 }
 0x26a   : > { %v1908_v29 = vadd.f32 %v1836_v36, %v1716_v8  ;;  %v1719_v8 = vld [vmem:[#allocation2 + $0x70] sm:$0xff] }
 0x26c   : > { %1941 = vst.msk [vmem:[#allocation2 + $0x58] sm:$0xff] %vm1929_vm10, %v1908_v29 }
 0x26d   : > { %v1833_v63 = vpop.xlane.xlu0 %1832 }
 0x26e   : > { %v1907_v7 = vadd.f32 %v1833_v63, %v1715_v54  ;;  %v1722_v54 = vld [vmem:[#allocation2 + $0x88] sm:$0xff] }
 0x270   : > { %1940 = vst.msk [vmem:[#allocation2 + $0x50] sm:$0xff] %vm1929_vm10, %v1907_v7 }
 0x271   : > { %v1842_v22 = vpop.xlane.xlu1 %1841 }
 0x272   : > { %v1910_v45 = vadd.f32 %v1842_v22, %v1718_v21  ;;  %v1721_v21 = vld [vmem:[#allocation2 + $0x80] sm:$0xff] }
 0x274   : > { %1943 = vst.msk [vmem:[#allocation2 + $0x68] sm:$0xff] %vm1929_vm10, %v1910_v45 }
 0x275   : > { %v1839_v11 = vpop.xlane.xlu0 %1838 }
 0x276   : > { %v1909_v9 = vadd.f32 %v1839_v11, %v1717_v12  ;;  %v1724_v12 = vld [vmem:[#allocation2 + $0x98] sm:$0xff] }
 0x278   : > { %1942 = vst.msk [vmem:[#allocation2 + $0x60] sm:$0xff] %vm1929_vm10, %v1909_v9 }
 0x279   : > { %v1848_v40 = vpop.xlane.xlu1 %1847 }
 0x27a   : > { %v1912_v3 = vadd.f32 %v1848_v40, %v1720_v10  ;;  %v1723_v10 = vld [vmem:[#allocation2 + $0x90] sm:$0xff] }
 0x27c   : > { %1945 = vst.msk [vmem:[#allocation2 + $0x78] sm:$0xff] %vm1929_vm10, %v1912_v3 }
 0x27d   : > { %v1845_v36 = vpop.xlane.xlu0 %1844 }
 0x27e   : > { %v1911_v29 = vadd.f32 %v1845_v36, %v1719_v8  ;;  %v1726_v8 = vld [vmem:[#allocation2 + $0xa8] sm:$0xff] }
 0x280   : > { %1944 = vst.msk [vmem:[#allocation2 + $0x70] sm:$0xff] %vm1929_vm10, %v1911_v29 }
 0x281   : > { %v1854_v63 = vpop.xlane.xlu1 %1853 }
 0x282   : > { %v1914_v7 = vadd.f32 %v1854_v63, %v1722_v54  ;;  %v1725_v54 = vld [vmem:[#allocation2 + $0xa0] sm:$0xff] }
 0x284   : > { %1947 = vst.msk [vmem:[#allocation2 + $0x88] sm:$0xff] %vm1929_vm10, %v1914_v7 }
 0x285   : > { %v1851_v22 = vpop.xlane.xlu0 %1850 }
 0x286   : > { %v1913_v45 = vadd.f32 %v1851_v22, %v1721_v21  ;;  %v1728_v21 = vld [vmem:[#allocation2 + $0xb8] sm:$0xff] }
 0x288   : > { %1946 = vst.msk [vmem:[#allocation2 + $0x80] sm:$0xff] %vm1929_vm10, %v1913_v45 }
 0x289   : > { %v1860_v11 = vpop.xlane.xlu1 %1859 }
 0x28a   : > { %v1916_v9 = vadd.f32 %v1860_v11, %v1724_v12  ;;  %v1727_v12 = vld [vmem:[#allocation2 + $0xb0] sm:$0xff] }
 0x28c   : > { %1949 = vst.msk [vmem:[#allocation2 + $0x98] sm:$0xff] %vm1929_vm10, %v1916_v9 }
 0x28d   : > { %v1857_v40 = vpop.xlane.xlu0 %1856 }
 0x28e   : > { %v1915_v3 = vadd.f32 %v1857_v40, %v1723_v10  ;;  %v1730_v10 = vld [vmem:[#allocation2 + $0xc8] sm:$0xff] }
 0x290   : > { %1948 = vst.msk [vmem:[#allocation2 + $0x90] sm:$0xff] %vm1929_vm10, %v1915_v3 }
 0x291   : > { %v1866_v36 = vpop.xlane.xlu1 %1865 }
 0x292   : > { %v1918_v29 = vadd.f32 %v1866_v36, %v1726_v8  ;;  %v1729_v8 = vld [vmem:[#allocation2 + $0xc0] sm:$0xff] }
 0x294   : > { %1951 = vst.msk [vmem:[#allocation2 + $0xa8] sm:$0xff] %vm1929_vm10, %v1918_v29 }
 0x295   : > { %v1863_v63 = vpop.xlane.xlu0 %1862 }
 0x296   : > { %v1917_v7 = vadd.f32 %v1863_v63, %v1725_v54  ;;  %v1732_v54 = vld [vmem:[#allocation2 + $0xd8] sm:$0xff] }
 0x298   : > { %1950 = vst.msk [vmem:[#allocation2 + $0xa0] sm:$0xff] %vm1929_vm10, %v1917_v7 }
 0x299   : > { %v1872_v22 = vpop.xlane.xlu1 %1871 }
 0x29a   : > { %v1920_v45 = vadd.f32 %v1872_v22, %v1728_v21  ;;  %v1731_v21 = vld [vmem:[#allocation2 + $0xd0] sm:$0xff] }
 0x29c   : > { %1953 = vst.msk [vmem:[#allocation2 + $0xb8] sm:$0xff] %vm1929_vm10, %v1920_v45 }
 0x29d   : > { %v1869_v11 = vpop.xlane.xlu0 %1868 }
 0x29e   : > { %v1919_v9 = vadd.f32 %v1869_v11, %v1727_v12  ;;  %v1734_v12 = vld [vmem:[#allocation2 + $0xe8] sm:$0xff] }
 0x2a0   : > { %1952 = vst.msk [vmem:[#allocation2 + $0xb0] sm:$0xff] %vm1929_vm10, %v1919_v9 }
 0x2a1   : > { %v1878_v40 = vpop.xlane.xlu1 %1877 }
 0x2a2   : > { %v1922_v3 = vadd.f32 %v1878_v40, %v1730_v10  ;;  %v1733_v10 = vld [vmem:[#allocation2 + $0xe0] sm:$0xff] }
 0x2a4   : > { %1955 = vst.msk [vmem:[#allocation2 + $0xc8] sm:$0xff] %vm1929_vm10, %v1922_v3 }
 0x2a5   : > { %v1875_v36 = vpop.xlane.xlu0 %1874 }
 0x2a6   : > { %v1921_v29 = vadd.f32 %v1875_v36, %v1729_v8  ;;  %v1736_v8 = vld [vmem:[#allocation2 + $0xf8] sm:$0xff] }
 0x2a8   : > { %1954 = vst.msk [vmem:[#allocation2 + $0xc0] sm:$0xff] %vm1929_vm10, %v1921_v29 }
 0x2a9   : > { %v1884_v63 = vpop.xlane.xlu1 %1883 }
 0x2aa   : > { %v1924_v7 = vadd.f32 %v1884_v63, %v1732_v54  ;;  %v1735_v54 = vld [vmem:[#allocation2 + $0xf0] sm:$0xff] }
 0x2ac   : > { %1957 = vst.msk [vmem:[#allocation2 + $0xd8] sm:$0xff] %vm1929_vm10, %v1924_v7 }
 0x2ad   : > { %v1881_v22 = vpop.xlane.xlu0 %1880 }
 0x2ae   : > { %v1923_v45 = vadd.f32 %v1881_v22, %v1731_v21 }
 0x2b0   : > { %1956 = vst.msk [vmem:[#allocation2 + $0xd0] sm:$0xff] %vm1929_vm10, %v1923_v45 }
 0x2b1   : > { %v1890_v11 = vpop.xlane.xlu1 %1889 }
 0x2b2   : > { %v1926_v9 = vadd.f32 %v1890_v11, %v1734_v12 }
 0x2b4   : > { %1959 = vst.msk [vmem:[#allocation2 + $0xe8] sm:$0xff] %vm1929_vm10, %v1926_v9 }
 0x2b5   : > { %v1887_v40 = vpop.xlane.xlu0 %1886 }
 0x2b6   : > { %v1925_v3 = vadd.f32 %v1887_v40, %v1733_v10 }
 0x2b8   : > { %1958 = vst.msk [vmem:[#allocation2 + $0xe0] sm:$0xff] %vm1929_vm10, %v1925_v3 }
 0x2b9   : > { %v1896_v36 = vpop.xlane.xlu1 %1895 }
 0x2ba   : > { %v1928_v29 = vadd.f32 %v1896_v36, %v1736_v8 }
 0x2bc   : > { %1961 = vst.msk [vmem:[#allocation2 + $0xf8] sm:$0xff] %vm1929_vm10, %v1928_v29 }
 0x2bd   : > { %v1893_v63 = vpop.xlane.xlu0 %1892 }
 0x2be   : > { %v1927_v7 = vadd.f32 %v1893_v63, %v1735_v54 }
 0x2c0   : > { %1960 = vst.msk [vmem:[#allocation2 + $0xf0] sm:$0xff] %vm1929_vm10, %v1927_v7 }
 0x2c1 PF: > { %p4305_p2 = scmp.ne.s32.totalorder %s4967_s24, 1 }
 0x2c3   : > { %1965 = sbr.rel (%p4305_p2) target bundleno = 1729 (0x6c1), region = 90 }
 0x2ca   : > { %v6785_v21 = vld [vmem:[#allocation2 + $0x10] sm:$0xff]  ;;  %v6787_v22 = vld [vmem:[#allocation2] sm:$0xff]  ;;  %v9672_v45 = vmov 0   ;;  %v6793_v12 = vld [vmem:[#allocation2 + $0x18] sm:$0xff]  ;;  %vm10206_vm0 = vcmp.ge.s32.totalorder %v5521_v43, 0  ;;  %vm10236_vm9 = vcmp.eq.s32.totalorder %v5557_v5, %v5527_v6  ;;  %p4306_p3 = scmp.ne.s32.totalorder %s4963_s23, 1 }
 0x2cb   : > { %10173 = vst [vmem:[#allocation206_spill] sm:$0xff] %v6785_v21  ;;  %10174 = vst [vmem:[#allocation207_spill] sm:$0xff] %v6787_v22  ;;  %4596 = vset.pattern.permute.xlu1 %v9672_v45  ;;  %4595 = vset.pattern.permute.xlu0 %v9672_v45  ;;  %v6795_v11 = vld [vmem:[#allocation2 + $0x8] sm:$0xff]  ;;  %v6801_v10 = vld [vmem:[#allocation2 + $0x20] sm:$0xff] }
 0x2cc   : > { %2010 = vperm.xlu1 %4596, %v6785_v21   ;;  %2000 = vperm.xlu0 %4595, %v6787_v22   ;;  %10175 = vst [vmem:[#allocation208_spill] sm:$0xff] %v6793_v12  ;;  %10176 = vst [vmem:[#allocation209_spill] sm:$0xff] %v6795_v11  ;;  %v6799_v9 = vld [vmem:[#allocation2 + $0x28] sm:$0xff]  ;;  %v6805_v40 = vld [vmem:[#allocation2 + $0x38] sm:$0xff]  ;;  %v10237_v21 = vmov 0 }
 0x2cd   : > { %10177 = vst [vmem:[#allocation210_spill] sm:$0xff] %v6799_v9  ;;  %10178 = vst [vmem:[#allocation211_spill] sm:$0xff] %v6801_v10  ;;  %v6807_v3 = vld [vmem:[#allocation2 + $0x30] sm:$0xff]  ;;  %v6811_v8 = vld [vmem:[#allocation2 + $0x48] sm:$0xff] }
 0x2ce   : > { %10179 = vst [vmem:[#allocation212_spill] sm:$0xff] %v6805_v40  ;;  %10180 = vst [vmem:[#allocation213_spill] sm:$0xff] %v6807_v3  ;;  %v6813_v36 = vld [vmem:[#allocation2 + $0x40] sm:$0xff]  ;;  %v6817_v29 = vld [vmem:[#allocation2 + $0x58] sm:$0xff] }
 0x2cf   : > { %10181 = vst [vmem:[#allocation214_spill] sm:$0xff] %v6811_v8  ;;  %10182 = vst [vmem:[#allocation215_spill] sm:$0xff] %v6813_v36  ;;  %v6819_v54 = vld [vmem:[#allocation2 + $0x50] sm:$0xff]  ;;  %v6823_v63 = vld [vmem:[#allocation2 + $0x68] sm:$0xff] }
 0x2d0   : > { %2015 = vperm.xlu1 %4596, %v6793_v12   ;;  %2005 = vperm.xlu0 %4595, %v6795_v11   ;;  %10183 = vst [vmem:[#allocation216_spill] sm:$0xff] %v6817_v29  ;;  %10184 = vst [vmem:[#allocation217_spill] sm:$0xff] %v6819_v54  ;;  %v6825_v7 = vld [vmem:[#allocation2 + $0x60] sm:$0xff]  ;;  %v6829_v45 = vld [vmem:[#allocation2 + $0x78] sm:$0xff] }
 0x2d1   : > { %10185 = vst [vmem:[#allocation218_spill] sm:$0xff] %v6823_v63  ;;  %10186 = vst [vmem:[#allocation219_spill] sm:$0xff] %v6825_v7  ;;  %v10294_v11 = vld [vmem:[#allocation113_spill] sm:$0xff] }
 0x2d2   : > { %10187 = vst [vmem:[#allocation220_spill] sm:$0xff] %v6829_v45 }
 0x2d4   : > { %2025 = vperm.xlu1 %4596, %v6799_v9   ;;  %2020 = vperm.xlu0 %4595, %v6801_v10  }
 0x2d8   : > { %2035 = vperm.xlu1 %4596, %v6805_v40   ;;  %2030 = vperm.xlu0 %4595, %v6807_v3   ;;  %v10211_v40 = vld [vmem:[#allocation87_spill] sm:$0xff] }
 0x2d9   : > { %vm10212_vm12 = vcmp.eq.s32.totalorder %v10211_v40, %v5527_v6 }
 0x2dc   : > { %2045 = vperm.xlu1 %4596, %v6811_v8   ;;  %2040 = vperm.xlu0 %4595, %v6813_v36   ;;  %v6831_v8 = vld [vmem:[#allocation2 + $0x70] sm:$0xff]  ;;  %v6835_v36 = vld [vmem:[#allocation2 + $0x88] sm:$0xff] }
 0x2dd   : > { %10188 = vst [vmem:[#allocation221_spill] sm:$0xff] %v6831_v8  ;;  %10189 = vst [vmem:[#allocation222_spill] sm:$0xff] %v6835_v36 }
 0x2e0   : > { %2055 = vperm.xlu1 %4596, %v6817_v29   ;;  %2050 = vperm.xlu0 %4595, %v6819_v54   ;;  %v6837_v29 = vld [vmem:[#allocation2 + $0x80] sm:$0xff]  ;;  %v6841_v54 = vld [vmem:[#allocation2 + $0x98] sm:$0xff] }
 0x2e1   : > { %10190 = vst [vmem:[#allocation223_spill] sm:$0xff] %v6837_v29  ;;  %10191 = vst [vmem:[#allocation224_spill] sm:$0xff] %v6841_v54 }
 0x2e4   : > { %2065 = vperm.xlu1 %4596, %v6823_v63   ;;  %2060 = vperm.xlu0 %4595, %v6825_v7   ;;  %v6843_v63 = vld [vmem:[#allocation2 + $0x90] sm:$0xff]  ;;  %v6847_v7 = vld [vmem:[#allocation2 + $0xa8] sm:$0xff] }
 0x2e5   : > { %10192 = vst [vmem:[#allocation225_spill] sm:$0xff] %v6843_v63  ;;  %10193 = vst [vmem:[#allocation226_spill] sm:$0xff] %v6847_v7 }
 0x2e8   : > { %2075 = vperm.xlu1 %4596, %v6829_v45   ;;  %2070 = vperm.xlu0 %4595, %v6831_v8   ;;  %v6849_v45 = vld [vmem:[#allocation2 + $0xa0] sm:$0xff]  ;;  %v6853_v8 = vld [vmem:[#allocation2 + $0xb8] sm:$0xff] }
 0x2e9   : > { %10194 = vst [vmem:[#allocation227_spill] sm:$0xff] %v6849_v45  ;;  %10195 = vst [vmem:[#allocation228_spill] sm:$0xff] %v6853_v8 }
 0x2ec   : > { %2085 = vperm.xlu1 %4596, %v6835_v36   ;;  %2080 = vperm.xlu0 %4595, %v6837_v29   ;;  %v6855_v36 = vld [vmem:[#allocation2 + $0xb0] sm:$0xff]  ;;  %v6859_v29 = vld [vmem:[#allocation2 + $0xc8] sm:$0xff] }
 0x2ed   : > { %10196 = vst [vmem:[#allocation229_spill] sm:$0xff] %v6855_v36  ;;  %10197 = vst [vmem:[#allocation230_spill] sm:$0xff] %v6859_v29 }
 0x2f0   : > { %2095 = vperm.xlu1 %4596, %v6841_v54   ;;  %2090 = vperm.xlu0 %4595, %v6843_v63   ;;  %v6861_v54 = vld [vmem:[#allocation2 + $0xc0] sm:$0xff]  ;;  %v6865_v63 = vld [vmem:[#allocation2 + $0xd8] sm:$0xff] }
 0x2f1   : > { %10198 = vst [vmem:[#allocation231_spill] sm:$0xff] %v6861_v54  ;;  %10199 = vst [vmem:[#allocation232_spill] sm:$0xff] %v6865_v63 }
 0x2f4   : > { %2105 = vperm.xlu1 %4596, %v6847_v7   ;;  %2100 = vperm.xlu0 %4595, %v6849_v45   ;;  %v6867_v7 = vld [vmem:[#allocation2 + $0xd0] sm:$0xff]  ;;  %v6871_v45 = vld [vmem:[#allocation2 + $0xe8] sm:$0xff] }
 0x2f5   : > { %10200 = vst [vmem:[#allocation233_spill] sm:$0xff] %v6867_v7  ;;  %10201 = vst [vmem:[#allocation234_spill] sm:$0xff] %v6871_v45 }
 0x2f8   : > { %2115 = vperm.xlu1 %4596, %v6853_v8   ;;  %2110 = vperm.xlu0 %4595, %v6855_v36   ;;  %v6873_v8 = vld [vmem:[#allocation2 + $0xe0] sm:$0xff]  ;;  %v6877_v36 = vld [vmem:[#allocation2 + $0xf8] sm:$0xff] }
 0x2f9   : > { %10202 = vst [vmem:[#allocation235_spill] sm:$0xff] %v6873_v8  ;;  %10203 = vst [vmem:[#allocation236_spill] sm:$0xff] %v6877_v36 }
 0x2fc   : > { %2125 = vperm.xlu1 %4596, %v6859_v29   ;;  %2120 = vperm.xlu0 %4595, %v6861_v54   ;;  %v6879_v29 = vld [vmem:[#allocation2 + $0xf0] sm:$0xff]  ;;  %v10205_v54 = vmov 0  }
 0x2fd   : > { %10204 = vst [vmem:[#allocation237_spill] sm:$0xff] %v6879_v29 }
 0x300   : > { %2135 = vperm.xlu1 %4596, %v6865_v63   ;;  %2130 = vperm.xlu0 %4595, %v6867_v7   ;;  %v2478_v7 = vsel %vm10206_vm0, 1, %v10205_v54  ;;  %v9698_v54 = vmov 0.0   ;;  %vm10240_vm0 = vcmp.eq.s32.totalorder %v5557_v5, %v5531_v38 }
 0x301   : > { %v2482_v63 = vrot.slane %v2478_v7, %v5511_v42  ;;  %v2486_v3 = vrot.slane %v2478_v7, %v5513_v16 }
 0x303   : > { %vm6888_vm13 = vcmp.eq.s32.totalorder %v2482_v63, 1  ;;  %vm6892_vm14 = vcmp.eq.s32.totalorder %v2486_v3, 1 }
 0x304   : > { %2145 = vperm.xlu1 %4596, %v6871_v45   ;;  %2140 = vperm.xlu0 %4595, %v6873_v8   ;;  %v10207_v45 = vmov 0  ;;  %vm6901_vm11 = vmand %vm6888_vm13, %vm10212_vm12 }
 0x305   : > { %v10208_v45 = vsel %vm6888_vm13, 4294967295, %v10207_v45  ;;  %vm6910_vm1 = vmand %vm6888_vm13, %vm1047_vm6 }
 0x306   : > { %vm6919_vm2 = vmand %vm6892_vm14, %vm1048_vm7  ;;  %v2844_v46 = vsel %vm6910_vm1, 1.0, %v9698_v54 }
 0x307   : > { %vm6928_vm15 = vmand %vm6892_vm14, %vm1046_vm3  ;;  %v2845_v63 = vsel %vm6919_vm2, 1.0, %v9698_v54  ;;  %v10226_v54 = vld [vmem:[#allocation86_spill] sm:$0xff] }
 0x308   : > { %2155 = vperm.xlu1 %4596, %v6877_v36   ;;  %2150 = vperm.xlu0 %4595, %v6879_v29   ;;  %vm6943_vm6 = vmand %vm6888_vm13, %vm1051_vm4  ;;  %v6947_v7 = vadd.f32 %v2845_v63, %v2844_v46  ;;  %vm10227_vm7 = vcmp.eq.s32.totalorder %v10226_v54, %v5527_v6  ;;  %v10230_v46 = vmov 0.0  }
 0x309   : > { %vm6954_vm3 = vmand %vm6892_vm14, %vm1052_vm5  ;;  %v2842_v63 = vsel %vm6901_vm11, 1.0, %v10230_v46  ;;  %v2843_v39 = vsel %vm6928_vm15, 1.0, %v10230_v46  ;;  %v2848_v10 = vsel %vm6943_vm6, 1.0, %v10230_v46  ;;  %vm10231_vm5 = vcmp.eq.s32.totalorder %v10226_v54, %v5531_v38 }
 0x30a   : > { %10223 = vst [vmem:[#allocation238_spill] sm:$0xff] %v6947_v7  ;;  %vm6963_vm4 = vmand %vm6888_vm13, %vm10227_vm7  ;;  %v2849_v9 = vsel %vm6954_vm3, 1.0, %v10230_v46  ;;  %v6988_v12 = vadd.f32 %v2843_v39, %v2842_v63  ;;  %v10241_v54 = vmov 0  ;;  %vm10244_vm7 = vcmp.eq.s32.totalorder %v5559_v31, %v5527_v6 }
 0x30b   : > { %vm6984_vm8 = vmand %vm6892_vm14, %vm10231_vm5  ;;  %v6990_v22 = vadd.f32 %v2849_v9, %v2848_v10  ;;  %v2846_v9 = vsel %vm6963_vm4, 1.0, %v10230_v46 }
 0x30c   : > { %10234 = vst [vmem:[#allocation239_spill] sm:$0xff] %v6988_v12  ;;  %vm6997_vm10 = vmand %vm6888_vm13, %vm10236_vm9  ;;  %v2847_v10 = vsel %vm6984_vm8, 1.0, %v10230_v46  ;;  %vm10249_vm9 = vcmp.eq.s32.totalorder %v5559_v31, %v5531_v38  ;;  %v10250_v12 = vmov 0 }
 0x30d   : > { %10235 = vst [vmem:[#allocation240_spill] sm:$0xff] %v6990_v22  ;;  %v10238_v21 = vsel %vm6997_vm10, 4294967295, %v10237_v21  ;;  %vm7006_vm12 = vmand %vm6892_vm14, %vm10240_vm0  ;;  %v2852_v63 = vsel %vm6997_vm10, 1.0, %v10230_v46  ;;  %v7031_v22 = vadd.f32 %v2847_v10, %v2846_v9  ;;  %v10254_v9 = vmov 0  ;;  %v10257_v10 = vld [vmem:[#allocation137_spill] sm:$0xff] }
 0x30e   : > { %10239 = vst [vmem:[#allocation241_spill] sm:$0xff] %v10238_v21  ;;  %v10242_v54 = vsel %vm7006_vm12, 4294967295, %v10241_v54  ;;  %v2853_v5 = vsel %vm7006_vm12, 1.0, %v10230_v46  ;;  %vm7027_vm5 = vmand %vm6888_vm13, %vm10244_vm7  ;;  %vm10253_vm7 = vcmp.eq.s32.totalorder %v5569_v30, %v5527_v6 }
 0x30f   : > { %10243 = vst [vmem:[#allocation242_spill] sm:$0xff] %v10242_v54  ;;  %10247 = vst [vmem:[#allocation243_spill] sm:$0xff] %v7031_v22  ;;  %v7033_v7 = vadd.f32 %v2853_v5, %v2852_v63  ;;  %v10259_v22 = vmov 0  ;;  %v2850_v15 = vsel %vm7027_vm5, 1.0, %v10230_v46 }
 0x310   : > { %vm7040_vm0 = vmand %vm6892_vm14, %vm10249_vm9  ;;  %vm10258_vm9 = vcmp.eq.s32.totalorder %v5569_v30, %v5531_v38 }
 0x311   : > { %10248 = vst [vmem:[#allocation244_spill] sm:$0xff] %v7033_v7  ;;  %v10251_v12 = vsel %vm7040_vm0, 4294967295, %v10250_v12  ;;  %vm7049_vm12 = vmand %vm6888_vm13, %vm10253_vm7  ;;  %vm10262_vm7 = vcmp.eq.s32.totalorder %v5571_v27, %v5527_v6 }
 0x312   : > { %10252 = vst [vmem:[#allocation245_spill] sm:$0xff] %v10251_v12  ;;  %v10255_v9 = vsel %vm7049_vm12, 4294967295, %v10254_v9  ;;  %vm7062_vm10 = vmand %vm6892_vm14, %vm10258_vm9 }
 0x313   : > { %10256 = vst [vmem:[#allocation246_spill] sm:$0xff] %v10255_v9  ;;  %v10260_v22 = vsel %vm7062_vm10, 4294967295, %v10259_v22  ;;  %v2857_v30 = vsel %vm7062_vm10, 1.0, %v10230_v46  ;;  %vm7085_vm9 = vmand %vm6888_vm13, %vm10262_vm7  ;;  %v10263_v9 = vmov 0  ;;  %vm10266_vm10 = vcmp.eq.s32.totalorder %v5571_v27, %v5531_v38 }
 0x314   : > { %v10264_v9 = vsel %vm7085_vm9, 4294967295, %v10263_v9 }
 0x34b   : > { %v2011_v60 = vpop.permute.xlu1 %2010  ;;  %v2001_v25 = vpop.permute.xlu0 %2000 }
 0x34c   : > { %v2162_v63 = vadd.f32 %v10257_v10, %v2011_v60  ;;  %v2163_v31 = vadd.f32 %v5850_v41, %v2011_v60  ;;  %v2158_v5 = vadd.f32 %v5800_v47, %v2001_v25  ;;  %v2159_v7 = vadd.f32 %v5806_v32, %v2001_v25 }
 0x34d   : > { %v2851_v41 = vsel %vm7040_vm0, 1.0, %v10230_v46  ;;  %v2856_v47 = vsel %vm7049_vm12, 1.0, %v10230_v46  ;;  %vm7099_vm12 = vmand %vm6892_vm14, %vm10266_vm10  ;;  %vm10269_vm10 = vcmp.eq.s32.totalorder %v5581_v26, %v5527_v6 }
 0x34e   : > { %v2226_v32 = vmax.f32 %v2162_v63, 1e-30  ;;  %v2227_v60 = vmax.f32 %v2163_v31, 1e-30  ;;  %v2222_v25 = vmax.f32 %v2158_v5, 1e-30  ;;  %v7078_v10 = vadd.f32 %v2851_v41, %v2850_v15  ;;  %vm7115_vm7 = vmand %vm6888_vm13, %vm10269_vm10 }
 0x34f   : > { %v2223_v4 = vmax.f32 %v2159_v7, 1e-30  ;;  %v2016_v54 = vpop.permute.xlu1 %2015  ;;  %v2006_v21 = vpop.permute.xlu0 %2005  ;;  %v7089_v12 = vadd.f32 %v2857_v30, %v2856_v47  ;;  %v10267_v31 = vmov 0  ;;  %v10270_v41 = vmov 0  ;;  %v10330_v30 = vld [vmem:[#allocation169_spill] sm:$0xff] }
 0x350   : > { %10261 = vst [vmem:[#allocation247_spill] sm:$0xff] %v7078_v10  ;;  %4597 = vlog2.f32 %v2226_v32  ;;  %v2164_v63 = vadd.f32 %v5864_v61, %v2016_v54  ;;  %v2165_v15 = vadd.f32 %v5877_v50, %v2016_v54  ;;  %v2160_v7 = vadd.f32 %v5820_v51, %v2006_v21 }
 0x351   : > { %10265 = vst [vmem:[#allocation248_spill] sm:$0xff] %v7089_v12  ;;  %v10268_v31 = vsel %vm7099_vm12, 4294967295, %v10267_v31  ;;  %4599 = vlog2.f32 %v2227_v60  ;;  %v2161_v5 = vadd.f32 %v5833_v13, %v2006_v21  ;;  %v2854_v61 = vsel %vm7085_vm9, 1.0, %v10230_v46 }
 0x352   : > { %v2855_v51 = vsel %vm7099_vm12, 1.0, %v10230_v46  ;;  %4601 = vlog2.f32 %v2222_v25  ;;  %v2228_v50 = vmax.f32 %v2164_v63, 1e-30  ;;  %v2229_v27 = vmax.f32 %v2165_v15, 1e-30 }
 0x353   : > { %v2224_v54 = vmax.f32 %v2160_v7, 1e-30  ;;  %v10271_v41 = vsel %vm7115_vm7, 4294967295, %v10270_v41  ;;  %4603 = vlog2.f32 %v2223_v4  ;;  %v2225_v13 = vmax.f32 %v2161_v5, 1e-30  ;;  %v2026_v21 = vpop.permute.xlu1 %2025  ;;  %v2021_v47 = vpop.permute.xlu0 %2020 }
 0x354   : > { %vm10272_vm12 = vcmp.eq.s32.totalorder %v5583_v19, %v5527_v6  ;;  %v7128_v32 = vadd.f32 %v2855_v51, %v2854_v61  ;;  %v2860_v60 = vsel %vm7115_vm7, 1.0, %v10230_v46  ;;  %4605 = vlog2.f32 %v2228_v50 }
 0x355   : > { %vm7124_vm9 = vmand %vm6888_vm13, %vm10272_vm12  ;;  %v2168_v4 = vadd.f32 %v5908_v34, %v2026_v21  ;;  %v2169_v25 = vadd.f32 %v5921_v58, %v2026_v21  ;;  %v2166_v63 = vadd.f32 %v5888_v53, %v2021_v47  ;;  %vm10276_vm10 = vcmp.eq.s32.totalorder %v5581_v26, %v5531_v38 }
 0x356   : > { %10275 = vst [vmem:[#allocation249_spill] sm:$0xff] %v7128_v32  ;;  %vm7141_vm12 = vmand %vm6892_vm14, %vm10276_vm10  ;;  %v10277_v15 = vmov 0  ;;  %4607 = vlog2.f32 %v2229_v27  ;;  %v2167_v7 = vadd.f32 %v5894_v28, %v2021_v47  ;;  %v2858_v53 = vsel %vm7124_vm9, 1.0, %v10230_v46 }
 0x357   : > { %v10278_v15 = vsel %vm7141_vm12, 4294967295, %v10277_v15  ;;  %v2861_v34 = vsel %vm7141_vm12, 1.0, %v10230_v46  ;;  %4609 = vlog2.f32 %v2224_v54  ;;  %v2232_v58 = vmax.f32 %v2168_v4, 1e-30  ;;  %v2036_v51 = vpop.permute.xlu1 %2035  ;;  %v2031_v50 = vpop.permute.xlu0 %2030 }
 0x358   : > { %v2233_v26 = vmax.f32 %v2169_v25, 1e-30  ;;  %v2230_v5 = vmax.f32 %v2166_v63, 1e-30  ;;  %vm10279_vm10 = vcmp.eq.s32.totalorder %v5583_v19, %v5531_v38  ;;  %4611 = vlog2.f32 %v2225_v13 }
 0x359   : > { %vm7157_vm7 = vmand %vm6892_vm14, %vm10279_vm10  ;;  %v2231_v28 = vmax.f32 %v2167_v7, 1e-30  ;;  %v7161_v27 = vadd.f32 %v2861_v34, %v2860_v60  ;;  %4613 = vlog2.f32 %v2232_v58  ;;  %v2172_v21 = vadd.f32 %v5952_v59, %v2036_v51 }
 0x35a   : > { %v2859_v54 = vsel %vm7157_vm7, 1.0, %v10230_v46  ;;  %v2173_v19 = vadd.f32 %v5965_v49, %v2036_v51  ;;  %v2170_v47 = vadd.f32 %v5932_v1, %v2031_v50  ;;  %vm10283_vm10 = vcmp.eq.s32.totalorder %v5593_v18, %v5527_v6  ;;  %v4598_v1 = vpop.eup %4597 }
 0x35b   : > { %10282 = vst [vmem:[#allocation250_spill] sm:$0xff] %v7161_v27  ;;  %vm7174_vm12 = vmand %vm6888_vm13, %vm10283_vm10  ;;  %4615 = vlog2.f32 %v2233_v26  ;;  %v2171_v60 = vadd.f32 %v5938_v24, %v2031_v50  ;;  %v7179_v4 = vadd.f32 %v2859_v54, %v2858_v53  ;;  %v2236_v49 = vmax.f32 %v2172_v21, 1e-30  ;;  %v4600_v24 = vpop.eup %4599  ;;  %v2046_v53 = vpop.permute.xlu1 %2045 }
 0x35c   : > { %v7184_v59 = vsel %vm7174_vm12, 1.0, %v10230_v46  ;;  %4617 = vlog2.f32 %v2230_v5  ;;  %v2237_v25 = vmax.f32 %v2173_v19, 1e-30  ;;  %v2234_v63 = vmax.f32 %v2170_v47, 1e-30  ;;  %v2041_v58 = vpop.permute.xlu0 %2040  ;;  %v4602_v51 = vpop.eup %4601 }
 0x35d   : > { %10286 = vst [vmem:[#allocation251_spill] sm:$0xff] %v7179_v4  ;;  %vm10287_vm10 = vcmp.eq.s32.totalorder %v5593_v18, %v5531_v38  ;;  %4619 = vlog2.f32 %v2231_v28  ;;  %v2235_v34 = vmax.f32 %v2171_v60, 1e-30  ;;  %v2295_v26 = vmul.f32 0.6931472, %v4598_v1  ;;  %v4604_v21 = vpop.eup %4603 }
 0x35e   : > { %vm7191_vm13 = vmand %vm6892_vm14, %vm10287_vm10  ;;  %4621 = vlog2.f32 %v2236_v49  ;;  %v2176_v18 = vadd.f32 %v5996_v0, %v2046_v53  ;;  %v2177_v50 = vadd.f32 %v6009_v55, %v2046_v53  ;;  %v2174_v54 = vadd.f32 %v5976_v37, %v2041_v58  ;;  %v7204_v60 = vpop.eup %4605  ;;  %v10290_v37 = vld [vmem:[#allocation109_spill] sm:$0xff] }
 0x35f   : > { %v7198_v5 = vsel %vm7191_vm13, 1.0, %v10230_v46  ;;  %4623 = vlog2.f32 %v2237_v25  ;;  %v2175_v28 = vadd.f32 %v5982_v35, %v2041_v58  ;;  %v2287_v19 = vmul.f32 0.6931472, %v4602_v51  ;;  %v2056_v49 = vpop.permute.xlu1 %2055 }
 0x360   : > { %v2297_v47 = vmul.f32 0.6931472, %v4600_v24  ;;  %4625 = vlog2.f32 %v2234_v63  ;;  %v2240_v1 = vmax.f32 %v2176_v18, 1e-30  ;;  %v2241_v27 = vmax.f32 %v2177_v50, 1e-30  ;;  %v7206_v12 = vpop.eup %4607  ;;  %v2051_v55 = vpop.permute.xlu0 %2050 }
 0x361   : > { %v2238_v4 = vmax.f32 %v2174_v54, 1e-30  ;;  %4627 = vlog2.f32 %v2235_v34  ;;  %v2239_v0 = vmax.f32 %v2175_v28, 1e-30  ;;  %v2289_v53 = vmul.f32 0.6931472, %v4604_v21  ;;  %v4610_v25 = vpop.eup %4609 }
 0x362   : > { %v2414_v32 = vsub.f32 %v10290_v37, %v2287_v19  ;;  %4629 = vlog2.f32 %v2240_v1  ;;  %v2180_v35 = vadd.f32 %v6040_v48, %v2056_v49  ;;  %v2181_v24 = vadd.f32 %v6053_v62, %v2056_v49  ;;  %v4612_v58 = vpop.eup %4611  ;;  %v10291_v18 = vld [vmem:[#allocation111_spill] sm:$0xff]  ;;  %v10292_v1 = vld [vmem:[#allocation117_spill] sm:$0xff] }
 0x363   : > { %v2178_v63 = vadd.f32 %v6020_v56, %v2051_v55  ;;  %4631 = vlog2.f32 %v2241_v27  ;;  %v2179_v51 = vadd.f32 %v6026_v23, %v2051_v55  ;;  %v2415_v34 = vsub.f32 %v10291_v18, %v2289_v53  ;;  %v7216_v54 = vpop.eup %4613  ;;  %v2066_v27 = vpop.permute.xlu1 %2065 }
 0x364   : > { %v2585_v50 = vsel %vm6901_vm11, %v2414_v32, 0.0  ;;  %4633 = vlog2.f32 %v2238_v4  ;;  %v2244_v21 = vmax.f32 %v2180_v35, 1e-30  ;;  %v2245_v28 = vmax.f32 %v2181_v24, 1e-30  ;;  %v2061_v23 = vpop.permute.xlu0 %2060  ;;  %v10293_v35 = vld [vmem:[#allocation119_spill] sm:$0xff] }
 0x365   : > { %v2242_v19 = vmax.f32 %v2178_v63, 1e-30  ;;  %v7218_v48 = vpop.eup %4615  ;;  %4635 = vlog2.f32 %v2239_v0  ;;  %v2243_v62 = vmax.f32 %v2179_v51, 1e-30  ;;  %v2586_v56 = vsel %vm6928_vm15, %v2415_v34, 0.0 }
 0x366   : > { %v2418_v49 = vsub.f32 %v10292_v1, %v2295_v26  ;;  %v4618_v55 = vpop.eup %4617  ;;  %4637 = vlog2.f32 %v2244_v21  ;;  %v2649_v43 = vadd.f32 %v2586_v56, %v2585_v50  ;;  %v2184_v32 = vadd.f32 %v6074_v17, %v2066_v27  ;;  %v10295_v1 = vld [vmem:[#allocation115_spill] sm:$0xff] }
 0x367   : > { %v2185_v4 = vadd.f32 %v6078_v14, %v2066_v27  ;;  %v4620_v53 = vpop.eup %4619  ;;  %4639 = vlog2.f32 %v2245_v28  ;;  %v2182_v37 = vadd.f32 %v6064_v20, %v2061_v23  ;;  %v2183_v0 = vadd.f32 %v6070_v44, %v2061_v23  ;;  %v2076_v44 = vpop.permute.xlu1 %2075 }
 0x368   : > { %v2419_v3 = vsub.f32 %v10293_v35, %v2297_v47  ;;  %v7228_v24 = vpop.eup %4621  ;;  %4641 = vlog2.f32 %v2242_v19  ;;  %2650 = vadd.xlane.f32.xlu0 %v2649_v43  ;;  %v2248_v26 = vmax.f32 %v2184_v32, 1e-30  ;;  %v2589_v51 = vsel %vm6963_vm4, %v2418_v49, 0.0  ;;  %v2071_v34 = vpop.permute.xlu0 %2070 }
 0x369   : > { %v2249_v63 = vmax.f32 %v2185_v4, 1e-30  ;;  %v7232_v17 = vpop.eup %4623  ;;  %4643 = vlog2.f32 %v2243_v62  ;;  %v2246_v14 = vmax.f32 %v2182_v37, 1e-30  ;;  %v2247_v18 = vmax.f32 %v2183_v0, 1e-30 }
 0x36a   : > { %v2590_v20 = vsel %vm6984_vm8, %v2419_v3, 0.0  ;;  %v7236_v47 = vpop.eup %4625  ;;  %4645 = vlog2.f32 %v2248_v26  ;;  %v2291_v21 = vmul.f32 0.6931472, %v4610_v25  ;;  %v2293_v28 = vmul.f32 0.6931472, %v4612_v58 }
 0x36b   : > { %v2655_v50 = vadd.f32 %v2590_v20, %v2589_v51  ;;  %v7238_v19 = vpop.eup %4627  ;;  %4647 = vlog2.f32 %v2249_v63  ;;  %v2188_v36 = vadd.f32 %v6090_v57, %v2076_v44  ;;  %v2189_v62 = vadd.f32 %v6094_v33, %v2076_v44  ;;  %v2086_v4 = vpop.permute.xlu1 %2085  ;;  %v10297_v44 = vld [vmem:[#allocation132_spill] sm:$0xff] }
 0x36c   : > { %v2186_v56 = vadd.f32 %v6082_v2, %v2071_v34  ;;  %v7243_v27 = vpop.eup %4629  ;;  %4649 = vlog2.f32 %v2246_v14  ;;  %v2416_v23 = vsub.f32 %v10294_v11, %v2291_v21  ;;  %v2417_v49 = vsub.f32 %v10295_v1, %v2293_v28  ;;  %v2081_v51 = vpop.permute.xlu0 %2080  ;;  %v10299_v21 = vld [vmem:[#allocation126_spill] sm:$0xff] }
 0x36d   : > { %2656 = vadd.xlane.f32.xlu0 %v2655_v50  ;;  %v2187_v25 = vadd.f32 %v6086_v52, %v2071_v34  ;;  %v7248_v58 = vpop.eup %4631  ;;  %4651 = vlog2.f32 %v2247_v18  ;;  %v2252_v43 = vmax.f32 %v2188_v36, 1e-30  ;;  %v2253_v32 = vmax.f32 %v2189_v62, 1e-30  ;;  %v10296_v18 = vld [vmem:[#allocation121_spill] sm:$0xff]  ;;  %v10300_v36 = vld [vmem:[#allocation136_spill] sm:$0xff] }
 0x36e   : > { %v2250_v57 = vmax.f32 %v2186_v56, 1e-30  ;;  %v7250_v33 = vpop.eup %4633  ;;  %v2587_v2 = vsel %vm6910_vm1, %v2416_v23, 0.0  ;;  %v2588_v37 = vsel %vm6919_vm2, %v2417_v49, 0.0  ;;  %v2299_v35 = vmul.f32 0.6931472, %v7204_v60 }
 0x36f   : > { %v2251_v0 = vmax.f32 %v2187_v25, 1e-30  ;;  %v7257_v3 = vpop.eup %4635  ;;  %v2652_v52 = vadd.f32 %v2588_v37, %v2587_v2  ;;  %4653 = vlog2.f32 %v2252_v43  ;;  %v2301_v26 = vmul.f32 0.6931472, %v7206_v12  ;;  %v10298_v60 = vld [vmem:[#allocation123_spill] sm:$0xff]  ;;  %v10301_v56 = vld [vmem:[#allocation129_spill] sm:$0xff] }
 0x370   : > { %v2303_v63 = vmul.f32 0.6931472, %v4618_v55  ;;  %v7260_v14 = vpop.eup %4637  ;;  %4655 = vlog2.f32 %v2253_v32  ;;  %v2420_v16 = vsub.f32 %v10296_v18, %v2299_v35  ;;  %v2305_v20 = vmul.f32 0.6931472, %v4620_v53  ;;  %v10302_v43 = vld [vmem:[#allocation125_spill] sm:$0xff] }
 0x371   : > { %v2192_v42 = vadd.f32 %v10297_v44, %v2086_v4  ;;  %v7264_v34 = vpop.eup %4639  ;;  %2653 = vadd.xlane.f32.xlu1 %v2652_v52  ;;  %4657 = vlog2.f32 %v2250_v57  ;;  %v2421_v50 = vsub.f32 %v10298_v60, %v2301_v26  ;;  %v2193_v12 = vadd.f32 %v10300_v36, %v2086_v4  ;;  %v2096_v57 = vpop.permute.xlu1 %2095 }
 0x372   : > { %v2422_v28 = vsub.f32 %v10299_v21, %v2303_v63  ;;  %v7269_v55 = vpop.eup %4641  ;;  %4659 = vlog2.f32 %v2251_v0  ;;  %v2591_v62 = vsel %vm6943_vm6, %v2420_v16, 0.0  ;;  %v2423_v53 = vsub.f32 %v10301_v56, %v2305_v20  ;;  %v10304_v0 = vld [vmem:[#allocation128_spill] sm:$0xff]  ;;  %v2091_v63 = vpop.permute.xlu0 %2090  ;;  %v10309_v56 = vld [vmem:[#allocation139_spill] sm:$0xff] }
 0x373   : > { %v2256_v11 = vmax.f32 %v2192_v42, 1e-30  ;;  %v7274_v23 = vpop.eup %4643  ;;  %v2592_v1 = vsel %vm6954_vm3, %v2421_v50, 0.0  ;;  %v2257_v25 = vmax.f32 %v2193_v12, 1e-30  ;;  %v2190_v32 = vadd.f32 %v10302_v43, %v2081_v51  ;;  %v10305_v42 = vld [vmem:[#allocation145_spill] sm:$0xff] }
 0x374   : > { %v2593_v49 = vsel %vm7027_vm5, %v2422_v28, 0.0  ;;  %v7281_v4 = vpop.eup %4645  ;;  %v2658_v2 = vadd.f32 %v2592_v1, %v2591_v62  ;;  %v2594_v37 = vsel %vm7040_vm0, %v2423_v53, 0.0  ;;  %v2191_v35 = vadd.f32 %v10304_v0, %v2081_v51  ;;  %v10306_v51 = vld [vmem:[#allocation131_spill] sm:$0xff]  ;;  %v10308_v12 = vld [vmem:[#allocation134_spill] sm:$0xff]  ;;  %v10317_v0 = vld [vmem:[#allocation141_spill] sm:$0xff] }
 0x375   : > { %4661 = vlog2.f32 %v2256_v11  ;;  %v7286_v52 = vpop.eup %4647  ;;  %v2661_v29 = vadd.f32 %v2594_v37, %v2593_v49  ;;  %v2254_v26 = vmax.f32 %v2190_v32, 1e-30  ;;  %v2307_v39 = vmul.f32 0.6931472, %v7216_v54  ;;  %v10307_v54 = vld [vmem:[#allocation149_spill] sm:$0xff]  ;;  %v10312_v49 = vld [vmem:[#allocation142_spill] sm:$0xff] }
 0x376   : > { %4663 = vlog2.f32 %v2257_v25  ;;  %v7289_v18 = vpop.eup %4649  ;;  %2659 = vadd.xlane.f32.xlu0 %v2658_v2  ;;  %v2255_v16 = vmax.f32 %v2191_v35, 1e-30  ;;  %v2309_v20 = vmul.f32 0.6931472, %v7218_v48  ;;  %v2311_v44 = vmul.f32 0.6931472, %v7236_v47 }
 0x377   : > { %v2196_v60 = vadd.f32 %v10305_v42, %v2096_v57  ;;  %v7294_v50 = vpop.eup %4651  ;;  %2662 = vadd.xlane.f32.xlu1 %v2661_v29  ;;  %4665 = vlog2.f32 %v2254_v26  ;;  %v2424_v21 = vsub.f32 %v10306_v51, %v2307_v39  ;;  %v2313_v28 = vmul.f32 0.6931472, %v7238_v19  ;;  %v10310_v47 = vld [vmem:[#allocation241_spill] sm:$0xff]  ;;  %v10313_v32 = vld [vmem:[#allocation138_spill] sm:$0xff]  ;;  %v2106_v29 = vpop.permute.xlu1 %2105 }
 0x378   : > { %v2197_v36 = vadd.f32 %v10307_v54, %v2096_v57  ;;  %4667 = vlog2.f32 %v2255_v16  ;;  %v2425_v62 = vsub.f32 %v10308_v12, %v2309_v20  ;;  %v2426_v53 = vsub.f32 %v10309_v56, %v2311_v44  ;;  %v10314_v19 = vld [vmem:[#allocation242_spill] sm:$0xff]  ;;  %v2101_v44 = vpop.permute.xlu0 %2100  ;;  %v10319_v54 = vld [vmem:[#allocation157_spill] sm:$0xff]  ;;  %v10320_v12 = vld [vmem:[#allocation144_spill] sm:$0xff] }
 0x379   : > { %v2260_v48 = vmax.f32 %v2196_v60, 1e-30  ;;  %v7301_v11 = vpop.eup %4653  ;;  %vm10311_vm11 = vnez %v10310_v47  ;;  %v2427_v25 = vsub.f32 %v10312_v49, %v2313_v28  ;;  %v2194_v2 = vadd.f32 %v10313_v32, %v2091_v63  ;;  %v10321_v56 = vld [vmem:[#allocation147_spill] sm:$0xff]  ;;  %v10324_v49 = vld [vmem:[#allocation154_spill] sm:$0xff] }
 0x37a   : > { %v2595_v1 = vsel %vm10311_vm11, %v2424_v21, 0.0  ;;  %v2261_v43 = vmax.f32 %v2197_v36, 1e-30  ;;  %v7307_v40 = vpop.eup %4655  ;;  %vm10315_vm1 = vnez %v10314_v19  ;;  %vm10316_vm2 = vnez %v10264_v9  ;;  %v10326_v32 = vld [vmem:[#allocation246_spill] sm:$0xff] }
 0x37b   : > { %v2596_v57 = vsel %vm10315_vm1, %v2425_v62, 0.0  ;;  %v2597_v37 = vsel %vm10316_vm2, %v2426_v53, 0.0  ;;  %4669 = vlog2.f32 %v2260_v48  ;;  %v2195_v35 = vadd.f32 %v10317_v0, %v2091_v63  ;;  %v7314_v26 = vpop.eup %4657  ;;  %v10322_v48 = vld [vmem:[#allocation161_spill] sm:$0xff] }
 0x37c   : > { %v2664_v39 = vadd.f32 %v2596_v57, %v2595_v1  ;;  %vm10318_vm15 = vnez %v10268_v31  ;;  %4671 = vlog2.f32 %v2261_v43  ;;  %v2258_v20 = vmax.f32 %v2194_v2, 1e-30  ;;  %v7318_v42 = vpop.eup %4659 }
 0x37d   : > { %v2598_v16 = vsel %vm10318_vm15, %v2427_v25, 0.0  ;;  %v2259_v51 = vmax.f32 %v2195_v35, 1e-30  ;;  %v2315_v9 = vmul.f32 0.6931472, %v7228_v24  ;;  %v2200_v31 = vadd.f32 %v10319_v54, %v2106_v29  ;;  %v2116_v35 = vpop.permute.xlu1 %2115 }
 0x37e   : > { %v2667_v60 = vadd.f32 %v2598_v16, %v2597_v37  ;;  %v2317_v21 = vmul.f32 0.6931472, %v7232_v17  ;;  %2665 = vadd.xlane.f32.xlu0 %v2664_v39  ;;  %4673 = vlog2.f32 %v2258_v20  ;;  %v2319_v63 = vmul.f32 0.6931472, %v7250_v33  ;;  %v10323_v17 = vld [vmem:[#allocation151_spill] sm:$0xff]  ;;  %v10329_v37 = vld [vmem:[#allocation153_spill] sm:$0xff] }
 0x37f   : > { %v2321_v28 = vmul.f32 0.6931472, %v7257_v3  ;;  %v7325_v36 = vpop.eup %4661  ;;  %4675 = vlog2.f32 %v2259_v51  ;;  %v2428_v62 = vsub.f32 %v10320_v12, %v2315_v9  ;;  %v2201_v24 = vadd.f32 %v10322_v48, %v2106_v29  ;;  %v10325_v3 = vld [vmem:[#allocation150_spill] sm:$0xff]  ;;  %v10331_v12 = vld [vmem:[#allocation88_spill] sm:$0xff] }
 0x380   : > { %2668 = vadd.xlane.f32.xlu1 %v2667_v60  ;;  %v2429_v53 = vsub.f32 %v10321_v56, %v2317_v21  ;;  %v7330_v47 = vpop.eup %4663  ;;  %v2430_v1 = vsub.f32 %v10323_v17, %v2319_v63  ;;  %v2264_v25 = vmax.f32 %v2200_v31, 1e-30  ;;  %v2198_v43 = vadd.f32 %v10325_v3, %v2101_v44  ;;  %v2111_v60 = vpop.permute.xlu0 %2110  ;;  %v10338_v48 = vld [vmem:[#allocation156_spill] sm:$0xff]  ;;  %v10339_v17 = vld [vmem:[#allocation159_spill] sm:$0xff] }
 0x381   : > { %v2431_v33 = vsub.f32 %v10324_v49, %v2321_v28  ;;  %vm10327_vm6 = vnez %v10326_v32  ;;  %vm10328_vm3 = vnez %v10260_v22  ;;  %v2265_v57 = vmax.f32 %v2201_v24, 1e-30  ;;  %v7340_v29 = vpop.eup %4665 }
 0x382   : > { %v2599_v2 = vsel %vm10327_vm6, %v2428_v62, 0.0  ;;  %v2600_v19 = vsel %vm10328_vm3, %v2429_v53, 0.0  ;;  %v2199_v0 = vadd.f32 %v10329_v37, %v2101_v44  ;;  %v2601_v16 = vsel %vm7124_vm9, %v2430_v1, 0.0  ;;  %v7346_v51 = vpop.eup %4667  ;;  %v10340_v1 = vld [vmem:[#allocation163_spill] sm:$0xff] }
 0x383   : > { %v2670_v39 = vadd.f32 %v2600_v19, %v2599_v2  ;;  %v2602_v20 = vsel %vm7157_vm7, %v2431_v33, 0.0  ;;  %4677 = vlog2.f32 %v2264_v25  ;;  %v2262_v22 = vmax.f32 %v2198_v43, 1e-30  ;;  %v10344_v25 = vld [vmem:[#allocation166_spill] sm:$0xff]  ;;  %v10345_v2 = vld [vmem:[#allocation165_spill] sm:$0xff] }
 0x384   : > { %v2673_v9 = vadd.f32 %v2602_v20, %v2601_v16  ;;  %4679 = vlog2.f32 %v2265_v57  ;;  %v2263_v21 = vmax.f32 %v2199_v0, 1e-30  ;;  %v2323_v44 = vmul.f32 0.6931472, %v7243_v27  ;;  %v10336_v27 = vld [vmem:[#allocation173_spill] sm:$0xff]  ;;  %v2126_v16 = vpop.permute.xlu1 %2125 }
 0x385   : > { %2671 = vadd.xlane.f32.xlu0 %v2670_v39  ;;  %v2325_v63 = vmul.f32 0.6931472, %v7248_v58  ;;  %v2327_v28 = vmul.f32 0.6931472, %v7269_v55  ;;  %v2204_v54 = vadd.f32 %v10330_v30, %v2116_v35  ;;  %v7352_v31 = vpop.eup %4669  ;;  %4681 = vlog2.f32 %v2262_v22  ;;  %v10337_v55 = vld [vmem:[#allocation162_spill] sm:$0xff] }
 0x386   : > { %2674 = vadd.xlane.f32.xlu1 %v2673_v9  ;;  %v2329_v61 = vmul.f32 0.6931472, %v7274_v23  ;;  %vm10332_vm4 = vcmp.eq.s32.totalorder %v10331_v12, %v5527_v6  ;;  %vm10333_vm8 = vnez %v10208_v45  ;;  %v2205_v58 = vadd.f32 %v10336_v27, %v2116_v35  ;;  %v7366_v53 = vpop.eup %4671  ;;  %v10348_v30 = vld [vmem:[#allocation90_spill] sm:$0xff] }
 0x387   : > { %vm7360_vm5 = vmand %vm10333_vm8, %vm10332_vm4  ;;  %v2202_v56 = vadd.f32 %v10337_v55, %v2111_v60  ;;  %4683 = vlog2.f32 %v2263_v21  ;;  %v2432_v24 = vsub.f32 %v10338_v48, %v2323_v44  ;;  %v2433_v23 = vsub.f32 %v10339_v17, %v2325_v63  ;;  %v2121_v21 = vpop.permute.xlu0 %2120  ;;  %v10358_v55 = vld [vmem:[#allocation185_spill] sm:$0xff] }
 0x388   : > { %v2434_v49 = vsub.f32 %v10340_v1, %v2327_v28  ;;  %vm10341_vm0 = vcmp.eq.s32.totalorder %v10331_v12, %v5531_v38  ;;  %v2435_v3 = vsub.f32 %v10344_v25, %v2329_v61  ;;  %v2268_v43 = vmax.f32 %v2204_v54, 1e-30  ;;  %v7382_v57 = vpop.eup %4673  ;;  %v10352_v61 = vld [vmem:[#allocation181_spill] sm:$0xff]  ;;  %v10361_v25 = vld [vmem:[#allocation174_spill] sm:$0xff] }
 0x389   : > { %vm7376_vm9 = vmand %vm6892_vm14, %vm10341_vm0  ;;  %v2269_v32 = vmax.f32 %v2205_v58, 1e-30  ;;  %v2203_v19 = vadd.f32 %v10345_v2, %v2111_v60  ;;  %vm10346_vm7 = vnez %v10271_v41  ;;  %vm10347_vm10 = vnez %v10278_v15  ;;  %v7390_v20 = vpop.eup %4675 }
 0x38a   : > { %v2603_v37 = vsel %vm10346_vm7, %v2432_v24, 0.0  ;;  %v2604_v0 = vsel %vm10347_vm10, %v2433_v23, 0.0  ;;  %v2605_v35 = vsel %vm7360_vm5, %v2434_v49, 0.0  ;;  %v2266_v39 = vmax.f32 %v2202_v56, 1e-30  ;;  %v10359_v24 = vld [vmem:[#allocation175_spill] sm:$0xff] }
 0x38b   : > { %v2676_v9 = vadd.f32 %v2604_v0, %v2603_v37  ;;  %v2606_v22 = vsel %vm7376_vm9, %v2435_v3, 0.0  ;;  %4685 = vlog2.f32 %v2268_v43  ;;  %v2267_v60 = vmax.f32 %v2203_v19, 1e-30  ;;  %v10360_v23 = vld [vmem:[#allocation178_spill] sm:$0xff]  ;;  %v10362_v19 = vld [vmem:[#allocation177_spill] sm:$0xff]  ;;  %v2136_v0 = vpop.permute.xlu1 %2135 }
 0x38c   : > { %v2679_v44 = vadd.f32 %v2606_v22, %v2605_v35  ;;  %4687 = vlog2.f32 %v2269_v32  ;;  %v2331_v41 = vmul.f32 0.6931472, %v7260_v14  ;;  %v2333_v15 = vmul.f32 0.6931472, %v7264_v34  ;;  %v10353_v34 = vld [vmem:[#allocation168_spill] sm:$0xff]  ;;  %v2131_v22 = vpop.permute.xlu0 %2130 }
 0x38d   : > { %2677 = vadd.xlane.f32.xlu0 %v2676_v9  ;;  %4689 = vlog2.f32 %v2266_v39  ;;  %v2335_v63 = vmul.f32 0.6931472, %v7289_v18  ;;  %v2337_v28 = vmul.f32 0.6931472, %v7294_v50  ;;  %vm10349_vm11 = vcmp.eq.s32.totalorder %v10348_v30, %v5527_v6  ;;  %v7408_v14 = vpop.eup %4677  ;;  %v10354_v18 = vld [vmem:[#allocation171_spill] sm:$0xff] }
 0x38e   : > { %vm7403_vm1 = vmand %vm10333_vm8, %vm10349_vm11  ;;  %v10350_v54 = vmov 0  ;;  %v2208_v12 = vadd.f32 %v10352_v61, %v2126_v16  ;;  %2680 = vadd.xlane.f32.xlu1 %v2679_v44  ;;  %4691 = vlog2.f32 %v2267_v60  ;;  %v2436_v27 = vsub.f32 %v10353_v34, %v2331_v41  ;;  %v7422_v48 = vpop.eup %4679  ;;  %v10363_v41 = vld [vmem:[#allocation89_spill] sm:$0xff] }
 0x38f   : > { %v10351_v54 = vsel %vm7403_vm1, 4294967295, %v10350_v54  ;;  %v2437_v58 = vsub.f32 %v10354_v18, %v2333_v15  ;;  %vm10355_vm2 = vcmp.eq.s32.totalorder %v10348_v30, %v5531_v38  ;;  %v10356_v50 = vmov 0  ;;  %v7432_v35 = vpop.eup %4681  ;;  %v10370_v61 = vld [vmem:[#allocation193_spill] sm:$0xff] }
 0x390   : > { %vm7417_vm15 = vmand %vm6892_vm14, %vm10355_vm2  ;;  %v2209_v56 = vadd.f32 %v10358_v55, %v2126_v16  ;;  %v2438_v17 = vsub.f32 %v10359_v24, %v2335_v63  ;;  %v2439_v1 = vsub.f32 %v10360_v23, %v2337_v28  ;;  %v2272_v49 = vmax.f32 %v2208_v12, 1e-30  ;;  %v10379_v23 = vld [vmem:[#allocation187_spill] sm:$0xff] }
 0x391   : > { %v10357_v50 = vsel %vm7417_vm15, 4294967295, %v10356_v50  ;;  %v2206_v3 = vadd.f32 %v10361_v25, %v2121_v21  ;;  %v2607_v43 = vsel %vm7174_vm12, %v2436_v27, 0.0  ;;  %v2608_v32 = vsel %vm7191_vm13, %v2437_v58, 0.0  ;;  %v7438_v13 = vpop.eup %4683  ;;  %v10375_v27 = vld [vmem:[#allocation197_spill] sm:$0xff]  ;;  %v10376_v58 = vld [vmem:[#allocation186_spill] sm:$0xff] }
 0x392   : > { %v2273_v2 = vmax.f32 %v2209_v56, 1e-30  ;;  %v2207_v37 = vadd.f32 %v10362_v19, %v2121_v21  ;;  %v2682_v39 = vadd.f32 %v2608_v32, %v2607_v43  ;;  %v2609_v16 = vsel %vm7403_vm1, %v2438_v17, 0.0  ;;  %v10377_v56 = vld [vmem:[#allocation180_spill] sm:$0xff]  ;;  %v10378_v17 = vld [vmem:[#allocation183_spill] sm:$0xff]  ;;  %v10384_v19 = vld [vmem:[#allocation189_spill] sm:$0xff] }
 0x393   : > { %v2610_v9 = vsel %vm7417_vm15, %v2439_v1, 0.0  ;;  %4693 = vlog2.f32 %v2272_v49  ;;  %v2270_v7 = vmax.f32 %v2206_v3, 1e-30  ;;  %vm10364_vm13 = vcmp.eq.s32.totalorder %v10363_v41, %v5527_v6  ;;  %v10383_v3 = vld [vmem:[#allocation190_spill] sm:$0xff] }
 0x394   : > { %v2685_v60 = vadd.f32 %v2610_v9, %v2609_v16  ;;  %4695 = vlog2.f32 %v2273_v2  ;;  %v2271_v44 = vmax.f32 %v2207_v37, 1e-30  ;;  %vm7445_vm12 = vmand %vm10333_vm8, %vm10364_vm13  ;;  %2683 = vadd.xlane.f32.xlu0 %v2682_v39  ;;  %v2339_v15 = vmul.f32 0.6931472, %v7281_v4  ;;  %v10371_v4 = vld [vmem:[#allocation92_spill] sm:$0xff] }
 0x395   : > { %v2341_v63 = vmul.f32 0.6931472, %v7286_v52  ;;  %vm10367_vm6 = vcmp.eq.s32.totalorder %v10363_v41, %v5531_v38  ;;  %v10368_v28 = vmov 0  ;;  %v2343_v30 = vmul.f32 0.6931472, %v7314_v26  ;;  %v7474_v26 = vpop.eup %4685 }
 0x396   : > { %vm7456_vm3 = vmand %vm6892_vm14, %vm10367_vm6  ;;  %v2212_v12 = vadd.f32 %v10370_v61, %v2136_v0  ;;  %2686 = vadd.xlane.f32.xlu1 %v2685_v60  ;;  %4697 = vlog2.f32 %v2270_v7  ;;  %v2345_v34 = vmul.f32 0.6931472, %v7318_v42  ;;  %vm10372_vm4 = vcmp.eq.s32.totalorder %v10371_v4, %v5527_v6  ;;  %v7488_v25 = vpop.eup %4687  ;;  %v2146_v7 = vpop.permute.xlu1 %2145 }
 0x397   : > { %v10369_v28 = vsel %vm7456_vm3, 4294967295, %v10368_v28  ;;  %vm7468_vm0 = vmand %vm10333_vm8, %vm10372_vm4  ;;  %v10373_v52 = vmov 0  ;;  %v2213_v18 = vadd.f32 %v10375_v27, %v2136_v0  ;;  %v2210_v55 = vadd.f32 %v10376_v58, %v2131_v22  ;;  %v7492_v0 = vpop.eup %4689  ;;  %v2141_v61 = vpop.permute.xlu0 %2140 }
 0x398   : > { %v10374_v52 = vsel %vm7468_vm0, 4294967295, %v10373_v52  ;;  %4699 = vlog2.f32 %v2271_v44  ;;  %v2440_v24 = vsub.f32 %v10377_v56, %v2339_v15  ;;  %v2441_v42 = vsub.f32 %v10378_v17, %v2341_v63  ;;  %v7500_v44 = vpop.eup %4691  ;;  %v10385_v63 = vld [vmem:[#allocation91_spill] sm:$0xff]  ;;  %v10397_v17 = vld [vmem:[#allocation192_spill] sm:$0xff] }
 0x399   : > { %v2442_v1 = vsub.f32 %v10379_v23, %v2343_v30  ;;  %vm10380_vm7 = vcmp.eq.s32.totalorder %v10371_v4, %v5531_v38  ;;  %v10381_v49 = vmov 0  ;;  %v2443_v43 = vsub.f32 %v10383_v3, %v2345_v34 }
 0x39a   : > { %vm7484_vm10 = vmand %vm6892_vm14, %vm10380_vm7  ;;  %v2276_v32 = vmax.f32 %v2212_v12, 1e-30  ;;  %v2277_v2 = vmax.f32 %v2213_v18, 1e-30  ;;  %v2211_v37 = vadd.f32 %v10384_v19, %v2131_v22  ;;  %v2611_v39 = vsel %vm7445_vm12, %v2440_v24, 0.0  ;;  %v10404_v19 = vld [vmem:[#allocation112_spill] sm:$0xff] }
 0x39b   : > { %v10382_v49 = vsel %vm7484_vm10, 4294967295, %v10381_v49  ;;  %v2612_v16 = vsel %vm7456_vm3, %v2441_v42, 0.0  ;;  %v2613_v9 = vsel %vm7468_vm0, %v2442_v1, 0.0  ;;  %v2274_v60 = vmax.f32 %v2210_v55, 1e-30  ;;  %v10392_v55 = vld [vmem:[#allocation94_spill] sm:$0xff] }
 0x39c   : > { %v2688_v41 = vadd.f32 %v2612_v16, %v2611_v39  ;;  %v2614_v15 = vsel %vm7484_vm10, %v2443_v43, 0.0  ;;  %4701 = vlog2.f32 %v2276_v32  ;;  %v2275_v22 = vmax.f32 %v2211_v37, 1e-30  ;;  %v10402_v1 = vld [vmem:[#allocation201_spill] sm:$0xff]  ;;  %v10403_v32 = vld [vmem:[#allocation110_spill] sm:$0xff] }
 0x39d   : > { %vm10386_vm11 = vcmp.eq.s32.totalorder %v10385_v63, %v5527_v6  ;;  %v10387_v30 = vmov 0  ;;  %v2691_v12 = vadd.f32 %v2614_v15, %v2613_v9  ;;  %4703 = vlog2.f32 %v2277_v2  ;;  %v7536_v24 = vpop.eup %4693  ;;  %v10405_v16 = vld [vmem:[#allocation198_spill] sm:$0xff] }
 0x39e   : > { %vm7509_vm2 = vmand %vm10333_vm8, %vm10386_vm11  ;;  %v2347_v34 = vmul.f32 0.6931472, %v7301_v11  ;;  %v2349_v4 = vmul.f32 0.6931472, %v7307_v40  ;;  %vm10389_vm13 = vcmp.eq.s32.totalorder %v10385_v63, %v5531_v38  ;;  %v10390_v27 = vmov 0  ;;  %2689 = vadd.xlane.f32.xlu0 %v2688_v41  ;;  %v10396_v40 = vld [vmem:[#allocation200_spill] sm:$0xff]  ;;  %v7550_v43 = vpop.eup %4695 }
 0x39f   : > { %v10388_v30 = vsel %vm7509_vm2, 4294967295, %v10387_v30  ;;  %vm7520_vm6 = vmand %vm6892_vm14, %vm10389_vm13  ;;  %4705 = vlog2.f32 %v2274_v60  ;;  %v2351_v18 = vmul.f32 0.6931472, %v7340_v29  ;;  %v2353_v58 = vmul.f32 0.6931472, %v7346_v51  ;;  %2692 = vadd.xlane.f32.xlu1 %v2691_v12  ;;  %v10398_v29 = vld [vmem:[#allocation195_spill] sm:$0xff]  ;;  %v2156_v12 = vpop.permute.xlu1 %2155 }
 0x3a0   : > { %v10391_v27 = vsel %vm7520_vm6, 4294967295, %v10390_v27  ;;  %vm10393_vm4 = vcmp.eq.s32.totalorder %v10392_v55, %v5527_v6  ;;  %v10394_v11 = vmov 0  ;;  %v2216_v56 = vadd.f32 %v10396_v40, %v2146_v7 }
 0x3a1   : > { %vm7531_vm7 = vmand %vm10333_vm8, %vm10393_vm4  ;;  %4707 = vlog2.f32 %v2275_v22  ;;  %v2444_v42 = vsub.f32 %v10397_v17, %v2347_v34  ;;  %v2445_v23 = vsub.f32 %v10398_v29, %v2349_v4  ;;  %vm10399_vm11 = vcmp.eq.s32.totalorder %v10392_v55, %v5531_v38  ;;  %v10406_v22 = vld [vmem:[#allocation199_spill] sm:$0xff] }
 0x3a2   : > { %v10395_v11 = vsel %vm7531_vm7, 4294967295, %v10394_v11  ;;  %vm7545_vm13 = vmand %vm6892_vm14, %vm10399_vm11  ;;  %v10400_v51 = vmov 0  ;;  %v2217_v3 = vadd.f32 %v10402_v1, %v2146_v7  ;;  %v2446_v2 = vsub.f32 %v10403_v32, %v2351_v18  ;;  %v7560_v7 = vpop.eup %4697  ;;  %v10414_v32 = vld [vmem:[#allocation96_spill] sm:$0xff] }
 0x3a3   : > { %v10401_v51 = vsel %vm7545_vm13, 4294967295, %v10400_v51  ;;  %v2447_v37 = vsub.f32 %v10404_v19, %v2353_v58  ;;  %v2280_v39 = vmax.f32 %v2216_v56, 1e-30  ;;  %v2214_v9 = vadd.f32 %v10405_v16, %v2141_v61  ;;  %v10407_v58 = vld [vmem:[#allocation93_spill] sm:$0xff]  ;;  %v7575_v40 = vpop.eup %4699  ;;  %v10418_v19 = vld [vmem:[#allocation204_spill] sm:$0xff]  ;;  %v10423_v16 = vld [vmem:[#allocation202_spill] sm:$0xff] }
 0x3a4   : > { %v2615_v60 = vsel %vm7509_vm2, %v2444_v42, 0.0  ;;  %v2616_v41 = vsel %vm7520_vm6, %v2445_v23, 0.0  ;;  %v2281_v15 = vmax.f32 %v2217_v3, 1e-30  ;;  %v2215_v63 = vadd.f32 %v10406_v22, %v2141_v61  ;;  %v2151_v61 = vpop.permute.xlu0 %2150  ;;  %v10425_v22 = vld [vmem:[#allocation116_spill] sm:$0xff] }
 0x3a5   : > { %v2694_v34 = vadd.f32 %v2616_v41, %v2615_v60  ;;  %v2617_v4 = vsel %vm7531_vm7, %v2446_v2, 0.0  ;;  %v2618_v18 = vsel %vm7545_vm13, %v2447_v37, 0.0  ;;  %4709 = vlog2.f32 %v2280_v39  ;;  %v10424_v41 = vld [vmem:[#allocation114_spill] sm:$0xff] }
 0x3a6   : > { %vm10408_vm4 = vcmp.eq.s32.totalorder %v10407_v58, %v5527_v6  ;;  %v10409_v55 = vmov 0  ;;  %v2697_v56 = vadd.f32 %v2618_v18, %v2617_v4  ;;  %4711 = vlog2.f32 %v2281_v15  ;;  %v7611_v60 = vpop.eup %4701  ;;  %v10427_v4 = vld [vmem:[#allocation95_spill] sm:$0xff] }
 0x3a7   : > { %vm7571_vm11 = vmand %vm10333_vm8, %vm10408_vm4  ;;  %v2278_v17 = vmax.f32 %v2214_v9, 1e-30  ;;  %v2279_v42 = vmax.f32 %v2215_v63, 1e-30  ;;  %vm10411_vm13 = vcmp.eq.s32.totalorder %v10407_v58, %v5531_v38  ;;  %v10412_v29 = vmov 0  ;;  %2695 = vadd.xlane.f32.xlu0 %v2694_v34  ;;  %v10426_v63 = vld [vmem:[#allocation118_spill] sm:$0xff] }
 0x3a8   : > { %v10410_v55 = vsel %vm7571_vm11, 4294967295, %v10409_v55  ;;  %vm7582_vm7 = vmand %vm6892_vm14, %vm10411_vm13  ;;  %v2355_v23 = vmul.f32 0.6931472, %v7325_v36  ;;  %v2357_v1 = vmul.f32 0.6931472, %v7330_v47  ;;  %vm10415_vm4 = vcmp.eq.s32.totalorder %v10414_v32, %v5527_v6  ;;  %2698 = vadd.xlane.f32.xlu1 %v2697_v56  ;;  %v10422_v47 = vld [vmem:[#allocation205_spill] sm:$0xff] }
 0x3a9   : > { %v10413_v29 = vsel %vm7582_vm7, 4294967295, %v10412_v29  ;;  %v2359_v3 = vmul.f32 0.6931472, %v7382_v57  ;;  %vm7594_vm10 = vmand %vm10333_vm8, %vm10415_vm4  ;;  %v10416_v2 = vmov 0  ;;  %v2220_v37 = vadd.f32 %v10418_v19, %v2156_v12  ;;  %v10431_v58 = vld [vmem:[#allocation120_spill] sm:$0xff] }
 0x3aa   : > { %v10417_v2 = vsel %vm7594_vm10, 4294967295, %v10416_v2  ;;  %4713 = vlog2.f32 %v2278_v17  ;;  %v2361_v39 = vmul.f32 0.6931472, %v7390_v20  ;;  %vm10419_vm13 = vcmp.eq.s32.totalorder %v10414_v32, %v5531_v38 }
 0x3ab   : > { %vm7605_vm0 = vmand %vm6892_vm14, %vm10419_vm13  ;;  %v10420_v36 = vmov 0  ;;  %v2221_v57 = vadd.f32 %v10422_v47, %v2156_v12  ;;  %v2218_v9 = vadd.f32 %v10423_v16, %v2151_v61  ;;  %4715 = vlog2.f32 %v2279_v42  ;;  %v7625_v12 = vpop.eup %4703  ;;  %v10436_v47 = vld [vmem:[#allocation98_spill] sm:$0xff] }
 0x3ac   : > { %v10421_v36 = vsel %vm7605_vm0, 4294967295, %v10420_v36  ;;  %v2448_v15 = vsub.f32 %v10424_v41, %v2355_v23  ;;  %v2449_v20 = vsub.f32 %v10425_v22, %v2357_v1  ;;  %v2450_v34 = vsub.f32 %v10426_v63, %v2359_v3  ;;  %v10432_v23 = vld [vmem:[#allocation203_spill] sm:$0xff]  ;;  %v7638_v3 = vpop.eup %4705 }
 0x3ad   : > { %vm10428_vm4 = vcmp.eq.s32.totalorder %v10427_v4, %v5527_v6  ;;  %v2451_v56 = vsub.f32 %v10431_v58, %v2361_v39  ;;  %v2284_v17 = vmax.f32 %v2220_v37, 1e-30  ;;  %v2285_v42 = vmax.f32 %v2221_v57, 1e-30  ;;  %v7655_v16 = vpop.eup %4707 }
 0x3ae   : > { %vm7621_vm13 = vmand %vm10333_vm8, %vm10428_vm4  ;;  %v2219_v32 = vadd.f32 %v10432_v23, %v2151_v61  ;;  %vm10433_vm6 = vcmp.eq.s32.totalorder %v10427_v4, %v5531_v38  ;;  %v2619_v19 = vsel %vm7571_vm11, %v2448_v15, 0.0  ;;  %v2620_v37 = vsel %vm7582_vm7, %v2449_v20, 0.0  ;;  %v10443_v4 = vld [vmem:[#allocation97_spill] sm:$0xff]  ;;  %v10450_v23 = vld [vmem:[#allocation122_spill] sm:$0xff] }
 0x3af   : > { %vm7634_vm2 = vmand %vm6892_vm14, %vm10433_vm6  ;;  %v2621_v61 = vsel %vm7594_vm10, %v2450_v34, 0.0  ;;  %v2282_v39 = vmax.f32 %v2218_v9, 1e-30  ;;  %vm10437_vm4 = vcmp.eq.s32.totalorder %v10436_v47, %v5527_v6  ;;  %v10438_v57 = vmov 0 }
 0x3b0   : > { %vm7651_vm6 = vmand %vm10333_vm8, %vm10437_vm4  ;;  %v2700_v41 = vadd.f32 %v2620_v37, %v2619_v19  ;;  %v2622_v15 = vsel %vm7605_vm0, %v2451_v56, 0.0  ;;  %4717 = vlog2.f32 %v2284_v17  ;;  %v2283_v22 = vmax.f32 %v2219_v32, 1e-30 }
 0x3b1   : > { %v10439_v57 = vsel %vm7651_vm6, 4294967295, %v10438_v57  ;;  %vm10440_vm10 = vcmp.eq.s32.totalorder %v10436_v47, %v5531_v38  ;;  %v10441_v9 = vmov 0  ;;  %v2703_v20 = vadd.f32 %v2622_v15, %v2621_v61 }
 0x3b2   : > { %vm7664_vm7 = vmand %vm6892_vm14, %vm10440_vm10  ;;  %4719 = vlog2.f32 %v2285_v42  ;;  %v2363_v63 = vmul.f32 0.6931472, %v7352_v31  ;;  %v2365_v34 = vmul.f32 0.6931472, %v7366_v53  ;;  %vm10444_vm4 = vcmp.eq.s32.totalorder %v10443_v4, %v5527_v6  ;;  %2701 = vadd.xlane.f32.xlu0 %v2700_v41  ;;  %v7691_v53 = vpop.eup %4709  ;;  %v10458_v41 = vld [vmem:[#allocation130_spill] sm:$0xff] }
 0x3b3   : > { %v10442_v9 = vsel %vm7664_vm7, 4294967295, %v10441_v9  ;;  %vm7675_vm0 = vmand %vm10333_vm8, %vm10444_vm4  ;;  %v10445_v58 = vmov 0  ;;  %4721 = vlog2.f32 %v2282_v39  ;;  %v2367_v56 = vmul.f32 0.6931472, %v7432_v35  ;;  %2704 = vadd.xlane.f32.xlu1 %v2703_v20  ;;  %v10451_v35 = vld [vmem:[#allocation124_spill] sm:$0xff]  ;;  %v7705_v61 = vpop.eup %4711  ;;  %v10457_v39 = vld [vmem:[#allocation127_spill] sm:$0xff] }
 0x3b4   : > { %v10446_v58 = vsel %vm7675_vm0, 4294967295, %v10445_v58  ;;  %v2369_v17 = vmul.f32 0.6931472, %v7438_v13  ;;  %v2371_v42 = vmul.f32 0.6931472, %v7408_v14  ;;  %vm10447_vm10 = vcmp.eq.s32.totalorder %v10443_v4, %v5531_v38  ;;  %v10452_v14 = vld [vmem:[#allocation100_spill] sm:$0xff] }
 0x3b5   : > { %vm7687_vm11 = vmand %vm6892_vm14, %vm10447_vm10  ;;  %v10448_v31 = vmov 0  ;;  %4723 = vlog2.f32 %v2283_v22  ;;  %v2452_v32 = vsub.f32 %v10450_v23, %v2363_v63  ;;  %v2453_v19 = vsub.f32 %v10451_v35, %v2365_v34  ;;  %v10459_v22 = vld [vmem:[#allocation133_spill] sm:$0xff]  ;;  %v4714_v35 = vpop.eup %4713 }
 0x3b6   : > { %v10449_v31 = vsel %vm7687_vm11, 4294967295, %v10448_v31  ;;  %v2373_v13 = vmul.f32 0.6931472, %v7422_v48  ;;  %vm10453_vm4 = vcmp.eq.s32.totalorder %v10452_v14, %v5527_v6  ;;  %v10454_v37 = vmov 0 }
 0x3b7   : > { %vm7701_vm15 = vmand %vm10333_vm8, %vm10453_vm4  ;;  %v2454_v47 = vsub.f32 %v10457_v39, %v2367_v56  ;;  %v2455_v15 = vsub.f32 %v10458_v41, %v2369_v17  ;;  %v2456_v20 = vsub.f32 %v10459_v22, %v2371_v42  ;;  %v2375_v63 = vmul.f32 0.6931472, %v7492_v0  ;;  %v10464_v56 = vld [vmem:[#allocation135_spill] sm:$0xff]  ;;  %v7750_v39 = vpop.eup %4715  ;;  %v10472_v22 = vld [vmem:[#allocation140_spill] sm:$0xff] }
 0x3b8   : > { %v10455_v37 = vsel %vm7701_vm15, 4294967295, %v10454_v37  ;;  %vm10460_vm10 = vcmp.eq.s32.totalorder %v10452_v14, %v5531_v38  ;;  %v10461_v48 = vmov 0  ;;  %v2623_v34 = vsel %vm7621_vm13, %v2452_v32, 0.0  ;;  %v10465_v0 = vld [vmem:[#allocation99_spill] sm:$0xff] }
 0x3b9   : > { %10456 = vst [vmem:[#allocation245_spill] sm:$0xff] %v10455_v37  ;;  %vm7716_vm1 = vmand %vm6892_vm14, %vm10460_vm10  ;;  %v2624_v4 = vsel %vm7634_vm2, %v2453_v19, 0.0  ;;  %v2457_v17 = vsub.f32 %v10464_v56, %v2373_v13  ;;  %v2377_v42 = vmul.f32 0.6931472, %v7500_v44  ;;  %vm10466_vm4 = vcmp.eq.s32.totalorder %v10465_v0, %v5527_v6 }
 0x3ba   : > { %v10462_v48 = vsel %vm7716_vm1, 4294967295, %v10461_v48  ;;  %vm7731_vm3 = vmand %vm10333_vm8, %vm10466_vm4  ;;  %v2706_v14 = vadd.f32 %v2624_v4, %v2623_v34  ;;  %v2625_v32 = vsel %vm7651_vm6, %v2454_v47, 0.0  ;;  %v2626_v19 = vsel %vm7664_vm7, %v2455_v15, 0.0  ;;  %v10473_v34 = vld [vmem:[#allocation143_spill] sm:$0xff] }
 0x3bb   : > { %10463 = vst [vmem:[#allocation241_spill] sm:$0xff] %v10462_v48  ;;  %v2627_v44 = vsel %vm7675_vm0, %v2456_v20, 0.0  ;;  %vm10469_vm10 = vcmp.eq.s32.totalorder %v10465_v0, %v5531_v38  ;;  %v10470_v13 = vmov 0  ;;  %v2709_v41 = vadd.f32 %v2626_v19, %v2625_v32  ;;  %v10474_v20 = vld [vmem:[#allocation102_spill] sm:$0xff]  ;;  %v10492_v48 = vld [vmem:[#allocation155_spill] sm:$0xff] }
 0x3bc   : > { %vm7746_vm4 = vmand %vm6892_vm14, %vm10469_vm10  ;;  %v2628_v47 = vsel %vm7687_vm11, %v2457_v17, 0.0  ;;  %v2458_v15 = vsub.f32 %v10472_v22, %v2375_v63  ;;  %v2459_v4 = vsub.f32 %v10473_v34, %v2377_v42  ;;  %vm10475_vm7 = vcmp.eq.s32.totalorder %v10474_v20, %v5527_v6  ;;  %2707 = vadd.xlane.f32.xlu0 %v2706_v14  ;;  %v10482_v14 = vld [vmem:[#allocation101_spill] sm:$0xff]  ;;  %v10486_v22 = vld [vmem:[#allocation146_spill] sm:$0xff] }
 0x3bd   : > { %v10471_v13 = vsel %vm7746_vm4, 4294967295, %v10470_v13  ;;  %vm7761_vm6 = vmand %vm10333_vm8, %vm10475_vm7  ;;  %v10476_v56 = vmov 0  ;;  %v2712_v0 = vadd.f32 %v2628_v47, %v2627_v44  ;;  %v2379_v32 = vmul.f32 0.6931472, %v7474_v26  ;;  %2710 = vadd.xlane.f32.xlu1 %v2709_v41  ;;  %v7792_v41 = vpop.eup %4717  ;;  %v10487_v34 = vld [vmem:[#allocation148_spill] sm:$0xff] }
 0x3be   : > { %v10477_v56 = vsel %vm7761_vm6, 4294967295, %v10476_v56  ;;  %v2381_v19 = vmul.f32 0.6931472, %v7488_v25  ;;  %v2383_v17 = vmul.f32 0.6931472, %v7560_v7  ;;  %vm10478_vm10 = vcmp.eq.s32.totalorder %v10474_v20, %v5531_v38  ;;  %v10488_v20 = vld [vmem:[#allocation152_spill] sm:$0xff]  ;;  %v4720_v10 = vpop.eup %4719 }
 0x3bf   : > { %vm7773_vm11 = vmand %vm6892_vm14, %vm10478_vm10  ;;  %v10479_v63 = vmov 0  ;;  %v2629_v42 = vsel %vm7701_vm15, %v2458_v15, 0.0  ;;  %v2630_v26 = vsel %vm7716_vm1, %v2459_v4, 0.0  ;;  %v2385_v25 = vmul.f32 0.6931472, %v7575_v40 }
 0x3c0   : > { %v10480_v63 = vsel %vm7773_vm11, 4294967295, %v10479_v63  ;;  %v2387_v7 = vmul.f32 0.6931472, %v7536_v24  ;;  %vm10483_vm7 = vcmp.eq.s32.totalorder %v10482_v14, %v5527_v6  ;;  %v10484_v44 = vmov 0  ;;  %2713 = vadd.xlane.f32.xlu0 %v2712_v0 }
 0x3c1   : > { %10481 = vst [vmem:[#allocation242_spill] sm:$0xff] %v10480_v63  ;;  %vm7788_vm10 = vmand %vm10333_vm8, %vm10483_vm7  ;;  %v2715_v47 = vadd.f32 %v2630_v26, %v2629_v42  ;;  %v2460_v15 = vsub.f32 %v10486_v22, %v2379_v32  ;;  %v2461_v4 = vsub.f32 %v10487_v34, %v2381_v19  ;;  %v2462_v40 = vsub.f32 %v10488_v20, %v2383_v17  ;;  %v10493_v26 = vld [vmem:[#allocation158_spill] sm:$0xff]  ;;  %v10494_v22 = vld [vmem:[#allocation104_spill] sm:$0xff] }
 0x3c2   : > { %v10485_v44 = vsel %vm7788_vm10, 4294967295, %v10484_v44  ;;  %vm10489_vm1 = vcmp.eq.s32.totalorder %v10482_v14, %v5531_v38  ;;  %v10490_v24 = vmov 0  ;;  %v2463_v37 = vsub.f32 %v10492_v48, %v2385_v25  ;;  %v4722_v14 = vpop.eup %4721 }
 0x3c3   : > { %vm7802_vm15 = vmand %vm6892_vm14, %vm10489_vm1  ;;  %v2389_v42 = vmul.f32 0.6931472, %v7550_v43  ;;  %v2464_v32 = vsub.f32 %v10493_v26, %v2387_v7  ;;  %v2391_v19 = vmul.f32 0.6931472, %v7638_v3  ;;  %vm10495_vm7 = vcmp.eq.s32.totalorder %v10494_v22, %v5527_v6  ;;  %v4724_v0 = vpop.eup %4723  ;;  %2716 = vadd.xlane.f32.xlu1 %v2715_v47  ;;  %v10506_v47 = vld [vmem:[#allocation164_spill] sm:$0xff] }
 0x3c4   : > { %v10491_v24 = vsel %vm7802_vm15, 4294967295, %v10490_v24  ;;  %vm7815_vm0 = vmand %vm10333_vm8, %vm10495_vm7  ;;  %v10496_v17 = vmov 0  ;;  %v2631_v48 = vsel %vm7731_vm3, %v2460_v15, 0.0  ;;  %v2632_v43 = vsel %vm7746_vm4, %v2461_v4, 0.0  ;;  %v10501_v4 = vld [vmem:[#allocation160_spill] sm:$0xff] }
 0x3c5   : > { %v10497_v17 = vsel %vm7815_vm0, 4294967295, %v10496_v17  ;;  %v2633_v3 = vsel %vm7761_vm6, %v2462_v40, 0.0  ;;  %v2393_v25 = vmul.f32 0.6931472, %v7655_v16  ;;  %vm10498_vm1 = vcmp.eq.s32.totalorder %v10494_v22, %v5531_v38  ;;  %v10502_v40 = vld [vmem:[#allocation103_spill] sm:$0xff] }
 0x3c6   : > { %vm7831_vm7 = vmand %vm6892_vm14, %vm10498_vm1  ;;  %v10499_v7 = vmov 0  ;;  %v2718_v15 = vadd.f32 %v2632_v43, %v2631_v48  ;;  %v2634_v34 = vsel %vm7773_vm11, %v2463_v37, 0.0  ;;  %v2465_v20 = vsub.f32 %v10501_v4, %v2389_v42  ;;  %v10507_v43 = vld [vmem:[#allocation167_spill] sm:$0xff] }
 0x3c7   : > { %v10500_v7 = vsel %vm7831_vm7, 4294967295, %v10499_v7  ;;  %v2635_v16 = vsel %vm7788_vm10, %v2464_v32, 0.0  ;;  %vm10503_vm6 = vcmp.eq.s32.totalorder %v10502_v40, %v5527_v6  ;;  %v2721_v22 = vadd.f32 %v2634_v34, %v2633_v3 }
 0x3c8   : > { %vm7845_vm1 = vmand %vm10333_vm8, %vm10503_vm6  ;;  %v2466_v48 = vsub.f32 %v10506_v47, %v2391_v19  ;;  %v2467_v63 = vsub.f32 %v10507_v43, %v2393_v25  ;;  %v2395_v37 = vmul.f32 0.6931472, %v7611_v60  ;;  %vm10508_vm11 = vcmp.eq.s32.totalorder %v10502_v40, %v5531_v38  ;;  %v10511_v19 = vld [vmem:[#allocation106_spill] sm:$0xff]  ;;  %2719 = vadd.xlane.f32.xlu0 %v2718_v15 }
 0x3c9   : > { %vm7857_vm10 = vmand %vm6892_vm14, %vm10508_vm11  ;;  %v10509_v42 = vmov 0  ;;  %v2636_v32 = vsel %vm7802_vm15, %v2465_v20, 0.0  ;;  %v2397_v3 = vmul.f32 0.6931472, %v7625_v12  ;;  %v2399_v34 = vmul.f32 0.6931472, %v4714_v35  ;;  %2722 = vadd.xlane.f32.xlu1 %v2721_v22 }
 0x3ca   : > { %v10510_v42 = vsel %vm7857_vm10, 4294967295, %v10509_v42  ;;  %vm10512_vm6 = vcmp.eq.s32.totalorder %v10511_v19, %v5527_v6  ;;  %v10513_v60 = vmov 0  ;;  %v7875_v25 = vadd.f32 %v7198_v5, %v7184_v59  ;;  %v10515_v35 = vld [vmem:[#allocation170_spill] sm:$0xff]  ;;  %v10519_v5 = vld [vmem:[#allocation172_spill] sm:$0xff] }
 0x3cb   : > { %vm7869_vm4 = vmand %vm10333_vm8, %vm10512_vm6  ;;  %v2724_v4 = vadd.f32 %v2636_v32, %v2635_v16  ;;  %v2637_v20 = vsel %vm7815_vm0, %v2466_v48, 0.0  ;;  %v2638_v12 = vsel %vm7831_vm7, %v2467_v63, 0.0  ;;  %v2468_v40 = vsub.f32 %v10515_v35, %v2395_v37  ;;  %v10520_v48 = vld [vmem:[#allocation176_spill] sm:$0xff]  ;;  %v10521_v63 = vld [vmem:[#allocation105_spill] sm:$0xff] }
 0x3cc   : > { %v10514_v60 = vsel %vm7869_vm4, 4294967295, %v10513_v60  ;;  %vm10516_vm11 = vcmp.eq.s32.totalorder %v10511_v19, %v5531_v38  ;;  %v10517_v47 = vmov 0  ;;  %v2727_v59 = vadd.f32 %v2638_v12, %v2637_v20  ;;  %v10528_v20 = vld [vmem:[#allocation179_spill] sm:$0xff]  ;;  %v10529_v35 = vld [vmem:[#allocation108_spill] sm:$0xff] }
 0x3cd   : > { %vm7887_vm6 = vmand %vm6892_vm14, %vm10516_vm11  ;;  %v2469_v15 = vsub.f32 %v10519_v5, %v2397_v3  ;;  %v2401_v16 = vmul.f32 0.6931472, %v7750_v39  ;;  %v2470_v43 = vsub.f32 %v10520_v48, %v2399_v34  ;;  %vm10522_vm7 = vcmp.eq.s32.totalorder %v10521_v63, %v5527_v6  ;;  %2725 = vadd.xlane.f32.xlu0 %v2724_v4  ;;  %v10533_v5 = vld [vmem:[#allocation182_spill] sm:$0xff]  ;;  %v10538_v4 = vld [vmem:[#allocation188_spill] sm:$0xff] }
 0x3ce   : > { %v10518_v47 = vsel %vm7887_vm6, 4294967295, %v10517_v47  ;;  %vm7899_vm0 = vmand %vm10333_vm8, %vm10522_vm7  ;;  %v2639_v32 = vsel %vm7845_vm1, %v2468_v40, 0.0  ;;  %v2403_v22 = vmul.f32 0.6931472, %v7691_v53  ;;  %v2405_v3 = vmul.f32 0.6931472, %v7705_v61  ;;  %2728 = vadd.xlane.f32.xlu1 %v2727_v59 }
 0x3cf   : > { %vm10525_vm11 = vcmp.eq.s32.totalorder %v10521_v63, %v5531_v38  ;;  %v2862_v34 = vsel %vm7360_vm5, 1.0, %v10230_v46  ;;  %v2640_v19 = vsel %vm7857_vm10, %v2469_v15, 0.0  ;;  %v2471_v53 = vsub.f32 %v10528_v20, %v2401_v16  ;;  %v10534_v15 = vld [vmem:[#allocation184_spill] sm:$0xff]  ;;  %v10590_v40 = vld [vmem:[#allocation250_spill] sm:$0xff] }
 0x3d0   : > { %vm7912_vm15 = vmand %vm6892_vm14, %vm10525_vm11  ;;  %v2641_v61 = vsel %vm7869_vm4, %v2470_v43, 0.0  ;;  %v2407_v12 = vmul.f32 0.6931472, %v4722_v14  ;;  %vm10530_vm7 = vcmp.eq.s32.totalorder %v10529_v35, %v5527_v6  ;;  %v2730_v62 = vadd.f32 %v2640_v19, %v2639_v32 }
 0x3d1   : > { %vm7929_vm11 = vmand %vm10333_vm8, %vm10530_vm7  ;;  %v2472_v48 = vsub.f32 %v10533_v5, %v2403_v22  ;;  %v2473_v63 = vsub.f32 %v10534_v15, %v2405_v3  ;;  %v2409_v16 = vmul.f32 0.6931472, %v4724_v0  ;;  %vm10535_vm5 = vcmp.eq.s32.totalorder %v10529_v35, %v5531_v38  ;;  %v10539_v3 = vld [vmem:[#allocation107_spill] sm:$0xff]  ;;  %v10548_v5 = vld [vmem:[#allocation196_spill] sm:$0xff] }
 0x3d2   : > { %vm7940_vm4 = vmand %vm6892_vm14, %vm10535_vm5  ;;  %v2642_v43 = vsel %vm7887_vm6, %v2471_v53, 0.0  ;;  %v2474_v32 = vsub.f32 %v10538_v4, %v2407_v12  ;;  %v2411_v22 = vmul.f32 0.6931472, %v7792_v41  ;;  %v2413_v19 = vmul.f32 0.6931472, %v4720_v10  ;;  %v10543_v12 = vld [vmem:[#allocation191_spill] sm:$0xff]  ;;  %2731 = vadd.xlane.f32.xlu0 %v2730_v62 }
 0x3d3   : > { %vm10540_vm7 = vcmp.eq.s32.totalorder %v10539_v3, %v5527_v6  ;;  %v2733_v20 = vadd.f32 %v2642_v43, %v2641_v61  ;;  %v2643_v59 = vsel %vm7899_vm0, %v2472_v48, 0.0  ;;  %v2644_v53 = vsel %vm7912_vm15, %v2473_v63, 0.0  ;;  %v10547_v41 = vld [vmem:[#allocation194_spill] sm:$0xff]  ;;  %v10586_v0 = vld [vmem:[#allocation244_spill] sm:$0xff] }
 0x3d4   : > { %vm7953_vm10 = vmand %vm10333_vm8, %vm10540_vm7  ;;  %v2475_v35 = vsub.f32 %v10543_v12, %v2409_v16  ;;  %vm10544_vm5 = vcmp.eq.s32.totalorder %v10539_v3, %v5531_v38  ;;  %v2736_v45 = vadd.f32 %v2644_v53, %v2643_v59  ;;  %v2645_v10 = vsel %vm7929_vm11, %v2474_v32, 0.0  ;;  %v10588_v6 = vld [vmem:[#allocation248_spill] sm:$0xff] }
 0x3d5   : > { %vm7967_vm6 = vmand %vm6892_vm14, %vm10544_vm5  ;;  %v2476_v61 = vsub.f32 %v10547_v41, %v2411_v22  ;;  %v2477_v48 = vsub.f32 %v10548_v5, %v2413_v19  ;;  %v2863_v38 = vsel %vm7376_vm9, 1.0, %v10230_v46  ;;  %v2868_v8 = vsel %vm7445_vm12, 1.0, %v10230_v46  ;;  %2734 = vadd.xlane.f32.xlu1 %v2733_v20 }
 0x3d6   : > { %v2646_v15 = vsel %vm7940_vm4, %v2475_v35, 0.0  ;;  %vm10549_vm14 = vnez %v10369_v28  ;;  %v7990_v4 = vadd.f32 %v2863_v38, %v2862_v34  ;;  %vm10550_vm8 = vnez %v10351_v54  ;;  %2737 = vadd.xlane.f32.xlu0 %v2736_v45 }
 0x3d7   : > { %v2869_v63 = vsel %vm10549_vm14, 1.0, %v10230_v46  ;;  %v2739_v16 = vadd.f32 %v2646_v15, %v2645_v10  ;;  %v2647_v62 = vsel %vm7953_vm10, %v2476_v61, 0.0  ;;  %v2648_v43 = vsel %vm7967_vm6, %v2477_v48, 0.0  ;;  %v10566_v10 = vld [vmem:[#allocation239_spill] sm:$0xff]  ;;  %v10568_v61 = vld [vmem:[#allocation245_spill] sm:$0xff] }
 0x3d8   : > { %v2742_v33 = vadd.f32 %v2648_v43, %v2647_v62  ;;  %v7992_v32 = vadd.f32 %v2869_v63, %v2868_v8  ;;  %v2866_v21 = vsel %vm10550_vm8, 1.0, %v10230_v46  ;;  %vm10551_vm9 = vnez %v10357_v50  ;;  %v10570_v48 = vld [vmem:[#allocation241_spill] sm:$0xff]  ;;  %v10575_v63 = vld [vmem:[#allocation242_spill] sm:$0xff] }
 0x3d9   : > { %v2867_v28 = vsel %vm10551_vm9, 1.0, %v10230_v46  ;;  %vm10552_vm12 = vnez %v10388_v30  ;;  %vm10553_vm7 = vnez %v10391_v27  ;;  %vm10554_vm5 = vnez %v10374_v52  ;;  %2740 = vadd.xlane.f32.xlu1 %v2739_v16  ;;  %v10577_v62 = vld [vmem:[#allocation238_spill] sm:$0xff] }
 0x3da   : > { %v8000_v22 = vadd.f32 %v2867_v28, %v2866_v21  ;;  %v2872_v19 = vsel %vm10552_vm12, 1.0, %v10230_v46  ;;  %v2873_v34 = vsel %vm10553_vm7, 1.0, %v10230_v46  ;;  %v2870_v3 = vsel %vm10554_vm5, 1.0, %v10230_v46  ;;  %2743 = vadd.xlane.f32.xlu0 %v2742_v33  ;;  %v10580_v33 = vld [vmem:[#allocation243_spill] sm:$0xff] }
 0x3db   : > { %v8011_v54 = vadd.f32 %v2873_v34, %v2872_v19  ;;  %vm10555_vm14 = vnez %v10382_v49  ;;  %vm10556_vm8 = vnez %v10410_v55  ;;  %vm10557_vm9 = vnez %v10413_v29 }
 0x3dc   : > { %v2871_v50 = vsel %vm10555_vm14, 1.0, %v10230_v46  ;;  %v2876_v30 = vsel %vm10556_vm8, 1.0, %v10230_v46  ;;  %v2877_v27 = vsel %vm10557_vm9, 1.0, %v10230_v46  ;;  %vm10558_vm12 = vnez %v10395_v11 }
 0x3dd   : > { %v2948_v20 = vadd.f32 %v2871_v50, %v2870_v3  ;;  %v8022_v59 = vadd.f32 %v2877_v27, %v2876_v30  ;;  %v2874_v52 = vsel %vm10558_vm12, 1.0, %v10230_v46  ;;  %vm10559_vm7 = vnez %v10401_v51  ;;  %2907 = vadd.xlane.f32.xlu1 %v10566_v10  ;;  %v10584_v30 = vld [vmem:[#allocation240_spill] sm:$0xff]  ;;  %v10585_v27 = vld [vmem:[#allocation247_spill] sm:$0xff] }
 0x3de   : > { %v2875_v49 = vsel %vm10559_vm7, 1.0, %v10230_v46  ;;  %v2880_v55 = vsel %vm7621_vm13, 1.0, %v10230_v46  ;;  %v2881_v29 = vsel %vm7634_vm2, 1.0, %v10230_v46  ;;  %vm10560_vm5 = vnez %v10417_v2  ;;  %2910 = vadd.xlane.f32.xlu0 %v10577_v62 }
 0x3df   : > { %v2954_v53 = vadd.f32 %v2875_v49, %v2874_v52  ;;  %v2878_v12 = vsel %vm10560_vm5, 1.0, %v10230_v46  ;;  %v2963_v35 = vadd.f32 %v2881_v29, %v2880_v55  ;;  %vm10561_vm14 = vnez %v10421_v36  ;;  %v10587_v49 = vld [vmem:[#allocation249_spill] sm:$0xff]  ;;  %v10589_v55 = vld [vmem:[#allocation251_spill] sm:$0xff]  ;;  %v2557_v29 = vld [vmem:[#allocation3 + $0x20] sm:$0xff] }
 0x3e0   : > { %v2879_v11 = vsel %vm10561_vm14, 1.0, %v10230_v46  ;;  %vm10562_vm8 = vnez %v10446_v58  ;;  %vm10563_vm13 = vnez %v10449_v31  ;;  %vm10564_vm2 = vnez %v10439_v57 }
 0x3e1   : > { %v2884_v51 = vsel %vm10562_vm8, 1.0, %v10230_v46  ;;  %v2885_v18 = vsel %vm10563_vm13, 1.0, %v10230_v46  ;;  %v2960_v1 = vadd.f32 %v2879_v11, %v2878_v12  ;;  %v2882_v2 = vsel %vm10564_vm2, 1.0, %v10230_v46  ;;  %2913 = vadd.xlane.f32.xlu1 %v10580_v33 }
 0x3e2   : > { %v2969_v45 = vadd.f32 %v2885_v18, %v2884_v51  ;;  %vm10565_vm9 = vnez %v10442_v9  ;;  %v2888_v58 = vsel %vm7731_vm3, 1.0, %v10230_v46  ;;  %vm10567_vm12 = vnez %v10471_v13  ;;  %2916 = vadd.xlane.f32.xlu0 %v10584_v30  ;;  %v2558_v18 = vld [vmem:[#allocation3 + $0x28] sm:$0xff] }
 0x3e3   : > { %v2883_v36 = vsel %vm10565_vm9, 1.0, %v10230_v46  ;;  %v2889_v31 = vsel %vm10567_vm12, 1.0, %v10230_v46  ;;  %vm10569_vm7 = vnez %v10568_v61  ;;  %vm10571_vm5 = vnez %v10570_v48  ;;  %v2562_v48 = vld [vmem:[#allocation3 + $0x48] sm:$0xff] }
 0x3e4   : > { %v2966_v41 = vadd.f32 %v2883_v36, %v2882_v2  ;;  %v2886_v57 = vsel %vm10569_vm7, 1.0, %v10230_v46  ;;  %v2975_v5 = vadd.f32 %v2889_v31, %v2888_v58  ;;  %v2887_v9 = vsel %vm10571_vm5, 1.0, %v10230_v46  ;;  %v2561_v58 = vld [vmem:[#allocation3 + $0x40] sm:$0xff] }
 0x3e5   : > { %vm10572_vm14 = vnez %v10485_v44  ;;  %vm10573_vm3 = vnez %v10491_v24  ;;  %v2972_v38 = vadd.f32 %v2887_v9, %v2886_v57  ;;  %vm10574_vm8 = vnez %v10477_v56  ;;  %2919 = vadd.xlane.f32.xlu1 %v10585_v27  ;;  %v2563_v9 = vld [vmem:[#allocation3 + $0x50] sm:$0xff]  ;;  %v2572_v27 = vld [vmem:[#allocation3 + $0x98] sm:$0xff] }
 0x3e6   : > { %v2892_v15 = vsel %vm10572_vm14, 1.0, %v10230_v46  ;;  %v2893_v23 = vsel %vm10573_vm3, 1.0, %v10230_v46  ;;  %v2890_v8 = vsel %vm10574_vm8, 1.0, %v10230_v46  ;;  %vm10576_vm13 = vnez %v10575_v63  ;;  %2922 = vadd.xlane.f32.xlu0 %v10586_v0  ;;  %v2565_v63 = vld [vmem:[#allocation3 + $0x60] sm:$0xff] }
 0x3e7   : > { %v2981_v13 = vadd.f32 %v2893_v23, %v2892_v15  ;;  %v2891_v16 = vsel %vm10576_vm13, 1.0, %v10230_v46  ;;  %v2896_v44 = vsel %vm7845_vm1, 1.0, %v10230_v46  ;;  %vm10578_vm2 = vnez %v10510_v42 }
 0x3e8   : > { %v2978_v43 = vadd.f32 %v2891_v16, %v2890_v8  ;;  %v2897_v24 = vsel %vm10578_vm2, 1.0, %v10230_v46  ;;  %vm10579_vm9 = vnez %v10497_v17  ;;  %vm10581_vm12 = vnez %v10500_v7  ;;  %v2564_v8 = vld [vmem:[#allocation3 + $0x58] sm:$0xff] }
 0x3e9   : > { %v2894_v56 = vsel %vm10579_vm9, 1.0, %v10230_v46  ;;  %v2987_v21 = vadd.f32 %v2897_v24, %v2896_v44  ;;  %v2895_v28 = vsel %vm10581_vm12, 1.0, %v10230_v46  ;;  %v2900_v26 = vsel %vm7899_vm0, 1.0, %v10230_v46  ;;  %2925 = vadd.xlane.f32.xlu1 %v10587_v49  ;;  %v2566_v24 = vld [vmem:[#allocation3 + $0x68] sm:$0xff] }
 0x3ea   : > { %v2901_v42 = vsel %vm7912_vm15, 1.0, %v10230_v46  ;;  %v2984_v19 = vadd.f32 %v2895_v28, %v2894_v56  ;;  %vm10582_vm1 = vnez %v10514_v60  ;;  %vm10583_vm7 = vnez %v10518_v47  ;;  %2928 = vadd.xlane.f32.xlu0 %v10588_v6  ;;  %v2567_v56 = vld [vmem:[#allocation3 + $0x70] sm:$0xff] }
 0x3eb   : > { %v2993_v34 = vadd.f32 %v2901_v42, %v2900_v26  ;;  %v2898_v17 = vsel %vm10582_vm1, 1.0, %v10230_v46  ;;  %v2899_v3 = vsel %vm10583_vm7, 1.0, %v10230_v46  ;;  %v2904_v37 = vsel %vm7953_vm10, 1.0, %v10230_v46  ;;  %v2568_v42 = vld [vmem:[#allocation3 + $0x78] sm:$0xff] }
 0x3ec   : > { %v2990_v7 = vadd.f32 %v2899_v3, %v2898_v17  ;;  %v2905_v39 = vsel %vm7967_vm6, 1.0, %v10230_v46  ;;  %v2902_v50 = vsel %vm7929_vm11, 1.0, %v10230_v46  ;;  %v2903_v47 = vsel %vm7940_vm4, 1.0, %v10230_v46  ;;  %v2553_v46 = vld [vmem:[#allocation3] sm:$0xff] }
 0x3ed   : > { %v2999_v60 = vadd.f32 %v2905_v39, %v2904_v37  ;;  %v2996_v52 = vadd.f32 %v2903_v47, %v2902_v50  ;;  %2931 = vadd.xlane.f32.xlu1 %v10589_v55  ;;  %vm9790_vm15 = vcmask 7168   ;;  %v2570_v37 = vld [vmem:[#allocation3 + $0x88] sm:$0xff]  ;;  %v2571_v39 = vld [vmem:[#allocation3 + $0x90] sm:$0xff] }
 0x3ee   : > { %2934 = vadd.xlane.f32.xlu0 %v10590_v40  ;;  %v2574_v40 = vld [vmem:[#allocation3 + $0xa8] sm:$0xff] }
 0x3f1   : > { %2937 = vadd.xlane.f32.xlu1 %v7990_v4  ;;  %v2555_v4 = vld [vmem:[#allocation3 + $0x10] sm:$0xff] }
 0x3f2   : > { %2940 = vadd.xlane.f32.xlu0 %v7875_v25 }
 0x3f5   : > { %2943 = vadd.xlane.f32.xlu1 %v8000_v22  ;;  %v2651_v25 = vpop.xlane.xlu0 %2650 }
 0x3f6   : > { %2946 = vadd.xlane.f32.xlu0 %v7992_v32  ;;  %v2745_v14 = vadd.f32 %v2651_v25, %v2553_v46  ;;  %v2575_v46 = vld [vmem:[#allocation3 + $0xb0] sm:$0xff] }
 0x3f8   : > { %2778 = vst.msk [vmem:[#allocation3] sm:$0xff] %vm9790_vm15, %v2745_v14 }
 0x3f9   : > { %2949 = vadd.xlane.f32.xlu1 %v2948_v20 }
 0x3fa   : > { %2952 = vadd.xlane.f32.xlu0 %v8011_v54  ;;  %v2657_v32 = vpop.xlane.xlu0 %2656  ;;  %v2554_v54 = vld [vmem:[#allocation3 + $0x8] sm:$0xff] }
 0x3fb   : > { %v2747_v22 = vadd.f32 %v2657_v32, %v2555_v4 }
 0x3fd   : > { %2955 = vadd.xlane.f32.xlu1 %v2954_v53  ;;  %2780 = vst.msk [vmem:[#allocation3 + $0x10] sm:$0xff] %vm9790_vm15, %v2747_v22  ;;  %v2556_v53 = vld [vmem:[#allocation3 + $0x18] sm:$0xff] }
 0x3fe   : > { %2958 = vadd.xlane.f32.xlu0 %v8022_v59  ;;  %v2654_v20 = vpop.xlane.xlu1 %2653  ;;  %v2576_v22 = vld [vmem:[#allocation3 + $0xb8] sm:$0xff] }
 0x3ff   : > { %v2746_v59 = vadd.f32 %v2654_v20, %v2554_v54  ;;  %v2577_v54 = vld [vmem:[#allocation3 + $0xc0] sm:$0xff] }
 0x401   : > { %2961 = vadd.xlane.f32.xlu1 %v2960_v1  ;;  %2779 = vst.msk [vmem:[#allocation3 + $0x8] sm:$0xff] %vm9790_vm15, %v2746_v59  ;;  %v2559_v1 = vld [vmem:[#allocation3 + $0x30] sm:$0xff] }
 0x402   : > { %2964 = vadd.xlane.f32.xlu0 %v2963_v35 }
 0x403   : > { %v2660_v12 = vpop.xlane.xlu0 %2659 }
 0x404   : > { %v2663_v35 = vpop.xlane.xlu1 %2662  ;;  %v2748_v11 = vadd.f32 %v2660_v12, %v2556_v53  ;;  %v2578_v12 = vld [vmem:[#allocation3 + $0xc8] sm:$0xff] }
 0x405   : > { %2967 = vadd.xlane.f32.xlu1 %v2966_v41  ;;  %v2749_v51 = vadd.f32 %v2663_v35, %v2557_v29  ;;  %v2560_v41 = vld [vmem:[#allocation3 + $0x38] sm:$0xff]  ;;  %v2579_v35 = vld [vmem:[#allocation3 + $0xd0] sm:$0xff] }
 0x406   : > { %2970 = vadd.xlane.f32.xlu0 %v2969_v45  ;;  %2781 = vst.msk [vmem:[#allocation3 + $0x18] sm:$0xff] %vm9790_vm15, %v2748_v11 }
 0x407   : > { %2782 = vst.msk [vmem:[#allocation3 + $0x20] sm:$0xff] %vm9790_vm15, %v2749_v51 }
 0x409   : > { %2973 = vadd.xlane.f32.xlu1 %v2972_v38 }
 0x40a   : > { %2976 = vadd.xlane.f32.xlu0 %v2975_v5 }
 0x40b   : > { %v2666_v45 = vpop.xlane.xlu0 %2665 }
 0x40c   : > { %v2750_v36 = vadd.f32 %v2666_v45, %v2558_v18  ;;  %v2580_v45 = vld [vmem:[#allocation3 + $0xd8] sm:$0xff] }
 0x40d   : > { %2979 = vadd.xlane.f32.xlu1 %v2978_v43  ;;  %v2669_v2 = vpop.xlane.xlu1 %2668 }
 0x40e   : > { %2982 = vadd.xlane.f32.xlu0 %v2981_v13  ;;  %v2751_v10 = vadd.f32 %v2669_v2, %v2559_v1  ;;  %2783 = vst.msk [vmem:[#allocation3 + $0x28] sm:$0xff] %vm9790_vm15, %v2750_v36  ;;  %v2581_v2 = vld [vmem:[#allocation3 + $0xe0] sm:$0xff] }
 0x410   : > { %2784 = vst.msk [vmem:[#allocation3 + $0x30] sm:$0xff] %vm9790_vm15, %v2751_v10 }
 0x411   : > { %2985 = vadd.xlane.f32.xlu1 %v2984_v19  ;;  %v2569_v19 = vld [vmem:[#allocation3 + $0x80] sm:$0xff] }
 0x412   : > { %2988 = vadd.xlane.f32.xlu0 %v2987_v21  ;;  %v2672_v31 = vpop.xlane.xlu0 %2671 }
 0x413   : > { %v2675_v61 = vpop.xlane.xlu1 %2674  ;;  %v2752_v57 = vadd.f32 %v2672_v31, %v2560_v41  ;;  %v2582_v31 = vld [vmem:[#allocation3 + $0xe8] sm:$0xff] }
 0x414   : > { %v2753_v5 = vadd.f32 %v2675_v61, %v2561_v58  ;;  %v2583_v61 = vld [vmem:[#allocation3 + $0xf0] sm:$0xff] }
 0x415   : > { %2991 = vadd.xlane.f32.xlu1 %v2990_v7  ;;  %2785 = vst.msk [vmem:[#allocation3 + $0x38] sm:$0xff] %vm9790_vm15, %v2752_v57 }
 0x416   : > { %2994 = vadd.xlane.f32.xlu0 %v2993_v34  ;;  %2786 = vst.msk [vmem:[#allocation3 + $0x40] sm:$0xff] %vm9790_vm15, %v2753_v5 }
 0x419   : > { %2997 = vadd.xlane.f32.xlu1 %v2996_v52  ;;  %v2573_v52 = vld [vmem:[#allocation3 + $0xa0] sm:$0xff] }
 0x41a   : > { %3000 = vadd.xlane.f32.xlu0 %v2999_v60  ;;  %v2678_v15 = vpop.xlane.xlu0 %2677 }
 0x41b   : > { %v2681_v23 = vpop.xlane.xlu1 %2680  ;;  %v2754_v38 = vadd.f32 %v2678_v15, %v2562_v48  ;;  %v2584_v15 = vld [vmem:[#allocation3 + $0xf8] sm:$0xff] }
 0x41c   : > { %v2755_v13 = vadd.f32 %v2681_v23, %v2563_v9  ;;  %v2810_v23 = vld [vmem:[#allocation4] sm:$0xff] }
 0x41d   : > { %2787 = vst.msk [vmem:[#allocation3 + $0x48] sm:$0xff] %vm9790_vm15, %v2754_v38 }
 0x41e   : > { %2788 = vst.msk [vmem:[#allocation3 + $0x50] sm:$0xff] %vm9790_vm15, %v2755_v13 }
 0x421   : > { %v2684_v16 = vpop.xlane.xlu0 %2683 }
 0x422   : > { %v2756_v43 = vadd.f32 %v2684_v16, %v2564_v8  ;;  %v2811_v16 = vld [vmem:[#allocation4 + $0x8] sm:$0xff] }
 0x423   : > { %v2687_v62 = vpop.xlane.xlu1 %2686 }
 0x424   : > { %v2757_v44 = vadd.f32 %v2687_v62, %v2565_v63  ;;  %2789 = vst.msk [vmem:[#allocation3 + $0x58] sm:$0xff] %vm9790_vm15, %v2756_v43  ;;  %v2812_v62 = vld [vmem:[#allocation4 + $0x10] sm:$0xff] }
 0x426   : > { %2790 = vst.msk [vmem:[#allocation3 + $0x60] sm:$0xff] %vm9790_vm15, %v2757_v44 }
 0x42b   : > { %v2690_v33 = vpop.xlane.xlu0 %2689 }
 0x42c   : > { %v2693_v21 = vpop.xlane.xlu1 %2692  ;;  %v2758_v28 = vadd.f32 %v2690_v33, %v2566_v24  ;;  %v2813_v33 = vld [vmem:[#allocation4 + $0x18] sm:$0xff] }
 0x42d   : > { %v2759_v26 = vadd.f32 %v2693_v21, %v2567_v56  ;;  %v2814_v21 = vld [vmem:[#allocation4 + $0x20] sm:$0xff] }
 0x42e   : > { %2791 = vst.msk [vmem:[#allocation3 + $0x68] sm:$0xff] %vm9790_vm15, %v2758_v28 }
 0x42f   : > { %2792 = vst.msk [vmem:[#allocation3 + $0x70] sm:$0xff] %vm9790_vm15, %v2759_v26 }
 0x434   : > { %v2696_v34 = vpop.xlane.xlu0 %2695 }
 0x435   : > { %v2699_v17 = vpop.xlane.xlu1 %2698  ;;  %v2760_v3 = vadd.f32 %v2696_v34, %v2568_v42  ;;  %v2815_v34 = vld [vmem:[#allocation4 + $0x28] sm:$0xff] }
 0x436   : > { %v2761_v7 = vadd.f32 %v2699_v17, %v2569_v19  ;;  %v2816_v17 = vld [vmem:[#allocation4 + $0x30] sm:$0xff] }
 0x437   : > { %2793 = vst.msk [vmem:[#allocation3 + $0x78] sm:$0xff] %vm9790_vm15, %v2760_v3 }
 0x438   : > { %2794 = vst.msk [vmem:[#allocation3 + $0x80] sm:$0xff] %vm9790_vm15, %v2761_v7 }
 0x43f   : > { %v2702_v50 = vpop.xlane.xlu0 %2701 }
 0x440   : > { %v2705_v30 = vpop.xlane.xlu1 %2704  ;;  %v2762_v60 = vadd.f32 %v2702_v50, %v2570_v37  ;;  %v2817_v50 = vld [vmem:[#allocation4 + $0x38] sm:$0xff] }
 0x441   : > { %v2763_v47 = vadd.f32 %v2705_v30, %v2571_v39  ;;  %v2818_v30 = vld [vmem:[#allocation4 + $0x40] sm:$0xff] }
 0x442   : > { %2795 = vst.msk [vmem:[#allocation3 + $0x88] sm:$0xff] %vm9790_vm15, %v2762_v60 }
 0x443   : > { %2796 = vst.msk [vmem:[#allocation3 + $0x90] sm:$0xff] %vm9790_vm15, %v2763_v47 }
 0x449   : > { %v2708_v0 = vpop.xlane.xlu0 %2707 }
 0x44a   : > { %v2711_v49 = vpop.xlane.xlu1 %2710  ;;  %v2764_v6 = vadd.f32 %v2708_v0, %v2572_v27  ;;  %v2819_v0 = vld [vmem:[#allocation4 + $0x48] sm:$0xff] }
 0x44b   : > { %v2765_v55 = vadd.f32 %v2711_v49, %v2573_v52  ;;  %v2820_v49 = vld [vmem:[#allocation4 + $0x50] sm:$0xff] }
 0x44c   : > { %2797 = vst.msk [vmem:[#allocation3 + $0x98] sm:$0xff] %vm9790_vm15, %v2764_v6 }
 0x44d   : > { %2798 = vst.msk [vmem:[#allocation3 + $0xa0] sm:$0xff] %vm9790_vm15, %v2765_v55  ;;  %v2714_v25 = vpop.xlane.xlu0 %2713 }
 0x44e   : > { %v2766_v4 = vadd.f32 %v2714_v25, %v2574_v40  ;;  %v2821_v25 = vld [vmem:[#allocation4 + $0x58] sm:$0xff] }
 0x450   : > { %v2717_v14 = vpop.xlane.xlu1 %2716  ;;  %2799 = vst.msk [vmem:[#allocation3 + $0xa8] sm:$0xff] %vm9790_vm15, %v2766_v4 }
 0x451   : > { %v2767_v32 = vadd.f32 %v2717_v14, %v2575_v46  ;;  %v2822_v14 = vld [vmem:[#allocation4 + $0x60] sm:$0xff] }
 0x453   : > { %2800 = vst.msk [vmem:[#allocation3 + $0xb0] sm:$0xff] %vm9790_vm15, %v2767_v32 }
 0x455   : > { %v2720_v20 = vpop.xlane.xlu0 %2719 }
 0x456   : > { %v2723_v59 = vpop.xlane.xlu1 %2722  ;;  %v2768_v53 = vadd.f32 %v2720_v20, %v2576_v22  ;;  %v2823_v20 = vld [vmem:[#allocation4 + $0x68] sm:$0xff] }
 0x457   : > { %v2769_v29 = vadd.f32 %v2723_v59, %v2577_v54  ;;  %v2824_v59 = vld [vmem:[#allocation4 + $0x70] sm:$0xff] }
 0x458   : > { %2801 = vst.msk [vmem:[#allocation3 + $0xb8] sm:$0xff] %vm9790_vm15, %v2768_v53 }
 0x459   : > { %2802 = vst.msk [vmem:[#allocation3 + $0xc0] sm:$0xff] %vm9790_vm15, %v2769_v29 }
 0x45a   : > { %v2726_v11 = vpop.xlane.xlu0 %2725 }
 0x45b   : > { %v2729_v51 = vpop.xlane.xlu1 %2728  ;;  %v2770_v18 = vadd.f32 %v2726_v11, %v2578_v12  ;;  %v2825_v11 = vld [vmem:[#allocation4 + $0x78] sm:$0xff] }
 0x45c   : > { %v2771_v1 = vadd.f32 %v2729_v51, %v2579_v35  ;;  %v2826_v51 = vld [vmem:[#allocation4 + $0x80] sm:$0xff] }
 0x45d   : > { %2803 = vst.msk [vmem:[#allocation3 + $0xc8] sm:$0xff] %vm9790_vm15, %v2770_v18 }
 0x45e   : > { %2804 = vst.msk [vmem:[#allocation3 + $0xd0] sm:$0xff] %vm9790_vm15, %v2771_v1 }
 0x45f   : > { %v2732_v36 = vpop.xlane.xlu0 %2731 }
 0x460   : > { %v2772_v41 = vadd.f32 %v2732_v36, %v2580_v45  ;;  %v2827_v36 = vld [vmem:[#allocation4 + $0x88] sm:$0xff] }
 0x462   : > { %v2735_v10 = vpop.xlane.xlu1 %2734  ;;  %2805 = vst.msk [vmem:[#allocation3 + $0xd8] sm:$0xff] %vm9790_vm15, %v2772_v41 }
 0x463   : > { %v2773_v58 = vadd.f32 %v2735_v10, %v2581_v2  ;;  %v2738_v57 = vpop.xlane.xlu0 %2737  ;;  %v2828_v10 = vld [vmem:[#allocation4 + $0x90] sm:$0xff] }
 0x464   : > { %v2774_v48 = vadd.f32 %v2738_v57, %v2582_v31  ;;  %v2829_v57 = vld [vmem:[#allocation4 + $0x98] sm:$0xff] }
 0x465   : > { %2806 = vst.msk [vmem:[#allocation3 + $0xe0] sm:$0xff] %vm9790_vm15, %v2773_v58 }
 0x466   : > { %v2741_v5 = vpop.xlane.xlu1 %2740  ;;  %2807 = vst.msk [vmem:[#allocation3 + $0xe8] sm:$0xff] %vm9790_vm15, %v2774_v48 }
 0x467   : > { %v2775_v9 = vadd.f32 %v2741_v5, %v2583_v61  ;;  %v2744_v38 = vpop.xlane.xlu0 %2743  ;;  %v2830_v5 = vld [vmem:[#allocation4 + $0xa0] sm:$0xff] }
 0x468   : > { %v2776_v13 = vadd.f32 %v2744_v38, %v2584_v15  ;;  %v2831_v38 = vld [vmem:[#allocation4 + $0xa8] sm:$0xff] }
 0x469   : > { %2808 = vst.msk [vmem:[#allocation3 + $0xf0] sm:$0xff] %vm9790_vm15, %v2775_v9 }
 0x46a   : > { %v2908_v8 = vpop.xlane.xlu1 %2907  ;;  %2809 = vst.msk [vmem:[#allocation3 + $0xf8] sm:$0xff] %vm9790_vm15, %v2776_v13  ;;  %v2832_v13 = vld [vmem:[#allocation4 + $0xb0] sm:$0xff] }
 0x46b   : > { %v3002_v63 = vadd.f32 %v2908_v8, %v2810_v23  ;;  %v2911_v43 = vpop.xlane.xlu0 %2910 }
 0x46c   : > { %v3003_v44 = vadd.f32 %v2911_v43, %v2811_v16  ;;  %v2833_v43 = vld [vmem:[#allocation4 + $0xb8] sm:$0xff] }
 0x46d   : > { %3034 = vst.msk [vmem:[#allocation4] sm:$0xff] %vm9790_vm15, %v3002_v63 }
 0x46e   : > { %v2914_v24 = vpop.xlane.xlu1 %2913  ;;  %3035 = vst.msk [vmem:[#allocation4 + $0x8] sm:$0xff] %vm9790_vm15, %v3003_v44  ;;  %v2834_v44 = vld [vmem:[#allocation4 + $0xc0] sm:$0xff] }
 0x46f   : > { %v3004_v56 = vadd.f32 %v2914_v24, %v2812_v62  ;;  %v2917_v28 = vpop.xlane.xlu0 %2916 }
 0x470   : > { %v3005_v26 = vadd.f32 %v2917_v28, %v2813_v33  ;;  %v2835_v28 = vld [vmem:[#allocation4 + $0xc8] sm:$0xff] }
 0x471   : > { %3036 = vst.msk [vmem:[#allocation4 + $0x10] sm:$0xff] %vm9790_vm15, %v3004_v56 }
 0x472   : > { %v2920_v42 = vpop.xlane.xlu1 %2919  ;;  %3037 = vst.msk [vmem:[#allocation4 + $0x18] sm:$0xff] %vm9790_vm15, %v3005_v26  ;;  %v2836_v26 = vld [vmem:[#allocation4 + $0xd0] sm:$0xff] }
 0x473   : > { %v3006_v19 = vadd.f32 %v2920_v42, %v2814_v21  ;;  %v2923_v3 = vpop.xlane.xlu0 %2922 }
 0x474   : > { %v3007_v7 = vadd.f32 %v2923_v3, %v2815_v34  ;;  %v2837_v3 = vld [vmem:[#allocation4 + $0xd8] sm:$0xff] }
 0x475   : > { %3038 = vst.msk [vmem:[#allocation4 + $0x20] sm:$0xff] %vm9790_vm15, %v3006_v19 }
 0x476   : > { %v2926_v37 = vpop.xlane.xlu1 %2925  ;;  %3039 = vst.msk [vmem:[#allocation4 + $0x28] sm:$0xff] %vm9790_vm15, %v3007_v7  ;;  %v2838_v7 = vld [vmem:[#allocation4 + $0xe0] sm:$0xff] }
 0x477   : > { %v3008_v39 = vadd.f32 %v2926_v37, %v2816_v17  ;;  %v2929_v60 = vpop.xlane.xlu0 %2928 }
 0x478   : > { %v3009_v47 = vadd.f32 %v2929_v60, %v2817_v50  ;;  %v2839_v60 = vld [vmem:[#allocation4 + $0xe8] sm:$0xff] }
 0x479   : > { %3040 = vst.msk [vmem:[#allocation4 + $0x30] sm:$0xff] %vm9790_vm15, %v3008_v39 }
 0x47a   : > { %v2932_v27 = vpop.xlane.xlu1 %2931  ;;  %3041 = vst.msk [vmem:[#allocation4 + $0x38] sm:$0xff] %vm9790_vm15, %v3009_v47  ;;  %v2840_v47 = vld [vmem:[#allocation4 + $0xf0] sm:$0xff] }
 0x47b   : > { %v3010_v52 = vadd.f32 %v2932_v27, %v2818_v30  ;;  %v2935_v6 = vpop.xlane.xlu0 %2934 }
 0x47c   : > { %v3011_v55 = vadd.f32 %v2935_v6, %v2819_v0  ;;  %v2841_v6 = vld [vmem:[#allocation4 + $0xf8] sm:$0xff] }
 0x47d   : > { %3042 = vst.msk [vmem:[#allocation4 + $0x40] sm:$0xff] %vm9790_vm15, %v3010_v52 }
 0x47e   : > { %v2938_v40 = vpop.xlane.xlu1 %2937  ;;  %3043 = vst.msk [vmem:[#allocation4 + $0x48] sm:$0xff] %vm9790_vm15, %v3011_v55 }
 0x47f   : > { %v3012_v46 = vadd.f32 %v2938_v40, %v2820_v49  ;;  %v2941_v4 = vpop.xlane.xlu0 %2940 }
 0x480   : > { %v3013_v32 = vadd.f32 %v2941_v4, %v2821_v25 }
 0x481   : > { %3044 = vst.msk [vmem:[#allocation4 + $0x50] sm:$0xff] %vm9790_vm15, %v3012_v46 }
 0x482   : > { %v2944_v22 = vpop.xlane.xlu1 %2943  ;;  %3045 = vst.msk [vmem:[#allocation4 + $0x58] sm:$0xff] %vm9790_vm15, %v3013_v32 }
 0x483   : > { %v3014_v54 = vadd.f32 %v2944_v22, %v2822_v14  ;;  %v2947_v53 = vpop.xlane.xlu0 %2946 }
 0x484   : > { %v3015_v29 = vadd.f32 %v2947_v53, %v2823_v20 }
 0x485   : > { %3046 = vst.msk [vmem:[#allocation4 + $0x60] sm:$0xff] %vm9790_vm15, %v3014_v54 }
 0x486   : > { %v2950_v12 = vpop.xlane.xlu1 %2949  ;;  %3047 = vst.msk [vmem:[#allocation4 + $0x68] sm:$0xff] %vm9790_vm15, %v3015_v29 }
 0x487   : > { %v3016_v35 = vadd.f32 %v2950_v12, %v2824_v59  ;;  %v2953_v18 = vpop.xlane.xlu0 %2952 }
 0x488   : > { %v3017_v1 = vadd.f32 %v2953_v18, %v2825_v11 }
 0x489   : > { %3048 = vst.msk [vmem:[#allocation4 + $0x70] sm:$0xff] %vm9790_vm15, %v3016_v35 }
 0x48a   : > { %v2956_v45 = vpop.xlane.xlu1 %2955  ;;  %3049 = vst.msk [vmem:[#allocation4 + $0x78] sm:$0xff] %vm9790_vm15, %v3017_v1 }
 0x48b   : > { %v3018_v2 = vadd.f32 %v2956_v45, %v2826_v51  ;;  %v2959_v41 = vpop.xlane.xlu0 %2958 }
 0x48c   : > { %v3019_v58 = vadd.f32 %v2959_v41, %v2827_v36 }
 0x48d   : > { %3050 = vst.msk [vmem:[#allocation4 + $0x80] sm:$0xff] %vm9790_vm15, %v3018_v2 }
 0x48e   : > { %v2962_v31 = vpop.xlane.xlu1 %2961  ;;  %3051 = vst.msk [vmem:[#allocation4 + $0x88] sm:$0xff] %vm9790_vm15, %v3019_v58 }
 0x48f   : > { %v3020_v61 = vadd.f32 %v2962_v31, %v2828_v10  ;;  %v2965_v48 = vpop.xlane.xlu0 %2964 }
 0x490   : > { %v3021_v9 = vadd.f32 %v2965_v48, %v2829_v57 }
 0x491   : > { %3052 = vst.msk [vmem:[#allocation4 + $0x90] sm:$0xff] %vm9790_vm15, %v3020_v61 }
 0x492   : > { %v2968_v15 = vpop.xlane.xlu1 %2967  ;;  %3053 = vst.msk [vmem:[#allocation4 + $0x98] sm:$0xff] %vm9790_vm15, %v3021_v9 }
 0x493   : > { %v3022_v23 = vadd.f32 %v2968_v15, %v2830_v5  ;;  %v2971_v8 = vpop.xlane.xlu0 %2970 }
 0x494   : > { %v3023_v63 = vadd.f32 %v2971_v8, %v2831_v38 }
 0x495   : > { %3054 = vst.msk [vmem:[#allocation4 + $0xa0] sm:$0xff] %vm9790_vm15, %v3022_v23 }
 0x496   : > { %v2974_v16 = vpop.xlane.xlu1 %2973  ;;  %3055 = vst.msk [vmem:[#allocation4 + $0xa8] sm:$0xff] %vm9790_vm15, %v3023_v63 }
 0x497   : > { %v3024_v62 = vadd.f32 %v2974_v16, %v2832_v13  ;;  %v2977_v24 = vpop.xlane.xlu0 %2976 }
 0x498   : > { %v3025_v56 = vadd.f32 %v2977_v24, %v2833_v43 }
 0x499   : > { %3056 = vst.msk [vmem:[#allocation4 + $0xb0] sm:$0xff] %vm9790_vm15, %v3024_v62 }
 0x49a   : > { %v2980_v33 = vpop.xlane.xlu1 %2979  ;;  %3057 = vst.msk [vmem:[#allocation4 + $0xb8] sm:$0xff] %vm9790_vm15, %v3025_v56 }
 0x49b   : > { %v3026_v21 = vadd.f32 %v2980_v33, %v2834_v44  ;;  %v2983_v42 = vpop.xlane.xlu0 %2982 }
 0x49c   : > { %v3027_v19 = vadd.f32 %v2983_v42, %v2835_v28 }
 0x49d   : > { %3058 = vst.msk [vmem:[#allocation4 + $0xc0] sm:$0xff] %vm9790_vm15, %v3026_v21 }
 0x49e   : > { %v2986_v34 = vpop.xlane.xlu1 %2985  ;;  %3059 = vst.msk [vmem:[#allocation4 + $0xc8] sm:$0xff] %vm9790_vm15, %v3027_v19 }
 0x49f   : > { %v3028_v17 = vadd.f32 %v2986_v34, %v2836_v26  ;;  %v2989_v37 = vpop.xlane.xlu0 %2988 }
 0x4a0   : > { %v3029_v39 = vadd.f32 %v2989_v37, %v2837_v3 }
 0x4a1   : > { %3060 = vst.msk [vmem:[#allocation4 + $0xd0] sm:$0xff] %vm9790_vm15, %v3028_v17 }
 0x4a2   : > { %v2992_v50 = vpop.xlane.xlu1 %2991  ;;  %3061 = vst.msk [vmem:[#allocation4 + $0xd8] sm:$0xff] %vm9790_vm15, %v3029_v39 }
 0x4a3   : > { %v3030_v30 = vadd.f32 %v2992_v50, %v2838_v7  ;;  %v2995_v27 = vpop.xlane.xlu0 %2994 }
 0x4a4   : > { %v3031_v52 = vadd.f32 %v2995_v27, %v2839_v60  ;;  %3069 = sbr.rel (%p4306_p3) target bundleno = 1729 (0x6c1), region = 94 }
 0x4a5   : > { %3062 = vst.msk [vmem:[#allocation4 + $0xe0] sm:$0xff] %vm9790_vm15, %v3030_v30 }
 0x4a6   : > { %v2998_v0 = vpop.xlane.xlu1 %2997  ;;  %3063 = vst.msk [vmem:[#allocation4 + $0xe8] sm:$0xff] %vm9790_vm15, %v3031_v52 }
 0x4a7   : > { %v3032_v49 = vadd.f32 %v2998_v0, %v2840_v47  ;;  %v3001_v55 = vpop.xlane.xlu0 %3000 }
 0x4a8   : > { %v3033_v40 = vadd.f32 %v3001_v55, %v2841_v6 }
 0x4a9   : > { %3064 = vst.msk [vmem:[#allocation4 + $0xf0] sm:$0xff] %vm9790_vm15, %v3032_v49 }
 0x4aa   : > { %3065 = vst.msk [vmem:[#allocation4 + $0xf8] sm:$0xff] %vm9790_vm15, %v3033_v40 }
 0x4ab   : > { %v10591_v46 = vld [vmem:[#allocation26_spill] sm:$0xff]  ;;  %v10592_v14 = vld [vmem:[#allocation20_spill] sm:$0xff]  ;;  %v10599_v56 = vld [vmem:[#allocation21_spill] sm:$0xff] }
 0x4ac   : > { %v3104_v25 = vunpack.c.l.bf16 %v10591_v46  ;;  %v3102_v4 = vunpack.c.l.bf16 %v10592_v14  ;;  %v3105_v32 = vunpack.c.h.bf16 %v10591_v46  ;;  %v3103_v22 = vunpack.c.h.bf16 %v10592_v14  ;;  %v10593_v29 = vld [vmem:[#allocation32_spill] sm:$0xff]  ;;  %v10594_v18 = vld [vmem:[#allocation38_spill] sm:$0xff]  ;;  %v10600_v42 = vld [vmem:[#allocation27_spill] sm:$0xff] }
 0x4ad   : > { %v3107_v12 = vunpack.c.h.bf16 %v10593_v29  ;;  %v3106_v35 = vunpack.c.l.bf16 %v10593_v29  ;;  %v3109_v1 = vunpack.c.h.bf16 %v10594_v18  ;;  %v3108_v45 = vunpack.c.l.bf16 %v10594_v18  ;;  %v10595_v10 = vld [vmem:[#allocation44_spill] sm:$0xff]  ;;  %v10596_v57 = vld [vmem:[#allocation50_spill] sm:$0xff]  ;;  %v10601_v7 = vld [vmem:[#allocation33_spill] sm:$0xff] }
 0x4ae   : > { %v3136_v54 = vmul.f32 %v3104_v25, %v3104_v25  ;;  %v3134_v20 = vmul.f32 %v3102_v4, %v3102_v4  ;;  %v3137_v59 = vmul.f32 %v3105_v32, %v3105_v32  ;;  %v3135_v53 = vmul.f32 %v3103_v22, %v3103_v22  ;;  %v10597_v23 = vld [vmem:[#allocation56_spill] sm:$0xff]  ;;  %v10598_v16 = vld [vmem:[#allocation62_spill] sm:$0xff]  ;;  %v10602_v60 = vld [vmem:[#allocation39_spill] sm:$0xff] }
 0x4af   : > { %v3139_v11 = vmul.f32 %v3107_v12, %v3107_v12  ;;  %v3138_v51 = vmul.f32 %v3106_v35, %v3106_v35  ;;  %v3141_v2 = vmul.f32 %v3109_v1, %v3109_v1  ;;  %v3140_v36 = vmul.f32 %v3108_v45, %v3108_v45  ;;  %v10603_v49 = vld [vmem:[#allocation45_spill] sm:$0xff]  ;;  %v10604_v25 = vld [vmem:[#allocation51_spill] sm:$0xff]  ;;  %v3614_v1 = vld [vmem:[#allocation4] sm:$0xff] }
 0x4b0   : > { %3170 = vadd.xlane.f32.xlu1 %v3136_v54  ;;  %3166 = vadd.xlane.f32.xlu0 %v3134_v20  ;;  %v3111_v41 = vunpack.c.h.bf16 %v10595_v10  ;;  %v3110_v58 = vunpack.c.l.bf16 %v10595_v10  ;;  %v3113_v5 = vunpack.c.h.bf16 %v10596_v57  ;;  %v3112_v48 = vunpack.c.l.bf16 %v10596_v57  ;;  %v10605_v54 = vld [vmem:[#allocation57_spill] sm:$0xff] }
 0x4b1   : > { %v3115_v38 = vunpack.c.h.bf16 %v10597_v23  ;;  %v3114_v13 = vunpack.c.l.bf16 %v10597_v23  ;;  %v3117_v62 = vunpack.c.h.bf16 %v10598_v16  ;;  %v3116_v43 = vunpack.c.l.bf16 %v10598_v16  ;;  %v10607_v29 = vld [vmem:[#allocation9_spill] sm:$0xff] }
 0x4b2   : > { %v3143_v31 = vmul.f32 %v3111_v41, %v3111_v41  ;;  %v3142_v61 = vmul.f32 %v3110_v58, %v3110_v58  ;;  %v3145_v9 = vmul.f32 %v3113_v5, %v3113_v5  ;;  %v3144_v15 = vmul.f32 %v3112_v48, %v3112_v48  ;;  %v10609_v41 = vld [vmem:[#allocation6_spill] sm:$0xff]  ;;  %v3616_v5 = vld [vmem:[#allocation4 + $0x10] sm:$0xff] }
 0x4b3   : > { %v3147_v8 = vmul.f32 %v3115_v38, %v3115_v38  ;;  %v3146_v63 = vmul.f32 %v3114_v13, %v3114_v13  ;;  %v3149_v44 = vmul.f32 %v3117_v62, %v3117_v62  ;;  %v3148_v24 = vmul.f32 %v3116_v43, %v3116_v43  ;;  %v3617_v38 = vld [vmem:[#allocation4 + $0x18] sm:$0xff] }
 0x4b4   : > { %3172 = vadd.xlane.f32.xlu1 %v3137_v59  ;;  %3168 = vadd.xlane.f32.xlu0 %v3135_v53  ;;  %v3119_v33 = vunpack.c.h.bf16 %v10599_v56  ;;  %v3118_v21 = vunpack.c.l.bf16 %v10599_v56  ;;  %v3121_v19 = vunpack.c.h.bf16 %v10600_v42  ;;  %v3120_v34 = vunpack.c.l.bf16 %v10600_v42  ;;  %v10606_v53 = vld [vmem:[#allocation7_spill] sm:$0xff] }
 0x4b5   : > { %v3123_v37 = vunpack.c.h.bf16 %v10601_v7  ;;  %v3122_v39 = vunpack.c.l.bf16 %v10601_v7  ;;  %v3125_v47 = vunpack.c.h.bf16 %v10602_v60  ;;  %v3124_v27 = vunpack.c.l.bf16 %v10602_v60  ;;  %v10621_v7 = vld [vmem:[#allocation13_spill] sm:$0xff]  ;;  %v3620_v60 = vld [vmem:[#allocation4 + $0x30] sm:$0xff] }
 0x4b6   : > { %v3151_v28 = vmul.f32 %v3119_v33, %v3119_v33  ;;  %v3150_v26 = vmul.f32 %v3118_v21, %v3118_v21  ;;  %v3153_v17 = vmul.f32 %v3121_v19, %v3121_v19  ;;  %v3152_v3 = vmul.f32 %v3120_v34, %v3120_v34  ;;  %v10618_v33 = vld [vmem:[#allocation10_spill] sm:$0xff]  ;;  %v3619_v34 = vld [vmem:[#allocation4 + $0x28] sm:$0xff] }
 0x4b7   : > { %v3155_v50 = vmul.f32 %v3123_v37, %v3123_v37  ;;  %v3154_v30 = vmul.f32 %v3122_v39, %v3122_v39  ;;  %v3157_v52 = vmul.f32 %v3125_v47, %v3125_v47  ;;  %v3156_v0 = vmul.f32 %v3124_v27, %v3124_v27 }
 0x4b8   : > { %3176 = vadd.xlane.f32.xlu1 %v3139_v11  ;;  %3174 = vadd.xlane.f32.xlu0 %v3138_v51  ;;  %v3127_v6 = vunpack.c.h.bf16 %v10603_v49  ;;  %v3126_v55 = vunpack.c.l.bf16 %v10603_v49  ;;  %v3129_v14 = vunpack.c.h.bf16 %v10604_v25  ;;  %v3128_v4 = vunpack.c.l.bf16 %v10604_v25  ;;  %v10608_v11 = vld [vmem:[#allocation63_spill] sm:$0xff] }
 0x4b9   : > { %v3131_v20 = vunpack.c.h.bf16 %v10605_v54  ;;  %v3130_v59 = vunpack.c.l.bf16 %v10605_v54  ;;  %vm9761_vm0 = vcmp.ge.s32.totalorder %v10606_v53, 0  ;;  %vm9759_vm4 = vcmp.ge.s32.totalorder %v10607_v29, 0 }
 0x4ba   : > { %v3159_v40 = vmul.f32 %v3127_v6, %v3127_v6  ;;  %v3158_v46 = vmul.f32 %v3126_v55, %v3126_v55  ;;  %v3161_v32 = vmul.f32 %v3129_v14, %v3129_v14  ;;  %v3160_v22 = vmul.f32 %v3128_v4, %v3128_v4  ;;  %v10627_v14 = vld [vmem:[#allocation15_spill] sm:$0xff] }
 0x4bb   : > { %v3163_v12 = vmul.f32 %v3131_v20, %v3131_v20  ;;  %v3162_v35 = vmul.f32 %v3130_v59, %v3130_v59  ;;  %v3133_v51 = vunpack.c.h.bf16 %v10608_v11  ;;  %v3132_v18 = vunpack.c.l.bf16 %v10608_v11  ;;  %v3622_v20 = vld [vmem:[#allocation4 + $0x40] sm:$0xff] }
 0x4bc   : > { %3180 = vadd.xlane.f32.xlu1 %v3141_v2  ;;  %3178 = vadd.xlane.f32.xlu0 %v3140_v36  ;;  %v9803_v45 = vmov 0.0   ;;  %v3615_v36 = vld [vmem:[#allocation4 + $0x8] sm:$0xff]  ;;  %vm9762_vm10 = vcmp.ge.s32.totalorder %v10609_v41, 0  ;;  %vm9765_vm9 = vcmp.ge.s32.totalorder %v10618_v33, 0  ;;  %vm9769_vm7 = vcmp.ge.s32.totalorder %v10621_v7, 0 }
 0x4bd   : > { %v3646_v2 = vsel %vm9761_vm0, 1.0, %v9803_v45  ;;  %v3647_v10 = vsel %vm9759_vm4, 1.0, %v9803_v45  ;;  %v3165_v58 = vmul.f32 %v3133_v51, %v3133_v51  ;;  %v3648_v48 = vsel %vm9762_vm10, 1.0, %v9803_v45 }
 0x4be   : > { %v8238_v57 = vsub.f32 %v3615_v36, %v3647_v10  ;;  %v3652_v47 = vsel %vm9769_vm7, 1.0, %v9803_v45  ;;  %v10628_v54 = vmov 0 }
 0x4bf   : > { %v8333_v6 = vsub.f32 %v3620_v60, %v3652_v47 }
 0x4c0   : > { %3184 = vadd.xlane.f32.xlu1 %v3143_v31  ;;  %3182 = vadd.xlane.f32.xlu0 %v3142_v61  ;;  %v3164_v31 = vmul.f32 %v3132_v18, %v3132_v18  ;;  %v8236_v61 = vsub.f32 %v3614_v1, %v3646_v2  ;;  %vm9767_vm14 = vcmp.gt.f32.partialorder %v8238_v57, 0.5  ;;  %v10632_v1 = vmov 0  ;;  %v3623_v2 = vld [vmem:[#allocation4 + $0x48] sm:$0xff] }
 0x4c1   : > { %vm8263_vm3 = vmand %vm9759_vm4, %vm9767_vm14 }
 0x4c2   : > { %vm9773_vm11 = vcmp.gt.f32.partialorder %v8236_v61, 0.5  ;;  %v4010_v43 = vsel %vm8263_vm3, 1.0, %v9803_v45 }
 0x4c3   : > { %vm8251_vm5 = vmand %vm9761_vm0, %vm9773_vm11 }
 0x4c4   : > { %3188 = vadd.xlane.f32.xlu1 %v3145_v9  ;;  %3186 = vadd.xlane.f32.xlu0 %v3144_v15  ;;  %v10610_v9 = vld [vmem:[#allocation8_spill] sm:$0xff]  ;;  %v8245_v15 = vsub.f32 %v3616_v5, %v3648_v48  ;;  %v4009_v16 = vsel %vm8251_vm5, 1.0, %v9803_v45 }
 0x4c5   : > { %vm9760_vm6 = vcmp.ge.s32.totalorder %v10610_v9, 0  ;;  %v4041_v21 = vsel %vm9790_vm15, %v4009_v16, 0.0 }
 0x4c6   : > { %v3649_v13 = vsel %vm9760_vm6, 1.0, %v9803_v45  ;;  %vm9774_vm13 = vcmp.gt.f32.partialorder %v8245_v15, 0.5 }
 0x4c7   : > { %v8272_v62 = vsub.f32 %v3617_v38, %v3649_v13  ;;  %vm8281_vm2 = vmand %vm9762_vm10, %vm9774_vm13  ;;  %v10636_v38 = vmov 0  ;;  %v3624_v13 = vld [vmem:[#allocation4 + $0x50] sm:$0xff] }
 0x4c8   : > { %3192 = vadd.xlane.f32.xlu1 %v3147_v8  ;;  %3190 = vadd.xlane.f32.xlu0 %v3146_v63  ;;  %v10615_v63 = vld [vmem:[#allocation11_spill] sm:$0xff] }
 0x4c9   : > { %vm9763_vm8 = vcmp.ge.s32.totalorder %v10615_v63, 0  ;;  %vm9768_vm12 = vcmp.gt.f32.partialorder %v8272_v62, 0.5 }
 0x4ca   : > { %v3650_v56 = vsel %vm9763_vm8, 1.0, %v9803_v45  ;;  %vm8301_vm1 = vmand %vm9760_vm6, %vm9768_vm12 }
 0x4cb   : > { %v4012_v39 = vsel %vm8301_vm1, 1.0, %v9803_v45 }
 0x4cc   : > { %3196 = vadd.xlane.f32.xlu1 %v3149_v44  ;;  %3194 = vadd.xlane.f32.xlu0 %v3148_v24  ;;  %v3618_v24 = vld [vmem:[#allocation4 + $0x20] sm:$0xff] }
 0x4cd   : > { %v8295_v42 = vsub.f32 %v3618_v24, %v3650_v56  ;;  %v10639_v24 = vld [vmem:[#allocation16_spill] sm:$0xff] }
 0x4ce   : > { %vm9779_vm11 = vcmp.ge.s32.totalorder %v10639_v24, 0 }
 0x4cf   : > { %vm9764_vm4 = vcmp.gt.f32.partialorder %v8295_v42, 0.5 }
 0x4d0   : > { %3200 = vadd.xlane.f32.xlu1 %v3151_v28  ;;  %3198 = vadd.xlane.f32.xlu0 %v3150_v26  ;;  %v4042_v28 = vsel %vm9790_vm15, %v4010_v43, 0.0  ;;  %v4011_v26 = vsel %vm8281_vm2, 1.0, %v9803_v45  ;;  %vm8320_vm6 = vmand %vm9763_vm8, %vm9764_vm4  ;;  %vm9775_vm4 = vcmp.ge.s32.totalorder %v10627_v14, 0 }
 0x4d1   : > { %v4044_v37 = vsel %vm9790_vm15, %v4011_v26, 0.0  ;;  %v4013_v49 = vsel %vm8320_vm6, 1.0, %v9803_v45  ;;  %v3654_v59 = vsel %vm9775_vm4, 1.0, %v9803_v45  ;;  %v10640_v26 = vmov 0 }
 0x4d2   : > { %v4048_v4 = vsel %vm9790_vm15, %v4013_v49, 0.0  ;;  %v8371_v18 = vsub.f32 %v3622_v20, %v3654_v59  ;;  %v10649_v20 = vmov 0  ;;  %v3627_v59 = vld [vmem:[#allocation4 + $0x68] sm:$0xff] }
 0x4d4   : > { %3204 = vadd.xlane.f32.xlu1 %v3153_v17  ;;  %3202 = vadd.xlane.f32.xlu0 %v3152_v3  ;;  %v3651_v17 = vsel %vm9765_vm9, 1.0, %v9803_v45  ;;  %v4043_v3 = vadd.f32 %v4042_v28, %v4041_v21 }
 0x4d6   : > { %v4045_v27 = vadd.f32 %v4044_v37, %v4043_v3  ;;  %v10643_v37 = vld [vmem:[#allocation19_spill] sm:$0xff] }
 0x4d8   : > { %3208 = vadd.xlane.f32.xlu1 %v3155_v50  ;;  %3206 = vadd.xlane.f32.xlu0 %v3154_v30  ;;  %v8313_v50 = vsub.f32 %v3619_v34, %v3651_v17  ;;  %v3625_v34 = vld [vmem:[#allocation4 + $0x58] sm:$0xff]  ;;  %v3657_v17 = vsel %vm9779_vm11, 1.0, %v9803_v45 }
 0x4d9   : > { %v8427_v47 = vsub.f32 %v3625_v34, %v3657_v17  ;;  %v10659_v17 = vmov 0 }
 0x4da   : > { %vm9766_vm10 = vcmp.gt.f32.partialorder %v8313_v50, 0.5 }
 0x4db   : > { %vm8339_vm8 = vmand %vm9765_vm9, %vm9766_vm10  ;;  %vm9770_vm9 = vcmp.gt.f32.partialorder %v8333_v6, 0.5 }
 0x4dc   : > { %3212 = vadd.xlane.f32.xlu1 %v3157_v52  ;;  %3210 = vadd.xlane.f32.xlu0 %v3156_v0  ;;  %v10624_v52 = vld [vmem:[#allocation12_spill] sm:$0xff]  ;;  %v4046_v0 = vsel %vm9790_vm15, %v4012_v39, 0.0  ;;  %vm8358_vm10 = vmand %vm9769_vm7, %vm9770_vm9 }
 0x4dd   : > { %vm9771_vm0 = vcmp.ge.s32.totalorder %v10624_v52, 0  ;;  %v4047_v25 = vadd.f32 %v4046_v0, %v4045_v27  ;;  %v10629_v54 = vsel %vm8358_vm10, 4294967295, %v10628_v54  ;;  %v4015_v51 = vsel %vm8358_vm10, 1.0, %v9803_v45  ;;  %v3626_v0 = vld [vmem:[#allocation4 + $0x60] sm:$0xff] }
 0x4de   : > { %10630 = vst [vmem:[#allocation252_spill] sm:$0xff] %v10629_v54  ;;  %v10644_v27 = vmov 0  ;;  %v10795_v54 = vld [vmem:[#allocation210_spill] sm:$0xff] }
 0x4e0   : > { %3216 = vadd.xlane.f32.xlu1 %v3159_v40  ;;  %3214 = vadd.xlane.f32.xlu0 %v3158_v46  ;;  %v3621_v40 = vld [vmem:[#allocation4 + $0x38] sm:$0xff]  ;;  %v3653_v46 = vsel %vm9771_vm0, 1.0, %v9803_v45 }
 0x4e4   : > { %3220 = vadd.xlane.f32.xlu1 %v3161_v32  ;;  %3218 = vadd.xlane.f32.xlu0 %v3160_v22  ;;  %v4014_v32 = vsel %vm8339_vm8, 1.0, %v9803_v45  ;;  %v8351_v22 = vsub.f32 %v3621_v40, %v3653_v46  ;;  %v10647_v46 = vld [vmem:[#allocation18_spill] sm:$0xff] }
 0x4e5   : > { %v4050_v11 = vsel %vm9790_vm15, %v4014_v32, 0.0  ;;  %vm9786_vm11 = vcmp.ge.s32.totalorder %v10647_v46, 0 }
 0x4e6   : > { %vm9772_vm12 = vcmp.gt.f32.partialorder %v8351_v22, 0.5 }
 0x4e7   : > { %vm8377_vm7 = vmand %vm9771_vm0, %vm9772_vm12  ;;  %vm9776_vm0 = vcmp.gt.f32.partialorder %v8371_v18, 0.5 }
 0x4e8   : > { %3224 = vadd.xlane.f32.xlu1 %v3163_v12  ;;  %3222 = vadd.xlane.f32.xlu0 %v3162_v35  ;;  %v4049_v12 = vadd.f32 %v4048_v4, %v4047_v25  ;;  %v10631_v35 = vld [vmem:[#allocation14_spill] sm:$0xff]  ;;  %v10633_v1 = vsel %vm8377_vm7, 4294967295, %v10632_v1  ;;  %v4016_v5 = vsel %vm8377_vm7, 1.0, %v9803_v45  ;;  %vm8396_vm12 = vmand %vm9775_vm4, %vm9776_vm0  ;;  %vm9783_vm0 = vcmp.ge.s32.totalorder %v10643_v37, 0 }
 0x4e9   : > { %vm9777_vm14 = vcmp.ge.s32.totalorder %v10631_v35, 0  ;;  %10634 = vst [vmem:[#allocation253_spill] sm:$0xff] %v10633_v1  ;;  %v10637_v38 = vsel %vm8396_vm12, 4294967295, %v10636_v38  ;;  %v4054_v56 = vsel %vm9790_vm15, %v4016_v5, 0.0  ;;  %v4017_v21 = vsel %vm8396_vm12, 1.0, %v9803_v45  ;;  %v3628_v5 = vld [vmem:[#allocation4 + $0x70] sm:$0xff] }
 0x4ea   : > { %v3655_v36 = vsel %vm9777_vm14, 1.0, %v9803_v45  ;;  %v4051_v10 = vadd.f32 %v4050_v11, %v4049_v12  ;;  %10638 = vst [vmem:[#allocation254_spill] sm:$0xff] %v10637_v38  ;;  %v4056_v39 = vsel %vm9790_vm15, %v4017_v21, 0.0  ;;  %v3658_v49 = vsel %vm9783_vm0, 1.0, %v9803_v45  ;;  %v10798_v1 = vld [vmem:[#allocation67_spill] sm:$0xff] }
 0x4eb   : > { %v8389_v48 = vsub.f32 %v3623_v2, %v3655_v36  ;;  %vm9784_vm12 = vcmp.gt.f32.partialorder %v8427_v47, 0.5  ;;  %v8447_v32 = vsub.f32 %v3626_v0, %v3658_v49  ;;  %v3659_v12 = vsel %vm9786_vm11, 1.0, %v9803_v45  ;;  %v10663_v49 = vld [vmem:[#allocation25_spill] sm:$0xff] }
 0x4ec   : > { %3228 = vadd.xlane.f32.xlu1 %v3165_v58  ;;  %3226 = vadd.xlane.f32.xlu0 %v3164_v31  ;;  %v10635_v58 = vld [vmem:[#allocation17_spill] sm:$0xff]  ;;  %v4052_v31 = vsel %vm9790_vm15, %v4015_v51, 0.0  ;;  %v10652_v51 = vld [vmem:[#allocation23_spill] sm:$0xff] }
 0x4ed   : > { %vm9781_vm9 = vcmp.ge.s32.totalorder %v10635_v58, 0  ;;  %v4053_v43 = vadd.f32 %v4052_v31, %v4051_v10  ;;  %vm9778_vm13 = vcmp.gt.f32.partialorder %v8389_v48, 0.5  ;;  %vm9789_vm0 = vcmp.ge.s32.totalorder %v10652_v51, 0  ;;  %v10786_v58 = vld [vmem:[#allocation61_spill] sm:$0xff] }
 0x4ee   : > { %v3656_v16 = vsel %vm9781_vm9, 1.0, %v9803_v45  ;;  %vm8415_vm4 = vmand %vm9777_vm14, %vm9778_vm13  ;;  %v8465_v10 = vsub.f32 %v3627_v59, %v3659_v12  ;;  %v10654_v31 = vmov 0 }
 0x4ef   : > { %v8409_v28 = vsub.f32 %v3624_v13, %v3656_v16  ;;  %v10641_v26 = vsel %vm8415_vm4, 4294967295, %v10640_v26  ;;  %v4055_v3 = vadd.f32 %v4054_v56, %v4053_v43  ;;  %v4018_v60 = vsel %vm8415_vm4, 1.0, %v9803_v45  ;;  %v10657_v43 = vld [vmem:[#allocation22_spill] sm:$0xff] }
 0x4f0   : > { %10642 = vst [vmem:[#allocation255_spill] sm:$0xff] %v10641_v26  ;;  %v4058_v25 = vsel %vm9790_vm15, %v4018_v60, 0.0  ;;  %v3660_v13 = vsel %vm9789_vm0, 1.0, %v9803_v45  ;;  %vm9793_vm11 = vcmp.ge.s32.totalorder %v10657_v43, 0  ;;  %vm10662_vm0 = vcmp.gt.f32.partialorder %v8245_v15, 0.5 }
 0x4f1   : > { %vm9782_vm14 = vcmp.gt.f32.partialorder %v8409_v28, 0.5  ;;  %v4057_v40 = vadd.f32 %v4056_v39, %v4055_v3  ;;  %v8485_v34 = vsub.f32 %v3628_v5, %v3660_v13  ;;  %v3629_v3 = vld [vmem:[#allocation4 + $0x78] sm:$0xff]  ;;  %v3661_v39 = vsel %vm9793_vm11, 1.0, %v9803_v45 }
 0x4f2   : > { %vm8434_vm13 = vmand %vm9781_vm9, %vm9782_vm14  ;;  %vm10648_vm9 = vcmp.ge.s32.totalorder %v10639_v24, 0  ;;  %v3776_v60 = vsel %vm10662_vm0, %v8245_v15, 1.0  ;;  %v8512_v12 = vsub.f32 %v3629_v3, %v3661_v39  ;;  %vm10667_vm11 = vcmp.ge.s32.totalorder %v10652_v51, 0  ;;  %v10671_v15 = vld [vmem:[#allocation24_spill] sm:$0xff] }
 0x4f3   : > { %v10645_v27 = vsel %vm8434_vm13, 4294967295, %v10644_v27  ;;  %v4019_v4 = vsel %vm8434_vm13, 1.0, %v9803_v45  ;;  %vm8453_vm14 = vmand %vm10648_vm9, %vm9784_vm12  ;;  %v4059_v11 = vadd.f32 %v4058_v25, %v4057_v40  ;;  %vm9788_vm9 = vcmp.gt.f32.partialorder %v8447_v32, 0.5  ;;  %v3636_v51 = vld [vmem:[#allocation4 + $0xb0] sm:$0xff] }
 0x4f4   : > { %10646 = vst [vmem:[#allocation256_spill] sm:$0xff] %v10645_v27  ;;  %v10650_v20 = vsel %vm8453_vm14, 4294967295, %v10649_v20  ;;  %v4060_v2 = vsel %vm9790_vm15, %v4019_v4, 0.0  ;;  %v4020_v36 = vsel %vm8453_vm14, 1.0, %v9803_v45  ;;  %vm10653_vm12 = vcmp.ge.s32.totalorder %v10643_v37, 0 }
 0x4f5   : > { %10651 = vst [vmem:[#allocation257_spill] sm:$0xff] %v10650_v20  ;;  %vm8472_vm13 = vmand %vm10653_vm12, %vm9788_vm9  ;;  %v4061_v16 = vadd.f32 %v4060_v2, %v4059_v11  ;;  %v4062_v56 = vsel %vm9790_vm15, %v4020_v36, 0.0  ;;  %vm9792_vm14 = vcmp.gt.f32.partialorder %v8465_v10, 0.5  ;;  %vm10658_vm12 = vcmp.ge.s32.totalorder %v10647_v46, 0 }
 0x4f6   : > { %v10655_v31 = vsel %vm8472_vm13, 4294967295, %v10654_v31  ;;  %v4021_v21 = vsel %vm8472_vm13, 1.0, %v9803_v45  ;;  %vm8491_vm9 = vmand %vm10658_vm12, %vm9792_vm14  ;;  %vm9796_vm15 = vcmp.ge.s32.totalorder %v10663_v49, 0  ;;  %vm10664_vm13 = vcmp.gt.f32.partialorder %v8236_v61, 0.5 }
 0x4f7   : > { %10656 = vst [vmem:[#allocation258_spill] sm:$0xff] %v10655_v31  ;;  %v10660_v17 = vsel %vm8491_vm9, 4294967295, %v10659_v17  ;;  %v4063_v0 = vadd.f32 %v4062_v56, %v4061_v16  ;;  %v3774_v40 = vsel %vm10664_vm13, %v8236_v61, 1.0  ;;  %vm10665_vm12 = vcmask 7168  }
 0x4f8   : > { %10661 = vst [vmem:[#allocation259_spill] sm:$0xff] %v10660_v17  ;;  %v4064_v25 = vsel %vm10665_vm12, %v4021_v21, 0.0  ;;  %vm10666_vm14 = vcmp.gt.f32.partialorder %v8272_v62, 0.5  ;;  %v4022_v59 = vsel %vm8491_vm9, 1.0, %v9803_v45  ;;  %vm9794_vm0 = vcmp.gt.f32.partialorder %v8485_v34, 0.5  ;;  %v3631_v21 = vld [vmem:[#allocation4 + $0x88] sm:$0xff] }
 0x4f9   : > { %v3777_v4 = vsel %vm10666_vm14, %v8272_v62, 1.0  ;;  %4725 = vrcp.f32 %v3776_v60  ;;  %vm8519_vm13 = vmand %vm10667_vm11, %vm9794_vm0  ;;  %v10668_v61 = vmov 0  ;;  %v3630_v62 = vld [vmem:[#allocation4 + $0x80] sm:$0xff]  ;;  %v3662_v11 = vsel %vm9796_vm15, 1.0, %v9803_v45 }
 0x4fa   : > { %v10669_v61 = vsel %vm8519_vm13, 4294967295, %v10668_v61  ;;  %4727 = vrcp.f32 %v3774_v40  ;;  %vm10672_vm14 = vcmp.gt.f32.partialorder %v8238_v57, 0.5  ;;  %v4065_v36 = vadd.f32 %v4064_v25, %v4063_v0  ;;  %v10682_v0 = vld [vmem:[#allocation29_spill] sm:$0xff] }
 0x4fb   : > { %10670 = vst [vmem:[#allocation260_spill] sm:$0xff] %v10669_v61  ;;  %v3775_v2 = vsel %vm10672_vm14, %v8238_v57, 1.0  ;;  %4729 = vrcp.f32 %v3777_v4  ;;  %vm10673_vm11 = vcmp.gt.f32.partialorder %v8313_v50, 0.5  ;;  %vm10674_vm0 = vcmp.gt.f32.partialorder %v8295_v42, 0.5 }
 0x4fc   : > { %v3779_v5 = vsel %vm10673_vm11, %v8313_v50, 1.0  ;;  %v3778_v13 = vsel %vm10674_vm0, %v8295_v42, 1.0  ;;  %v4066_v16 = vsel %vm10665_vm12, %v4022_v59, 0.0  ;;  %vm9798_vm9 = vcmp.gt.f32.partialorder %v8512_v12, 0.5  ;;  %v10690_v59 = vld [vmem:[#allocation28_spill] sm:$0xff] }
 0x4fd   : > { %v4023_v56 = vsel %vm8519_vm13, 1.0, %v9803_v45  ;;  %vm10675_vm14 = vcmp.ge.s32.totalorder %v10671_v15, 0  ;;  %v8544_v3 = vsub.f32 %v3630_v62, %v3662_v11  ;;  %4731 = vrcp.f32 %v3775_v2  ;;  %v3632_v62 = vld [vmem:[#allocation4 + $0x90] sm:$0xff] }
 0x4fe   : > { %v3663_v57 = vsel %vm10675_vm14, 1.0, %v9803_v45  ;;  %vm10676_vm11 = vcmp.gt.f32.partialorder %v8351_v22, 0.5  ;;  %vm10677_vm0 = vcmp.ge.s32.totalorder %v10657_v43, 0  ;;  %v10678_v50 = vmov 0 }
 0x4ff   : > { %v3781_v42 = vsel %vm10676_vm11, %v8351_v22, 1.0  ;;  %vm8553_vm12 = vmand %vm10677_vm0, %vm9798_vm9  ;;  %4733 = vrcp.f32 %v3779_v5  ;;  %vm10681_vm15 = vcmp.gt.f32.partialorder %v8333_v6, 0.5  ;;  %v4067_v60 = vadd.f32 %v4066_v16, %v4065_v36 }
 0x500   : > { %v10679_v50 = vsel %vm8553_vm12, 4294967295, %v10678_v50  ;;  %v3780_v39 = vsel %vm10681_vm15, %v8333_v6, 1.0  ;;  %vm9800_vm14 = vcmp.ge.s32.totalorder %v10682_v0, 0  ;;  %4735 = vrcp.f32 %v3778_v13 }
 0x501   : > { %10680 = vst [vmem:[#allocation261_spill] sm:$0xff] %v10679_v50  ;;  %vm10683_vm11 = vcmp.gt.f32.partialorder %v8389_v48, 0.5  ;;  %vm10684_vm13 = vcmask 7168   ;;  %v8565_v25 = vsub.f32 %v3631_v21, %v3663_v57  ;;  %4737 = vrcp.f32 %v3781_v42  ;;  %v3633_v21 = vld [vmem:[#allocation4 + $0x98] sm:$0xff]  ;;  %v10695_v42 = vld [vmem:[#allocation30_spill] sm:$0xff] }
 0x502   : > { %v3783_v22 = vsel %vm10683_vm11, %v8389_v48, 1.0  ;;  %v4068_v40 = vsel %vm10684_vm13, %v4023_v56, 0.0  ;;  %vm10685_vm0 = vcmp.gt.f32.partialorder %v8371_v18, 0.5  ;;  %v4024_v6 = vsel %vm8553_vm12, 1.0, %v9803_v45 }
 0x503   : > { %v3782_v4 = vsel %vm10685_vm0, %v8371_v18, 1.0  ;;  %vm9799_vm15 = vcmp.gt.f32.partialorder %v8544_v3, 0.5  ;;  %4739 = vrcp.f32 %v3780_v39  ;;  %vm10686_vm11 = vcmp.ge.s32.totalorder %v10663_v49, 0  ;;  %v8589_v36 = vpop.eup %4725 }
 0x504   : > { %vm8578_vm9 = vmand %vm10686_vm11, %vm9799_vm15  ;;  %v10687_v48 = vmov 0  ;;  %v3664_v18 = vsel %vm9800_vm14, 1.0, %v9803_v45  ;;  %4741 = vrcp.f32 %v3783_v22  ;;  %vm10691_vm0 = vcmp.gt.f32.partialorder %v8427_v47, 0.5  ;;  %v8596_v16 = vpop.eup %4727 }
 0x505   : > { %v10688_v48 = vsel %vm8578_vm9, 4294967295, %v10687_v48  ;;  %v3785_v11 = vsel %vm10691_vm0, %v8427_v47, 1.0  ;;  %v4069_v2 = vadd.f32 %v4068_v40, %v4067_v60  ;;  %4743 = vrcp.f32 %v3782_v4  ;;  %vm10693_vm15 = vmmov %vm10684_vm13  ;;  %v8605_v39 = vpop.eup %4729  ;;  %v10700_v60 = vld [vmem:[#allocation31_spill] sm:$0xff]  ;;  %v10702_v4 = vld [vmem:[#allocation34_spill] sm:$0xff] }
 0x506   : > { %10689 = vst [vmem:[#allocation262_spill] sm:$0xff] %v10688_v48  ;;  %vm10692_vm11 = vcmp.gt.f32.partialorder %v8409_v28, 0.5  ;;  %v4070_v13 = vsel %vm10693_vm15, %v4024_v6, 0.0  ;;  %vm9806_vm13 = vcmp.gt.f32.partialorder %v8565_v25, 0.5  ;;  %v4025_v56 = vsel %vm8578_vm9, 1.0, %v9803_v45 }
 0x507   : > { %v3784_v5 = vsel %vm10692_vm11, %v8409_v28, 1.0  ;;  %vm10694_vm0 = vcmp.ge.s32.totalorder %v10690_v59, 0  ;;  %v3696_v57 = vsub.f32 %v3632_v62, %v3664_v18  ;;  %4745 = vrcp.f32 %v3785_v11  ;;  %v8620_v6 = vpop.eup %4731 }
 0x508   : > { %v3665_v47 = vsel %vm10694_vm0, 1.0, %v9803_v45  ;;  %vm10696_vm15 = vcmp.ge.s32.totalorder %v10671_v15, 0  ;;  %v10697_v28 = vmov 0  ;;  %vm9809_vm9 = vcmp.ge.s32.totalorder %v10700_v60, 0  ;;  %v3635_v45 = vld [vmem:[#allocation4 + $0xa8] sm:$0xff] }
 0x509   : > { %vm8611_vm11 = vmand %vm10696_vm15, %vm9806_vm13  ;;  %4747 = vrcp.f32 %v3784_v5  ;;  %vm10701_vm0 = vcmp.gt.f32.partialorder %v8465_v10, 0.5  ;;  %v4071_v40 = vadd.f32 %v4070_v13, %v4069_v2  ;;  %vm10703_vm12 = vcmp.gt.f32.partialorder %v8447_v32, 0.5  ;;  %v8629_v49 = vpop.eup %4733  ;;  %v3634_v2 = vld [vmem:[#allocation4 + $0xa0] sm:$0xff]  ;;  %v10707_v13 = vld [vmem:[#allocation35_spill] sm:$0xff] }
 0x50a   : > { %v10698_v28 = vsel %vm8611_vm11, 4294967295, %v10697_v28  ;;  %v3787_v22 = vsel %vm10701_vm0, %v8465_v10, 1.0  ;;  %v3786_v62 = vsel %vm10703_vm12, %v8447_v32, 1.0  ;;  %vm10704_vm15 = vcmask 7168  }
 0x50b   : > { %10699 = vst [vmem:[#allocation263_spill] sm:$0xff] %v10698_v28  ;;  %v4072_v18 = vsel %vm10704_vm15, %v4025_v56, 0.0  ;;  %v3697_v11 = vsub.f32 %v3633_v21, %v3665_v47  ;;  %v10705_v48 = vmov 0.0   ;;  %vm10706_vm13 = vcmp.ge.s32.totalorder %v10695_v42, 0  ;;  %v8638_v56 = vpop.eup %4735  ;;  %v3637_v28 = vld [vmem:[#allocation4 + $0xb8] sm:$0xff] }
 0x50c   : > { %v3667_v5 = vsel %vm10706_vm13, 1.0, %v10705_v48  ;;  %v4026_v10 = vsel %vm8611_vm11, 1.0, %v10705_v48  ;;  %vm9817_vm0 = vcmp.gt.f32.partialorder %v3696_v57, 0.5  ;;  %v3666_v32 = vsel %vm9809_vm9, 1.0, %v10705_v48  ;;  %v8653_v50 = vpop.eup %4737 }
 0x50d   : > { %4749 = vrcp.f32 %v3787_v22  ;;  %vm10708_vm13 = vcmp.gt.f32.partialorder %v8512_v12, 0.5  ;;  %vm10709_vm15 = vcmp.ge.s32.totalorder %v10682_v0, 0  ;;  %v10710_v47 = vmov 0  ;;  %v8658_v17 = vpop.eup %4739 }
 0x50e   : > { %v3789_v21 = vsel %vm10708_vm13, %v8512_v12, 1.0  ;;  %vm8646_vm14 = vmand %vm10709_vm15, %vm9817_vm0  ;;  %vm10713_vm9 = vcmp.ge.s32.totalorder %v10702_v4, 0  ;;  %4751 = vrcp.f32 %v3786_v62  ;;  %vm10714_vm12 = vcmp.gt.f32.partialorder %v8485_v34, 0.5  ;;  %v8664_v37 = vpop.eup %4741 }
 0x50f   : > { %v10711_v47 = vsel %vm8646_vm14, 4294967295, %v10710_v47  ;;  %v3669_v15 = vsel %vm10713_vm9, 1.0, %v10705_v48  ;;  %v3788_v22 = vsel %vm10714_vm12, %v8485_v34, 1.0  ;;  %v4073_v12 = vadd.f32 %v4072_v18, %v4071_v40  ;;  %v8674_v62 = vpop.eup %4743 }
 0x510   : > { %10712 = vst [vmem:[#allocation264_spill] sm:$0xff] %v10711_v47  ;;  %v3699_v61 = vsub.f32 %v3635_v45, %v3667_v5  ;;  %vm10715_vm13 = vcmask 7168   ;;  %vm3729_vm15 = vcmp.gt.f32.partialorder %v3697_v11, 0.5  ;;  %v3698_v31 = vsub.f32 %v3634_v2, %v3666_v32  ;;  %10718 = vst [vmem:[#allocation265_spill] sm:$0xff] %v8674_v62  ;;  %v3643_v62 = vld [vmem:[#allocation4 + $0xe8] sm:$0xff] }
 0x511   : > { %v4074_v0 = vsel %vm10715_vm13, %v4026_v10, 0.0  ;;  %vm10716_vm0 = vcmp.ge.s32.totalorder %v10707_v13, 0  ;;  %4753 = vrcp.f32 %v3789_v21  ;;  %vm10717_vm9 = vcmp.gt.f32.partialorder %v8565_v25, 0.5  ;;  %v8685_v32 = vpop.eup %4745 }
 0x512   : > { %v3668_v43 = vsel %vm10716_vm0, 1.0, %v10705_v48  ;;  %v3791_v34 = vsel %vm10717_vm9, %v8565_v25, 1.0  ;;  %v4027_v45 = vsel %vm8646_vm14, 1.0, %v10705_v48  ;;  %v8672_v40 = vsub.f32 %v3637_v28, %v3669_v15  ;;  %10724 = vst [vmem:[#allocation267_spill] sm:$0xff] %v8685_v32 }
 0x513   : > { %4755 = vrcp.f32 %v3788_v22  ;;  %vm10719_vm12 = vcmp.gt.f32.partialorder %v8544_v3, 0.5  ;;  %vm10720_vm0 = vcmp.ge.s32.totalorder %v10690_v59, 0  ;;  %v10721_v5 = vmov 0  ;;  %v8689_v21 = vpop.eup %4747 }
 0x514   : > { %v3790_v18 = vsel %vm10719_vm12, %v8544_v3, 1.0  ;;  %vm8681_vm13 = vmand %vm10720_vm0, %vm3729_vm15  ;;  %v3793_v25 = vsel %vm3729_vm15, %v3697_v11, 1.0  ;;  %v4075_v10 = vadd.f32 %v4074_v0, %v4073_v12  ;;  %vm3731_vm9 = vcmp.gt.f32.partialorder %v3699_v61, 0.5  ;;  %10727 = vst [vmem:[#allocation268_spill] sm:$0xff] %v8689_v21  ;;  %v10783_v21 = vld [vmem:[#allocation206_spill] sm:$0xff] }
 0x515   : > { %v10722_v5 = vsel %vm8681_vm13, 4294967295, %v10721_v5  ;;  %v3700_v2 = vsub.f32 %v3636_v51, %v3668_v43  ;;  %4757 = vrcp.f32 %v3791_v34  ;;  %vm10725_vm14 = vcmp.gt.f32.partialorder %v3696_v57, 0.5  ;;  %v10732_v51 = vld [vmem:[#allocation36_spill] sm:$0xff] }
 0x516   : > { %10723 = vst [vmem:[#allocation266_spill] sm:$0xff] %v10722_v5  ;;  %v3792_v15 = vsel %vm10725_vm14, %v3696_v57, 1.0  ;;  %vm10726_vm11 = vcmask 7168   ;;  %vm3730_vm4 = vcmp.gt.f32.partialorder %v3698_v31, 0.5  ;;  %4759 = vrcp.f32 %v3790_v18  ;;  %v3639_v18 = vld [vmem:[#allocation4 + $0xc8] sm:$0xff] }
 0x517   : > { %v4076_v28 = vsel %vm10726_vm11, %v4027_v45, 0.0  ;;  %v4028_v3 = vsel %vm8681_vm13, 1.0, %v10705_v48  ;;  %vm10728_vm15 = vcmp.ge.s32.totalorder %v10700_v60, 0  ;;  %v10729_v0 = vmov 0  ;;  %v8703_v22 = vpop.eup %4749 }
 0x518   : > { %vm8696_vm12 = vmand %vm10728_vm15, %vm3730_vm4  ;;  %vm3733_vm0 = vcmp.gt.f32.partialorder %v8672_v40, 0.5  ;;  %vm9829_vm14 = vcmp.ge.s32.totalorder %v10732_v51, 0  ;;  %4761 = vrcp.f32 %v3793_v25  ;;  %v3795_v43 = vsel %vm3731_vm9, %v3699_v61, 1.0  ;;  %10733 = vst [vmem:[#allocation270_spill] sm:$0xff] %v8703_v22  ;;  %v10744_v22 = vld [vmem:[#allocation53_spill] sm:$0xff] }
 0x519   : > { %v10730_v0 = vsel %vm8696_vm12, 4294967295, %v10729_v0  ;;  %4763 = vrcp.f32 %v3792_v15  ;;  %v4077_v57 = vadd.f32 %v4076_v28, %v4075_v10  ;;  %v3794_v11 = vsel %vm3730_vm4, %v3698_v31, 1.0  ;;  %v8715_v10 = vpop.eup %4751 }
 0x51a   : > { %10731 = vst [vmem:[#allocation269_spill] sm:$0xff] %v10730_v0  ;;  %vm3732_vm11 = vcmp.gt.f32.partialorder %v3700_v2, 0.5  ;;  %vm10734_vm13 = vcmask 7168   ;;  %v4029_v34 = vsel %vm8696_vm12, 1.0, %v10705_v48  ;;  %v3797_v45 = vsel %vm3733_vm0, %v8672_v40, 1.0  ;;  %10735 = vst [vmem:[#allocation271_spill] sm:$0xff] %v8715_v10 }
 0x51b   : > { %v4078_v12 = vsel %vm10734_vm13, %v4028_v3, 0.0  ;;  %v3671_v25 = vsel %vm9829_vm14, 1.0, %v10705_v48  ;;  %vm10736_vm4 = vcmp.ge.s32.totalorder %v10695_v42, 0  ;;  %v10737_v28 = vmov 0  ;;  %v10740_v3 = vld [vmem:[#allocation37_spill] sm:$0xff]  ;;  %v8726_v60 = vpop.eup %4753 }
 0x51c   : > { %vm8720_vm13 = vmand %vm10736_vm4, %vm3731_vm9  ;;  %4765 = vrcp.f32 %v3795_v43  ;;  %vm9833_vm15 = vcmp.ge.s32.totalorder %v10740_v3, 0  ;;  %v3796_v47 = vsel %vm3732_vm11, %v3700_v2, 1.0  ;;  %10741 = vst [vmem:[#allocation273_spill] sm:$0xff] %v8726_v60  ;;  %v4079_v59 = vadd.f32 %v4078_v12, %v4077_v57  ;;  %v10745_v43 = vld [vmem:[#allocation49_spill] sm:$0xff]  ;;  %v10756_v2 = vld [vmem:[#allocation48_spill] sm:$0xff] }
 0x51d   : > { %v10738_v28 = vsel %vm8720_vm13, 4294967295, %v10737_v28  ;;  %4767 = vrcp.f32 %v3794_v11  ;;  %vm10742_vm14 = vcmask 7168   ;;  %v3703_v61 = vsub.f32 %v3639_v18, %v3671_v25  ;;  %v8729_v42 = vpop.eup %4755 }
 0x51e   : > { %10739 = vst [vmem:[#allocation272_spill] sm:$0xff] %v10738_v28  ;;  %v4080_v10 = vsel %vm10742_vm14, %v4029_v34, 0.0  ;;  %4769 = vrcp.f32 %v3797_v45  ;;  %10743 = vst [vmem:[#allocation274_spill] sm:$0xff] %v8729_v42  ;;  %v4030_v11 = vsel %vm8720_vm13, 1.0, %v10705_v48  ;;  %v3670_v57 = vsel %vm9833_vm15, 1.0, %v10705_v48  ;;  %v10746_v45 = vld [vmem:[#allocation40_spill] sm:$0xff] }
 0x51f   : > { %4771 = vrcp.f32 %v3796_v47  ;;  %v8744_v18 = vpop.eup %4757  ;;  %vm10748_vm14 = vcmp.ge.s32.totalorder %v10707_v13, 0  ;;  %vm10753_vm15 = vcmask 7168   ;;  %v4081_v28 = vadd.f32 %v4080_v10, %v4079_v59  ;;  %v10757_v42 = vld [vmem:[#allocation41_spill] sm:$0xff] }
 0x520   : > { %10747 = vst [vmem:[#allocation275_spill] sm:$0xff] %v8744_v18  ;;  %vm8751_vm4 = vmand %vm10748_vm14, %vm3732_vm11  ;;  %v4082_v47 = vsel %vm10753_vm15, %v4030_v11, 0.0  ;;  %vm3735_vm9 = vcmp.gt.f32.partialorder %v3703_v61, 0.5  ;;  %vm10759_vm15 = vcmp.ge.s32.totalorder %v10702_v4, 0  ;;  %v10760_v59 = vmov 0 }
 0x521   : > { %vm8775_vm14 = vmand %vm10759_vm15, %vm3733_vm0  ;;  %v4031_v10 = vsel %vm8751_vm4, 1.0, %v10705_v48  ;;  %vm10763_vm11 = vcmp.ge.s32.totalorder %v10746_v45, 0  ;;  %vm10764_vm0 = vcmp.ge.s32.totalorder %v10732_v51, 0 }
 0x522   : > { %v10761_v59 = vsel %vm8775_vm14, 4294967295, %v10760_v59  ;;  %vm8790_vm15 = vmand %vm10764_vm0, %vm3735_vm9 }
 0x523   : > { %10762 = vst [vmem:[#allocation280_spill] sm:$0xff] %v10761_v59 }
 0x53d   : > { %v3171_v31 = vpop.xlane.xlu1 %3170  ;;  %v3167_v15 = vpop.xlane.xlu0 %3166 }
 0x53e   : > { %v3232_v0 = vmul.f32 10.0, %v3171_v31  ;;  %v3230_v5 = vmul.f32 10.0, %v3167_v15  ;;  %v3638_v31 = vld [vmem:[#allocation4 + $0xc0] sm:$0xff]  ;;  %v10749_v15 = vmov 0 }
 0x53f   : > { %v10750_v15 = vsel %vm8751_vm4, 4294967295, %v10749_v15  ;;  %v8758_v18 = vsub.f32 %v3638_v31, %v3670_v57  ;;  %v3641_v31 = vld [vmem:[#allocation4 + $0xd8] sm:$0xff]  ;;  %v3673_v57 = vsel %vm10763_vm11, 1.0, %v10705_v48  ;;  %vm10769_vm4 = vcmp.ge.s32.totalorder %v10757_v42, 0 }
 0x540   : > { %v8732_v46 = vsub.f32 %v3232_v0, %v10744_v22  ;;  %v8735_v20 = vsub.f32 %v3230_v5, %v10745_v43  ;;  %10751 = vst [vmem:[#allocation276_spill] sm:$0xff] %v10750_v15  ;;  %v8755_v43 = vpop.eup %4759  ;;  %v3799_v15 = vsel %vm3735_vm9, %v3703_v61, 1.0  ;;  %v3672_v4 = vsel %vm10769_vm4, 1.0, %v10705_v48 }
 0x541   : > { %v3173_v12 = vpop.xlane.xlu1 %3172  ;;  %v3169_v34 = vpop.xlane.xlu0 %3168  ;;  %10752 = vst [vmem:[#allocation277_spill] sm:$0xff] %v8755_v43  ;;  %vm9847_vm11 = vcmp.gt.f32.partialorder %v8758_v18, 0.5  ;;  %v8809_v45 = vsub.f32 %v3641_v31, %v3673_v57  ;;  %v4032_v42 = vsel %vm8775_vm14, 1.0, %v10705_v48  ;;  %vm10775_vm9 = vcmask 7168  }
 0x542   : > { %v3298_v0 = vmul.f32 1.442695, %v8732_v46  ;;  %v3294_v5 = vmul.f32 1.442695, %v8735_v20  ;;  %v3233_v22 = vmul.f32 10.0, %v3173_v12  ;;  %v3231_v25 = vmul.f32 10.0, %v3169_v34  ;;  %v8760_v60 = vpop.eup %4761  ;;  %vm10780_vm0 = vmmov %vm10775_vm9 }
 0x543   : > { %10754 = vst [vmem:[#allocation278_spill] sm:$0xff] %v8760_v60  ;;  %v10755_v12 = vld [vmem:[#allocation52_spill] sm:$0xff]  ;;  %v8769_v27 = vpop.eup %4763  ;;  %v10772_v60 = vld [vmem:[#allocation55_spill] sm:$0xff]  ;;  %10773 = vst [vmem:[#allocation284_spill] sm:$0xff] %v8809_v45  ;;  %vm9856_vm4 = vcmp.gt.f32.partialorder %v8809_v45, 0.5 }
 0x544   : > { %4773 = vpow2.f32 %v3298_v0  ;;  %v8763_v34 = vsub.f32 %v3233_v22, %v10755_v12  ;;  %v8766_v13 = vsub.f32 %v3231_v25, %v10756_v2  ;;  %10758 = vst [vmem:[#allocation279_spill] sm:$0xff] %v8769_v27  ;;  %v10765_v25 = vmov 0  ;;  %v8794_v12 = vpop.eup %4765 }
 0x545   : > { %4775 = vpow2.f32 %v3294_v5  ;;  %v3177_v43 = vpop.xlane.xlu1 %3176  ;;  %v3175_v11 = vpop.xlane.xlu0 %3174  ;;  %v10766_v25 = vsel %vm8790_vm15, 4294967295, %v10765_v25  ;;  %10768 = vst [vmem:[#allocation282_spill] sm:$0xff] %v8794_v12  ;;  %v4083_v2 = vadd.f32 %v4082_v47, %v4081_v28  ;;  %v3640_v28 = vld [vmem:[#allocation4 + $0xd0] sm:$0xff] }
 0x546   : > { %v3300_v0 = vmul.f32 1.442695, %v8763_v34  ;;  %v3296_v5 = vmul.f32 1.442695, %v8766_v13  ;;  %v3235_v40 = vmul.f32 10.0, %v3177_v43  ;;  %v3234_v22 = vmul.f32 10.0, %v3175_v11  ;;  %v8801_v43 = vpop.eup %4767 }
 0x547   : > { %10767 = vst [vmem:[#allocation281_spill] sm:$0xff] %v10766_v25  ;;  %10770 = vst [vmem:[#allocation283_spill] sm:$0xff] %v8801_v43  ;;  %v10771_v11 = vld [vmem:[#allocation54_spill] sm:$0xff]  ;;  %v8811_v47 = vpop.eup %4769  ;;  %v8827_v59 = vsub.f32 %v3640_v28, %v3672_v4  ;;  %v10779_v25 = vld [vmem:[#allocation59_spill] sm:$0xff] }
 0x548   : > { %4777 = vpow2.f32 %v3300_v0  ;;  %v8804_v51 = vsub.f32 %v3235_v40, %v10771_v11  ;;  %v8807_v27 = vsub.f32 %v3234_v22, %v10772_v60  ;;  %10774 = vst [vmem:[#allocation285_spill] sm:$0xff] %v8811_v47  ;;  %v4084_v0 = vsel %vm10775_vm9, %v4031_v10, 0.0  ;;  %v8822_v11 = vpop.eup %4771  ;;  %v10778_v10 = vld [vmem:[#allocation58_spill] sm:$0xff]  ;;  %vm10781_vm9 = vmmov %vm10780_vm0 }
 0x549   : > { %4779 = vpow2.f32 %v3296_v5  ;;  %v3181_v61 = vpop.xlane.xlu1 %3180  ;;  %v3179_v12 = vpop.xlane.xlu0 %3178  ;;  %v4034_v40 = vsel %vm8790_vm15, 1.0, %v10705_v48  ;;  %10776 = vst [vmem:[#allocation286_spill] sm:$0xff] %v8822_v11  ;;  %v3798_v5 = vsel %vm9847_vm11, %v8758_v18, 1.0  ;;  %10777 = vst [vmem:[#allocation287_spill] sm:$0xff] %v8827_v59  ;;  %v8839_v11 = vadd.f32 %v4084_v0, %v4083_v2  ;;  %v10784_v2 = vld [vmem:[#allocation207_spill] sm:$0xff] }
 0x54a   : > { %v3304_v60 = vmul.f32 1.442695, %v8804_v51  ;;  %v3302_v31 = vmul.f32 1.442695, %v8807_v27  ;;  %v3237_v57 = vmul.f32 10.0, %v3181_v61  ;;  %v3236_v22 = vmul.f32 10.0, %v3179_v12 }
 0x54b   : > { %4781 = vrcp.f32 %v3799_v15  ;;  %v8837_v15 = vsel %vm10780_vm0, %v4032_v42, 0.0  ;;  %v8842_v4 = vsel %vm10781_vm9, %v4034_v40, 0.0  ;;  %v3801_v42 = vsel %vm9856_vm4, %v8809_v45, 1.0  ;;  %v10785_v40 = vld [vmem:[#allocation60_spill] sm:$0xff] }
 0x54c   : > { %4783 = vpow2.f32 %v3304_v60  ;;  %v8830_v47 = vsub.f32 %v3237_v57, %v10778_v10  ;;  %v8833_v43 = vsub.f32 %v3236_v22, %v10779_v25  ;;  %10782 = vst [vmem:[#allocation288_spill] sm:$0xff] %v8842_v4  ;;  %vm9857_vm0 = vcmp.gt.f32.partialorder %v8827_v59, 0.5 }
 0x54d   : > { %4785 = vpow2.f32 %v3302_v31  ;;  %v3185_v12 = vpop.xlane.xlu1 %3184  ;;  %v3183_v61 = vpop.xlane.xlu0 %3182  ;;  %vm10802_vm4 = vcmp.ge.s32.totalorder %v10740_v3, 0 }
 0x54e   : > { %v4774_v28 = vpop.eup %4773  ;;  %v3308_v60 = vmul.f32 1.442695, %v8830_v47  ;;  %v3306_v57 = vmul.f32 1.442695, %v8833_v43  ;;  %v3239_v25 = vmul.f32 10.0, %v3185_v12  ;;  %v3238_v22 = vmul.f32 10.0, %v3183_v61 }
 0x54f   : > { %v4776_v10 = vpop.eup %4775  ;;  %v3360_v31 = vadd.f32 %v4774_v28, %v10783_v21  ;;  %4787 = vrcp.f32 %v3798_v5  ;;  %v10787_v5 = vld [vmem:[#allocation42_spill] sm:$0xff]  ;;  %v10788_v28 = vld [vmem:[#allocation43_spill] sm:$0xff] }
 0x550   : > { %v3358_v0 = vadd.f32 %v4776_v10, %v10784_v2  ;;  %4789 = vpow2.f32 %v3308_v60  ;;  %v8853_v4 = vsub.f32 %v3239_v25, %v10785_v40  ;;  %v8856_v38 = vsub.f32 %v3238_v22, %v10786_v58  ;;  %v10789_v10 = vld [vmem:[#allocation208_spill] sm:$0xff] }
 0x551   : > { %v3392_v12 = vmax.f32 %v3360_v31, 1e-30  ;;  %4791 = vpow2.f32 %v3306_v57  ;;  %v3189_v61 = vpop.xlane.xlu1 %3188  ;;  %v3187_v21 = vpop.xlane.xlu0 %3186  ;;  %vm9855_vm9 = vcmp.ge.s32.totalorder %v10787_v5, 0  ;;  %vm9865_vm11 = vcmp.ge.s32.totalorder %v10788_v28, 0  ;;  %v10790_v57 = vld [vmem:[#allocation209_spill] sm:$0xff] }
 0x552   : > { %v4778_v45 = vpop.eup %4777  ;;  %v3390_v32 = vmax.f32 %v3358_v0, 1e-30  ;;  %v3312_v26 = vmul.f32 1.442695, %v8853_v4  ;;  %v3310_v60 = vmul.f32 1.442695, %v8856_v38  ;;  %4793 = vrcp.f32 %v3801_v42 }
 0x553   : > { %v4780_v25 = vpop.eup %4779  ;;  %4795 = vlog2.f32 %v3392_v12  ;;  %v3361_v58 = vadd.f32 %v4778_v45, %v10789_v10  ;;  %v3241_v22 = vmul.f32 10.0, %v3189_v61  ;;  %v3240_v31 = vmul.f32 10.0, %v3187_v21  ;;  %v10793_v12 = vld [vmem:[#allocation64_spill] sm:$0xff]  ;;  %v10794_v61 = vld [vmem:[#allocation65_spill] sm:$0xff] }
 0x554   : > { %4797 = vlog2.f32 %v3390_v32  ;;  %v3359_v2 = vadd.f32 %v4780_v25, %v10790_v57  ;;  %v8867_v40 = vsel %vm9857_vm0, %v8827_v59, 1.0  ;;  %v3675_v0 = vsel %vm9855_vm9, 1.0, %v10705_v48 }
 0x555   : > { %10791 = vst [vmem:[#allocation289_spill] sm:$0xff] %v8867_v40  ;;  %v8872_v24 = vpop.eup %4781  ;;  %v3393_v42 = vmax.f32 %v3361_v58, 1e-30  ;;  %4799 = vpow2.f32 %v3312_v26  ;;  %v8875_v45 = vsub.f32 %v3241_v22, %v10793_v12  ;;  %v8878_v32 = vsub.f32 %v3240_v31, %v10794_v61  ;;  %v3193_v21 = vpop.xlane.xlu1 %3192  ;;  %v10796_v22 = vld [vmem:[#allocation211_spill] sm:$0xff]  ;;  %v10797_v12 = vld [vmem:[#allocation66_spill] sm:$0xff] }
 0x556   : > { %10792 = vst [vmem:[#allocation290_spill] sm:$0xff] %v8872_v24  ;;  %v3191_v25 = vpop.xlane.xlu0 %3190  ;;  %v4784_v10 = vpop.eup %4783  ;;  %v3391_v57 = vmax.f32 %v3359_v2, 1e-30  ;;  %4801 = vpow2.f32 %v3310_v60  ;;  %v3243_v40 = vmul.f32 10.0, %v3193_v21  ;;  %vm10801_vm9 = vcmp.gt.f32.partialorder %v8758_v18, 0.5 }
 0x557   : > { %v3242_v59 = vmul.f32 10.0, %v3191_v25  ;;  %v4786_v5 = vpop.eup %4785  ;;  %4803 = vlog2.f32 %v3393_v42  ;;  %v3363_v24 = vadd.f32 %v4784_v10, %v10795_v54  ;;  %v3316_v26 = vmul.f32 1.442695, %v8875_v45  ;;  %vm8896_vm0 = vmand %vm10802_vm4, %vm10801_vm9 }
 0x558   : > { %v3314_v58 = vmul.f32 1.442695, %v8878_v32  ;;  %4805 = vlog2.f32 %v3391_v57  ;;  %v3362_v31 = vadd.f32 %v4786_v5, %v10796_v22  ;;  %v8885_v61 = vsub.f32 %v3243_v40, %v10797_v12  ;;  %v3642_v40 = vld [vmem:[#allocation4 + $0xe0] sm:$0xff] }
 0x559   : > { %v8888_v2 = vsub.f32 %v3242_v59, %v10798_v1  ;;  %v8890_v60 = vpop.eup %4787  ;;  %v3395_v21 = vmax.f32 %v3363_v24, 1e-30  ;;  %4807 = vpow2.f32 %v3316_v26  ;;  %v3197_v42 = vpop.xlane.xlu1 %3196  ;;  %v10803_v54 = vmov 0  ;;  %v10807_v26 = vld [vmem:[#allocation212_spill] sm:$0xff] }
 0x55a   : > { %10800 = vst [vmem:[#allocation292_spill] sm:$0xff] %v8890_v60  ;;  %v3195_v25 = vpop.xlane.xlu0 %3194  ;;  %v10804_v54 = vsel %vm8896_vm0, 4294967295, %v10803_v54  ;;  %v8900_v5 = vsub.f32 %v3643_v62, %v3675_v0  ;;  %v3674_v1 = vsel %vm9865_vm11, 1.0, %v10705_v48  ;;  %v4790_v59 = vpop.eup %4789  ;;  %v3394_v24 = vmax.f32 %v3362_v31, 1e-30  ;;  %v10809_v0 = vld [vmem:[#allocation213_spill] sm:$0xff] }
 0x55b   : > { %10799 = vst [vmem:[#allocation291_spill] sm:$0xff] %v8888_v2  ;;  %10805 = vst [vmem:[#allocation293_spill] sm:$0xff] %v10804_v54  ;;  %4809 = vpow2.f32 %v3314_v58  ;;  %v3320_v10 = vmul.f32 1.442695, %v8885_v61  ;;  %v3318_v18 = vmul.f32 1.442695, %v8888_v2  ;;  %v4792_v57 = vpop.eup %4791  ;;  %v3365_v22 = vadd.f32 %v4790_v59, %v10807_v26 }
 0x55c   : > { %10806 = vst [vmem:[#allocation294_spill] sm:$0xff] %v8900_v5  ;;  %4811 = vlog2.f32 %v3395_v21  ;;  %v3245_v12 = vmul.f32 10.0, %v3197_v42  ;;  %v3244_v60 = vmul.f32 10.0, %v3195_v25  ;;  %v8908_v62 = vpop.eup %4793  ;;  %v3364_v3 = vadd.f32 %v4792_v57, %v10809_v0  ;;  %v10811_v21 = vld [vmem:[#allocation68_spill] sm:$0xff]  ;;  %v10812_v42 = vld [vmem:[#allocation69_spill] sm:$0xff] }
 0x55d   : > { %10808 = vst [vmem:[#allocation295_spill] sm:$0xff] %v8908_v62  ;;  %4813 = vlog2.f32 %v3394_v24  ;;  %v8914_v31 = vsel %vm8896_vm0, 1.0, %v10705_v48  ;;  %v8916_v58 = vsub.f32 %v3642_v40, %v3674_v1  ;;  %v4796_v28 = vpop.eup %4795  ;;  %v3397_v5 = vmax.f32 %v3365_v22, 1e-30  ;;  %v3201_v59 = vpop.xlane.xlu1 %3200  ;;  %v3520_v22 = vld [vmem:[#allocation3 + $0x10] sm:$0xff] }
 0x55e   : > { %4815 = vpow2.f32 %v3320_v10  ;;  %v8919_v2 = vsub.f32 %v3245_v12, %v10811_v21  ;;  %v8922_v25 = vsub.f32 %v3244_v60, %v10812_v42  ;;  %v4798_v24 = vpop.eup %4797  ;;  %v3427_v26 = vmul.f32 0.6931472, %v4796_v28  ;;  %v10813_v60 = vld [vmem:[#allocation214_spill] sm:$0xff] }
 0x55f   : > { %10810 = vst [vmem:[#allocation296_spill] sm:$0xff] %v8916_v58  ;;  %v3396_v57 = vmax.f32 %v3364_v3, 1e-30  ;;  %4817 = vpow2.f32 %v3318_v18  ;;  %v3247_v0 = vmul.f32 10.0, %v3201_v59  ;;  %v4800_v54 = vpop.eup %4799  ;;  %v3423_v62 = vmul.f32 0.6931472, %v4798_v24 }
 0x560   : > { %4819 = vlog2.f32 %v3397_v5  ;;  %v3324_v40 = vmul.f32 1.442695, %v8919_v2  ;;  %v3322_v1 = vmul.f32 1.442695, %v8922_v25  ;;  %v4802_v10 = vpop.eup %4801  ;;  %v3488_v12 = vsub.f32 %v8732_v46, %v3427_v26  ;;  %v3518_v18 = vld [vmem:[#allocation3] sm:$0xff]  ;;  %v10814_v5 = vld [vmem:[#allocation215_spill] sm:$0xff] }
 0x561   : > { %4821 = vlog2.f32 %v3396_v57  ;;  %v3367_v21 = vadd.f32 %v4800_v54, %v10813_v60  ;;  %v8930_v28 = vadd.f32 %v8837_v15, %v8839_v11  ;;  %v4804_v3 = vpop.eup %4803  ;;  %v3486_v42 = vsub.f32 %v8735_v20, %v3423_v62  ;;  %v10815_v24 = vld [vmem:[#allocation70_spill] sm:$0xff] }
 0x562   : > { %v3366_v59 = vadd.f32 %v4802_v10, %v10814_v5  ;;  %4823 = vpow2.f32 %v3324_v40  ;;  %v8935_v58 = vsub.f32 %v3247_v0, %v10815_v24  ;;  %v4806_v48 = vpop.eup %4805  ;;  %vm10816_vm4 = vcmp.ge.s32.totalorder %v10609_v41, 0  ;;  %v3521_v40 = vld [vmem:[#allocation3 + $0x18] sm:$0xff]  ;;  %v10818_v5 = vld [vmem:[#allocation216_spill] sm:$0xff] }
 0x563   : > { %v3552_v46 = vsel %vm10816_vm4, %v3488_v12, 0.0  ;;  %v3429_v26 = vmul.f32 0.6931472, %v4804_v3  ;;  %v3399_v54 = vmax.f32 %v3367_v21, 1e-30  ;;  %4825 = vpow2.f32 %v3322_v1  ;;  %v4808_v57 = vpop.eup %4807  ;;  %v3519_v21 = vld [vmem:[#allocation3 + $0x8] sm:$0xff] }
 0x564   : > { %v3584_v11 = vsub.f32 %v3520_v22, %v3552_v46  ;;  %vm10817_vm9 = vcmp.ge.s32.totalorder %v10606_v53, 0  ;;  %v3425_v60 = vmul.f32 0.6931472, %v4806_v48  ;;  %v3398_v20 = vmax.f32 %v3366_v59, 1e-30  ;;  %v10819_v22 = vld [vmem:[#allocation217_spill] sm:$0xff] }
 0x565   : > { %v3550_v15 = vsel %vm10817_vm9, %v3486_v42, 0.0  ;;  %v4810_v62 = vpop.eup %4809  ;;  %v3489_v0 = vsub.f32 %v8763_v34, %v3429_v26  ;;  %4827 = vlog2.f32 %v3399_v54  ;;  %v3369_v24 = vadd.f32 %v4808_v57, %v10818_v5 }
 0x566   : > { %v3582_v10 = vsub.f32 %v3518_v18, %v3550_v15  ;;  %v4812_v41 = vpop.eup %4811  ;;  %v3811_v12 = vmul.f32 %v8589_v36, %v3584_v11  ;;  %v3487_v1 = vsub.f32 %v8766_v13, %v3425_v60  ;;  %4829 = vlog2.f32 %v3398_v20  ;;  %v3523_v15 = vld [vmem:[#allocation3 + $0x28] sm:$0xff] }
 0x567   : > { %v3368_v53 = vadd.f32 %v4810_v62, %v10819_v22  ;;  %v4814_v3 = vpop.eup %4813  ;;  %vm10820_vm4 = vcmp.ge.s32.totalorder %v10610_v9, 0  ;;  %v3433_v42 = vmul.f32 0.6931472, %v4812_v41  ;;  %v3401_v34 = vmax.f32 %v3369_v24, 1e-30  ;;  %v3522_v62 = vld [vmem:[#allocation3 + $0x20] sm:$0xff] }
 0x568   : > { %v3807_v48 = vmul.f32 %v8596_v16, %v3582_v10  ;;  %v3553_v18 = vsel %vm10820_vm4, %v3489_v0, 0.0  ;;  %v4816_v59 = vpop.eup %4815  ;;  %v3872_v46 = vmul.f32 -1.4285715, %v3811_v12  ;;  %vm10821_vm9 = vcmp.ge.s32.totalorder %v10607_v29, 0 }
 0x569   : > { %v3585_v26 = vsub.f32 %v3521_v40, %v3553_v18  ;;  %v3551_v36 = vsel %vm10821_vm9, %v3487_v1, 0.0  ;;  %v3431_v54 = vmul.f32 0.6931472, %v4814_v3  ;;  %v8951_v57 = vpop.eup %4817  ;;  %v3491_v60 = vsub.f32 %v8804_v51, %v3433_v42  ;;  %v10826_v3 = vld [vmem:[#allocation218_spill] sm:$0xff] }
 0x56a   : > { %v3870_v13 = vmul.f32 -1.4285715, %v3807_v48  ;;  %v3583_v11 = vsub.f32 %v3519_v21, %v3551_v36  ;;  %4831 = vlog2.f32 %v3401_v34  ;;  %v4820_v16 = vpop.eup %4819  ;;  %v3904_v9 = vsel %vm8281_vm2, %v3872_v46, 0.0  ;;  %v3525_v46 = vld [vmem:[#allocation3 + $0x38] sm:$0xff] }
 0x56b   : > { %v3813_v20 = vmul.f32 %v8605_v39, %v3585_v26  ;;  %v3490_v10 = vsub.f32 %v8807_v27, %v3431_v54  ;;  %v3400_v29 = vmax.f32 %v3368_v53, 1e-30  ;;  %v4822_v40 = vpop.eup %4821  ;;  %vm10822_vm4 = vcmask 7168  }
 0x56c   : > { %v3937_v0 = vsel %vm10822_vm4, %v3904_v9, 0.0  ;;  %v3902_v5 = vsel %vm8251_vm5, %v3870_v13, 0.0  ;;  %v3809_v24 = vmul.f32 %v8620_v6, %v3583_v11  ;;  %vm10823_vm9 = vcmp.ge.s32.totalorder %v10618_v33, 0  ;;  %v8964_v41 = vpop.eup %4823  ;;  %vm10824_vm2 = vmmov %vm10822_vm4  ;;  %v3524_v13 = vld [vmem:[#allocation3 + $0x30] sm:$0xff] }
 0x56d   : > { %v3555_v51 = vsel %vm10823_vm9, %v3491_v60, 0.0  ;;  %v3934_v44 = vsel %vm10824_vm2, %v3902_v5, 0.0  ;;  %v3873_v39 = vmul.f32 -1.4285715, %v3813_v20  ;;  %vm10825_vm11 = vcmp.ge.s32.totalorder %v10615_v63, 0  ;;  %v8969_v21 = vpop.eup %4825  ;;  %vm10827_vm5 = vmmov %vm10824_vm2  ;;  %v3527_v20 = vld [vmem:[#allocation3 + $0x48] sm:$0xff] }
 0x56e   : > { %v3587_v12 = vsub.f32 %v3523_v15, %v3555_v51  ;;  %v3554_v27 = vsel %vm10825_vm11, %v3490_v10, 0.0  ;;  %v3871_v1 = vmul.f32 -1.4285715, %v3809_v24  ;;  %v3437_v23 = vmul.f32 0.6931472, %v4820_v16  ;;  %vm10828_vm11 = vmmov %vm10824_vm2 }
 0x56f   : > { %v3586_v22 = vsub.f32 %v3522_v62, %v3554_v27  ;;  %v3435_v53 = vmul.f32 0.6931472, %v4822_v40  ;;  %v3905_v6 = vsel %vm8301_vm1, %v3873_v39, 0.0  ;;  %4833 = vlog2.f32 %v3400_v29  ;;  %v4828_v18 = vpop.eup %4827  ;;  %vm10831_vm4 = vmmov %vm10824_vm2 }
 0x570   : > { %v3817_v33 = vmul.f32 %v8629_v49, %v3587_v12  ;;  %v3371_v48 = vadd.f32 %v4816_v59, %v10826_v3  ;;  %v3939_v42 = vsel %vm10827_vm5, %v3905_v6, 0.0  ;;  %v3903_v63 = vsel %vm8263_vm3, %v3871_v1, 0.0  ;;  %v4830_v36 = vpop.eup %4829  ;;  %v3199_v59 = vpop.xlane.xlu0 %3198  ;;  %vm10832_vm9 = vmmov %vm10824_vm2  ;;  %v10856_v3 = vld [vmem:[#allocation72_spill] sm:$0xff] }
 0x571   : > { %v3815_v34 = vmul.f32 %v8638_v56, %v3586_v22  ;;  %v3493_v26 = vsub.f32 %v8830_v47, %v3437_v23  ;;  %v3935_v19 = vsel %vm10828_vm11, %v3903_v63, 0.0  ;;  %v3492_v49 = vsub.f32 %v8833_v43, %v3435_v53  ;;  %v10835_v22 = vld [vmem:[#allocation219_spill] sm:$0xff] }
 0x572   : > { %v3875_v54 = vmul.f32 -1.4285715, %v3817_v33  ;;  %v3441_v11 = vmul.f32 0.6931472, %v4828_v18  ;;  %v3936_v15 = vadd.f32 %v3935_v19, %v3934_v44  ;;  %vm10829_vm1 = vcmp.ge.s32.totalorder %v10624_v52, 0  ;;  %v3205_v44 = vpop.xlane.xlu1 %3204  ;;  %v3529_v18 = vld [vmem:[#allocation3 + $0x58] sm:$0xff] }
 0x573   : > { %v3874_v60 = vmul.f32 -1.4285715, %v3815_v34  ;;  %v3557_v8 = vsel %vm10829_vm1, %v3493_v26, 0.0  ;;  %v3439_v16 = vmul.f32 0.6931472, %v4830_v36  ;;  %vm10830_vm3 = vcmp.ge.s32.totalorder %v10621_v7, 0 }
 0x574   : > { %v3907_v56 = vsel %vm8339_vm8, %v3875_v54, 0.0  ;;  %v3589_v9 = vsub.f32 %v3525_v46, %v3557_v8  ;;  %v3556_v47 = vsel %vm10830_vm3, %v3492_v49, 0.0  ;;  %v3495_v62 = vsub.f32 %v8853_v4, %v3441_v11  ;;  %v4832_v10 = vpop.eup %4831  ;;  %v3526_v7 = vld [vmem:[#allocation3 + $0x40] sm:$0xff]  ;;  %v3203_v23 = vpop.xlane.xlu0 %3202  ;;  %v10838_v36 = vld [vmem:[#allocation265_spill] sm:$0xff]  ;;  %v10839_v19 = vld [vmem:[#allocation16_spill] sm:$0xff] }
 0x575   : > { %v3938_v43 = vadd.f32 %v3937_v0, %v3936_v15  ;;  %v3943_v29 = vsel %vm10831_vm4, %v3907_v56, 0.0  ;;  %v3906_v40 = vsel %vm8320_vm6, %v3874_v60, 0.0  ;;  %v3588_v52 = vsub.f32 %v3524_v13, %v3556_v47  ;;  %v10842_v60 = vld [vmem:[#allocation255_spill] sm:$0xff]  ;;  %v3528_v56 = vld [vmem:[#allocation3 + $0x50] sm:$0xff]  ;;  %vm10852_vm3 = vmmov %vm10824_vm2 }
 0x576   : > { %v3941_v5 = vsel %vm10832_vm9, %v3906_v40, 0.0  ;;  %v3821_v55 = vmul.f32 %v8653_v50, %v3589_v9  ;;  %vm10833_vm8 = vcmp.ge.s32.totalorder %v10631_v35, 0  ;;  %v3494_v51 = vsub.f32 %v8856_v38, %v3439_v16  ;;  %v3209_v49 = vpop.xlane.xlu1 %3208  ;;  %v10844_v9 = vld [vmem:[#allocation220_spill] sm:$0xff]  ;;  %vm10853_vm4 = vmmov %vm10824_vm2 }
 0x577   : > { %v3559_v24 = vsel %vm10833_vm8, %v3495_v62, 0.0  ;;  %v3940_v4 = vadd.f32 %v3939_v42, %v3938_v43  ;;  %v3819_v0 = vmul.f32 %v8658_v17, %v3588_v52  ;;  %v3445_v12 = vmul.f32 0.6931472, %v4832_v10  ;;  %v10845_v10 = vld [vmem:[#allocation267_spill] sm:$0xff]  ;;  %vm10854_vm9 = vmmov %vm10824_vm2 }
 0x578   : > { %v3591_v39 = vsub.f32 %v3527_v20, %v3559_v24  ;;  %v3877_v27 = vmul.f32 -1.4285715, %v3821_v55  ;;  %vm10834_vm6 = vcmp.ge.s32.totalorder %v10627_v14, 0  ;;  %v3403_v1 = vmax.f32 %v3371_v48, 1e-30  ;;  %v3207_v20 = vpop.xlane.xlu0 %3206  ;;  %v10849_v24 = vld [vmem:[#allocation17_spill] sm:$0xff] }
 0x579   : > { %v3558_v30 = vsel %vm10834_vm6, %v3494_v51, 0.0  ;;  %v3370_v50 = vadd.f32 %v8951_v57, %v10835_v22  ;;  %v3942_v35 = vadd.f32 %v3941_v5, %v3940_v4  ;;  %v3876_v53 = vmul.f32 -1.4285715, %v3819_v0  ;;  %v4834_v33 = vpop.eup %4833  ;;  %v10847_v5 = vld [vmem:[#allocation254_spill] sm:$0xff] }
 0x57a   : > { %v3825_v6 = vmul.f32 %v8664_v37, %v3591_v39  ;;  %v3590_v38 = vsub.f32 %v3526_v7, %v3558_v30  ;;  %v3909_v17 = vsel %vm8377_vm7, %v3877_v27, 0.0  ;;  %v3497_v42 = vsub.f32 %v8875_v45, %v3445_v12  ;;  %vm10841_vm7 = vmmov %vm10824_vm2 }
 0x57b   : > { %4835 = vlog2.f32 %v3403_v1  ;;  %v3402_v14 = vmax.f32 %v3370_v50, 1e-30  ;;  %v3908_v48 = vsel %vm8358_vm10, %v3876_v53, 0.0  ;;  %v3944_v34 = vadd.f32 %v3943_v29, %v3942_v35  ;;  %v10846_v29 = vld [vmem:[#allocation221_spill] sm:$0xff]  ;;  %v3213_v1 = vpop.xlane.xlu1 %3212  ;;  %v10855_v50 = vld [vmem:[#allocation268_spill] sm:$0xff] }
 0x57c   : > { %v3879_v57 = vmul.f32 -1.4285715, %v3825_v6  ;;  %v3246_v46 = vmul.f32 10.0, %v3199_v59  ;;  %v3945_v26 = vsel %vm10824_vm2, %v3908_v48, 0.0  ;;  %v3823_v37 = vmul.f32 %v10838_v36, %v3590_v38  ;;  %v3531_v36 = vld [vmem:[#allocation3 + $0x68] sm:$0xff] }
 0x57d   : > { %vm10840_vm5 = vcmp.ge.s32.totalorder %v10839_v19, 0  ;;  %v3443_v13 = vmul.f32 0.6931472, %v4834_v33  ;;  %v3947_v11 = vsel %vm10841_vm7, %v3909_v17, 0.0  ;;  %v3946_v45 = vadd.f32 %v3945_v26, %v3944_v34 }
 0x57e   : > { %v3561_v54 = vsel %vm10840_vm5, %v3497_v42, 0.0  ;;  %4837 = vlog2.f32 %v3402_v14  ;;  %vm10843_vm11 = vnez %v10842_v60  ;;  %v3878_v16 = vmul.f32 -1.4285715, %v3823_v37  ;;  %v10857_v14 = vld [vmem:[#allocation73_spill] sm:$0xff] }
 0x57f   : > { %v3593_v15 = vsub.f32 %v3529_v18, %v3561_v54  ;;  %v3911_v8 = vsel %vm10843_vm11, %v3879_v57, 0.0  ;;  %v3496_v59 = vsub.f32 %v8878_v32, %v3443_v13  ;;  %v3373_v47 = vadd.f32 %v8964_v41, %v10844_v9  ;;  %v10851_v32 = vld [vmem:[#allocation71_spill] sm:$0xff]  ;;  %v10860_v13 = vld [vmem:[#allocation257_spill] sm:$0xff]  ;;  %vm10872_vm11 = vmmov %vm10824_vm2 }
 0x580   : > { %v3948_v62 = vadd.f32 %v3947_v11, %v3946_v45  ;;  %v3372_v40 = vadd.f32 %v8969_v21, %v10846_v29  ;;  %v3328_v52 = vmul.f32 1.442695, %v8935_v58  ;;  %vm10848_vm10 = vnez %v10847_v5  ;;  %v10868_v5 = vld [vmem:[#allocation77_spill] sm:$0xff] }
 0x581   : > { %v3829_v43 = vmul.f32 %v10845_v10, %v3593_v15  ;;  %v3910_v55 = vsel %vm10848_vm10, %v3878_v16, 0.0  ;;  %vm10850_vm1 = vcmp.ge.s32.totalorder %v10849_v24, 0  ;;  %v3405_v51 = vmax.f32 %v3373_v47, 1e-30  ;;  %v10862_v15 = vld [vmem:[#allocation74_spill] sm:$0xff] }
 0x582   : > { %v3560_v7 = vsel %vm10850_vm1, %v3496_v59, 0.0  ;;  %v9027_v4 = vsub.f32 %v3246_v46, %v10851_v32  ;;  %v3949_v41 = vsel %vm10852_vm3, %v3910_v55, 0.0  ;;  %v3404_v39 = vmax.f32 %v3372_v40, 1e-30  ;;  %v10858_v46 = vld [vmem:[#allocation256_spill] sm:$0xff]  ;;  %v10863_v16 = vld [vmem:[#allocation18_spill] sm:$0xff] }
 0x583   : > { %v3592_v0 = vsub.f32 %v3528_v56, %v3560_v7  ;;  %v9032_v12 = vsel %vm10853_vm4, %v8914_v31, 0.0  ;;  %v3950_v21 = vadd.f32 %v3949_v41, %v3948_v62  ;;  %4839 = vlog2.f32 %v3405_v51  ;;  %v3211_v31 = vpop.xlane.xlu0 %3210  ;;  %v10865_v59 = vld [vmem:[#allocation75_spill] sm:$0xff]  ;;  %v3530_v47 = vld [vmem:[#allocation3 + $0x60] sm:$0xff] }
 0x584   : > { %v3326_v27 = vmul.f32 1.442695, %v9027_v4  ;;  %v3249_v30 = vmul.f32 10.0, %v3205_v44  ;;  %v3951_v22 = vsel %vm10854_vm9, %v3911_v8, 0.0  ;;  %4841 = vlog2.f32 %v3404_v39  ;;  %v10869_v51 = vld [vmem:[#allocation270_spill] sm:$0xff]  ;;  %v10870_v41 = vld [vmem:[#allocation19_spill] sm:$0xff] }
 0x585   : > { %v3827_v35 = vmul.f32 %v10855_v50, %v3592_v0  ;;  %v3248_v53 = vmul.f32 10.0, %v3203_v23  ;;  %v4836_v6 = vpop.eup %4835  ;;  %v3881_v38 = vmul.f32 -1.4285715, %v3829_v43  ;;  %v3952_v33 = vadd.f32 %v3951_v22, %v3950_v21  ;;  %v10867_v43 = vld [vmem:[#allocation76_spill] sm:$0xff] }
 0x586   : > { %4843 = vpow2.f32 %v3328_v52  ;;  %v9038_v17 = vsub.f32 %v3249_v30, %v10856_v3  ;;  %v3449_v42 = vmul.f32 0.6931472, %v4836_v6  ;;  %v3251_v48 = vmul.f32 10.0, %v3209_v49  ;;  %v3217_v49 = vpop.xlane.xlu1 %3216 }
 0x587   : > { %v3880_v18 = vmul.f32 -1.4285715, %v3827_v35  ;;  %4845 = vpow2.f32 %v3326_v27  ;;  %v9041_v44 = vsub.f32 %v3248_v53, %v10857_v14  ;;  %v3250_v34 = vmul.f32 10.0, %v3207_v20  ;;  %v10866_v20 = vld [vmem:[#allocation291_spill] sm:$0xff]  ;;  %v10873_v53 = vld [vmem:[#allocation78_spill] sm:$0xff] }
 0x588   : > { %v3332_v63 = vmul.f32 1.442695, %v9038_v17  ;;  %v3253_v57 = vmul.f32 10.0, %v3213_v1  ;;  %v4838_v23 = vpop.eup %4837  ;;  %vm10859_vm8 = vnez %v10858_v46  ;;  %v3499_v37 = vsub.f32 %v8885_v61, %v3449_v42  ;;  %v10875_v42 = vld [vmem:[#allocation222_spill] sm:$0xff] }
 0x589   : > { %v3912_v26 = vsel %vm10859_vm8, %v3880_v18, 0.0  ;;  %v3330_v19 = vmul.f32 1.442695, %v9041_v44  ;;  %v3252_v54 = vmul.f32 10.0, %v3211_v31  ;;  %vm10861_vm6 = vnez %v10860_v13  ;;  %v3533_v31 = vld [vmem:[#allocation3 + $0x78] sm:$0xff] }
 0x58a   : > { %v3913_v11 = vsel %vm10861_vm6, %v3881_v38, 0.0  ;;  %v3447_v45 = vmul.f32 0.6931472, %v4838_v23  ;;  %4847 = vpow2.f32 %v3332_v63  ;;  %v9051_v60 = vsub.f32 %v3251_v48, %v10862_v15  ;;  %v3532_v48 = vld [vmem:[#allocation3 + $0x70] sm:$0xff] }
 0x58b   : > { %v3953_v8 = vsel %vm10824_vm2, %v3912_v26, 0.0  ;;  %vm10864_vm5 = vcmp.ge.s32.totalorder %v10863_v16, 0  ;;  %4849 = vpow2.f32 %v3330_v19  ;;  %v9057_v61 = vsub.f32 %v3250_v34, %v10865_v59  ;;  %v3215_v26 = vpop.xlane.xlu0 %3214  ;;  %v10877_v19 = vld [vmem:[#allocation22_spill] sm:$0xff] }
 0x58c   : > { %v3563_v56 = vsel %vm10864_vm5, %v3499_v37, 0.0  ;;  %v3498_v62 = vsub.f32 %v10866_v20, %v3447_v45  ;;  %v3336_v10 = vmul.f32 1.442695, %v9051_v60  ;;  %v9062_v29 = vsub.f32 %v3253_v57, %v10867_v43  ;;  %v10876_v57 = vld [vmem:[#allocation223_spill] sm:$0xff]  ;;  %v10887_v59 = vld [vmem:[#allocation258_spill] sm:$0xff]  ;;  %v10889_v20 = vld [vmem:[#allocation224_spill] sm:$0xff] }
 0x58d   : > { %v3595_v9 = vsub.f32 %v3531_v36, %v3563_v56  ;;  %v3954_v40 = vadd.f32 %v3953_v8, %v3952_v33  ;;  %v3334_v52 = vmul.f32 1.442695, %v9057_v61  ;;  %v9066_v55 = vsub.f32 %v3252_v54, %v10868_v5  ;;  %v4840_v7 = vpop.eup %4839  ;;  %v10874_v33 = vld [vmem:[#allocation271_spill] sm:$0xff]  ;;  %v10890_v43 = vld [vmem:[#allocation46_spill] sm:$0xff] }
 0x58e   : > { %v3255_v24 = vmul.f32 10.0, %v3217_v49  ;;  %vm10871_vm7 = vcmp.ge.s32.totalorder %v10870_v41, 0  ;;  %4851 = vpow2.f32 %v3336_v10  ;;  %v3340_v39 = vmul.f32 1.442695, %v9062_v29  ;;  %v4842_v21 = vpop.eup %4841  ;;  %v10879_v45 = vld [vmem:[#allocation23_spill] sm:$0xff]  ;;  %v3221_v10 = vpop.xlane.xlu1 %3220 }
 0x58f   : > { %v3833_v32 = vmul.f32 %v10869_v51, %v3595_v9  ;;  %v3562_v0 = vsel %vm10871_vm7, %v3498_v62, 0.0  ;;  %v3453_v30 = vmul.f32 0.6931472, %v4840_v7  ;;  %4853 = vpow2.f32 %v3334_v52  ;;  %v10881_v8 = vld [vmem:[#allocation287_spill] sm:$0xff]  ;;  %v10893_v7 = vld [vmem:[#allocation274_spill] sm:$0xff]  ;;  %vm10897_vm7 = vmmov %vm10872_vm11 }
 0x590   : > { %v3594_v27 = vsub.f32 %v3530_v47, %v3562_v0  ;;  %v3338_v1 = vmul.f32 1.442695, %v9066_v55  ;;  %v4844_v22 = vpop.eup %4843  ;;  %v3955_v50 = vsel %vm10872_vm11, %v3913_v11, 0.0  ;;  %v3451_v35 = vmul.f32 0.6931472, %v4842_v21  ;;  %vm10903_vm11 = vmmov %vm10897_vm7 }
 0x591   : > { %4855 = vpow2.f32 %v3340_v39  ;;  %v9075_v6 = vsub.f32 %v3255_v24, %v10873_v53  ;;  %v4846_v38 = vpop.eup %4845  ;;  %v3501_v18 = vsub.f32 %v8919_v2, %v3453_v30  ;;  %v3375_v14 = vadd.f32 %v4844_v22, %v10875_v42  ;;  %v10892_v24 = vld [vmem:[#allocation47_spill] sm:$0xff]  ;;  %v10898_v22 = vld [vmem:[#allocation273_spill] sm:$0xff] }
 0x592   : > { %v3831_v3 = vmul.f32 %v10874_v33, %v3594_v27  ;;  %4857 = vpow2.f32 %v3338_v1  ;;  %v3883_v63 = vmul.f32 -1.4285715, %v3833_v32  ;;  %v3500_v34 = vsub.f32 %v8922_v25, %v3451_v35  ;;  %v10883_v25 = vld [vmem:[#allocation41_spill] sm:$0xff]  ;;  %v10895_v27 = vld [vmem:[#allocation259_spill] sm:$0xff] }
 0x593   : > { %v3374_v23 = vadd.f32 %v4846_v38, %v10876_v57  ;;  %v3344_v46 = vmul.f32 1.442695, %v9075_v6  ;;  %v3956_v37 = vadd.f32 %v3955_v50, %v3954_v40  ;;  %vm10878_vm10 = vcmp.ge.s32.totalorder %v10877_v19, 0  ;;  %v10891_v40 = vld [vmem:[#allocation225_spill] sm:$0xff]  ;;  %v3219_v50 = vpop.xlane.xlu0 %3218  ;;  %v10899_v38 = vld [vmem:[#allocation226_spill] sm:$0xff]  ;;  %v10900_v42 = vld [vmem:[#allocation227_spill] sm:$0xff] }
 0x594   : > { %v3882_v36 = vmul.f32 -1.4285715, %v3831_v3  ;;  %v3565_v54 = vsel %vm10878_vm10, %v3501_v18, 0.0  ;;  %v3407_v13 = vmax.f32 %v3375_v14, 1e-30  ;;  %v4848_v11 = vpop.eup %4847  ;;  %vm10880_vm1 = vcmp.ge.s32.totalorder %v10879_v45, 0 }
 0x595   : > { %v3597_v2 = vsub.f32 %v3533_v31, %v3565_v54  ;;  %v3564_v15 = vsel %vm10880_vm1, %v3500_v34, 0.0  ;;  %v3406_v49 = vmax.f32 %v3374_v23, 1e-30  ;;  %4859 = vpow2.f32 %v3344_v46  ;;  %v4850_v56 = vpop.eup %4849  ;;  %v10901_v57 = vld [vmem:[#allocation228_spill] sm:$0xff]  ;;  %v10902_v46 = vld [vmem:[#allocation79_spill] sm:$0xff] }
 0x596   : > { %vm10882_vm3 = vcmp.gt.f32.partialorder %v10881_v8, 0.5  ;;  %vm10884_vm4 = vcmp.ge.s32.totalorder %v10883_v25, 0  ;;  %vm10888_vm8 = vnez %v10887_v59  ;;  %v3596_v47 = vsub.f32 %v3532_v48, %v3564_v15  ;;  %v10906_v59 = vld [vmem:[#allocation260_spill] sm:$0xff] }
 0x597   : > { %vm9091_vm9 = vmand %vm10884_vm4, %vm10882_vm3  ;;  %v3914_v9 = vsel %vm10888_vm8, %v3882_v36, 0.0  ;;  %4861 = vlog2.f32 %v3407_v13  ;;  %v3377_v62 = vadd.f32 %v4848_v11, %v10889_v20  ;;  %vm9867_vm6 = vcmp.ge.s32.totalorder %v10890_v43, 0  ;;  %v10904_v11 = vld [vmem:[#allocation229_spill] sm:$0xff]  ;;  %v10908_v20 = vld [vmem:[#allocation284_spill] sm:$0xff] }
 0x598   : > { %4863 = vlog2.f32 %v3406_v49  ;;  %v3376_v52 = vadd.f32 %v4850_v56, %v10891_v40  ;;  %v9102_v5 = vadd.f32 %v9032_v12, %v8930_v28  ;;  %vm9869_vm2 = vcmp.ge.s32.totalorder %v10892_v24, 0  ;;  %v4852_v21 = vpop.eup %4851  ;;  %v10905_v49 = vld [vmem:[#allocation80_spill] sm:$0xff] }
 0x599   : > { %v3835_v51 = vmul.f32 %v10893_v7, %v3596_v47  ;;  %v3409_v32 = vmax.f32 %v3377_v62, 1e-30  ;;  %v3254_v41 = vmul.f32 10.0, %v3215_v26  ;;  %v10894_v0 = vmov 0.0   ;;  %v4854_v35 = vpop.eup %4853  ;;  %v10910_v62 = vld [vmem:[#allocation40_spill] sm:$0xff] }
 0x59a   : > { %v9109_v39 = vsel %vm9091_vm9, 1.0, %v10894_v0  ;;  %vm10896_vm5 = vnez %v10895_v27  ;;  %v3957_v1 = vsel %vm10897_vm7, %v3914_v9, 0.0  ;;  %v3837_v28 = vmul.f32 %v10898_v22, %v3597_v2 }
 0x59b   : > { %v3915_v30 = vsel %vm10896_vm5, %v3883_v63, 0.0  ;;  %v3408_v12 = vmax.f32 %v3376_v52, 1e-30  ;;  %v3958_v53 = vadd.f32 %v3957_v1, %v3956_v37  ;;  %4865 = vlog2.f32 %v3409_v32  ;;  %v4856_v31 = vpop.eup %4855  ;;  %v3225_v37 = vpop.xlane.xlu1 %3224  ;;  %vm10919_vm5 = vmmov %vm10897_vm7 }
 0x59c   : > { %v3379_v33 = vadd.f32 %v4852_v21, %v10899_v38  ;;  %v3257_v3 = vmul.f32 10.0, %v3221_v10  ;;  %v3884_v18 = vmul.f32 -1.4285715, %v3835_v51  ;;  %v3378_v14 = vadd.f32 %v4854_v35, %v10900_v42  ;;  %v4858_v48 = vpop.eup %4857  ;;  %v3223_v52 = vpop.xlane.xlu0 %3222  ;;  %v10914_v51 = vld [vmem:[#allocation230_spill] sm:$0xff]  ;;  %v10915_v21 = vld [vmem:[#allocation81_spill] sm:$0xff] }
 0x59d   : > { %4867 = vlog2.f32 %v3408_v12  ;;  %v9120_v63 = vsel %vm9869_vm2, 1.0, %v10894_v0  ;;  %v3381_v23 = vadd.f32 %v4856_v31, %v10901_v57  ;;  %v9124_v26 = vsub.f32 %v3254_v41, %v10902_v46  ;;  %v10916_v35 = vld [vmem:[#allocation82_spill] sm:$0xff] }
 0x59e   : > { %v3411_v34 = vmax.f32 %v3379_v33, 1e-30  ;;  %v3256_v36 = vmul.f32 10.0, %v3219_v50  ;;  %v3959_v19 = vsel %vm10903_vm11, %v3915_v30, 0.0  ;;  %v3885_v54 = vmul.f32 -1.4285715, %v3837_v28 }
 0x59f   : > { %v3410_v13 = vmax.f32 %v3378_v14, 1e-30  ;;  %v3380_v2 = vadd.f32 %v4858_v48, %v10904_v11  ;;  %v3960_v45 = vadd.f32 %v3959_v19, %v3958_v53  ;;  %v3413_v15 = vmax.f32 %v3381_v23, 1e-30  ;;  %v4860_v56 = vpop.eup %4859  ;;  %v10917_v33 = vld [vmem:[#allocation261_spill] sm:$0xff]  ;;  %v3534_v57 = vld [vmem:[#allocation3 + $0x80] sm:$0xff] }
 0x5a0   : > { %4869 = vlog2.f32 %v3411_v34  ;;  %v9129_v8 = vsub.f32 %v3257_v3, %v10905_v49  ;;  %vm10907_vm10 = vnez %v10906_v59  ;;  %vm10909_vm1 = vcmp.gt.f32.partialorder %v10908_v20, 0.5  ;;  %v3537_v59 = vld [vmem:[#allocation3 + $0x98] sm:$0xff] }
 0x5a1   : > { %v3916_v9 = vsel %vm10907_vm10, %v3884_v18, 0.0  ;;  %4871 = vlog2.f32 %v3410_v13  ;;  %v3412_v47 = vmax.f32 %v3380_v2, 1e-30  ;;  %vm10911_vm3 = vcmp.ge.s32.totalorder %v10910_v62, 0  ;;  %v4862_v7 = vpop.eup %4861  ;;  %v3535_v18 = vld [vmem:[#allocation3 + $0x88] sm:$0xff]  ;;  %vm10925_vm10 = vmmov %vm10919_vm5 }
 0x5a2   : > { %vm9137_vm4 = vmand %vm10911_vm3, %vm10909_vm1  ;;  %v3259_v40 = vmul.f32 10.0, %v3225_v37  ;;  %4873 = vlog2.f32 %v3413_v15  ;;  %v3383_v32 = vadd.f32 %v4860_v56, %v10914_v51  ;;  %v3342_v41 = vmul.f32 1.442695, %v9124_v26  ;;  %v4864_v30 = vpop.eup %4863  ;;  %v10920_v37 = vld [vmem:[#allocation24_spill] sm:$0xff] }
 0x5a3   : > { %v9144_v27 = vsub.f32 %v3256_v36, %v10915_v21  ;;  %v3457_v1 = vmul.f32 0.6931472, %v4862_v7  ;;  %4875 = vlog2.f32 %v3412_v47  ;;  %v3348_v22 = vmul.f32 1.442695, %v9129_v8  ;;  %v10926_v47 = vld [vmem:[#allocation296_spill] sm:$0xff] }
 0x5a4   : > { %v9150_v28 = vsel %vm9867_vm6, 1.0, %v10894_v0  ;;  %v3455_v12 = vmul.f32 0.6931472, %v4864_v30  ;;  %v9155_v50 = vsel %vm9137_vm4, 1.0, %v10894_v0  ;;  %v9158_v53 = vsub.f32 %v3259_v40, %v10916_v35  ;;  %v10927_v40 = vld [vmem:[#allocation275_spill] sm:$0xff]  ;;  %v3536_v51 = vld [vmem:[#allocation3 + $0x90] sm:$0xff] }
 0x5a5   : > { %v3258_v38 = vmul.f32 10.0, %v3223_v52  ;;  %vm10918_vm8 = vnez %v10917_v33  ;;  %v3961_v31 = vsel %vm10919_vm5, %v3916_v9, 0.0  ;;  %v3503_v42 = vsub.f32 %v8935_v58, %v3457_v1  ;;  %v4866_v48 = vpop.eup %4865  ;;  %v10923_v58 = vld [vmem:[#allocation25_spill] sm:$0xff]  ;;  %v3644_v33 = vld [vmem:[#allocation4 + $0xf0] sm:$0xff] }
 0x5a6   : > { %v3917_v3 = vsel %vm10918_vm8, %v3885_v54, 0.0  ;;  %v3415_v14 = vmax.f32 %v3383_v32, 1e-30  ;;  %v3962_v34 = vadd.f32 %v3961_v31, %v3960_v45  ;;  %v3502_v23 = vsub.f32 %v9027_v4, %v3455_v12  ;;  %v10922_v54 = vld [vmem:[#allocation83_spill] sm:$0xff]  ;;  %v10929_v30 = vld [vmem:[#allocation277_spill] sm:$0xff] }
 0x5a7   : > { %4877 = vpow2.f32 %v3342_v41  ;;  %v3346_v46 = vmul.f32 1.442695, %v9144_v27  ;;  %v4868_v36 = vpop.eup %4867  ;;  %vm10921_vm7 = vcmp.ge.s32.totalorder %v10920_v37, 0  ;;  %v3461_v13 = vmul.f32 0.6931472, %v4866_v48  ;;  %v10928_v41 = vld [vmem:[#allocation294_spill] sm:$0xff] }
 0x5a8   : > { %v3567_v19 = vsel %vm10921_vm7, %v3503_v42, 0.0  ;;  %4879 = vpow2.f32 %v3348_v22  ;;  %v9169_v11 = vsub.f32 %v3258_v38, %v10922_v54  ;;  %vm10924_vm11 = vcmp.ge.s32.totalorder %v10923_v58, 0  ;;  %v10930_v22 = vld [vmem:[#allocation28_spill] sm:$0xff]  ;;  %v3229_v38 = vpop.xlane.xlu1 %3228  ;;  %v10934_v54 = vld [vmem:[#allocation262_spill] sm:$0xff]  ;;  %v10936_v58 = vld [vmem:[#allocation279_spill] sm:$0xff] }
 0x5a9   : > { %v3599_v2 = vsub.f32 %v3535_v18, %v3567_v19  ;;  %v3566_v15 = vsel %vm10924_vm11, %v3502_v23, 0.0  ;;  %v3459_v45 = vmul.f32 0.6931472, %v4868_v36  ;;  %v3352_v49 = vmul.f32 1.442695, %v9158_v53  ;;  %v10932_v18 = vld [vmem:[#allocation29_spill] sm:$0xff]  ;;  %vm10937_vm11 = vmmov %vm10925_vm10 }
 0x5aa   : > { %v3963_v4 = vsel %vm10925_vm10, %v3917_v3, 0.0  ;;  %v3598_v56 = vsub.f32 %v3534_v57, %v3566_v15  ;;  %v3505_v9 = vsub.f32 %v9038_v17, %v3461_v13  ;;  %4881 = vlog2.f32 %v3415_v14  ;;  %v4870_v20 = vpop.eup %4869 }
 0x5ab   : > { %vm9866_vm1 = vcmp.gt.f32.partialorder %v10926_v47, 0.5  ;;  %v3841_v52 = vmul.f32 %v10927_v40, %v3599_v2  ;;  %v3964_v7 = vadd.f32 %v3963_v4, %v3962_v34  ;;  %v3504_v32 = vsub.f32 %v9041_v44, %v3459_v45  ;;  %v4872_v21 = vpop.eup %4871  ;;  %v10941_v40 = vld [vmem:[#allocation31_spill] sm:$0xff] }
 0x5ac   : > { %4883 = vpow2.f32 %v3346_v46  ;;  %vm9868_vm3 = vcmp.gt.f32.partialorder %v10928_v41, 0.5  ;;  %v3839_v1 = vmul.f32 %v10929_v30, %v3598_v56  ;;  %vm10931_vm8 = vcmp.ge.s32.totalorder %v10930_v22, 0  ;;  %v4874_v3 = vpop.eup %4873  ;;  %v3538_v46 = vld [vmem:[#allocation3 + $0xa0] sm:$0xff] }
 0x5ad   : > { %v3569_v12 = vsel %vm10931_vm8, %v3505_v9, 0.0  ;;  %v3465_v17 = vmul.f32 0.6931472, %v4870_v20  ;;  %v3350_v35 = vmul.f32 1.442695, %v9169_v11  ;;  %vm10933_vm5 = vcmp.ge.s32.totalorder %v10932_v18, 0  ;;  %v4876_v14 = vpop.eup %4875 }
 0x5ae   : > { %v3601_v31 = vsub.f32 %v3537_v59, %v3569_v12  ;;  %v3568_v42 = vsel %vm10933_vm5, %v3504_v32, 0.0  ;;  %v3463_v44 = vmul.f32 0.6931472, %v4872_v21  ;;  %4885 = vpow2.f32 %v3352_v49  ;;  %v3645_v49 = vld [vmem:[#allocation4 + $0xf8] sm:$0xff]  ;;  %v3539_v9 = vld [vmem:[#allocation3 + $0xa8] sm:$0xff]  ;;  %v10951_v18 = vld [vmem:[#allocation42_spill] sm:$0xff] }
 0x5af   : > { %v3887_v48 = vmul.f32 -1.4285715, %v3841_v52  ;;  %v3886_v34 = vmul.f32 -1.4285715, %v3839_v1  ;;  %v3600_v57 = vsub.f32 %v3536_v51, %v3568_v42  ;;  %v3507_v23 = vsub.f32 %v9051_v60, %v3465_v17  ;;  %v10938_v60 = vld [vmem:[#allocation278_spill] sm:$0xff]  ;;  %v10943_v51 = vld [vmem:[#allocation263_spill] sm:$0xff] }
 0x5b0   : > { %v3506_v36 = vsub.f32 %v9057_v61, %v3463_v44  ;;  %v3467_v37 = vmul.f32 0.6931472, %v4876_v14  ;;  %v3261_v19 = vmul.f32 10.0, %v3229_v38  ;;  %v9189_v13 = vsub.f32 %v3644_v33, %v9120_v63  ;;  %v10939_v61 = vld [vmem:[#allocation30_spill] sm:$0xff]  ;;  %v10946_v17 = vld [vmem:[#allocation43_spill] sm:$0xff]  ;;  %v3227_v38 = vpop.xlane.xlu0 %3226 }
 0x5b1   : > { %vm10935_vm7 = vnez %v10934_v54  ;;  %v3843_v15 = vmul.f32 %v10936_v58, %v3600_v57  ;;  %v3469_v45 = vmul.f32 0.6931472, %v4874_v3  ;;  %4887 = vpow2.f32 %v3350_v35  ;;  %v4878_v4 = vpop.eup %4877  ;;  %v10957_v57 = vld [vmem:[#allocation283_spill] sm:$0xff] }
 0x5b2   : > { %v3918_v2 = vsel %vm10935_vm7, %v3886_v34, 0.0  ;;  %v3845_v59 = vmul.f32 %v10938_v60, %v3601_v31  ;;  %vm10940_vm10 = vcmp.ge.s32.totalorder %v10939_v61, 0  ;;  %vm10942_vm8 = vcmp.ge.s32.totalorder %v10941_v40, 0  ;;  %v4880_v52 = vpop.eup %4879  ;;  %vm10945_vm7 = vmmov %vm10937_vm11  ;;  %v10950_v31 = vld [vmem:[#allocation84_spill] sm:$0xff]  ;;  %v10961_v58 = vld [vmem:[#allocation35_spill] sm:$0xff] }
 0x5b3   : > { %v3965_v56 = vsel %vm10937_vm11, %v3918_v2, 0.0  ;;  %v3571_v20 = vsel %vm10940_vm10, %v3507_v23, 0.0  ;;  %v3570_v63 = vsel %vm10942_vm8, %v3506_v36, 0.0  ;;  %vm10944_vm5 = vnez %v10943_v51  ;;  %v3541_v61 = vld [vmem:[#allocation3 + $0xb8] sm:$0xff] }
 0x5b4   : > { %v3919_v32 = vsel %vm10944_vm5, %v3887_v48, 0.0  ;;  %v3966_v21 = vadd.f32 %v3965_v56, %v3964_v7  ;;  %v3888_v30 = vmul.f32 -1.4285715, %v3843_v15  ;;  %v3602_v1 = vsub.f32 %v3538_v46, %v3570_v63  ;;  %v4882_v7 = vpop.eup %4881  ;;  %v10959_v46 = vld [vmem:[#allocation264_spill] sm:$0xff] }
 0x5b5   : > { %v3508_v22 = vsub.f32 %v9066_v55, %v3467_v37  ;;  %v4092_v12 = vsel %vm10945_vm7, %v9109_v39, 0.0  ;;  %vm10947_vm11 = vcmp.ge.s32.totalorder %v10946_v17, 0  ;;  %v9214_v33 = vsub.f32 %v3645_v49, %v9150_v28  ;;  %v10955_v28 = vld [vmem:[#allocation288_spill] sm:$0xff] }
 0x5b6   : > { %vm9209_vm10 = vmand %vm10947_vm11, %vm9866_vm1  ;;  %vm9870_vm8 = vcmp.gt.f32.partialorder %v9189_v13, 0.5  ;;  %v3603_v3 = vsub.f32 %v3539_v9, %v3571_v20  ;;  %v3509_v55 = vsub.f32 %v9062_v29, %v3469_v45  ;;  %v9219_v39 = vsub.f32 %v3261_v19, %v10950_v31  ;;  %v4884_v14 = vpop.eup %4883  ;;  %v10963_v45 = vld [vmem:[#allocation231_spill] sm:$0xff]  ;;  %v10964_v56 = vld [vmem:[#allocation232_spill] sm:$0xff] }
 0x5b7   : > { %vm10952_vm5 = vcmp.ge.s32.totalorder %v10951_v18, 0  ;;  %v4091_v44 = vadd.f32 %v10955_v28, %v9102_v5  ;;  %vm10956_vm11 = vcmask 7168   ;;  %v3889_v34 = vmul.f32 -1.4285715, %v3845_v59  ;;  %v3540_v5 = vld [vmem:[#allocation3 + $0xb0] sm:$0xff]  ;;  %v10965_v59 = vld [vmem:[#allocation282_spill] sm:$0xff] }
 0x5b8   : > { %vm9225_vm7 = vmand %vm10952_vm5, %vm9868_vm3  ;;  %v3967_v48 = vsel %vm10956_vm11, %v3919_v32, 0.0  ;;  %v3847_v29 = vmul.f32 %v10957_v57, %v3602_v1  ;;  %vm10960_vm6 = vnez %v10959_v46  ;;  %v3260_v19 = vmul.f32 10.0, %v3227_v38  ;;  %v4886_v2 = vpop.eup %4885  ;;  %v10966_v20 = vld [vmem:[#allocation34_spill] sm:$0xff] }
 0x5b9   : > { %vm10958_vm1 = vmmov %vm10956_vm11  ;;  %v3920_v36 = vsel %vm10960_vm6, %v3888_v30, 0.0  ;;  %v3968_v37 = vadd.f32 %v3967_v48, %v3966_v21  ;;  %v4037_v54 = vsel %vm9209_vm10, 1.0, %v10894_v0  ;;  %vm10962_vm5 = vcmp.ge.s32.totalorder %v10961_v58, 0  ;;  %v10968_v32 = vld [vmem:[#allocation266_spill] sm:$0xff]  ;;  %v10974_v48 = vld [vmem:[#allocation233_spill] sm:$0xff] }
 0x5ba   : > { %v4094_v23 = vsel %vm10958_vm1, %v9155_v50, 0.0  ;;  %v3572_v15 = vsel %vm10962_vm5, %v3508_v22, 0.0  ;;  %v3382_v49 = vadd.f32 %v4878_v4, %v10963_v45  ;;  %v3385_v60 = vadd.f32 %v4880_v52, %v10964_v56  ;;  %vm9259_vm3 = vmand %vm9869_vm2, %vm9870_vm8  ;;  %v10975_v57 = vld [vmem:[#allocation234_spill] sm:$0xff] }
 0x5bb   : > { %vm3741_vm1 = vcmp.gt.f32.partialorder %v9214_v33, 0.5  ;;  %v4038_v50 = vsel %vm9225_vm7, 1.0, %v10894_v0  ;;  %v3849_v9 = vmul.f32 %v10965_v59, %v3603_v3  ;;  %vm10967_vm6 = vcmp.ge.s32.totalorder %v10966_v20, 0  ;;  %v4888_v22 = vpop.eup %4887  ;;  %v10978_v56 = vld [vmem:[#allocation286_spill] sm:$0xff]  ;;  %v10980_v59 = vld [vmem:[#allocation285_spill] sm:$0xff] }
 0x5bc   : > { %v3573_v40 = vsel %vm10967_vm6, %v3509_v55, 0.0  ;;  %v3473_v63 = vmul.f32 0.6931472, %v4882_v7  ;;  %v3356_v51 = vmul.f32 1.442695, %v9219_v39  ;;  %vm10969_vm11 = vnez %v10968_v32  ;;  %v10973_v55 = vld [vmem:[#allocation85_spill] sm:$0xff] }
 0x5bd   : > { %v3921_v4 = vsel %vm10969_vm11, %v3889_v34, 0.0  ;;  %vm10970_vm5 = vcmask 7168   ;;  %v3890_v21 = vmul.f32 -1.4285715, %v3847_v29  ;;  %v3414_v30 = vmax.f32 %v3382_v49, 1e-30 }
 0x5be   : > { %v3969_v52 = vsel %vm10970_vm5, %v3920_v36, 0.0  ;;  %v3604_v7 = vsub.f32 %v3540_v5, %v3572_v15  ;;  %v3417_v3 = vmax.f32 %v3385_v60, 1e-30  ;;  %v9264_v31 = vsub.f32 %v3260_v19, %v10973_v55  ;;  %vm10976_vm6 = vmmov %vm10970_vm5  ;;  %v10979_v60 = vld [vmem:[#allocation235_spill] sm:$0xff] }
 0x5bf   : > { %v3970_v38 = vadd.f32 %v3969_v52, %v3968_v37  ;;  %v3605_v28 = vsub.f32 %v3541_v61, %v3573_v40  ;;  %4889 = vlog2.f32 %v3414_v30  ;;  %v3384_v34 = vadd.f32 %v4884_v14, %v10974_v48  ;;  %v3543_v52 = vld [vmem:[#allocation3 + $0xc8] sm:$0xff] }
 0x5c0   : > { %v3387_v29 = vadd.f32 %v4886_v2, %v10975_v57  ;;  %v3971_v46 = vsel %vm10976_vm6, %v3921_v4, 0.0  ;;  %v3891_v36 = vmul.f32 -1.4285715, %v3849_v9  ;;  %4891 = vlog2.f32 %v3417_v3  ;;  %vm10985_vm6 = vmmov %vm10970_vm5 }
 0x5c1   : > { %v4039_v58 = vsel %vm9259_vm3, 1.0, %v10894_v0  ;;  %v3922_v5 = vsel %vm8696_vm12, %v3890_v21, 0.0  ;;  %v3511_v19 = vsub.f32 %v9075_v6, %v3473_v63  ;;  %v3416_v15 = vmax.f32 %v3384_v34, 1e-30  ;;  %v10986_v21 = vld [vmem:[#allocation36_spill] sm:$0xff] }
 0x5c2   : > { %v3419_v45 = vmax.f32 %v3387_v29, 1e-30  ;;  %v3972_v49 = vadd.f32 %v3971_v46, %v3970_v38  ;;  %v3851_v14 = vmul.f32 %v10978_v56, %v3604_v7  ;;  %v3386_v2 = vadd.f32 %v4888_v22, %v10979_v60  ;;  %v10998_v56 = vld [vmem:[#allocation290_spill] sm:$0xff] }
 0x5c3   : > { %4893 = vpow2.f32 %v3356_v51  ;;  %v3853_v9 = vmul.f32 %v10980_v59, %v3605_v28  ;;  %v3354_v61 = vmul.f32 1.442695, %v9264_v31  ;;  %v4093_v20 = vadd.f32 %v4092_v12, %v4091_v44  ;;  %v10989_v28 = vld [vmem:[#allocation289_spill] sm:$0xff]  ;;  %v3542_v60 = vld [vmem:[#allocation3 + $0xc0] sm:$0xff] }
 0x5c4   : > { %4895 = vlog2.f32 %v3416_v15  ;;  %v3923_v32 = vsel %vm8720_vm13, %v3891_v36, 0.0  ;;  %v3418_v4 = vmax.f32 %v3386_v2, 1e-30  ;;  %vm10982_vm12 = vcmp.ge.s32.totalorder %v10890_v43, 0  ;;  %vm10988_vm13 = vmmov %vm10970_vm5  ;;  %v3546_v15 = vld [vmem:[#allocation3 + $0xe0] sm:$0xff] }
 0x5c5   : > { %4897 = vlog2.f32 %v3419_v45  ;;  %vm9285_vm11 = vmand %vm10982_vm12, %vm3741_vm1  ;;  %v4096_v63 = vsel %vm10970_vm5, %v4037_v54, 0.0  ;;  %v3973_v51 = vsel %vm10985_vm6, %v3922_v5, 0.0  ;;  %vm10987_vm2 = vcmp.ge.s32.totalorder %v10986_v21, 0 }
 0x5c6   : > { %v3575_v12 = vsel %vm10987_vm2, %v3511_v19, 0.0  ;;  %4899 = vpow2.f32 %v3354_v61  ;;  %v4095_v44 = vadd.f32 %v4094_v23, %v4093_v20  ;;  %v3974_v30 = vadd.f32 %v3973_v51, %v3972_v49  ;;  %vm10991_vm2 = vmmov %vm10970_vm5  ;;  %v11000_v20 = vld [vmem:[#allocation236_spill] sm:$0xff] }
 0x5c7   : > { %v3892_v22 = vmul.f32 -1.4285715, %v3851_v14  ;;  %4901 = vlog2.f32 %v3418_v4  ;;  %v4098_v38 = vsel %vm10988_vm13, %v4038_v50, 0.0  ;;  %v3893_v7 = vmul.f32 -1.4285715, %v3853_v9  ;;  %vm10992_vm5 = vmmov %vm10991_vm2  ;;  %v3545_v9 = vld [vmem:[#allocation3 + $0xd8] sm:$0xff] }
 0x5c8   : > { %v4040_v3 = vsel %vm9285_vm11, 1.0, %v10894_v0  ;;  %v4097_v55 = vadd.f32 %v4096_v63, %v4095_v44  ;;  %v3607_v54 = vsub.f32 %v3543_v52, %v3575_v12  ;;  %4903 = vrcp.f32 %v10989_v28  ;;  %v10994_v0 = vld [vmem:[#allocation276_spill] sm:$0xff]  ;;  %vm10996_vm8 = vmmov %vm10991_vm2  ;;  %v11002_v52 = vld [vmem:[#allocation37_spill] sm:$0xff] }
 0x5c9   : > { %vm10990_vm12 = vcmp.gt.f32.partialorder %v10926_v47, 0.5  ;;  %v4100_v23 = vsel %vm10991_vm2, %v4039_v58, 0.0  ;;  %v4890_v34 = vpop.eup %4889  ;;  %v3975_v57 = vsel %vm10992_vm5, %v3923_v32, 0.0  ;;  %vm10993_vm6 = vcmp.gt.f32.partialorder %v10928_v41, 0.5  ;;  %v11005_v28 = vld [vmem:[#allocation237_spill] sm:$0xff] }
 0x5ca   : > { %v3802_v48 = vsel %vm10990_vm12, %v10926_v47, 1.0  ;;  %v3803_v50 = vsel %vm10993_vm6, %v10928_v41, 1.0  ;;  %v4099_v29 = vadd.f32 %v4098_v38, %v4097_v55  ;;  %v4892_v46 = vpop.eup %4891  ;;  %vm10995_vm13 = vnez %v10994_v0  ;;  %vm10999_vm12 = vmmov %vm10991_vm2  ;;  %v3544_v55 = vld [vmem:[#allocation3 + $0xd0] sm:$0xff] }
 0x5cb   : > { %v3924_v36 = vsel %vm10995_vm13, %v3892_v22, 0.0  ;;  %v3976_v37 = vadd.f32 %v3975_v57, %v3974_v30  ;;  %v3471_v5 = vmul.f32 0.6931472, %v4890_v34  ;;  %v4102_v19 = vsel %vm10996_vm8, %v4040_v3, 0.0  ;;  %vm11013_vm13 = vmmov %vm10999_vm12 }
 0x5cc   : > { %v3925_v47 = vsel %vm8775_vm14, %v3893_v7, 0.0  ;;  %v3477_v58 = vmul.f32 0.6931472, %v4892_v46  ;;  %4905 = vrcp.f32 %v3802_v48  ;;  %v4101_v45 = vadd.f32 %v4100_v23, %v4099_v29  ;;  %vm11001_vm14 = vmmov %vm10991_vm2  ;;  %v11006_v23 = vld [vmem:[#allocation292_spill] sm:$0xff] }
 0x5cd   : > { %v4894_v49 = vpop.eup %4893  ;;  %v3857_v14 = vmul.f32 %v10998_v56, %v3607_v54  ;;  %v3510_v41 = vsub.f32 %v9124_v26, %v3471_v5  ;;  %4907 = vrcp.f32 %v3803_v50  ;;  %v3977_v59 = vsel %vm10999_vm12, %v3924_v36, 0.0 }
 0x5ce   : > { %v4896_v2 = vpop.eup %4895  ;;  %v3513_v61 = vsub.f32 %v9129_v8, %v3477_v58  ;;  %v3389_v40 = vadd.f32 %v4894_v49, %v11000_v20  ;;  %v4103_v32 = vadd.f32 %v4102_v19, %v4101_v45  ;;  %v3979_v63 = vsel %vm11001_vm14, %v3925_v47, 0.0 }
 0x5cf   : > { %v4898_v4 = vpop.eup %4897  ;;  %v3978_v51 = vadd.f32 %v3977_v59, %v3976_v37  ;;  %vm11003_vm8 = vcmp.ge.s32.totalorder %v11002_v52, 0  ;;  %v3475_v12 = vmul.f32 0.6931472, %v4896_v2  ;;  %vm11004_vm2 = vcmp.ge.s32.totalorder %v10910_v62, 0 }
 0x5d0   : > { %v3574_v21 = vsel %vm11003_vm8, %v3510_v41, 0.0  ;;  %v4900_v44 = vpop.eup %4899  ;;  %v3577_v30 = vsel %vm11004_vm2, %v3513_v61, 0.0  ;;  %v3481_v22 = vmul.f32 0.6931472, %v4898_v4  ;;  %v3421_v38 = vmax.f32 %v3389_v40, 1e-30  ;;  %4104 = vadd.xlane.f32.xlu1 %v4103_v32 }
 0x5d1   : > { %v3606_v26 = vsub.f32 %v3542_v60, %v3574_v21  ;;  %v4902_v8 = vpop.eup %4901  ;;  %v3895_v7 = vmul.f32 -1.4285715, %v3857_v14  ;;  %v3609_v3 = vsub.f32 %v3545_v9, %v3577_v30  ;;  %v3512_v54 = vsub.f32 %v9144_v27, %v3475_v12  ;;  %v11008_v27 = vld [vmem:[#allocation295_spill] sm:$0xff]  ;;  %v3549_v30 = vld [vmem:[#allocation3 + $0xf8] sm:$0xff] }
 0x5d2   : > { %v3388_v48 = vadd.f32 %v4900_v44, %v11005_v28  ;;  %v3515_v57 = vsub.f32 %v9158_v53, %v3481_v22  ;;  %v3479_v50 = vmul.f32 0.6931472, %v4902_v8  ;;  %4909 = vlog2.f32 %v3421_v38  ;;  %v4904_v29 = vpop.eup %4903  ;;  %v3547_v14 = vld [vmem:[#allocation3 + $0xe8] sm:$0xff]  ;;  %v3548_v28 = vld [vmem:[#allocation3 + $0xf0] sm:$0xff] }
 0x5d3   : > { %v3855_v34 = vmul.f32 %v11006_v23, %v3606_v26  ;;  %v3980_v62 = vadd.f32 %v3979_v63, %v3978_v51  ;;  %vm11007_vm5 = vcmp.ge.s32.totalorder %v10883_v25, 0  ;;  %v3805_v36 = vsel %vm3741_vm1, %v9214_v33, 1.0 }
 0x5d4   : > { %v3576_v46 = vsel %vm11007_vm5, %v3512_v54, 0.0  ;;  %v3420_v0 = vmax.f32 %v3388_v48, 1e-30  ;;  %v3861_v5 = vmul.f32 %v11008_v27, %v3609_v3  ;;  %v3514_v47 = vsub.f32 %v9169_v11, %v3479_v50 }
 0x5d5   : > { %v3894_v37 = vmul.f32 -1.4285715, %v3855_v34  ;;  %v3608_v19 = vsub.f32 %v3544_v55, %v3576_v46  ;;  %v3927_v58 = vsel %vm8790_vm15, %v3895_v7, 0.0  ;;  %vm11011_vm6 = vcmp.ge.s32.totalorder %v10951_v18, 0 }
 0x5d6   : > { %4911 = vlog2.f32 %v3420_v0  ;;  %v4906_v45 = vpop.eup %4905  ;;  %v3579_v33 = vsel %vm11011_vm6, %v3515_v57, 0.0  ;;  %vm11012_vm1 = vcmp.ge.s32.totalorder %v10946_v17, 0  ;;  %vm11014_vm15 = vcmp.gt.f32.partialorder %v9189_v13, 0.5 }
 0x5d7   : > { %v3926_v25 = vsel %vm8896_vm0, %v3894_v37, 0.0  ;;  %v3859_v56 = vmul.f32 %v4904_v29, %v3608_v19  ;;  %v3578_v60 = vsel %vm11012_vm1, %v3514_v47, 0.0  ;;  %v4908_v41 = vpop.eup %4907  ;;  %v3804_v59 = vsel %vm11014_vm15, %v9189_v13, 1.0  ;;  %vm11015_vm0 = vmmov %vm10999_vm12 }
 0x5d8   : > { %v3981_v2 = vsel %vm11013_vm13, %v3926_v25, 0.0  ;;  %v3610_v11 = vsub.f32 %v3546_v15, %v3578_v60  ;;  %4913 = vrcp.f32 %v3805_v36  ;;  %v3897_v61 = vmul.f32 -1.4285715, %v3861_v5  ;;  %vm11016_vm12 = vmmov %vm11015_vm0 }
 0x5d9   : > { %v3982_v9 = vadd.f32 %v3981_v2, %v3980_v62  ;;  %v3896_v20 = vmul.f32 -1.4285715, %v3859_v56  ;;  %v3983_v40 = vsel %vm11015_vm0, %v3927_v58, 0.0  ;;  %v3611_v32 = vsub.f32 %v3547_v14, %v3579_v33  ;;  %vm11017_vm14 = vmmov %vm11015_vm0 }
 0x5da   : > { %v3863_v18 = vmul.f32 %v4906_v45, %v3610_v11  ;;  %4915 = vrcp.f32 %v3804_v59  ;;  %v3929_v51 = vsel %vm9137_vm4, %v3897_v61, 0.0  ;;  %vm11019_vm4 = vcmp.ge.s32.totalorder %v10892_v24, 0  ;;  %vm11020_vm8 = vmmov %vm11015_vm0 }
 0x5db   : > { %v3928_v17 = vsel %vm9091_vm9, %v3896_v20, 0.0  ;;  %v3984_v4 = vadd.f32 %v3983_v40, %v3982_v9  ;;  %v3865_v13 = vmul.f32 %v4908_v41, %v3611_v32  ;;  %v3987_v16 = vsel %vm11017_vm14, %v3929_v51, 0.0  ;;  %vm11022_vm2 = vmmov %vm11015_vm0 }
 0x5dc   : > { %v4910_v63 = vpop.eup %4909  ;;  %v3985_v52 = vsel %vm11016_vm12, %v3928_v17, 0.0  ;;  %v3898_v21 = vmul.f32 -1.4285715, %v3863_v18  ;;  %vm11018_vm9 = vcmp.ge.s32.totalorder %v10890_v43, 0  ;;  %vm11023_vm5 = vmmov %vm11015_vm0 }
 0x5dd   : > { %v3485_v12 = vmul.f32 0.6931472, %v4910_v63  ;;  %v3986_v44 = vadd.f32 %v3985_v52, %v3984_v4  ;;  %v3899_v7 = vmul.f32 -1.4285715, %v3865_v13 }
 0x5de   : > { %v3930_v10 = vsel %vm9209_vm10, %v3898_v21, 0.0  ;;  %vm11021_vm10 = vmmov %vm11015_vm0 }
 0x5df   : > { %v3517_v22 = vsub.f32 %v9219_v39, %v3485_v12  ;;  %v3988_v55 = vadd.f32 %v3987_v16, %v3986_v44  ;;  %v3989_v57 = vsel %vm11020_vm8, %v3930_v10, 0.0  ;;  %v3931_v43 = vsel %vm9225_vm7, %v3899_v7, 0.0 }
 0x5e0   : > { %v4912_v26 = vpop.eup %4911  ;;  %v3991_v46 = vsel %vm11021_vm10, %v3931_v43, 0.0 }
 0x5e1   : > { %v3483_v38 = vmul.f32 0.6931472, %v4912_v26  ;;  %v3581_v3 = vsel %vm11018_vm9, %v3517_v22, 0.0  ;;  %v3990_v29 = vadd.f32 %v3989_v57, %v3988_v55 }
 0x5e2   : > { %v4914_v8 = vpop.eup %4913  ;;  %v3613_v54 = vsub.f32 %v3549_v30, %v3581_v3 }
 0x5e3   : > { %v3516_v48 = vsub.f32 %v9264_v31, %v3483_v38  ;;  %v3992_v36 = vadd.f32 %v3991_v46, %v3990_v29 }
 0x5e4   : > { %v4916_v23 = vpop.eup %4915  ;;  %v3869_v34 = vmul.f32 %v4914_v8, %v3613_v54 }
 0x5e5   : > { %v3580_v39 = vsel %vm11019_vm4, %v3516_v48, 0.0 }
 0x5e6   : > { %v3612_v50 = vsub.f32 %v3548_v28, %v3580_v39  ;;  %v3901_v35 = vmul.f32 -1.4285715, %v3869_v34 }
 0x5e8   : > { %v3867_v62 = vmul.f32 %v4916_v23, %v3612_v50  ;;  %v3933_v24 = vsel %vm9285_vm11, %v3901_v35, 0.0 }
 0x5e9   : > { %v3995_v5 = vsel %vm11023_vm5, %v3933_v24, 0.0 }
 0x5ea   : > { %v3900_v0 = vmul.f32 -1.4285715, %v3867_v62 }
 0x5ec   : > { %v3932_v31 = vsel %vm9259_vm3, %v3900_v0, 0.0  ;;  %vm4007_vm3 = vcmask 0  }
 0x5ed   : > { %v3993_v37 = vsel %vm11022_vm2, %v3932_v31, 0.0 }
 0x5ee   : > { %v3994_v27 = vadd.f32 %v3993_v37, %v3992_v36 }
 0x5f0   : > { %v3996_v42 = vadd.f32 %v3995_v5, %v3994_v27 }
 0x5f2   : > { %3997 = vadd.xlane.f32.xlu0 %v3996_v42 }
 0x65d   : > { %v4105_v19 = vpop.xlane.xlu1 %4104 }
 0x65e   : > { %v4106_v15 = vrot.slane %v4105_v19, 4 }
 0x660   : > { %v4107_v47 = vadd.f32 %v4106_v15, %v4105_v19 }
 0x662   : > { %v4108_v53 = vrot.slane %v4107_v47, 2 }
 0x664   : > { %v4109_v1 = vadd.f32 %v4108_v53, %v4107_v47 }
 0x666   : > { %v4110_v56 = vrot.slane %v4109_v1, 1 }
 0x668   : > { %v4111_v60 = vadd.f32 %v4110_v56, %v4109_v1 }
 0x67f   : > { %v3998_v58 = vpop.xlane.xlu0 %3997 }
 0x680   : > { %v3999_v45 = vrot.slane %v3998_v58, 4 }
 0x682   : > { %v4000_v49 = vadd.f32 %v3999_v45, %v3998_v58 }
 0x684   : > { %v4001_v25 = vrot.slane %v4000_v49, 2 }
 0x686   : > { %v4002_v6 = vadd.f32 %v4001_v25, %v4000_v49 }
 0x688   : > { %v4003_v14 = vrot.slane %v4002_v6, 1 }
 0x68a   : > { %v4004_v33 = vadd.f32 %v4003_v14, %v4002_v6 }
 0x68c   : > { %4326 = vpush %v4004_v33 }
 0x68d   : > { %4328 = vpush %v4111_v60 }
 0x6bd   : > { %s4327_s23 = spop %4326 }
 0x6be   : > { %v4006_v41 = vstv %s4327_s23  ;;  %s4329_s24 = spop %4328 }
 0x6bf   : > { %4008 = vst.msk [vmem:[%s453_s13] sm:$0x1] %vm4007_vm3, %v4006_v41  ;;  %v4113_v2 = vstv %s4329_s24 }
 0x6c0   : > { %4114 = vst.msk [vmem:[%s456_s16] sm:$0x1] %vm4007_vm3, %v4113_v2 }
 0x6c1 PF: > { %s17_s29 = sadd.s32 1, %s4987_s29   ;;  %s11024_s21 = smov %s4959_s22 }
 0x6c2   : > { %p14_p4 = scmp.ge.s32.totalorder %s17_s29, 10   ;;  %s11025_s22 = smov %s5092_s11 }
 0x6c3   : > { %s11026_s23 = smov %s4975_s26  ;;  %s11027_s24 = smov %s4979_s27 }
 0x6c4   : > { %s11028_s25 = smov %s4983_s28  ;;  %s11029_s26 = smov %s11033_s30 }
 0x6c5   : > { %s11030_s27 = smov %s11037_s7  ;;  %s11031_s28 = smov %s11041_s8 }
 0x6c6   :  { %16 = sbr.rel (!%p14_p4) target bundleno = 5 (0x5), region = 153 }

</bundles_post_ra>
